<compile_context>
chip_gen: v7x
topology: tpu7x:2x2x1
jax: 0.10.0
libtpu: 0.0.40
codegen_flags: <defaults>
</compile_context>

<pallas_src>
import math
import numpy as np
import jax
import jax.numpy as jnp
from jax.experimental import pallas as pl
from jax.experimental.pallas import tpu as pltpu


# ----------------------------------------------------------------------------
# Host-side constant setup (replaces sympy / dimenet_utils, float64 numpy)
# ----------------------------------------------------------------------------
def _sph_jn_np(x, n):
    """Spherical Bessel j_n(x) via the closed-form sin/cos recurrence."""
    x = np.asarray(x, dtype=np.float64)
    j0 = np.sin(x) / x
    if n == 0:
        return j0
    j1 = np.sin(x) / x ** 2 - np.cos(x) / x
    jm2, jm1 = j0, j1
    for m in range(2, n + 1):
        jm2, jm1 = jm1, (2 * m - 1) / x * jm1 - jm2
    return jm1


def _bisect_zero(f, lo, hi, iters=200):
    flo = f(lo)
    for _ in range(iters):
        mid = 0.5 * (lo + hi)
        fm = f(mid)
        if flo * fm <= 0.0:
            hi = mid
        else:
            lo, flo = mid, fm
    return 0.5 * (lo + hi)


def _jn_zeros(n, k):
    """First k positive zeros of spherical Bessel j_l, l=0..n-1 (dimenet algorithm)."""
    zerosj = np.zeros((n, k))
    zerosj[0] = np.arange(1, k + 1) * np.pi
    points = np.arange(1, k + n) * np.pi
    racines = np.zeros(k + n - 1)
    for i in range(1, n):
        for j in range(k + n - 1 - i):
            racines[j] = _bisect_zero(lambda r: _sph_jn_np(r, i),
                                      points[j], points[j + 1])
        points = racines.copy()
        zerosj[i, :k] = racines[:k]
    return zerosj


def spherical_basis_constants(num_spherical, num_radial):
    """Returns (zeros z[l,k], bessel normalizer N[l,k], sph-harm prefactor c[l])."""
    z = _jn_zeros(num_spherical, num_radial)                       # (n, K)
    norm = np.zeros_like(z)
    for l in range(num_spherical):
        # 1 / sqrt(0.5 * j_{l+1}(z_{l,k})^2)
        norm[l] = np.sqrt(2.0) / np.abs(_sph_jn_np(z[l], l + 1))
    c_sph = np.array([math.sqrt((2 * l + 1) / (4.0 * math.pi))
                      for l in range(num_spherical)], dtype=np.float64)
    return z, norm, c_sph


# ----------------------------------------------------------------------------
# Pallas kernel
# ----------------------------------------------------------------------------
def _make_kernel(num_spherical, p_env):
    # Envelope(exponent) with p = exponent + 1 (p_env here).
    a = -(p_env + 1) * (p_env + 2) / 2.0
    b = float(p_env * (p_env + 2))
    c = -p_env * (p_env + 1) / 2.0
    n = num_spherical

    def kernel(d_ref, th_ref, z_ref, comb_ref, l_ref, out_ref):
        d = d_ref[...]        # (1, T)   dist/cutoff gathered at idx_kj (lanes = triplets)
        th = th_ref[...]      # (1, T)   angle
        z = z_ref[...]        # (F, 1)   flattened bessel zeros, feature f = l*K + k
        comb = comb_ref[...]  # (F, 1)   bessel normalizer * sph-harm prefactor (0 on pad)
        lcol = l_ref[...]     # (F, 1)   l index (as f32) per flattened feature

        # --- Envelope on the (1, T) row (explicit muls for d^(p-1)) ------------
        inv_d = 1.0 / d
        dp = d
        for _ in range(p_env - 2):         # d^(p-1)
            dp = dp * d
        env = (inv_d + a * dp + b * dp * d + c * dp * d * d) \
            * (d < 1.0).astype(d.dtype)    # (1, T)

        # --- Per-l feature masks: one (F,1) compare each, shared by both selects
        masks = {l: (lcol == float(l)) for l in range(1, n)}

        # --- Dense (F, T) argument grid -----------------------------------------
        arg = d * z                                   # (F, T) = (1,T)*(F,1)

        # --- Legendre P_l(cos th) with the envelope folded into the (1,T) rows --
        ct = jnp.cos(th)                              # (1, T)
        ep_full = jnp.broadcast_to(env, arg.shape)    # l == 0 : env * P_0
        p_prev2 = jnp.ones_like(ct)
        p_prev1 = ct
        if n > 1:
            ep_full = jnp.where(masks[1], env * p_prev1, ep_full)
        for l in range(2, n):
            p_l = ((2 * l - 1) * ct * p_prev1 - (l - 1) * p_prev2) / float(l)
            ep_full = jnp.where(masks[l], env * p_l, ep_full)
            p_prev2, p_prev1 = p_prev1, p_l

        # --- Spherical Bessel j_l(arg): one upward recurrence, masked select ----
        inv = 1.0 / arg
        sx = jnp.sin(arg)
        j0 = sx * inv
        jful = j0                                     # l == 0
        if n > 1:
            cx = jnp.cos(arg)
            j1 = (j0 - cx) * inv                      # = sin/x^2 - cos/x
            jful = jnp.where(masks[1], j1, jful)
            jm2, jm1 = j0, j1
            for m in range(2, n):
                jm = (2 * m - 1) * inv * jm1 - jm2
                jful = jnp.where(masks[m], jm, jful)
                jm2, jm1 = jm1, jm

        # Single dense, lane-wide store (tile_t is a multiple of 128 -> unmasked vst).
        out_ref[...] = ep_full * jful * comb

    return kernel


def spherical_basis_pallas(dist, angle, idx_kj, *, num_spherical, num_radial,
                           cutoff=5.0, envelope_exponent=5, tile_t=512):
    n, K = num_spherical, num_radial
    F = n * K
    F_pad = ((F + 7) // 8) * 8

    z64, norm64, c64 = spherical_basis_constants(n, K)
    z_col = np.ones((F_pad, 1), np.float32)                  # pad zeros=1 keeps 1/arg finite
    z_col[:F, 0] = z64.reshape(-1)
    comb_col = np.zeros((F_pad, 1), np.float32)              # pad -> output 0 on pad features
    comb_col[:F, 0] = (norm64 * c64[:, None]).reshape(-1)    # fold normalizer * prefactor
    l_col = np.zeros((F_pad, 1), np.float32)
    l_col[:F, 0] = np.repeat(np.arange(n), K).astype(np.float32)

    # Glue (plain JAX): scale + gather.  rbf is an elementwise function of dist per
    # edge, so gathering dist first is exactly equivalent to gathering rbf[idx_kj].
    d_kj = (dist.astype(jnp.float32) / cutoff)[idx_kj]
    ang = angle.astype(jnp.float32)
    T = d_kj.shape[0]
    T_pad = pl.cdiv(T, tile_t) * tile_t
    pad = T_pad - T
    # Padded triplet columns use d=0.5 (finite 1/d, same as reference for d>0) and
    # angle=0; they are sliced off below and never reduced over.
    d_row = jnp.pad(d_kj, (0, pad), constant_values=0.5).reshape(1, T_pad)
    a_row = jnp.pad(ang, (0, pad)).reshape(1, T_pad)

    kernel = _make_kernel(n, envelope_exponent + 1)
    out = pl.pallas_call(
        kernel,
        out_shape=jax.ShapeDtypeStruct((F_pad, T_pad), jnp.float32),
        grid=(T_pad // tile_t,),
        in_specs=[
            pl.BlockSpec((1, tile_t), lambda i: (0, i)),     # gathered, scaled dist
            pl.BlockSpec((1, tile_t), lambda i: (0, i)),     # angle
            pl.BlockSpec((F_pad, 1), lambda i: (0, 0)),      # flattened bessel zeros
            pl.BlockSpec((F_pad, 1), lambda i: (0, 0)),      # folded normalizers
            pl.BlockSpec((F_pad, 1), lambda i: (0, 0)),      # l index per feature
        ],
        out_specs=pl.BlockSpec((F_pad, tile_t), lambda i: (0, i)),
        compiler_params=pltpu.CompilerParams(dimension_semantics=("parallel",)),
    )(d_row, a_row, jnp.asarray(z_col), jnp.asarray(comb_col), jnp.asarray(l_col))
    # Final (T, n*K) layout change done once by XLA; keeping the kernel's stores
    # lane-dense (feature dim = 42 < 128 would force masked vst otherwise).
    return out[:F, :T].T                     # (T, n*K), feature index = l*K + k


# ----------------------------------------------------------------------------
# Pure numpy (float64) reference mirroring the PyTorch forward
# ----------------------------------------------------------------------------
def spherical_basis_ref_np(dist, angle, idx_kj, num_spherical, num_radial,
                           cutoff, envelope_exponent):
    n, K = num_spherical, num_radial
    z, norm, c_sph = spherical_basis_constants(n, K)
    p = envelope_exponent + 1
    a = -(p + 1) * (p + 2) / 2.0
    b = float(p * (p + 2))
    c = -p * (p + 1) / 2.0

    d = np.asarray(dist, np.float64) / cutoff
    env = (1.0 / d + a * d ** (p - 1) + b * d ** p + c * d ** (p + 1)) * (d < 1.0)
    rbf = np.concatenate(
        [norm[l] * _sph_jn_np(d[:, None] * z[l][None, :], l) for l in range(n)],
        axis=1)                                        # (E, n*K), flat index l*K + k
    rbf = env[:, None] * rbf

    th = np.asarray(angle, np.float64)
    ct = np.cos(th)
    P = [np.ones_like(ct), ct]
    for l in range(2, n):
        P.append(((2 * l - 1) * ct * P[l - 1] - (l - 1) * P[l - 2]) / l)
    cbf = np.stack([c_sph[l] * P[l] for l in range(n)], axis=1)   # (T, n)

    idx = np.asarray(idx_kj)
    out = (rbf[idx].reshape(-1, n, K) * cbf.reshape(-1, n, 1)).reshape(-1, n * K)
    return out


# ----------------------------------------------------------------------------
if __name__ == "__main__":
    num_spherical, num_radial = 7, 6
    cutoff, envelope_exponent = 5.0, 5
    E, T = 32, 20   # E edges (dist), T triplets (angle, idx_kj)

    key = jax.random.PRNGKey(0)
    k1, k2, k3 = jax.random.split(key, 3)
    dist = jax.random.uniform(k1, (E,), jnp.float32, 0.5, cutoff - 0.1)
    angle = jax.random.uniform(k2, (T,), jnp.float32, 0.0, math.pi)
    idx_kj = jax.random.randint(k3, (T,), 0, E, jnp.int32)

    out = spherical_basis_pallas(dist, angle, idx_kj,
                                 num_spherical=num_spherical,
                                 num_radial=num_radial,
                                 cutoff=cutoff,
                                 envelope_exponent=envelope_exponent)
    out = jax.block_until_ready(out)

    ref = spherical_basis_ref_np(np.asarray(dist), np.asarray(angle),
                                 np.asarray(idx_kj), num_spherical, num_radial,
                                 cutoff, envelope_exponent)
    err = np.max(np.abs(np.asarray(out, np.float64) - ref)) / (np.max(np.abs(ref)) + 1e-12)
    assert out.shape == (T, num_spherical * num_radial), out.shape
    assert err < 1e-3, f"mismatch vs reference: rel-to-max err = {err}"
    print("KERNEL_OK")
</pallas_src>

<mosaic_0001>
module attributes {stable_mosaic.version = 11 : i64} {
  func.func @kernel(%arg0: i32, %arg1: memref<1x512xf32, #tpu.memory_space<vmem>>, %arg2: memref<1x512xf32, #tpu.memory_space<vmem>>, %arg3: memref<48x1xf32, #tpu.memory_space<vmem>>, %arg4: memref<48x1xf32, #tpu.memory_space<vmem>>, %arg5: memref<48x1xf32, #tpu.memory_space<vmem>>, %arg6: memref<48x512xf32, #tpu.memory_space<vmem>>) attributes {dimension_semantics = [#tpu.dimension_semantics<parallel>], iteration_bounds = array<i64: 1>, scalar_prefetch = 0 : i64, scratch_operands = 0 : i64, tpu.core_type = #tpu.core_type<tc>, window_params = [{transform_indices = @transform_0, window_bounds = array<i64: 1, 512>}, {transform_indices = @transform_1, window_bounds = array<i64: 1, 512>}, {pipeline_mode = #tpu.pipeline_mode<synchronous>, transform_indices = @transform_2, window_bounds = array<i64: 48, 1>}, {pipeline_mode = #tpu.pipeline_mode<synchronous>, transform_indices = @transform_3, window_bounds = array<i64: 48, 1>}, {pipeline_mode = #tpu.pipeline_mode<synchronous>, transform_indices = @transform_4, window_bounds = array<i64: 48, 1>}, {transform_indices = @transform_5, window_bounds = array<i64: 48, 512>}]} {
    %c0 = arith.constant 0 : index
    %c0_0 = arith.constant 0 : index
    %0 = vector.load %arg1[%c0, %c0_0] : memref<1x512xf32, #tpu.memory_space<vmem>>, vector<1x512xf32>
    %c0_1 = arith.constant 0 : index
    %c0_2 = arith.constant 0 : index
    %1 = vector.load %arg2[%c0_1, %c0_2] : memref<1x512xf32, #tpu.memory_space<vmem>>, vector<1x512xf32>
    %c0_3 = arith.constant 0 : index
    %c0_4 = arith.constant 0 : index
    %2 = vector.load %arg3[%c0_3, %c0_4] : memref<48x1xf32, #tpu.memory_space<vmem>>, vector<48x1xf32>
    %c0_5 = arith.constant 0 : index
    %c0_6 = arith.constant 0 : index
    %3 = vector.load %arg4[%c0_5, %c0_6] : memref<48x1xf32, #tpu.memory_space<vmem>>, vector<48x1xf32>
    %c0_7 = arith.constant 0 : index
    %c0_8 = arith.constant 0 : index
    %4 = vector.load %arg5[%c0_7, %c0_8] : memref<48x1xf32, #tpu.memory_space<vmem>>, vector<48x1xf32>
    %cst = arith.constant 1.000000e+00 : f32
    %5 = vector.broadcast %cst : f32 to vector<1x512xf32>
    %6 = arith.divf %5, %0 : vector<1x512xf32>
    %7 = arith.mulf %0, %0 : vector<1x512xf32>
    %8 = arith.mulf %7, %0 : vector<1x512xf32>
    %9 = arith.mulf %8, %0 : vector<1x512xf32>
    %10 = arith.mulf %9, %0 : vector<1x512xf32>
    %cst_9 = arith.constant -2.800000e+01 : f32
    %11 = vector.broadcast %cst_9 : f32 to vector<1x512xf32>
    %12 = arith.mulf %11, %10 : vector<1x512xf32>
    %13 = arith.addf %6, %12 : vector<1x512xf32>
    %cst_10 = arith.constant 4.800000e+01 : f32
    %14 = vector.broadcast %cst_10 : f32 to vector<1x512xf32>
    %15 = arith.mulf %14, %10 : vector<1x512xf32>
    %16 = arith.mulf %15, %0 : vector<1x512xf32>
    %17 = arith.addf %13, %16 : vector<1x512xf32>
    %cst_11 = arith.constant -2.100000e+01 : f32
    %18 = vector.broadcast %cst_11 : f32 to vector<1x512xf32>
    %19 = arith.mulf %18, %10 : vector<1x512xf32>
    %20 = arith.mulf %19, %0 : vector<1x512xf32>
    %21 = arith.mulf %20, %0 : vector<1x512xf32>
    %22 = arith.addf %17, %21 : vector<1x512xf32>
    %cst_12 = arith.constant 1.000000e+00 : f32
    %23 = vector.broadcast %cst_12 : f32 to vector<1x512xf32>
    %24 = arith.cmpf olt, %0, %23 : vector<1x512xf32>
    %25 = arith.extui %24 : vector<1x512xi1> to vector<1x512xi32>
    %26 = arith.sitofp %25 : vector<1x512xi32> to vector<1x512xf32>
    %27 = arith.mulf %22, %26 : vector<1x512xf32>
    %cst_13 = arith.constant 1.000000e+00 : f32
    %28 = vector.broadcast %cst_13 : f32 to vector<48x1xf32>
    %29 = arith.cmpf oeq, %4, %28 : vector<48x1xf32>
    %cst_14 = arith.constant 2.000000e+00 : f32
    %30 = vector.broadcast %cst_14 : f32 to vector<48x1xf32>
    %31 = arith.cmpf oeq, %4, %30 : vector<48x1xf32>
    %cst_15 = arith.constant 3.000000e+00 : f32
    %32 = vector.broadcast %cst_15 : f32 to vector<48x1xf32>
    %33 = arith.cmpf oeq, %4, %32 : vector<48x1xf32>
    %cst_16 = arith.constant 4.000000e+00 : f32
    %34 = vector.broadcast %cst_16 : f32 to vector<48x1xf32>
    %35 = arith.cmpf oeq, %4, %34 : vector<48x1xf32>
    %cst_17 = arith.constant 5.000000e+00 : f32
    %36 = vector.broadcast %cst_17 : f32 to vector<48x1xf32>
    %37 = arith.cmpf oeq, %4, %36 : vector<48x1xf32>
    %cst_18 = arith.constant 6.000000e+00 : f32
    %38 = vector.broadcast %cst_18 : f32 to vector<48x1xf32>
    %39 = arith.cmpf oeq, %4, %38 : vector<48x1xf32>
    %40 = vector.broadcast %0 : vector<1x512xf32> to vector<48x512xf32>
    %41 = vector.broadcast %2 : vector<48x1xf32> to vector<48x512xf32>
    %42 = arith.mulf %40, %41 : vector<48x512xf32>
    %43 = math.cos %1 : vector<1x512xf32>
    %44 = vector.shape_cast %27 : vector<1x512xf32> to vector<1x512xf32>
    %45 = vector.broadcast %44 : vector<1x512xf32> to vector<48x512xf32>
    %cst_19 = arith.constant 1.000000e+00 : f32
    %46 = vector.broadcast %cst_19 : f32 to vector<1x512xf32>
    %47 = arith.mulf %27, %43 : vector<1x512xf32>
    %48 = vector.shape_cast %29 : vector<48x1xi1> to vector<48x1xi1>
    %49 = vector.broadcast %48 : vector<48x1xi1> to vector<48x512xi1>
    %50 = vector.shape_cast %47 : vector<1x512xf32> to vector<1x512xf32>
    %51 = vector.broadcast %50 : vector<1x512xf32> to vector<48x512xf32>
    %52 = arith.select %49, %51, %45 : vector<48x512xi1>, vector<48x512xf32>
    %cst_20 = arith.constant 3.000000e+00 : f32
    %53 = vector.broadcast %cst_20 : f32 to vector<1x512xf32>
    %54 = arith.mulf %53, %43 : vector<1x512xf32>
    %55 = arith.mulf %54, %43 : vector<1x512xf32>
    %cst_21 = arith.constant 1.000000e+00 : f32
    %56 = vector.broadcast %cst_21 : f32 to vector<1x512xf32>
    %57 = arith.mulf %56, %46 : vector<1x512xf32>
    %58 = arith.subf %55, %57 : vector<1x512xf32>
    %cst_22 = arith.constant 2.000000e+00 : f32
    %59 = vector.broadcast %cst_22 : f32 to vector<1x512xf32>
    %60 = arith.divf %58, %59 : vector<1x512xf32>
    %61 = arith.mulf %27, %60 : vector<1x512xf32>
    %62 = vector.shape_cast %31 : vector<48x1xi1> to vector<48x1xi1>
    %63 = vector.broadcast %62 : vector<48x1xi1> to vector<48x512xi1>
    %64 = vector.shape_cast %61 : vector<1x512xf32> to vector<1x512xf32>
    %65 = vector.broadcast %64 : vector<1x512xf32> to vector<48x512xf32>
    %66 = arith.select %63, %65, %52 : vector<48x512xi1>, vector<48x512xf32>
    %cst_23 = arith.constant 5.000000e+00 : f32
    %67 = vector.broadcast %cst_23 : f32 to vector<1x512xf32>
    %68 = arith.mulf %67, %43 : vector<1x512xf32>
    %69 = arith.mulf %68, %60 : vector<1x512xf32>
    %cst_24 = arith.constant 2.000000e+00 : f32
    %70 = vector.broadcast %cst_24 : f32 to vector<1x512xf32>
    %71 = arith.mulf %70, %43 : vector<1x512xf32>
    %72 = arith.subf %69, %71 : vector<1x512xf32>
    %cst_25 = arith.constant 3.000000e+00 : f32
    %73 = vector.broadcast %cst_25 : f32 to vector<1x512xf32>
    %74 = arith.divf %72, %73 : vector<1x512xf32>
    %75 = arith.mulf %27, %74 : vector<1x512xf32>
    %76 = vector.shape_cast %33 : vector<48x1xi1> to vector<48x1xi1>
    %77 = vector.broadcast %76 : vector<48x1xi1> to vector<48x512xi1>
    %78 = vector.shape_cast %75 : vector<1x512xf32> to vector<1x512xf32>
    %79 = vector.broadcast %78 : vector<1x512xf32> to vector<48x512xf32>
    %80 = arith.select %77, %79, %66 : vector<48x512xi1>, vector<48x512xf32>
    %cst_26 = arith.constant 7.000000e+00 : f32
    %81 = vector.broadcast %cst_26 : f32 to vector<1x512xf32>
    %82 = arith.mulf %81, %43 : vector<1x512xf32>
    %83 = arith.mulf %82, %74 : vector<1x512xf32>
    %cst_27 = arith.constant 3.000000e+00 : f32
    %84 = vector.broadcast %cst_27 : f32 to vector<1x512xf32>
    %85 = arith.mulf %84, %60 : vector<1x512xf32>
    %86 = arith.subf %83, %85 : vector<1x512xf32>
    %cst_28 = arith.constant 4.000000e+00 : f32
    %87 = vector.broadcast %cst_28 : f32 to vector<1x512xf32>
    %88 = arith.divf %86, %87 : vector<1x512xf32>
    %89 = arith.mulf %27, %88 : vector<1x512xf32>
    %90 = vector.shape_cast %35 : vector<48x1xi1> to vector<48x1xi1>
    %91 = vector.broadcast %90 : vector<48x1xi1> to vector<48x512xi1>
    %92 = vector.shape_cast %89 : vector<1x512xf32> to vector<1x512xf32>
    %93 = vector.broadcast %92 : vector<1x512xf32> to vector<48x512xf32>
    %94 = arith.select %91, %93, %80 : vector<48x512xi1>, vector<48x512xf32>
    %cst_29 = arith.constant 9.000000e+00 : f32
    %95 = vector.broadcast %cst_29 : f32 to vector<1x512xf32>
    %96 = arith.mulf %95, %43 : vector<1x512xf32>
    %97 = arith.mulf %96, %88 : vector<1x512xf32>
    %cst_30 = arith.constant 4.000000e+00 : f32
    %98 = vector.broadcast %cst_30 : f32 to vector<1x512xf32>
    %99 = arith.mulf %98, %74 : vector<1x512xf32>
    %100 = arith.subf %97, %99 : vector<1x512xf32>
    %cst_31 = arith.constant 5.000000e+00 : f32
    %101 = vector.broadcast %cst_31 : f32 to vector<1x512xf32>
    %102 = arith.divf %100, %101 : vector<1x512xf32>
    %103 = arith.mulf %27, %102 : vector<1x512xf32>
    %104 = vector.shape_cast %37 : vector<48x1xi1> to vector<48x1xi1>
    %105 = vector.broadcast %104 : vector<48x1xi1> to vector<48x512xi1>
    %106 = vector.shape_cast %103 : vector<1x512xf32> to vector<1x512xf32>
    %107 = vector.broadcast %106 : vector<1x512xf32> to vector<48x512xf32>
    %108 = arith.select %105, %107, %94 : vector<48x512xi1>, vector<48x512xf32>
    %cst_32 = arith.constant 1.100000e+01 : f32
    %109 = vector.broadcast %cst_32 : f32 to vector<1x512xf32>
    %110 = arith.mulf %109, %43 : vector<1x512xf32>
    %111 = arith.mulf %110, %102 : vector<1x512xf32>
    %cst_33 = arith.constant 5.000000e+00 : f32
    %112 = vector.broadcast %cst_33 : f32 to vector<1x512xf32>
    %113 = arith.mulf %112, %88 : vector<1x512xf32>
    %114 = arith.subf %111, %113 : vector<1x512xf32>
    %cst_34 = arith.constant 6.000000e+00 : f32
    %115 = vector.broadcast %cst_34 : f32 to vector<1x512xf32>
    %116 = arith.divf %114, %115 : vector<1x512xf32>
    %117 = arith.mulf %27, %116 : vector<1x512xf32>
    %118 = vector.shape_cast %39 : vector<48x1xi1> to vector<48x1xi1>
    %119 = vector.broadcast %118 : vector<48x1xi1> to vector<48x512xi1>
    %120 = vector.shape_cast %117 : vector<1x512xf32> to vector<1x512xf32>
    %121 = vector.broadcast %120 : vector<1x512xf32> to vector<48x512xf32>
    %122 = arith.select %119, %121, %108 : vector<48x512xi1>, vector<48x512xf32>
    %cst_35 = arith.constant 1.000000e+00 : f32
    %123 = vector.broadcast %cst_35 : f32 to vector<48x512xf32>
    %124 = arith.divf %123, %42 : vector<48x512xf32>
    %125 = math.sin %42 : vector<48x512xf32>
    %126 = arith.mulf %125, %124 : vector<48x512xf32>
    %127 = math.cos %42 : vector<48x512xf32>
    %128 = arith.subf %126, %127 : vector<48x512xf32>
    %129 = arith.mulf %128, %124 : vector<48x512xf32>
    %130 = vector.shape_cast %29 : vector<48x1xi1> to vector<48x1xi1>
    %131 = vector.broadcast %130 : vector<48x1xi1> to vector<48x512xi1>
    %132 = arith.select %131, %129, %126 : vector<48x512xi1>, vector<48x512xf32>
    %cst_36 = arith.constant 3.000000e+00 : f32
    %133 = vector.broadcast %cst_36 : f32 to vector<48x512xf32>
    %134 = arith.mulf %133, %124 : vector<48x512xf32>
    %135 = arith.mulf %134, %129 : vector<48x512xf32>
    %136 = arith.subf %135, %126 : vector<48x512xf32>
    %137 = vector.shape_cast %31 : vector<48x1xi1> to vector<48x1xi1>
    %138 = vector.broadcast %137 : vector<48x1xi1> to vector<48x512xi1>
    %139 = arith.select %138, %136, %132 : vector<48x512xi1>, vector<48x512xf32>
    %cst_37 = arith.constant 5.000000e+00 : f32
    %140 = vector.broadcast %cst_37 : f32 to vector<48x512xf32>
    %141 = arith.mulf %140, %124 : vector<48x512xf32>
    %142 = arith.mulf %141, %136 : vector<48x512xf32>
    %143 = arith.subf %142, %129 : vector<48x512xf32>
    %144 = vector.shape_cast %33 : vector<48x1xi1> to vector<48x1xi1>
    %145 = vector.broadcast %144 : vector<48x1xi1> to vector<48x512xi1>
    %146 = arith.select %145, %143, %139 : vector<48x512xi1>, vector<48x512xf32>
    %cst_38 = arith.constant 7.000000e+00 : f32
    %147 = vector.broadcast %cst_38 : f32 to vector<48x512xf32>
    %148 = arith.mulf %147, %124 : vector<48x512xf32>
    %149 = arith.mulf %148, %143 : vector<48x512xf32>
    %150 = arith.subf %149, %136 : vector<48x512xf32>
    %151 = vector.shape_cast %35 : vector<48x1xi1> to vector<48x1xi1>
    %152 = vector.broadcast %151 : vector<48x1xi1> to vector<48x512xi1>
    %153 = arith.select %152, %150, %146 : vector<48x512xi1>, vector<48x512xf32>
    %cst_39 = arith.constant 9.000000e+00 : f32
    %154 = vector.broadcast %cst_39 : f32 to vector<48x512xf32>
    %155 = arith.mulf %154, %124 : vector<48x512xf32>
    %156 = arith.mulf %155, %150 : vector<48x512xf32>
    %157 = arith.subf %156, %143 : vector<48x512xf32>
    %158 = vector.shape_cast %37 : vector<48x1xi1> to vector<48x1xi1>
    %159 = vector.broadcast %158 : vector<48x1xi1> to vector<48x512xi1>
    %160 = arith.select %159, %157, %153 : vector<48x512xi1>, vector<48x512xf32>
    %cst_40 = arith.constant 1.100000e+01 : f32
    %161 = vector.broadcast %cst_40 : f32 to vector<48x512xf32>
    %162 = arith.mulf %161, %124 : vector<48x512xf32>
    %163 = arith.mulf %162, %157 : vector<48x512xf32>
    %164 = arith.subf %163, %150 : vector<48x512xf32>
    %165 = vector.shape_cast %39 : vector<48x1xi1> to vector<48x1xi1>
    %166 = vector.broadcast %165 : vector<48x1xi1> to vector<48x512xi1>
    %167 = arith.select %166, %164, %160 : vector<48x512xi1>, vector<48x512xf32>
    %168 = arith.mulf %122, %167 : vector<48x512xf32>
    %169 = vector.broadcast %3 : vector<48x1xf32> to vector<48x512xf32>
    %170 = arith.mulf %168, %169 : vector<48x512xf32>
    %c0_41 = arith.constant 0 : index
    %c0_42 = arith.constant 0 : index
    %171 = vector.load %arg6[%c0_41, %c0_42] : memref<48x512xf32, #tpu.memory_space<vmem>>, vector<48x512xf32>
    tpu.vector_store %arg6[%c0_41, %c0_42], %170 {strides = array<i32>} : memref<48x512xf32, #tpu.memory_space<vmem>>, vector<48x512xf32>,
    return
  }
  func.func @transform_0(%arg0: i32) -> (i32, i32) {
    %c0_i32 = arith.constant 0 : i32
    %c0_i32_0 = arith.constant 0 : i32
    return %c0_i32, %arg0 : i32, i32
  }
  func.func @transform_1(%arg0: i32) -> (i32, i32) {
    %c0_i32 = arith.constant 0 : i32
    %c0_i32_0 = arith.constant 0 : i32
    return %c0_i32, %arg0 : i32, i32
  }
  func.func @transform_2(%arg0: i32) -> (i32, i32) {
    %c0_i32 = arith.constant 0 : i32
    %c0_i32_0 = arith.constant 0 : i32
    %c0_i32_1 = arith.constant 0 : i32
    return %c0_i32, %c0_i32_0 : i32, i32
  }
  func.func @transform_3(%arg0: i32) -> (i32, i32) {
    %c0_i32 = arith.constant 0 : i32
    %c0_i32_0 = arith.constant 0 : i32
    %c0_i32_1 = arith.constant 0 : i32
    return %c0_i32, %c0_i32_0 : i32, i32
  }
  func.func @transform_4(%arg0: i32) -> (i32, i32) {
    %c0_i32 = arith.constant 0 : i32
    %c0_i32_0 = arith.constant 0 : i32
    %c0_i32_1 = arith.constant 0 : i32
    return %c0_i32, %c0_i32_0 : i32, i32
  }
  func.func @transform_5(%arg0: i32) -> (i32, i32) {
    %c0_i32 = arith.constant 0 : i32
    %c0_i32_0 = arith.constant 0 : i32
    return %c0_i32, %arg0 : i32, i32
  }
}

</mosaic_0001>

<bundles_post_ra>
// kernel: tpu_custom_call.1
= control target key start
LH: loop header
LB: loop body
LE: loop exit
PB: predicated region body
PF: predicated region fallthrough
CT: control target
= control target key end

     0   :  { %v6976_v2 = vmov 0   ;;  %s11875_s0 = inlined_call_operand.vmem [shape: f32[1,512], index: 0, kind: input, shape index: {}]   ;;  %s11876_s1 = inlined_call_operand.vmem [shape: f32[1,512], index: 1, kind: input, shape index: {}]   ;;  %s11877_s2 = inlined_call_operand.vmem [shape: f32[48,1], index: 2, kind: input, shape index: {}]   ;;  %s11878_s3 = inlined_call_operand.vmem [shape: f32[48,1], index: 3, kind: input, shape index: {}]   ;;  %s11879_s4 = inlined_call_operand.vmem [shape: f32[48,1], index: 4, kind: input, shape index: {}]   ;;  %s11880_s5 = inlined_call_operand.hbm [shape: f32[48,512], index: 5, kind: output, shape index: {}]  }
   0x1   :  { %v25_v0 = vld [vmem:[%s11877_s2 + $0x10] sm:$0xff]  ;;  %v23_v1 = vld [vmem:[%s11877_s2] sm:$0xff]  ;;  %6800 = vset.pattern.permute.xlu1 %v6976_v2  ;;  %6799 = vset.pattern.permute.xlu0 %v6976_v2  ;;  %v26_v3 = vld [vmem:[%s11877_s2 + $0x18] sm:$0xff] }
   0x2   :  { %129 = vperm.xlu1 %6800, %v25_v0   ;;  %119 = vperm.xlu0 %6799, %v23_v1   ;;  %v24_v4 = vld [vmem:[%s11877_s2 + $0x8] sm:$0xff]  ;;  %v7039_v6 = vld [vmem:[%s11879_s4] sm:$0xff] }
   0x3   :  { %v7034_v5 = vld [vmem:[%s11879_s4 + $0x8] sm:$0xff]  ;;  %v27_v8 = vld [vmem:[%s11877_s2 + $0x20] sm:$0xff]  ;;  %vm60_vm1 = vcmp.eq.f32.partialorder %v7039_v6, 1.0 }
   0x4   :  { %v28_v7 = vld [vmem:[%s11877_s2 + $0x28] sm:$0xff]  ;;  %vm61_vm0 = vcmp.eq.f32.partialorder %v7034_v5, 1.0 }
   0x6   :  { %134 = vperm.xlu1 %6800, %v26_v3   ;;  %124 = vperm.xlu0 %6799, %v24_v4  }
   0x7   :  { %10 = vsyncpa [#allocation3], 0  ;;  %v7052_v9 = vld [vmem:[%s11879_s4 + $0x18] sm:$0xff]  ;;  %v7057_v10 = vld [vmem:[%s11879_s4 + $0x10] sm:$0xff]  ;;  %v297_v11 = vsel %vm61_vm0, 1, %v6976_v2  ;;  %v296_v12 = vsel %vm60_vm1, 1, %v6976_v2  ;;  %v97_v55 = vlaneseq }
   0x8   :  { %vm63_vm2 = vcmp.eq.f32.partialorder %v7052_v9, 1.0  ;;  %vm62_vm3 = vcmp.eq.f32.partialorder %v7057_v10, 1.0  ;;  %v7066_v13 = vld [vmem:[%s11879_s4 + $0x28] sm:$0xff]  ;;  %v7071_v14 = vld [vmem:[%s11879_s4 + $0x20] sm:$0xff]  ;;  %vm67_vm6 = vcmp.eq.f32.partialorder %v7034_v5, 2.0  ;;  %vm66_vm7 = vcmp.eq.f32.partialorder %v7039_v6, 2.0 }
   0x9   :  { %v299_v15 = vsel %vm63_vm2, 1, %v6976_v2  ;;  %v298_v16 = vsel %vm62_vm3, 1, %v6976_v2  ;;  %vm65_vm4 = vcmp.eq.f32.partialorder %v7066_v13, 1.0  ;;  %vm64_vm5 = vcmp.eq.f32.partialorder %v7071_v14, 1.0  ;;  %v30_v49 = vld [vmem:[%s11878_s3 + $0x8] sm:$0xff]  ;;  %v29_v50 = vld [vmem:[%s11878_s3] sm:$0xff] }
   0xa   :  { %144 = vperm.xlu1 %6800, %v28_v7   ;;  %139 = vperm.xlu0 %6799, %v27_v8   ;;  %v301_v17 = vsel %vm65_vm4, 1, %v6976_v2  ;;  %v300_v18 = vsel %vm64_vm5, 1, %v6976_v2  ;;  %v378_v19 = vsel %vm67_vm6, 1, %v6976_v2  ;;  %v377_v20 = vsel %vm66_vm7, 1, %v6976_v2  ;;  %v32_v51 = vld [vmem:[%s11878_s3 + $0x18] sm:$0xff]  ;;  %v31_v52 = vld [vmem:[%s11878_s3 + $0x10] sm:$0xff] }
   0xb   :  { %vm69_vm8 = vcmp.eq.f32.partialorder %v7052_v9, 2.0  ;;  %vm68_vm9 = vcmp.eq.f32.partialorder %v7057_v10, 2.0  ;;  %vm71_vm10 = vcmp.eq.f32.partialorder %v7066_v13, 2.0  ;;  %vm70_vm11 = vcmp.eq.f32.partialorder %v7071_v14, 2.0  ;;  %v34_v53 = vld [vmem:[%s11878_s3 + $0x28] sm:$0xff]  ;;  %v33_v54 = vld [vmem:[%s11878_s3 + $0x20] sm:$0xff] }
   0xc   :  { %v380_v21 = vsel %vm69_vm8, 1, %v6976_v2  ;;  %v379_v22 = vsel %vm68_vm9, 1, %v6976_v2  ;;  %v382_v23 = vsel %vm71_vm10, 1, %v6976_v2  ;;  %v381_v24 = vsel %vm70_vm11, 1, %v6976_v2  ;;  %v7166_v60 = vld [vmem:[%s11875_s0] sm:$0xf] }
   0xd   :  { %vm73_vm12 = vcmp.eq.f32.partialorder %v7034_v5, 3.0  ;;  %vm72_vm13 = vcmp.eq.f32.partialorder %v7039_v6, 3.0  ;;  %vm75_vm14 = vcmp.eq.f32.partialorder %v7052_v9, 3.0  ;;  %vm74_vm15 = vcmp.eq.f32.partialorder %v7057_v10, 3.0 }
   0xe   :  { %306 = vperm.xlu1 %6800, %v297_v11   ;;  %303 = vperm.xlu0 %6799, %v296_v12   ;;  %v460_v25 = vsel %vm73_vm12, 1, %v6976_v2  ;;  %v459_v26 = vsel %vm72_vm13, 1, %v6976_v2  ;;  %v462_v27 = vsel %vm75_vm14, 1, %v6976_v2  ;;  %v461_v28 = vsel %vm74_vm15, 1, %v6976_v2 }
   0xf   :  { %vm77_vm0 = vcmp.eq.f32.partialorder %v7066_v13, 3.0  ;;  %vm76_vm1 = vcmp.eq.f32.partialorder %v7071_v14, 3.0  ;;  %vm79_vm2 = vcmp.eq.f32.partialorder %v7034_v5, 4.0  ;;  %vm78_vm3 = vcmp.eq.f32.partialorder %v7039_v6, 4.0 }
  0x10   :  { %v464_v29 = vsel %vm77_vm0, 1, %v6976_v2  ;;  %v463_v30 = vsel %vm76_vm1, 1, %v6976_v2  ;;  %v542_v31 = vsel %vm79_vm2, 1, %v6976_v2  ;;  %v541_v32 = vsel %vm78_vm3, 1, %v6976_v2 }
  0x11   :  { %vm81_vm4 = vcmp.eq.f32.partialorder %v7052_v9, 4.0  ;;  %vm80_vm5 = vcmp.eq.f32.partialorder %v7057_v10, 4.0  ;;  %vm83_vm6 = vcmp.eq.f32.partialorder %v7066_v13, 4.0  ;;  %vm82_vm7 = vcmp.eq.f32.partialorder %v7071_v14, 4.0 }
  0x12   :  { %312 = vperm.xlu1 %6800, %v299_v15   ;;  %309 = vperm.xlu0 %6799, %v298_v16   ;;  %v544_v33 = vsel %vm81_vm4, 1, %v6976_v2  ;;  %v543_v34 = vsel %vm80_vm5, 1, %v6976_v2  ;;  %v546_v35 = vsel %vm83_vm6, 1, %v6976_v2  ;;  %v545_v36 = vsel %vm82_vm7, 1, %v6976_v2 }
  0x13   :  { %vm85_vm8 = vcmp.eq.f32.partialorder %v7034_v5, 5.0  ;;  %vm84_vm9 = vcmp.eq.f32.partialorder %v7039_v6, 5.0  ;;  %vm87_vm10 = vcmp.eq.f32.partialorder %v7052_v9, 5.0  ;;  %vm86_vm11 = vcmp.eq.f32.partialorder %v7057_v10, 5.0 }
  0x14   :  { %v624_v37 = vsel %vm85_vm8, 1, %v6976_v2  ;;  %v623_v38 = vsel %vm84_vm9, 1, %v6976_v2  ;;  %v626_v39 = vsel %vm87_vm10, 1, %v6976_v2  ;;  %v625_v40 = vsel %vm86_vm11, 1, %v6976_v2 }
  0x15   :  { %vm89_vm12 = vcmp.eq.f32.partialorder %v7066_v13, 5.0  ;;  %vm88_vm13 = vcmp.eq.f32.partialorder %v7071_v14, 5.0  ;;  %vm91_vm14 = vcmp.eq.f32.partialorder %v7034_v5, 6.0  ;;  %vm90_vm15 = vcmp.eq.f32.partialorder %v7039_v6, 6.0 }
  0x16   :  { %318 = vperm.xlu1 %6800, %v301_v17   ;;  %315 = vperm.xlu0 %6799, %v300_v18   ;;  %v628_v41 = vsel %vm89_vm12, 1, %v6976_v2  ;;  %v627_v42 = vsel %vm88_vm13, 1, %v6976_v2  ;;  %v706_v43 = vsel %vm91_vm14, 1, %v6976_v2  ;;  %v705_v44 = vsel %vm90_vm15, 1, %v6976_v2 }
  0x17   :  { %vm93_vm0 = vcmp.eq.f32.partialorder %v7052_v9, 6.0  ;;  %vm92_vm1 = vcmp.eq.f32.partialorder %v7057_v10, 6.0  ;;  %vm95_vm2 = vcmp.eq.f32.partialorder %v7066_v13, 6.0  ;;  %vm94_vm3 = vcmp.eq.f32.partialorder %v7071_v14, 6.0 }
  0x18   :  { %v708_v45 = vsel %vm93_vm0, 1, %v6976_v2  ;;  %v707_v46 = vsel %vm92_vm1, 1, %v6976_v2  ;;  %v710_v47 = vsel %vm95_vm2, 1, %v6976_v2  ;;  %v709_v48 = vsel %vm94_vm3, 1, %v6976_v2 }
  0x19   :  { %v98_v56 = vshrl.u32 %v97_v55, 7 }
  0x1a   :  { %387 = vperm.xlu1 %6800, %v378_v19   ;;  %384 = vperm.xlu0 %6799, %v377_v20  }
  0x1b   :  { %v7157_v57 = vsub.s32 0, %v98_v56  ;;  %v7159_v58 = vsub.s32 1, %v98_v56  ;;  %v7161_v59 = vsub.s32 2, %v98_v56  ;;  %v7205_v19 = vsub.s32 3, %v98_v56 }
  0x1d   :  { %12233 = vst [vmem:[#allocation5_spill] sm:$0xff] %v7157_v57  ;;  %12234 = vst [vmem:[#allocation6_spill] sm:$0xff] %v7159_v58  ;;  %v7170_v61 = vrot.slane %v7166_v60, %v7157_v57  ;;  %v7174_v62 = vrot.slane %v7166_v60, %v7159_v58  ;;  %v7180_v0 = vrot.slane %v7166_v60, %v7161_v59 }
  0x1e   :  { %393 = vperm.xlu1 %6800, %v380_v21   ;;  %390 = vperm.xlu0 %6799, %v379_v22   ;;  %12235 = vst [vmem:[#allocation7_spill] sm:$0xff] %v7161_v59  ;;  %12240 = vst [vmem:[#allocation12_spill] sm:$0xff] %v7205_v19 }
  0x1f   :  { %12236 = vst [vmem:[#allocation8_spill] sm:$0xff] %v7180_v0 }
  0x22   :  { %399 = vperm.xlu1 %6800, %v382_v23   ;;  %396 = vperm.xlu0 %6799, %v381_v24  }
  0x26   :  { %469 = vperm.xlu1 %6800, %v460_v25   ;;  %466 = vperm.xlu0 %6799, %v459_v26  }
  0x2a   :  { %475 = vperm.xlu1 %6800, %v462_v27   ;;  %472 = vperm.xlu0 %6799, %v461_v28  }
  0x2e   :  { %481 = vperm.xlu1 %6800, %v464_v29   ;;  %478 = vperm.xlu0 %6799, %v463_v30   ;;  %v11893_v30 = vmov 683565275  }
  0x32   :  { %551 = vperm.xlu1 %6800, %v542_v31   ;;  %548 = vperm.xlu0 %6799, %v541_v32   ;;  %v11897_v32 = vmov 2475754826  }
  0x36   :  { %557 = vperm.xlu1 %6800, %v544_v33   ;;  %554 = vperm.xlu0 %6799, %v543_v34   ;;  %v11890_v34 = vmov 2131351028  }
  0x3a   :  { %563 = vperm.xlu1 %6800, %v546_v35   ;;  %560 = vperm.xlu0 %6799, %v545_v36   ;;  %v11884_v36 = vmov 2102212464  }
  0x3e   :  { %633 = vperm.xlu1 %6800, %v624_v37   ;;  %630 = vperm.xlu0 %6799, %v623_v38  }
  0x42   :  { %639 = vperm.xlu1 %6800, %v626_v39   ;;  %636 = vperm.xlu0 %6799, %v625_v40  }
  0x46   :  { %645 = vperm.xlu1 %6800, %v628_v41   ;;  %642 = vperm.xlu0 %6799, %v627_v42   ;;  %v11886_v41 = vmov 920167782  }
  0x4a   :  { %715 = vperm.xlu1 %6800, %v706_v43   ;;  %712 = vperm.xlu0 %6799, %v705_v44   ;;  %v11888_v44 = vmov 1326507024  }
  0x4e   :  { %721 = vperm.xlu1 %6800, %v708_v45   ;;  %718 = vperm.xlu0 %6799, %v707_v46  }
  0x52   :  { %727 = vperm.xlu1 %6800, %v710_v47   ;;  %724 = vperm.xlu0 %6799, %v709_v48  }
  0x56   :  { %6403 = vperm.xlu1 %6800, %v30_v49   ;;  %6398 = vperm.xlu0 %6799, %v29_v50  }
  0x5a   :  { %6413 = vperm.xlu1 %6800, %v32_v51   ;;  %6408 = vperm.xlu0 %6799, %v31_v52  }
  0x5e   :  { %6423 = vperm.xlu1 %6800, %v34_v53   ;;  %6418 = vperm.xlu0 %6799, %v33_v54  }
  0x81   :  { %v7176_v63 = vpop.permute.xlu1 %129 }
  0x82   :  { %v7184_v1 = vmul.f32 %v7176_v63, %v7170_v61  ;;  %v7188_v2 = vmul.f32 %v7176_v63, %v7174_v62  ;;  %v7194_v5 = vmul.f32 %v7176_v63, %v7180_v0 }
  0x84   :  { %12237 = vst [vmem:[#allocation9_spill] sm:$0xff] %v7184_v1  ;;  %12238 = vst [vmem:[#allocation10_spill] sm:$0xff] %v7188_v2  ;;  %v1660_v3 = vand.u32 2147483647, %v7184_v1  ;;  %v1663_v4 = vand.u32 2139095040, %v7184_v1  ;;  %v1767_v6 = vand.u32 2139095040, %v7188_v2  ;;  %6801 = vrcp.f32 %v7184_v1 }
  0x85   :  { %12239 = vst [vmem:[#allocation11_spill] sm:$0xff] %v7194_v5  ;;  %v1764_v9 = vand.u32 2147483647, %v7188_v2  ;;  %v1871_v13 = vand.u32 2139095040, %v7194_v5  ;;  %6803 = vrcp.f32 %v7188_v2 }
  0x86   :  { %v1664_v7 = vshrl.u32 %v1663_v4, 23  ;;  %v1667_v8 = vand.u32 8388607, %v1660_v3  ;;  %v1768_v10 = vshrl.u32 %v1767_v6, 23  ;;  %6805 = vrcp.f32 %v7194_v5 }
  0x87   :  { %v7203_v16 = vand.u32 8388607, %v1764_v9  ;;  %v1872_v18 = vshrl.u32 %v1871_v13, 23 }
  0x88   :  { %v6528_v11 = vadd.s32 4294967169, %v1664_v7  ;;  %v6532_v12 = vadd.s32 4294967169, %v1768_v10  ;;  %v1668_v15 = vor.u32 8388608, %v1667_v8 }
  0x89   :  { %v1772_v25 = vor.u32 8388608, %v7203_v16  ;;  %v6536_v29 = vadd.s32 4294967169, %v1872_v18 }
  0x8a   :  { %v1670_v14 = vadd.s32 1, %v6528_v11  ;;  %v1774_v17 = vadd.s32 1, %v6532_v12  ;;  %v7207_v24 = vshll.u32 %v1668_v15, 8 }
  0x8c   :  { %vm1671_vm4 = vcmp.gt.s32.totalorder %v1670_v14, 0  ;;  %vm1775_vm5 = vcmp.gt.s32.totalorder %v1774_v17, 0 }
  0x8d   :  { %v1672_v20 = vsel %vm1671_vm4, %v1670_v14, 0  ;;  %v1776_v22 = vsel %vm1775_vm5, %v1774_v17, 0 }
  0x8e   :  { %v1674_v21 = vand.u32 31, %v1672_v20  ;;  %v1673_v23 = vshrl.u32 %v1672_v20, 5  ;;  %v7210_v27 = vshrl.u32 %v1776_v22, 5  ;;  %v1778_v28 = vand.u32 31, %v1776_v22 }
  0x90   :  { %v1675_v26 = vsub.s32 32, %v1674_v21  ;;  %v1677_v31 = vshll.u32 %v11893_v30, %v1674_v21  ;;  %v1680_v33 = vshll.u32 %v11897_v32, %v1674_v21  ;;  %v1683_v35 = vshll.u32 %v11890_v34, %v1674_v21 }
  0x91   :  { %v1686_v37 = vshll.u32 %v11884_v36, %v1674_v21  ;;  %v1689_v42 = vshll.u32 %v11886_v41, %v1674_v21  ;;  %vm1692_vm6 = vcmp.lt.s32.totalorder %v1673_v23, 1  ;;  %vm1693_vm7 = vcmp.lt.s32.totalorder %v1673_v23, 2 }
  0x92   :  { %v1678_v38 = vshrl.u32 %v11897_v32, %v1675_v26  ;;  %v1681_v39 = vshrl.u32 %v11890_v34, %v1675_v26  ;;  %v1684_v40 = vshrl.u32 %v11884_v36, %v1675_v26  ;;  %v1687_v43 = vshrl.u32 %v11886_v41, %v1675_v26 }
  0x93   :  { %v1690_v45 = vshrl.u32 %v11888_v44, %v1675_v26  ;;  %v7222_v49 = vsub.s32 32, %v1778_v28  ;;  %v1676_v50 = vshrl.u32 %v11893_v30, %v1675_v26  ;;  %vm1695_vm8 = vcmp.lt.s32.totalorder %v1673_v23, 4 }
  0x94   :  { %v1679_v46 = vor.u32 %v1678_v38, %v1677_v31  ;;  %v1682_v47 = vor.u32 %v1681_v39, %v1680_v33  ;;  %v1685_v48 = vor.u32 %v1684_v40, %v1683_v35  ;;  %v1688_v51 = vor.u32 %v1687_v43, %v1686_v37 }
  0x95   :  { %v1691_v52 = vor.u32 %v1690_v45, %v1689_v42  ;;  %vm1694_vm9 = vcmp.lt.s32.totalorder %v1673_v23, 3  ;;  %v1781_v6 = vshll.u32 %v11893_v30, %v1778_v28  ;;  %v1784_v7 = vshll.u32 %v11897_v32, %v1778_v28 }
  0x96   :  { %v1697_v53 = vsel %vm1695_vm8, %v1685_v48, 2102212464  ;;  %v1700_v54 = vsel %vm1692_vm6, %v1679_v46, %v1682_v47  ;;  %v1704_v55 = vsel %vm1692_vm6, %v1682_v47, %v1685_v48  ;;  %v1701_v56 = vsel %vm1695_vm8, %v1688_v51, 920167782 }
  0x97   :  { %v1705_v4 = vsel %vm1695_vm8, %v1691_v52, 1326507024  ;;  %v1696_v8 = vsel %vm1692_vm6, %v1676_v50, %v1679_v46  ;;  %v1702_v10 = vsel %vm1694_vm9, %v1685_v48, %v1701_v56  ;;  %v1782_v12 = vshrl.u32 %v11897_v32, %v7222_v49 }
  0x98   :  { %v1706_v11 = vsel %vm1694_vm9, %v1688_v51, %v1705_v4  ;;  %v1698_v13 = vsel %vm1694_vm9, %v1682_v47, %v1697_v53  ;;  %v1703_v14 = vsel %vm1693_vm7, %v1700_v54, %v1702_v10  ;;  %v1785_v16 = vshrl.u32 %v11890_v34, %v7222_v49 }
  0x99   :  { %v1707_v15 = vsel %vm1693_vm7, %v1704_v55, %v1706_v11  ;;  %v7241_v20 = vmul.u32.u64.low %v7207_v24, %v1703_v14  ;;  %v7242_v21 = vmul.u32.u64.high %v7207_v24, %v1703_v14, %v7241_v20  ;;  %v1783_v22 = vor.u32 %v1782_v12, %v1781_v6 }
  0x9a   :  { %v7237_v17 = vmul.u32.u64.low %v7207_v24, %v1707_v15  ;;  %v7238_v18 = vmul.u32.u64.high %v7207_v24, %v1707_v15, %v7237_v17  ;;  %v1786_v26 = vor.u32 %v1785_v16, %v1784_v7  ;;  %v1787_v31 = vshll.u32 %v11890_v34, %v1778_v28 }
  0x9b   :  { %v1788_v33 = vshrl.u32 %v11884_v36, %v7222_v49  ;;  %v1699_v35 = vsel %vm1693_vm7, %v1696_v8, %v1698_v13  ;;  %v1790_v37 = vshll.u32 %v11884_v36, %v1778_v28  ;;  %v1791_v38 = vshrl.u32 %v11886_v41, %v7222_v49 }
  0x9c   :  { %v1794_v39 = vshrl.u32 %v11888_v44, %v7222_v49  ;;  %v1793_v42 = vshll.u32 %v11886_v41, %v1778_v28  ;;  %v1812_v43 = vshll.u32 %v1772_v25, 8  ;;  %v1878_v45 = vadd.s32 1, %v6536_v29 }
  0x9d   :  { %v1789_v40 = vor.u32 %v1788_v33, %v1787_v31  ;;  %vm1717_vm10 = vc.u32 %v7238_v18, %v7241_v20  ;;  %v1718_v46 = vadd.s32 1, %v7242_v21  ;;  %v1792_v23 = vor.u32 %v1791_v38, %v1790_v37 }
  0x9e   :  { %vm1796_vm11 = vcmp.lt.s32.totalorder %v7210_v27, 1  ;;  %v1715_v47 = vmul.u32 %v7207_v24, %v1699_v35  ;;  %v1795_v48 = vor.u32 %v1794_v39, %v1793_v42  ;;  %vm1799_vm12 = vcmp.lt.s32.totalorder %v7210_v27, 4 }
  0x9f   :  { %v1804_v50 = vsel %vm1796_vm11, %v1783_v22, %v1786_v26  ;;  %v1719_v28 = vsel %vm1717_vm10, %v1718_v46, %v7242_v21  ;;  %vm1798_vm13 = vcmp.lt.s32.totalorder %v7210_v27, 3  ;;  %v1805_v25 = vsel %vm1799_vm12, %v1792_v23, 920167782 }
  0xa0   :  { %v1808_v29 = vsel %vm1796_vm11, %v1786_v26, %v1789_v40  ;;  %v1720_v51 = vadd.s32 %v1719_v28, %v1715_v47  ;;  %vm1797_vm14 = vcmp.lt.s32.totalorder %v7210_v27, 2  ;;  %v1806_v24 = vsel %vm1798_vm13, %v1789_v40, %v1805_v25 }
  0xa1   :  { %v1809_v52 = vsel %vm1799_vm12, %v1795_v48, 1326507024  ;;  %v7276_v53 = vrot.slane %v7166_v60, %v7205_v19  ;;  %v1807_v54 = vsel %vm1797_vm14, %v1804_v50, %v1806_v24  ;;  %vm1879_vm15 = vcmp.gt.s32.totalorder %v1878_v45, 0 }
  0xa2   :  { %v1810_v55 = vsel %vm1798_vm13, %v1792_v23, %v1809_v52  ;;  %v1721_v56 = vadd.s32 536870912, %v1720_v51  ;;  %v7284_v6 = vmul.u32.u64.low %v1812_v43, %v1807_v54  ;;  %v7285_v7 = vmul.u32.u64.high %v1812_v43, %v1807_v54, %v7284_v6 }
  0xa3   :  { %12241 = vst [vmem:[#allocation13_spill] sm:$0xff] %v7276_v53  ;;  %v1811_v4 = vsel %vm1797_vm14, %v1808_v29, %v1810_v55  ;;  %v1801_v60 = vsel %vm1799_vm12, %v1789_v40, 2102212464  ;;  %v1880_v11 = vsel %vm1879_vm15, %v1878_v45, 0  ;;  %v1780_v12 = vshrl.u32 %v11893_v30, %v7222_v49 }
  0xa4   :  { %v7288_v8 = vmul.u32.u64.low %v1812_v43, %v1811_v4  ;;  %v7289_v10 = vmul.u32.u64.high %v1812_v43, %v1811_v4, %v7288_v8  ;;  %v7297_v13 = vmul.f32 %v7176_v63, %v7276_v53  ;;  %v7299_v14 = vshrl.u32 %v1721_v56, 30 }
  0xa5   :  { %v1800_v15 = vsel %vm1796_vm11, %v1780_v12, %v1783_v22  ;;  %v1802_v16 = vsel %vm1798_vm13, %v1786_v26, %v1801_v60  ;;  %v1882_v17 = vand.u32 31, %v1880_v11  ;;  %v1822_v21 = vadd.s32 1, %v7285_v7 }
  0xa6   :  { %12242 = vst [vmem:[#allocation14_spill] sm:$0xff] %v7297_v13  ;;  %vm1821_vm0 = vc.u32 %v7289_v10, %v7284_v6  ;;  %v1723_v49 = vshll.u32 %v7299_v14, 30  ;;  %v1803_v63 = vsel %vm1797_vm14, %v1800_v15, %v1802_v16  ;;  %v1975_v31 = vand.u32 2139095040, %v7297_v13 }
  0xa7   :  { %v1883_v33 = vsub.s32 32, %v1882_v17  ;;  %v1823_v35 = vsel %vm1821_vm0, %v1822_v21, %v7285_v7  ;;  %v1819_v22 = vmul.u32 %v1812_v43, %v1803_v63  ;;  %v11883_v40 = vand.u32 2147483647, %v7194_v5 }
  0xa8   :  { %v7313_v37 = vsub.s32 %v1720_v51, %v1723_v49  ;;  %v1976_v26 = vshrl.u32 %v1975_v31, 23  ;;  %v7318_v45 = vshrl.u32 %v1880_v11, 5  ;;  %v1894_v23 = vshll.u32 %v11884_v36, %v1882_v17 }
  0xa9   :  { %v1824_v38 = vadd.s32 %v1823_v35, %v1819_v22  ;;  %v1895_v39 = vshrl.u32 %v11886_v41, %v1883_v33  ;;  %v1898_v42 = vshrl.u32 %v11888_v44, %v1883_v33  ;;  %v1886_v27 = vshrl.u32 %v11897_v32, %v1883_v33 }
  0xaa   :  { %v1889_v46 = vshrl.u32 %v11890_v34, %v1883_v33  ;;  %v1726_v43 = vsub.s32 0, %v7313_v37  ;;  %v1892_v47 = vshrl.u32 %v11884_v36, %v1883_v33  ;;  %v1897_v48 = vshll.u32 %v11886_v41, %v1882_v17 }
  0xab   :  { %v6540_v50 = vadd.s32 4294967169, %v1976_v26  ;;  %v1825_v28 = vadd.s32 536870912, %v1824_v38  ;;  %v1885_v25 = vshll.u32 %v11893_v30, %v1882_v17  ;;  %v1888_v29 = vshll.u32 %v11897_v32, %v1882_v17 }
  0xac   :  { %v1896_v51 = vor.u32 %v1895_v39, %v1894_v23  ;;  %v1891_v24 = vshll.u32 %v11890_v34, %v1882_v17  ;;  %v1899_v52 = vor.u32 %v1898_v42, %v1897_v48  ;;  %v1875_v54 = vand.u32 8388607, %v11883_v40 }
  0xad   :  { %v1887_v55 = vor.u32 %v1886_v27, %v1885_v25  ;;  %v1890_v56 = vor.u32 %v1889_v46, %v1888_v29  ;;  %v6529_v4 = vmin.u32 %v1726_v43, %v7313_v37  ;;  %vm1903_vm1 = vcmp.lt.s32.totalorder %v7318_v45, 4 }
  0xae   :  { %v1893_v7 = vor.u32 %v1892_v47, %v1891_v24  ;;  %v1982_v8 = vadd.s32 1, %v6540_v50  ;;  %v7333_v60 = vshrl.u32 %v1825_v28, 30  ;;  %v1909_v11 = vsel %vm1903_vm1, %v1896_v51, 920167782 }
  0xaf   :  { %v1913_v12 = vsel %vm1903_vm1, %v1899_v52, 1326507024  ;;  %v1876_v15 = vor.u32 8388608, %v1875_v54  ;;  %vm1900_vm2 = vcmp.lt.s32.totalorder %v7318_v45, 1  ;;  %vm1902_vm3 = vcmp.lt.s32.totalorder %v7318_v45, 3 }
  0xb0   :  { %vm1983_vm4 = vcmp.gt.s32.totalorder %v1982_v8, 0  ;;  %v1728_v16 = vclz %v6529_v4  ;;  %v1908_v17 = vsel %vm1900_vm2, %v1887_v55, %v1890_v56  ;;  %v1910_v21 = vsel %vm1902_vm3, %v1893_v7, %v1909_v11 }
  0xb1   :  { %v1984_v49 = vsel %vm1983_vm4, %v1982_v8, 0  ;;  %v1827_v63 = vshll.u32 %v7333_v60, 30  ;;  %v1912_v31 = vsel %vm1900_vm2, %v1890_v56, %v1893_v7  ;;  %v1914_v35 = vsel %vm1902_vm3, %v1896_v51, %v1913_v12 }
  0xb2   :  { %v1986_v22 = vand.u32 31, %v1984_v49  ;;  %vm1901_vm5 = vcmp.lt.s32.totalorder %v7318_v45, 2  ;;  %v11882_v39 = vand.u32 2147483647, %v7297_v13  ;;  %v6530_v42 = vadd.s32 4294967294, %v1728_v16 }
  0xb3   :  { %v1911_v26 = vsel %vm1901_vm5, %v1908_v17, %v1910_v21  ;;  %v1915_v27 = vsel %vm1901_vm5, %v1912_v31, %v1914_v35  ;;  %v1916_v46 = vshll.u32 %v1876_v15, 8  ;;  %v7356_v43 = vsub.s32 %v1824_v38, %v1827_v63 }
  0xb4   :  { %v1987_v23 = vsub.s32 32, %v1986_v22  ;;  %v1905_v47 = vsel %vm1903_vm1, %v1893_v7, 2102212464  ;;  %vm6531_vm6 = vcmp.lt.s32.totalorder %v6530_v42, 0  ;;  %v1884_v24 = vshrl.u32 %v11893_v30, %v1883_v33 }
  0xb5   :  { %v7360_v48 = vmul.u32.u64.low %v1916_v46, %v1911_v26  ;;  %v7361_v50 = vmul.u32.u64.high %v1916_v46, %v1911_v26, %v7360_v48  ;;  %v7364_v28 = vmul.u32.u64.low %v1916_v46, %v1915_v27  ;;  %v7365_v25 = vmul.u32.u64.high %v1916_v46, %v1915_v27, %v7364_v28 }
  0xb6   :  { %v1990_v29 = vshrl.u32 %v11897_v32, %v1987_v23  ;;  %v1993_v51 = vshrl.u32 %v11890_v34, %v1987_v23  ;;  %v1979_v38 = vand.u32 8388607, %v11882_v39  ;;  %v1830_v52 = vsub.s32 0, %v7356_v43 }
  0xb7   :  { %v1989_v54 = vshll.u32 %v11893_v30, %v1986_v22  ;;  %v1992_v4 = vshll.u32 %v11897_v32, %v1986_v22  ;;  %v1996_v7 = vshrl.u32 %v11884_v36, %v1987_v23  ;;  %v1904_v8 = vsel %vm1900_vm2, %v1884_v24, %v1887_v55 }
  0xb8   :  { %v1906_v11 = vsel %vm1902_vm3, %v1890_v56, %v1905_v47  ;;  %v1985_v12 = vshrl.u32 %v1984_v49, 5  ;;  %v1995_v33 = vshll.u32 %v11890_v34, %v1986_v22  ;;  %v1998_v17 = vshll.u32 %v11884_v36, %v1986_v22  ;;  %v7389_v49 = vpop.permute.xlu0 %119 }
  0xb9   :  { %v1991_v15 = vor.u32 %v1990_v29, %v1989_v54  ;;  %v1994_v16 = vor.u32 %v1993_v51, %v1992_v4  ;;  %v1999_v21 = vshrl.u32 %v11886_v41, %v1987_v23  ;;  %v7384_v63 = vsel %vm6531_vm6, 0, %v6530_v42 }
  0xba   :  { %v1980_v31 = vor.u32 8388608, %v1979_v38  ;;  %v2002_v35 = vshrl.u32 %v11888_v44, %v1987_v23  ;;  %v6533_v55 = vmin.u32 %v1830_v52, %v7356_v43  ;;  %v1997_v26 = vor.u32 %v1996_v7, %v1995_v33 }
  0xbb   :  { %v2000_v27 = vor.u32 %v1999_v21, %v1998_v17  ;;  %v2001_v56 = vshll.u32 %v11886_v41, %v1986_v22  ;;  %v1907_v47 = vsel %vm1901_vm5, %v1904_v8, %v1906_v11  ;;  %v1926_v28 = vadd.s32 1, %v7361_v50 }
  0xbc   :  { %vm2004_vm7 = vcmp.lt.s32.totalorder %v1985_v12, 1  ;;  %vm1925_vm8 = vc.u32 %v7365_v25, %v7360_v48  ;;  %vm2007_vm9 = vcmp.lt.s32.totalorder %v1985_v12, 4  ;;  %v1736_v51 = vsub.s32 4294967266, %v7384_v63 }
  0xbd   :  { %v2003_v42 = vor.u32 %v2002_v35, %v2001_v56  ;;  %v2012_v29 = vsel %vm2004_vm7, %v1991_v15, %v1994_v16  ;;  %vm2006_vm10 = vcmp.lt.s32.totalorder %v1985_v12, 3  ;;  %v2013_v24 = vsel %vm2007_vm9, %v2000_v27, 920167782 }
  0xbe   :  { %v7400_v22 = vmul.f32 %v7389_v49, %v7170_v61  ;;  %v1832_v45 = vclz %v6533_v55  ;;  %vm2005_vm11 = vcmp.lt.s32.totalorder %v1985_v12, 2  ;;  %v2014_v38 = vsel %vm2006_vm10, %v1997_v26, %v2013_v24 }
  0xbf   :  { %v2020_v52 = vshll.u32 %v1980_v31, 8  ;;  %v1923_v54 = vmul.u32 %v1916_v46, %v1907_v47  ;;  %v1927_v4 = vsel %vm1925_vm8, %v1926_v28, %v7361_v50  ;;  %v2015_v7 = vsel %vm2005_vm11, %v2012_v29, %v2014_v38 }
  0xc0   :  { %12243 = vst [vmem:[#allocation15_spill] sm:$0xff] %v7400_v22  ;;  %v2016_v8 = vsel %vm2004_vm7, %v1994_v16, %v1997_v26  ;;  %v2009_v11 = vsel %vm2007_vm9, %v1997_v26, 2102212464  ;;  %v2017_v33 = vsel %vm2007_vm9, %v2003_v42, 1326507024  ;;  %v1737_v35 = vadd.s32 127, %v1736_v51 }
  0xc1   :  { %v7406_v17 = vmul.u32.u64.low %v2020_v52, %v2015_v7  ;;  %v7407_v21 = vmul.u32.u64.high %v2020_v52, %v2015_v7, %v7406_v17  ;;  %v1988_v55 = vshrl.u32 %v11893_v30, %v1987_v23  ;;  %v2018_v56 = vsel %vm2006_vm10, %v2000_v27, %v2017_v33 }
  0xc2   :  { %v1732_v31 = vsub.s32 32, %v7384_v63  ;;  %v6534_v46 = vadd.s32 4294967294, %v1832_v45  ;;  %v7413_v47 = vadd.s32 %v1927_v4, %v1923_v54  ;;  %v2019_v50 = vsel %vm2005_vm11, %v2016_v8, %v2018_v56 }
  0xc3   :  { %v2008_v28 = vsel %vm2004_vm7, %v1988_v55, %v1991_v15  ;;  %v2010_v26 = vsel %vm2006_vm10, %v1994_v16, %v2009_v11  ;;  %v7418_v42 = vmul.u32.u64.low %v2020_v52, %v2019_v50  ;;  %v7419_v29 = vmul.u32.u64.high %v2020_v52, %v2019_v50, %v7418_v42 }
  0xc4   :  { %v2030_v51 = vadd.s32 1, %v7407_v21  ;;  %v831_v23 = vand.u32 2139095040, %v7400_v22  ;;  %v1716_v27 = vadd.s32 %v7241_v20, %v7238_v18  ;;  %v1738_v24 = vshll.u32 %v1737_v35, 23 }
  0xc5   :  { %v7427_v45 = vmul.f32 %v7389_v49, %v7174_v62  ;;  %v7431_v15 = vmul.f32 %v7389_v49, %v7180_v0  ;;  %vm6535_vm12 = vcmp.lt.s32.totalorder %v6534_v46, 0  ;;  %v1929_v16 = vadd.s32 536870912, %v7413_v47 }
  0xc6   :  { %v2011_v38 = vsel %vm2005_vm11, %v2008_v28, %v2010_v26  ;;  %v832_v54 = vshrl.u32 %v831_v23, 23  ;;  %vm1662_vm13 = vcmp.lt.s32.totalorder %v7184_v1, 0  ;;  %v1734_v18 = vshrl.u32 %v1716_v27, %v1732_v31 }
  0xc7   :  { %12244 = vst [vmem:[#allocation16_spill] sm:$0xff] %v7427_v45  ;;  %12245 = vst [vmem:[#allocation17_spill] sm:$0xff] %v7431_v15  ;;  %vm2029_vm14 = vc.u32 %v7419_v29, %v7406_v17  ;;  %v1746_v20 = vsub.s32 4, %v7299_v14  ;;  %v1733_v12 = vshll.u32 %v7313_v37, %v7384_v63  ;;  %v1739_v8 = vor.u32 4788187, %v1738_v24 }
  0xc8   :  { %v2031_v4 = vsel %vm2029_vm14, %v2030_v51, %v7407_v21  ;;  %v6496_v7 = vadd.s32 4294967169, %v832_v54  ;;  %v7444_v11 = vsel %vm6535_vm12, 0, %v6534_v46  ;;  %v2027_v33 = vmul.u32 %v2020_v52, %v2011_v38 }
  0xc9   :  { %v1850_v35 = vsub.s32 4, %v7333_v60  ;;  %v7447_v55 = vshrl.u32 %v1929_v16, 30  ;;  %v11881_v56 = vand.u32 2147483647, %v7400_v22  ;;  %v1735_v50 = vor.u32 %v1734_v18, %v1733_v12 }
  0xca   :  { %v838_v31 = vadd.s32 1, %v6496_v7  ;;  %vm1766_vm15 = vcmp.lt.s32.totalorder %v7188_v2, 0  ;;  %v7451_v28 = vadd.s32 %v2031_v4, %v2027_v33  ;;  %v935_v21 = vand.u32 2139095040, %v7427_v45  ;;  %v7485_v4 = vpop.eup %6801 }
  0xcb   :  { %vm7457_vm0 = vcmp.le.f32.partialorder %v1660_v3, 0.7853982  ;;  %v1840_v63 = vsub.s32 4294967266, %v7444_v11  ;;  %v1740_v52 = vand.u32 2147483647, %v1739_v8  ;;  %v1747_v46 = vsel %vm1662_vm13, %v1746_v20, %v7299_v14  ;;  %12250 = vst [vmem:[#allocation18_spill] sm:$0xff] %v7485_v4  ;;  %v7495_v8 = vpop.eup %6803 }
  0xcc   :  { %vm839_vm1 = vcmp.gt.s32.totalorder %v838_v31, 0  ;;  %v1836_v26 = vsub.s32 32, %v7444_v11  ;;  %v1851_v51 = vsel %vm1766_vm15, %v1850_v35, %v7333_v60  ;;  %v1931_v3 = vshll.u32 %v7447_v55, 30  ;;  %12251 = vst [vmem:[#allocation19_spill] sm:$0xff] %v7495_v8 }
  0xcd   :  { %v840_v42 = vsel %vm839_vm1, %v838_v31, 0  ;;  %v835_v23 = vand.u32 8388607, %v11881_v56  ;;  %v1742_v24 = vcvt.s32.f32 %v1735_v50  ;;  %v1820_v16 = vadd.s32 %v7284_v6, %v7289_v10 }
  0xce   :  { %v842_v27 = vand.u32 31, %v840_v42  ;;  %v2033_v38 = vadd.s32 536870912, %v7451_v28  ;;  %v936_v14 = vshrl.u32 %v935_v21, 23  ;;  %v7477_v54 = vsel %vm7457_vm0, 0, %v1747_v46 }
  0xcf   :  { %vm7481_vm2 = vcmp.le.f32.partialorder %v1764_v9, 0.7853982  ;;  %v1841_v18 = vadd.s32 127, %v1840_v63  ;;  %v7487_v7 = vmul.f32 %v1742_v24, %v1740_v52  ;;  %v1837_v6 = vshll.u32 %v7356_v43, %v7444_v11  ;;  %v7510_v24 = vpop.eup %6805 }
  0xd0   :  { %v843_v20 = vsub.s32 32, %v842_v27  ;;  %v1838_v10 = vshrl.u32 %v1820_v16, %v1836_v26  ;;  %v7493_v12 = vsel %vm7481_vm2, 0, %v1851_v51  ;;  %v7498_v9 = vsub.s32 %v7413_v47, %v1931_v3  ;;  %12252 = vst [vmem:[#allocation20_spill] sm:$0xff] %v7510_v24 }
  0xd1   :  { %v836_v33 = vor.u32 8388608, %v835_v23  ;;  %v7502_v50 = vshrl.u32 %v2033_v38, 30  ;;  %v845_v21 = vshll.u32 %v11893_v30, %v842_v27  ;;  %v848_v43 = vshll.u32 %v11897_v32, %v842_v27 }
  0xd2   :  { %v846_v35 = vshrl.u32 %v11897_v32, %v843_v20  ;;  %v849_v31 = vshrl.u32 %v11890_v34, %v843_v20  ;;  %v6500_v11 = vadd.s32 4294967169, %v936_v14  ;;  %v1842_v63 = vshll.u32 %v1841_v18, 23 }
  0xd3   :  { %v841_v52 = vshrl.u32 %v840_v42, 5  ;;  %v851_v46 = vshll.u32 %v11890_v34, %v842_v27  ;;  %v852_v26 = vshrl.u32 %v11884_v36, %v843_v20  ;;  %v854_v3 = vshll.u32 %v11884_v36, %v842_v27 }
  0xd4   :  { %v847_v47 = vor.u32 %v846_v35, %v845_v21  ;;  %v850_v51 = vor.u32 %v849_v31, %v848_v43  ;;  %v855_v23 = vshrl.u32 %v11886_v41, %v843_v20  ;;  %v1934_v16 = vsub.s32 0, %v7498_v9 }
  0xd5   :  { %v853_v38 = vor.u32 %v852_v26, %v851_v46  ;;  %v857_v56 = vshll.u32 %v11886_v41, %v842_v27  ;;  %v858_v14 = vshrl.u32 %v11888_v44, %v843_v20  ;;  %v2035_v42 = vshll.u32 %v7502_v50, 30 }
  0xd6   :  { %v856_v18 = vor.u32 %v855_v23, %v854_v3  ;;  %v876_v39 = vshll.u32 %v836_v33, 8  ;;  %v942_v40 = vadd.s32 1, %v6500_v11  ;;  %v844_v35 = vshrl.u32 %v11893_v30, %v843_v20 }
  0xd7   :  { %v859_v31 = vor.u32 %v858_v14, %v857_v56  ;;  %vm860_vm3 = vcmp.lt.s32.totalorder %v841_v52, 1  ;;  %vm863_vm4 = vcmp.lt.s32.totalorder %v841_v52, 4  ;;  %vm862_vm5 = vcmp.lt.s32.totalorder %v841_v52, 3 }
  0xd8   :  { %v865_v21 = vsel %vm863_vm4, %v853_v38, 2102212464  ;;  %v868_v43 = vsel %vm860_vm3, %v847_v47, %v850_v51  ;;  %v869_v36 = vsel %vm863_vm4, %v856_v18, 920167782  ;;  %vm861_vm6 = vcmp.lt.s32.totalorder %v841_v52, 2 }
  0xd9   :  { %v870_v46 = vsel %vm862_vm5, %v853_v38, %v869_v36  ;;  %v872_v26 = vsel %vm860_vm3, %v850_v51, %v853_v38  ;;  %v873_v27 = vsel %vm863_vm4, %v859_v31, 1326507024  ;;  %v864_v41 = vsel %vm860_vm3, %v844_v35, %v847_v47 }
  0xda   :  { %v871_v44 = vsel %vm861_vm6, %v868_v43, %v870_v46  ;;  %v874_v34 = vsel %vm862_vm5, %v856_v18, %v873_v27  ;;  %vm943_vm7 = vcmp.gt.s32.totalorder %v942_v40, 0  ;;  %v866_v33 = vsel %vm862_vm5, %v850_v51, %v865_v21 }
  0xdb   :  { %v875_v11 = vsel %vm861_vm6, %v872_v26, %v874_v34  ;;  %v7519_v20 = vmul.u32.u64.low %v876_v39, %v871_v44  ;;  %v7520_v56 = vmul.u32.u64.high %v876_v39, %v871_v44, %v7519_v20  ;;  %v1839_v3 = vor.u32 %v1838_v10, %v1837_v6 }
  0xdc   :  { %v1843_v23 = vor.u32 4788187, %v1842_v63  ;;  %v6537_v14 = vmin.u32 %v1934_v16, %v7498_v9  ;;  %v11892_v36 = vand.u32 2147483647, %v7427_v45  ;;  %v7526_v38 = vsub.s32 %v7451_v28, %v2035_v42 }
  0xdd   :  { %v7528_v47 = vmul.u32.u64.low %v876_v39, %v875_v11  ;;  %v7529_v35 = vmul.u32.u64.high %v876_v39, %v875_v11, %v7528_v47  ;;  %v944_v18 = vsel %vm943_vm7, %v942_v40, 0  ;;  %6807 = vrcp.f32 %v7297_v13 }
  0xde   :  { %v7534_v34 = vmul.f32 %v7389_v49, %v7276_v53  ;;  %v867_v44 = vsel %vm861_vm6, %v864_v41, %v866_v33  ;;  %v946_v6 = vand.u32 31, %v944_v18  ;;  %v1744_v10 = vxor.u32 2147483648, %v7487_v7 }
  0xdf   :  { %v7539_v63 = vadd.s32 3, %v7477_v54  ;;  %v7542_v28 = vadd.s32 3, %v7493_v12  ;;  %v886_v51 = vadd.s32 1, %v7520_v56  ;;  %v1844_v40 = vand.u32 2147483647, %v1843_v23 }
  0xe0   :  { %12253 = vst [vmem:[#allocation21_spill] sm:$0xff] %v7534_v34  ;;  %v1846_v16 = vcvt.s32.f32 %v1839_v3  ;;  %v1936_v42 = vclz %v6537_v14  ;;  %v947_v31 = vsub.s32 32, %v946_v6  ;;  %v2038_v49 = vsub.s32 0, %v7526_v38 }
  0xe1   :  { %v883_v21 = vmul.u32 %v876_v39, %v867_v44  ;;  %vm885_vm8 = vc.u32 %v7529_v35, %v7519_v20  ;;  %v939_v41 = vand.u32 8388607, %v11892_v36  ;;  %v949_v43 = vshll.u32 %v11893_v30, %v946_v6 }
  0xe2   :  { %v887_v52 = vsel %vm885_vm8, %v886_v51, %v7520_v56  ;;  %v952_v46 = vshll.u32 %v11897_v32, %v946_v6  ;;  %v1039_v26 = vand.u32 2139095040, %v7431_v15  ;;  %v950_v33 = vshrl.u32 %v11897_v32, %v947_v31 }
  0xe3   :  { %v7554_v27 = vadd.s32 %v887_v52, %v883_v21  ;;  %v12254_v11 = vmov 2131351028   ;;  %v12255_v3 = vmov 2102212464   ;;  %v945_v14 = vshrl.u32 %v944_v18, 5 }
  0xe4   :  { %v953_v39 = vshrl.u32 %v12254_v11, %v947_v31  ;;  %v956_v23 = vshrl.u32 %v12255_v3, %v947_v31  ;;  %v955_v47 = vshll.u32 %v12254_v11, %v946_v6  ;;  %v958_v44 = vshll.u32 %v12255_v3, %v946_v6 }
  0xe5   :  { %v12256_v56 = vmov 920167782   ;;  %v6538_v36 = vadd.s32 4294967294, %v1936_v42  ;;  %v6541_v30 = vmin.u32 %v2038_v49, %v7526_v38  ;;  %v951_v24 = vor.u32 %v950_v33, %v949_v43 }
  0xe6   :  { %v959_v51 = vshrl.u32 %v12256_v56, %v947_v31  ;;  %v954_v8 = vor.u32 %v953_v39, %v952_v46  ;;  %v957_v21 = vor.u32 %v956_v23, %v955_v47  ;;  %v961_v32 = vshll.u32 %v12256_v56, %v946_v6 }
  0xe7   :  { %v12257_v4 = vmov 1326507024   ;;  %v1745_v18 = vsel %vm1662_vm13, %v1744_v10, %v7487_v7  ;;  %v1847_v59 = vmul.f32 %v1846_v16, %v1844_v40  ;;  %v1954_v58 = vsub.s32 4, %v7447_v55  ;;  %v7570_v42 = vpop.eup %6807 }
  0xe8   :  { %v960_v52 = vor.u32 %v959_v51, %v958_v44  ;;  %v962_v19 = vshrl.u32 %v12257_v4, %v947_v31  ;;  %v889_v57 = vadd.s32 536870912, %v7554_v27  ;;  %12258 = vst [vmem:[#allocation22_spill] sm:$0xff] %v7570_v42  ;;  %v940_v49 = vor.u32 8388608, %v939_v41 }
  0xe9   :  { %vm964_vm9 = vcmp.lt.s32.totalorder %v945_v14, 1  ;;  %v1040_v46 = vshrl.u32 %v1039_v26, 23  ;;  %vm1870_vm10 = vcmp.lt.s32.totalorder %v7194_v5, 0  ;;  %vm6539_vm11 = vcmp.lt.s32.totalorder %v6538_v36, 0 }
  0xea   :  { %v963_v43 = vor.u32 %v962_v19, %v961_v32  ;;  %v2040_v6 = vclz %v6541_v30  ;;  %vm967_vm12 = vcmp.lt.s32.totalorder %v945_v14, 4  ;;  %v972_v33 = vsel %vm964_vm9, %v951_v24, %v954_v8 }
  0xeb   :  { %v12259_v39 = vmov 683565275   ;;  %vm966_vm13 = vcmp.lt.s32.totalorder %v945_v14, 3  ;;  %v969_v10 = vsel %vm967_vm12, %v957_v21, 2102212464  ;;  %v7575_v16 = vshrl.u32 %v889_v57, 30 }
  0xec   :  { %v948_v7 = vshrl.u32 %v12259_v39, %v947_v31  ;;  %v973_v40 = vsel %vm967_vm12, %v960_v52, 920167782  ;;  %vm965_vm14 = vcmp.lt.s32.totalorder %v945_v14, 2  ;;  %v976_v19 = vsel %vm964_vm9, %v954_v8, %v957_v21 }
  0xed   :  { %v974_v23 = vsel %vm966_vm13, %v957_v21, %v973_v40  ;;  %v977_v41 = vsel %vm967_vm12, %v963_v43, 1326507024  ;;  %v980_v26 = vshll.u32 %v940_v49, 8  ;;  %v6504_v47 = vadd.s32 4294967169, %v1040_v46 }
  0xee   :  { %v975_v32 = vsel %vm965_vm14, %v972_v33, %v974_v23  ;;  %v7580_v30 = vsel %vm6539_vm11, 0, %v6538_v36  ;;  %v968_v44 = vsel %vm964_vm9, %v948_v7, %v951_v24  ;;  %v970_v31 = vsel %vm966_vm13, %v954_v8, %v969_v10 }
  0xef   :  { %v978_v51 = vsel %vm966_vm13, %v960_v52, %v977_v41  ;;  %v6542_v42 = vadd.s32 4294967294, %v2040_v6  ;;  %v7584_v53 = vmul.u32.u64.low %v980_v26, %v975_v32  ;;  %v7585_v0 = vmul.u32.u64.high %v980_v26, %v975_v32, %v7584_v53 }
  0xf0   :  { %v979_v57 = vsel %vm965_vm14, %v976_v19, %v978_v51  ;;  %v12261_v21 = vand.u32 2147483647, %v7194_v5  ;;  %v891_v36 = vshll.u32 %v7575_v16, 30  ;;  %v1944_v8 = vsub.s32 4294967266, %v7580_v30 }
  0xf1   :  { %12260 = vst [vmem:[#allocation23_spill] sm:$0xff] %v7584_v53  ;;  %v7595_v49 = vmul.u32.u64.low %v980_v26, %v979_v57  ;;  %v7596_v46 = vmul.u32.u64.high %v980_v26, %v979_v57, %v7595_v49  ;;  %6809 = vrcp.f32 %v7400_v22  ;;  %v971_v24 = vsel %vm965_vm14, %v968_v44, %v970_v31 }
  0xf2   :  { %vm7590_vm1 = vcmp.le.f32.partialorder %v12261_v21, 0.7853982  ;;  %v1046_v52 = vadd.s32 1, %v6504_v47  ;;  %v1748_v6 = vsel %vm7457_vm0, %v7184_v1, %v1745_v18  ;;  %v7605_v33 = vand.u32 3, %v7539_v63 }
  0xf3   :  { %12264 = vst [vmem:[#allocation24_spill] sm:$0xff] %v7596_v46  ;;  %v1848_v7 = vxor.u32 2147483648, %v1847_v59  ;;  %v7608_v10 = vand.u32 3, %v7542_v28  ;;  %v1955_v40 = vsel %vm1870_vm10, %v1954_v58, %v7447_v55  ;;  %vm6543_vm3 = vcmp.lt.s32.totalorder %v6542_v42, 0 }
  0xf4   :  { %12265 = vst [vmem:[#allocation25_spill] sm:$0xff] %v7605_v33  ;;  %v990_v14 = vadd.s32 1, %v7585_v0  ;;  %vm1047_vm4 = vcmp.gt.s32.totalorder %v1046_v52, 0  ;;  %v7615_v23 = vsub.s32 %v7554_v27, %v891_v36  ;;  %v987_v37 = vmul.u32 %v980_v26, %v971_v24 }
  0xf5   :  { %12266 = vst [vmem:[#allocation26_spill] sm:$0xff] %v7608_v10  ;;  %vm989_vm0 = vc.u32 %v7596_v46, %v7584_v53  ;;  %v1048_v63 = vsel %vm1047_vm4, %v1046_v52, 0  ;;  %v1945_v18 = vadd.s32 127, %v1944_v8  ;;  %v7620_v28 = vand.u32 3, %v7477_v54 }
  0xf6   :  { %v991_v19 = vsel %vm989_vm0, %v990_v14, %v7585_v0  ;;  %v1050_v32 = vand.u32 31, %v1048_v63  ;;  %v1849_v58 = vsel %vm1766_vm15, %v1848_v7, %v1847_v59  ;;  %v7627_v55 = vsel %vm7590_vm1, 0, %v1955_v40 }
  0xf7   :  { %12267 = vst [vmem:[#allocation27_spill] sm:$0xff] %v7620_v28  ;;  %v7630_v27 = vand.u32 3, %v7493_v12  ;;  %v992_v41 = vadd.s32 %v991_v19, %v987_v37  ;;  %6811 = vcosq.f32 %v1748_v6  ;;  %v7633_v26 = vsel %vm6543_vm3, 0, %v6542_v42 }
  0xf8   :  { %v11913_v54 = vand.u32 2147483647, %v7431_v15  ;;  %v7636_v47 = vsub.s32 32, %v1050_v32  ;;  %6813 = vsinq.f32 %v1748_v6  ;;  %v1924_v59 = vadd.s32 %v7360_v48, %v7365_v25 }
  0xf9   :  { %12268 = vst [vmem:[#allocation28_spill] sm:$0xff] %v7630_v27  ;;  %v894_v0 = vsub.s32 0, %v7615_v23  ;;  %v993_v44 = vadd.s32 536870912, %v992_v41  ;;  %v1852_v12 = vsel %vm7481_vm2, %v7188_v2, %v1849_v58  ;;  %v1940_v31 = vsub.s32 32, %v7580_v30 }
  0xfa   :  { %v1946_v51 = vshll.u32 %v1945_v18, 23  ;;  %v1961_v42 = vadd.s32 3, %v7627_v55  ;;  %v2048_v57 = vsub.s32 4294967266, %v7633_v26  ;;  %v12269_v36 = vmov 2475754826  }
  0xfb   :  { %v7647_v21 = vshrl.u32 %v993_v44, 30  ;;  %v1054_v49 = vshrl.u32 %v12269_v36, %v7636_v47  ;;  %v1057_v48 = vshrl.u32 %v12254_v11, %v7636_v47  ;;  %v7653_v25 = vpop.eup %6809  ;;  %v1043_v60 = vand.u32 8388607, %v11913_v54 }
  0xfc   :  { %12270 = vst [vmem:[#allocation29_spill] sm:$0xff] %v7653_v25  ;;  %v1060_v8 = vshrl.u32 %v12255_v3, %v7636_v47  ;;  %v1063_v24 = vshrl.u32 %v12256_v56, %v7636_v47  ;;  %v1143_v52 = vand.u32 2139095040, %v7534_v34  ;;  %v6497_v6 = vmin.u32 %v894_v0, %v7615_v23 }
  0xfd   :  { %v7663_v7 = vshrl.u32 %v1048_v63, 5  ;;  %v1053_v40 = vshll.u32 %v12259_v39, %v1050_v32  ;;  %v1056_v14 = vshll.u32 %v12269_v36, %v1050_v32  ;;  %v1059_v37 = vshll.u32 %v12254_v11, %v1050_v32 }
  0xfe   :  { %v1062_v18 = vshll.u32 %v12255_v3, %v1050_v32  ;;  %v1065_v19 = vshll.u32 %v12256_v56, %v1050_v32  ;;  %v1066_v58 = vshrl.u32 %v12257_v4, %v7636_v47  ;;  %v7672_v44 = vand.u32 3, %v1961_v42 }
  0xff   :  { %v995_v54 = vshll.u32 %v7647_v21, 30  ;;  %v1055_v0 = vor.u32 %v1054_v49, %v1053_v40  ;;  %v1058_v63 = vor.u32 %v1057_v48, %v1056_v14  ;;  %v1061_v27 = vor.u32 %v1060_v8, %v1059_v37 }
 0x100   :  { %12271 = vst [vmem:[#allocation30_spill] sm:$0xff] %v7672_v44  ;;  %v1064_v28 = vor.u32 %v1063_v24, %v1062_v18  ;;  %v1067_v2 = vor.u32 %v1066_v58, %v1065_v19  ;;  %v1144_v1 = vshrl.u32 %v1143_v52, 23  ;;  %6815 = vcosq.f32 %v1852_v12 }
 0x101   :  { %v1941_v10 = vshll.u32 %v7498_v9, %v7580_v30  ;;  %v1942_v33 = vshrl.u32 %v1924_v59, %v1940_v31  ;;  %v896_v25 = vclz %v6497_v6  ;;  %v7677_v32 = vpop.eup %6811  ;;  %v1947_v53 = vor.u32 4788187, %v1946_v51 }
 0x102   :  { %12272 = vst [vmem:[#allocation31_spill] sm:$0xff] %v7677_v32  ;;  %v2049_v46 = vadd.s32 127, %v2048_v57  ;;  %v1044_v42 = vor.u32 8388608, %v1043_v60  ;;  %vm1068_vm15 = vcmp.lt.s32.totalorder %v7663_v7, 1  ;;  %v7680_v44 = vpop.eup %6813  ;;  %v7682_v49 = vsub.s32 %v992_v41, %v995_v54 }
 0x103   :  { %12273 = vst [vmem:[#allocation32_spill] sm:$0xff] %v7680_v44  ;;  %vm1070_vm2 = vcmp.lt.s32.totalorder %v7663_v7, 3  ;;  %vm1071_vm5 = vcmp.lt.s32.totalorder %v7663_v7, 4  ;;  %v1076_v9 = vsel %vm1068_vm15, %v1055_v0, %v1058_v63  ;;  %v1080_v59 = vsel %vm1068_vm15, %v1058_v63, %v1061_v27 }
 0x104   :  { %v1077_v30 = vsel %vm1071_vm5, %v1064_v28, 920167782  ;;  %v1081_v31 = vsel %vm1071_vm5, %v1067_v2, 1326507024  ;;  %v6508_v51 = vadd.s32 4294967169, %v1144_v1  ;;  %6817 = vsinq.f32 %v1852_v12 }
 0x105   :  { %v1943_v41 = vor.u32 %v1942_v33, %v1941_v10  ;;  %v6498_v54 = vadd.s32 4294967294, %v896_v25  ;;  %v1078_v57 = vsel %vm1070_vm2, %v1061_v27, %v1077_v30  ;;  %v1948_v48 = vand.u32 2147483647, %v1947_v53 }
 0x106   :  { %vm1069_vm6 = vcmp.lt.s32.totalorder %v7663_v7, 2  ;;  %v1082_v60 = vsel %vm1070_vm2, %v1064_v28, %v1081_v31  ;;  %v1150_v8 = vadd.s32 1, %v6508_v51  ;;  %v998_v24 = vsub.s32 0, %v7682_v49 }
 0x107   :  { %v1079_v52 = vsel %vm1069_vm6, %v1076_v9, %v1078_v57  ;;  %v1083_v1 = vsel %vm1069_vm6, %v1080_v59, %v1082_v60  ;;  %v7704_v2 = vshll.u32 %v1044_v42, 8  ;;  %v2044_v33 = vsub.s32 32, %v7633_v26 }
 0x108   :  { %v2050_v10 = vshll.u32 %v2049_v46, 23  ;;  %v11926_v53 = vand.u32 2147483647, %v7534_v34  ;;  %vm1151_vm7 = vcmp.gt.s32.totalorder %v1150_v8, 0  ;;  %vm6499_vm8 = vcmp.lt.s32.totalorder %v6498_v54, 0 }
 0x109   :  { %v1073_v28 = vsel %vm1071_vm5, %v1061_v27, 2102212464  ;;  %v7711_v12 = vmul.u32.u64.low %v7704_v2, %v1083_v1  ;;  %v7712_v25 = vmul.u32.u64.high %v7704_v2, %v1083_v1, %v7711_v12  ;;  %v1052_v6 = vshrl.u32 %v12259_v39, %v7636_v47 }
 0x10a   :  { %v7717_v40 = vmul.u32.u64.low %v7704_v2, %v1079_v52  ;;  %v7718_v14 = vmul.u32.u64.high %v7704_v2, %v1079_v52, %v7717_v40  ;;  %v1152_v46 = vsel %vm1151_vm7, %v1150_v8, 0  ;;  %v7721_v37 = vpop.eup %6815  ;;  %v1950_v18 = vcvt.s32.f32 %v1943_v41 }
 0x10b   :  { %12274 = vst [vmem:[#allocation33_spill] sm:$0xff] %v7721_v37  ;;  %v2028_v19 = vadd.s32 %v7406_v17, %v7419_v29  ;;  %6819 = vrcp.f32 %v7427_v45  ;;  %v6501_v27 = vmin.u32 %v998_v24, %v7682_v49  ;;  %v7727_v58 = vsel %vm6499_vm8, 0, %v6498_v54 }
 0x10c   :  { %v1072_v47 = vsel %vm1068_vm15, %v1052_v6, %v1055_v0  ;;  %v1074_v42 = vsel %vm1070_vm2, %v1058_v63, %v1073_v28  ;;  %v1154_v9 = vand.u32 31, %v1152_v46  ;;  %v7733_v30 = vmul.f32 %v1950_v18, %v1948_v48 }
 0x10d   :  { %v2045_v59 = vshll.u32 %v7526_v38, %v7633_v26  ;;  %v7738_v17 = vand.u32 3, %v7627_v55  ;;  %6821 = vrcp.f32 %v7431_v15  ;;  %v2046_v29 = vshrl.u32 %v2028_v19, %v2044_v33 }
 0x10e   :  { %v7741_v31 = vor.u32 4788187, %v2050_v10  ;;  %v1147_v0 = vand.u32 8388607, %v11926_v53  ;;  %v1155_v51 = vsub.s32 32, %v1154_v9  ;;  %v7745_v41 = vpop.eup %6817  ;;  %v904_v63 = vsub.s32 4294967266, %v7727_v58 }
 0x10f   :  { %12275 = vst [vmem:[#allocation34_spill] sm:$0xff] %v7738_v17  ;;  %12276 = vst [vmem:[#allocation35_spill] sm:$0xff] %v7745_v41  ;;  %v1000_v54 = vclz %v6501_v27  ;;  %v1075_v38 = vsel %vm1069_vm6, %v1072_v47, %v1074_v42  ;;  %v7750_v26 = vshrl.u32 %v1152_v46, 5  ;;  %v1157_v55 = vshll.u32 %v12259_v39, %v1154_v9 }
 0x110   :  { %v1158_v57 = vshrl.u32 %v12269_v36, %v1155_v51  ;;  %v1160_v48 = vshll.u32 %v12269_v36, %v1154_v9  ;;  %v1161_v60 = vshrl.u32 %v12254_v11, %v1155_v51  ;;  %v1163_v8 = vshll.u32 %v12254_v11, %v1154_v9 }
 0x111   :  { %v1164_v24 = vshrl.u32 %v12255_v3, %v1155_v51  ;;  %v1166_v52 = vshll.u32 %v12255_v3, %v1154_v9  ;;  %v1167_v1 = vshrl.u32 %v12256_v56, %v1155_v51  ;;  %vm1093_vm9 = vc.u32 %v7712_v25, %v7717_v40 }
 0x112   :  { %v1094_v7 = vadd.s32 1, %v7718_v14  ;;  %v1159_v33 = vor.u32 %v1158_v57, %v1157_v55  ;;  %v1162_v10 = vor.u32 %v1161_v60, %v1160_v48  ;;  %v1169_v6 = vshll.u32 %v12256_v56, %v1154_v9 }
 0x113   :  { %v1165_v28 = vor.u32 %v1164_v24, %v1163_v8  ;;  %v1168_v12 = vor.u32 %v1167_v1, %v1166_v52  ;;  %v1170_v46 = vshrl.u32 %v12257_v4, %v1155_v51  ;;  %v2047_v18 = vor.u32 %v2046_v29, %v2045_v59 }
 0x114   :  { %v2058_v19 = vsub.s32 4, %v7502_v50  ;;  %v884_v27 = vadd.s32 %v7519_v20, %v7529_v35  ;;  %v1148_v47 = vor.u32 8388608, %v1147_v0  ;;  %vm1974_vm11 = vcmp.lt.s32.totalorder %v7297_v13, 0 }
 0x115   :  { %v7768_v42 = vpop.eup %6819  ;;  %v2052_v55 = vand.u32 2147483647, %v7741_v31  ;;  %v905_v57 = vadd.s32 127, %v904_v63  ;;  %v1091_v48 = vmul.u32 %v7704_v2, %v1075_v38  ;;  %v1171_v60 = vor.u32 %v1170_v46, %v1169_v6 }
 0x116   :  { %12277 = vst [vmem:[#allocation36_spill] sm:$0xff] %v7768_v42  ;;  %v6502_v9 = vadd.s32 4294967294, %v1000_v54  ;;  %v1095_v59 = vsel %vm1093_vm9, %v1094_v7, %v7718_v14  ;;  %vm1172_vm12 = vcmp.lt.s32.totalorder %v7750_v26, 1  ;;  %vm1175_vm13 = vcmp.lt.s32.totalorder %v7750_v26, 4  ;;  %v7789_v54 = vpop.permute.xlu1 %134 }
 0x117   :  { %v7779_v20 = vpop.eup %6821  ;;  %vm1174_vm14 = vcmp.lt.s32.totalorder %v7750_v26, 3  ;;  %v1180_v35 = vsel %vm1172_vm12, %v1159_v33, %v1162_v10  ;;  %v1181_v29 = vsel %vm1175_vm13, %v1168_v12, 920167782  ;;  %v1184_v2 = vsel %vm1172_vm12, %v1162_v10, %v1165_v28 }
 0x118   :  { %12278 = vst [vmem:[#allocation37_spill] sm:$0xff] %v7779_v20  ;;  %v900_v31 = vsub.s32 32, %v7727_v58  ;;  %v1182_v14 = vsel %vm1174_vm14, %v1165_v28, %v1181_v29  ;;  %v1185_v0 = vsel %vm1175_vm13, %v1171_v60, 1326507024  ;;  %v1188_v63 = vshll.u32 %v1148_v47, 8 }
 0x119   :  { %v12279_v38 = vand.u32 2147483647, %v7297_v13  ;;  %v7797_v24 = vadd.s32 %v1095_v59, %v1091_v48  ;;  %vm1173_vm4 = vcmp.lt.s32.totalorder %v7750_v26, 2  ;;  %v1177_v52 = vsel %vm1175_vm13, %v1165_v28, 2102212464 }
 0x11a   :  { %v1186_v1 = vsel %vm1174_vm14, %v1168_v12, %v1185_v0  ;;  %vm6503_vm0 = vcmp.lt.s32.totalorder %v6502_v9, 0  ;;  %v1156_v7 = vshrl.u32 %v12259_v39, %v1155_v51  ;;  %v1183_v6 = vsel %vm1173_vm4, %v1180_v35, %v1182_v14 }
 0x11b   :  { %vm7793_vm3 = vcmp.le.f32.partialorder %v12279_v38, 0.7853982  ;;  %v1187_v46 = vsel %vm1173_vm4, %v1184_v2, %v1186_v1  ;;  %vm830_vm15 = vcmp.lt.s32.totalorder %v7400_v22, 0  ;;  %v906_v47 = vshll.u32 %v905_v57, 23 }
 0x11c   :  { %v7808_v48 = vmul.u32.u64.low %v1188_v63, %v1187_v46  ;;  %v7809_v60 = vmul.u32.u64.high %v1188_v63, %v1187_v46, %v7808_v48  ;;  %v7813_v28 = vmul.f32 %v7789_v54, %v7170_v61  ;;  %v2054_v12 = vcvt.s32.f32 %v2047_v18 }
 0x11d   :  { %v902_v59 = vshrl.u32 %v884_v27, %v900_v31  ;;  %v1176_v51 = vsel %vm1172_vm12, %v1156_v7, %v1159_v33  ;;  %v1178_v35 = vsel %vm1174_vm14, %v1162_v10, %v1177_v52  ;;  %v7819_v29 = vsel %vm6503_vm0, 0, %v6502_v9 }
 0x11e   :  { %12282 = vst [vmem:[#allocation38_spill] sm:$0xff] %v7813_v28  ;;  %v1097_v2 = vadd.s32 536870912, %v7797_v24  ;;  %v7822_v57 = vmul.u32.u64.low %v1188_v63, %v1183_v6  ;;  %v7823_v14 = vmul.u32.u64.high %v1188_v63, %v1183_v6, %v7822_v57  ;;  %v1952_v0 = vxor.u32 2147483648, %v7733_v30 }
 0x11f   :  { %v2055_v38 = vmul.f32 %v2054_v12, %v2052_v55  ;;  %v2059_v18 = vsel %vm1974_vm11, %v2058_v19, %v7502_v50  ;;  %6823 = vrcp.f32 %v7534_v34  ;;  %v12283_v33 = vand.u32 2147483647, %v7400_v22 }
 0x120   :  { %v901_v27 = vshll.u32 %v7615_v23, %v7727_v58  ;;  %v907_v9 = vor.u32 4788187, %v906_v47  ;;  %v1179_v31 = vsel %vm1173_vm4, %v1176_v51, %v1178_v35  ;;  %v2079_v55 = vand.u32 2139095040, %v7813_v28 }
 0x121   :  { %vm7833_vm2 = vcmp.le.f32.partialorder %v12283_v33, 0.7853982  ;;  %v914_v52 = vsub.s32 4, %v7575_v16  ;;  %vm934_vm5 = vcmp.lt.s32.totalorder %v7427_v45, 0  ;;  %v1008_v50 = vsub.s32 4294967266, %v7819_v29 }
 0x122   :  { %vm1197_vm6 = vc.u32 %v7809_v60, %v7822_v57  ;;  %v903_v19 = vor.u32 %v902_v59, %v901_v27  ;;  %v7847_v1 = vshrl.u32 %v1097_v2, 30  ;;  %v1198_v23 = vadd.s32 1, %v7823_v14 }
 0x123   :  { %v2080_v58 = vshrl.u32 %v2079_v55, 23  ;;  %v1953_v26 = vsel %vm1870_vm10, %v1952_v0, %v7733_v30  ;;  %v2056_v7 = vxor.u32 2147483648, %v2055_v38  ;;  %v2061_v6 = vsel %vm7793_vm3, 0, %v2059_v18 }
 0x124   :  { %v12286_v46 = vand.u32 2147483647, %v7427_v45  ;;  %v1195_v48 = vmul.u32 %v1188_v63, %v1179_v31  ;;  %v908_v12 = vand.u32 2147483647, %v907_v9  ;;  %v1018_v59 = vsub.s32 4, %v7647_v21 }
 0x125   :  { %v1199_v51 = vsel %vm1197_vm6, %v1198_v23, %v7823_v14  ;;  %v6544_v35 = vadd.s32 4294967169, %v2080_v58  ;;  %v915_v30 = vsel %vm830_vm15, %v914_v52, %v7575_v16  ;;  %v1009_v2 = vadd.s32 127, %v1008_v50 }
 0x126   :  { %vm7857_vm7 = vcmp.le.f32.partialorder %v12286_v46, 0.7853982  ;;  %v1200_v0 = vadd.s32 %v1199_v51, %v1195_v48  ;;  %v7868_v18 = vmul.f32 %v7789_v54, %v7174_v62  ;;  %v2065_v33 = vadd.s32 3, %v2061_v6 }
 0x127   :  { %v910_v27 = vcvt.s32.f32 %v903_v19  ;;  %v1099_v63 = vshll.u32 %v7847_v1, 30  ;;  %v2086_v9 = vadd.s32 1, %v6544_v35  ;;  %v1956_v14 = vsel %vm7590_vm1, %v7194_v5, %v1953_v26 }
 0x128   :  { %12289 = vst [vmem:[#allocation39_spill] sm:$0xff] %v7868_v18  ;;  %v2057_v31 = vsel %vm1974_vm11, %v2056_v7, %v2055_v38  ;;  %v7876_v55 = vand.u32 3, %v2061_v6  ;;  %v1201_v16 = vadd.s32 536870912, %v1200_v0  ;;  %v7880_v50 = vsel %vm7833_vm2, 0, %v915_v30 }
 0x129   :  { %v911_v52 = vmul.f32 %v910_v27, %v908_v12  ;;  %v1019_v19 = vsel %vm934_vm5, %v1018_v59, %v7647_v21  ;;  %vm2087_vm10 = vcmp.gt.s32.totalorder %v2086_v9, 0  ;;  %v7885_v23 = vpop.eup %6823  ;;  %v1004_v43 = vsub.s32 32, %v7819_v29  ;;  %v12293_v21 = vld [vmem:[#allocation24_spill] sm:$0xff]  ;;  %v12294_v12 = vld [vmem:[#allocation23_spill] sm:$0xff] }
 0x12a   :  { %12290 = vst [vmem:[#allocation40_spill] sm:$0xff] %v7876_v55  ;;  %12291 = vst [vmem:[#allocation41_spill] sm:$0xff] %v7885_v23  ;;  %v1010_v58 = vshll.u32 %v1009_v2, 23  ;;  %v2088_v26 = vsel %vm2087_vm10, %v2086_v9, 0  ;;  %v2183_v38 = vand.u32 2139095040, %v7868_v18  ;;  %6825 = vcosq.f32 %v1956_v14 }
 0x12b   :  { %v7890_v7 = vsub.s32 %v7797_v24, %v1099_v63  ;;  %v11927_v6 = vand.u32 2147483647, %v7813_v28  ;;  %v2090_v46 = vand.u32 31, %v2088_v26  ;;  %6827 = vsinq.f32 %v1956_v14 }
 0x12c   :  { %v7893_v48 = vand.u32 3, %v2065_v33  ;;  %v988_v59 = vadd.s32 %v12294_v12, %v12293_v21  ;;  %v7897_v51 = vshrl.u32 %v1201_v16, 30  ;;  %v7902_v35 = vsel %vm7793_vm3, %v7297_v13, %v2057_v31 }
 0x12d   :  { %v7905_v30 = vadd.s32 3, %v7880_v50  ;;  %v7909_v24 = vsel %vm7857_vm7, 0, %v1019_v19  ;;  %v2091_v2 = vsub.s32 32, %v2090_v46  ;;  %v912_v33 = vxor.u32 2147483648, %v911_v52 }
 0x12e   :  { %12292 = vst [vmem:[#allocation42_spill] sm:$0xff] %v7893_v48  ;;  %v1006_v27 = vshrl.u32 %v988_v59, %v1004_v43  ;;  %v1011_v63 = vor.u32 4788187, %v1010_v58  ;;  %v2184_v9 = vshrl.u32 %v2183_v38, 23  ;;  %v1102_v14 = vsub.s32 0, %v7890_v7 }
 0x12f   :  { %v2083_v16 = vand.u32 8388607, %v11927_v6  ;;  %v2094_v8 = vshrl.u32 %v12269_v36, %v2091_v2  ;;  %v2097_v31 = vshrl.u32 %v12254_v11, %v2091_v2  ;;  %v1203_v21 = vshll.u32 %v7897_v51, 30 }
 0x130   :  { %v2089_v12 = vshrl.u32 %v2088_v26, 5  ;;  %v2093_v19 = vshll.u32 %v12259_v39, %v2090_v46  ;;  %v2096_v53 = vshll.u32 %v12269_v36, %v2090_v46  ;;  %v2099_v43 = vshll.u32 %v12254_v11, %v2090_v46 }
 0x131   :  { %v2100_v58 = vshrl.u32 %v12255_v3, %v2091_v2  ;;  %v2102_v38 = vshll.u32 %v12255_v3, %v2090_v46  ;;  %v2103_v59 = vshrl.u32 %v12256_v56, %v2091_v2  ;;  %v1005_v6 = vshll.u32 %v7682_v49, %v7819_v29 }
 0x132   :  { %v2095_v55 = vor.u32 %v2094_v8, %v2093_v19  ;;  %v2098_v17 = vor.u32 %v2097_v31, %v2096_v53  ;;  %v6548_v13 = vadd.s32 4294967169, %v2184_v9  ;;  %v2105_v48 = vshll.u32 %v12256_v56, %v2090_v46 }
 0x133   :  { %v2101_v5 = vor.u32 %v2100_v58, %v2099_v43  ;;  %v2104_v26 = vor.u32 %v2103_v59, %v2102_v38  ;;  %v2106_v37 = vshrl.u32 %v12257_v4, %v2091_v2  ;;  %v913_v41 = vsel %vm830_vm15, %v912_v33, %v911_v52 }
 0x134   :  { %v1007_v32 = vor.u32 %v1006_v27, %v1005_v6  ;;  %v1012_v44 = vand.u32 2147483647, %v1011_v63  ;;  %v6505_v23 = vmin.u32 %v1102_v14, %v7890_v7  ;;  %v7930_v20 = vpop.eup %6825  ;;  %v7932_v42 = vsub.s32 %v1200_v0, %v1203_v21 }
 0x135   :  { %12295 = vst [vmem:[#allocation24_spill] sm:$0xff] %v7930_v20  ;;  %v2084_v49 = vor.u32 8388608, %v2083_v16  ;;  %v2107_v53 = vor.u32 %v2106_v37, %v2105_v48  ;;  %vm2108_vm1 = vcmp.lt.s32.totalorder %v2089_v12, 1  ;;  %v7934_v29 = vpop.eup %6827  ;;  %vm2111_vm8 = vcmp.lt.s32.totalorder %v2089_v12, 4 }
 0x136   :  { %12296 = vst [vmem:[#allocation23_spill] sm:$0xff] %v7934_v29  ;;  %v2116_v46 = vsel %vm2108_vm1, %v2095_v55, %v2098_v17  ;;  %v11942_v9 = vand.u32 2147483647, %v7868_v18  ;;  %v2190_v8 = vadd.s32 1, %v6548_v13  ;;  %vm2110_vm9 = vcmp.lt.s32.totalorder %v2089_v12, 3 }
 0x137   :  { %v2113_v52 = vsel %vm2111_vm8, %v2101_v5, 2102212464  ;;  %v2117_v6 = vsel %vm2111_vm8, %v2104_v26, 920167782  ;;  %v2120_v33 = vsel %vm2108_vm1, %v2098_v17, %v2101_v5  ;;  %v2092_v27 = vshrl.u32 %v12259_v39, %v2091_v2 }
 0x138   :  { %vm2109_vm11 = vcmp.lt.s32.totalorder %v2089_v12, 2  ;;  %v2118_v0 = vsel %vm2110_vm9, %v2101_v5, %v2117_v6  ;;  %v2121_v63 = vsel %vm2111_vm8, %v2107_v53, 1326507024  ;;  %v1206_v37 = vsub.s32 0, %v7932_v42  ;;  %v12298_v53 = vld [vmem:[#allocation8_spill] sm:$0xff] }
 0x139   :  { %v2119_v48 = vsel %vm2109_vm11, %v2116_v46, %v2118_v0  ;;  %v2122_v14 = vsel %vm2110_vm9, %v2104_v26, %v2121_v63  ;;  %v2124_v16 = vshll.u32 %v2084_v49, 8  ;;  %v1014_v31 = vcvt.s32.f32 %v1007_v32 }
 0x13a   :  { %v2112_v21 = vsel %vm2108_vm1, %v2092_v27, %v2095_v55  ;;  %v2114_v13 = vsel %vm2110_vm9, %v2098_v17, %v2113_v52  ;;  %v2123_v19 = vsel %vm2109_vm11, %v2120_v33, %v2122_v14  ;;  %v916_v5 = vsel %vm7833_vm2, %v7400_v22, %v913_v41 }
 0x13b   :  { %v7944_v43 = vmul.u32.u64.low %v2124_v16, %v2123_v19  ;;  %v7945_v58 = vmul.u32.u64.high %v2124_v16, %v2123_v19, %v7944_v43  ;;  %v7947_v38 = vmul.u32.u64.low %v2124_v16, %v2119_v48  ;;  %v7948_v2 = vmul.u32.u64.high %v2124_v16, %v2119_v48, %v7947_v38 }
 0x13c   :  { %v1015_v59 = vmul.f32 %v1014_v31, %v1012_v44  ;;  %v1104_v26 = vclz %v6505_v23  ;;  %vm2191_vm12 = vcmp.gt.s32.totalorder %v2190_v8, 0  ;;  %6829 = vcosq.f32 %v7902_v35 }
 0x13d   :  { %v6509_v32 = vmin.u32 %v1206_v37, %v7932_v42  ;;  %v2187_v17 = vand.u32 8388607, %v11942_v9  ;;  %v2192_v55 = vsel %vm2191_vm12, %v2190_v8, 0  ;;  %6831 = vsinq.f32 %v7902_v35 }
 0x13e   :  { %v7960_v49 = vand.u32 3, %v7905_v30  ;;  %vm1038_vm13 = vcmp.lt.s32.totalorder %v7431_v15, 0  ;;  %v2115_v41 = vsel %vm2109_vm11, %v2112_v21, %v2114_v13  ;;  %v2194_v44 = vand.u32 31, %v2192_v55 }
 0x13f   :  { %6833 = vcosq.f32 %v916_v5  ;;  %v1025_v10 = vadd.s32 3, %v7909_v24  ;;  %v1122_v23 = vsub.s32 4, %v7847_v1  ;;  %v7968_v46 = vmul.f32 %v7789_v54, %v12298_v53 }
 0x140   :  { %12297 = vst [vmem:[#allocation43_spill] sm:$0xff] %v7960_v49  ;;  %v1016_v8 = vxor.u32 2147483648, %v1015_v59  ;;  %v6506_v52 = vadd.s32 4294967294, %v1104_v26  ;;  %v2134_v35 = vadd.s32 1, %v7948_v2  ;;  %v2195_v30 = vsub.s32 32, %v2194_v44 }
 0x141   :  { %12299 = vst [vmem:[#allocation44_spill] sm:$0xff] %v7968_v46  ;;  %v1208_v6 = vclz %v6509_v32  ;;  %v2131_v33 = vmul.u32 %v2124_v16, %v2115_v41  ;;  %vm2133_vm14 = vc.u32 %v7945_v58, %v7947_v38  ;;  %v2188_v12 = vor.u32 8388608, %v2187_v17 }
 0x142   :  { %v2197_v27 = vshll.u32 %v12259_v39, %v2194_v44  ;;  %v2198_v0 = vshrl.u32 %v12269_v36, %v2195_v30  ;;  %v2200_v63 = vshll.u32 %v12269_v36, %v2194_v44  ;;  %v2203_v37 = vshll.u32 %v12254_v11, %v2194_v44 }
 0x143   :  { %v2201_v48 = vshrl.u32 %v12254_v11, %v2195_v30  ;;  %v2204_v14 = vshrl.u32 %v12255_v3, %v2195_v30  ;;  %v2206_v31 = vshll.u32 %v12255_v3, %v2194_v44  ;;  %v2207_v16 = vshrl.u32 %v12256_v56, %v2195_v30 }
 0x144   :  { %v2135_v21 = vsel %vm2133_vm14, %v2134_v35, %v7948_v2  ;;  %v2193_v13 = vshrl.u32 %v2192_v55, 5  ;;  %v2209_v19 = vshll.u32 %v12256_v56, %v2194_v44  ;;  %v2210_v43 = vshrl.u32 %v12257_v4, %v2195_v30 }
 0x145   :  { %v12300_v26 = vand.u32 2147483647, %v7431_v15  ;;  %v2199_v17 = vor.u32 %v2198_v0, %v2197_v27  ;;  %v2202_v41 = vor.u32 %v2201_v48, %v2200_v63  ;;  %v2205_v9 = vor.u32 %v2204_v14, %v2203_v37 }
 0x146   :  { %v2208_v20 = vor.u32 %v2207_v16, %v2206_v31  ;;  %6835 = vsinq.f32 %v916_v5  ;;  %v7990_v29 = vand.u32 3, %v1025_v10  ;;  %v7993_v2 = vand.u32 3, %v7880_v50  ;;  %v7996_v44 = vpop.eup %6829 }
 0x147   :  { %vm7986_vm3 = vcmp.le.f32.partialorder %v12300_v26, 0.7853982  ;;  %v2287_v55 = vand.u32 2139095040, %v7968_v46  ;;  %12305 = vst [vmem:[#allocation47_spill] sm:$0xff] %v7996_v44  ;;  %v1017_v35 = vsel %vm934_vm5, %v1016_v8, %v1015_v59  ;;  %v1123_v27 = vsel %vm1038_vm13, %v1122_v23, %v7847_v1  ;;  %v8005_v5 = vpop.eup %6831 }
 0x148   :  { %12303 = vst [vmem:[#allocation45_spill] sm:$0xff] %v7990_v29  ;;  %12304 = vst [vmem:[#allocation46_spill] sm:$0xff] %v7993_v2  ;;  %v8003_v0 = vadd.s32 %v2135_v21, %v2131_v33  ;;  %v2211_v63 = vor.u32 %v2210_v43, %v2209_v19  ;;  %vm6507_vm4 = vcmp.lt.s32.totalorder %v6506_v52, 0  ;;  %vm2212_vm0 = vcmp.lt.s32.totalorder %v2193_v13, 1 }
 0x149   :  { %12306 = vst [vmem:[#allocation48_spill] sm:$0xff] %v8005_v5  ;;  %vm2215_vm15 = vcmp.lt.s32.totalorder %v2193_v13, 4  ;;  %v2228_v50 = vshll.u32 %v2188_v12, 8  ;;  %v8007_v10 = vpop.eup %6833  ;;  %v6510_v37 = vadd.s32 4294967294, %v1208_v6  ;;  %v2220_v14 = vsel %vm2212_vm0, %v2199_v17, %v2202_v41 }
 0x14a   :  { %12307 = vst [vmem:[#allocation49_spill] sm:$0xff] %v8007_v10  ;;  %v2217_v48 = vsel %vm2215_vm15, %v2205_v9, 2102212464  ;;  %v2221_v59 = vsel %vm2215_vm15, %v2208_v20, 920167782  ;;  %v2196_v8 = vshrl.u32 %v12259_v39, %v2195_v30  ;;  %vm2214_vm2 = vcmp.lt.s32.totalorder %v2193_v13, 3 }
 0x14b   :  { %v2224_v1 = vsel %vm2212_vm0, %v2202_v41, %v2205_v9  ;;  %v2288_v23 = vshrl.u32 %v2287_v55, 23  ;;  %v2137_v33 = vadd.s32 536870912, %v8003_v0  ;;  %vm2213_vm5 = vcmp.lt.s32.totalorder %v2193_v13, 2 }
 0x14c   :  { %v2222_v31 = vsel %vm2214_vm2, %v2205_v9, %v2221_v59  ;;  %v2225_v16 = vsel %vm2215_vm15, %v2211_v63, 1326507024  ;;  %v2216_v12 = vsel %vm2212_vm0, %v2196_v8, %v2199_v17  ;;  %v2218_v21 = vsel %vm2214_vm2, %v2202_v41, %v2217_v48 }
 0x14d   :  { %v2223_v19 = vsel %vm2213_vm5, %v2220_v14, %v2222_v31  ;;  %v2226_v6 = vsel %vm2214_vm2, %v2208_v20, %v2225_v16  ;;  %v8015_v43 = vsel %vm6507_vm4, 0, %v6506_v52  ;;  %v1020_v55 = vsel %vm7857_vm7, %v7427_v45, %v1017_v35  ;;  %v12310_v35 = vld [vmem:[#allocation13_spill] sm:$0xff] }
 0x14e   :  { %v2227_v26 = vsel %vm2213_vm5, %v2224_v1, %v2226_v6  ;;  %v8017_v44 = vmul.u32.u64.low %v2228_v50, %v2223_v19  ;;  %v8018_v30 = vmul.u32.u64.high %v2228_v50, %v2223_v19, %v8017_v44  ;;  %v1125_v9 = vsel %vm7986_vm3, 0, %v1123_v27 }
 0x14f   :  { %v8026_v13 = vmul.u32.u64.low %v2228_v50, %v2227_v26  ;;  %v8027_v17 = vmul.u32.u64.high %v2228_v50, %v2227_v26, %v8026_v13  ;;  %vm6511_vm6 = vcmp.lt.s32.totalorder %v6510_v37, 0  ;;  %v8029_v20 = vshrl.u32 %v2137_v33, 30 }
 0x150   :  { %v2219_v52 = vsel %vm2213_vm5, %v2216_v12, %v2218_v21  ;;  %v6552_v41 = vadd.s32 4294967169, %v2288_v23  ;;  %v8031_v63 = vpop.eup %6835  ;;  %v1092_v48 = vadd.s32 %v7717_v40, %v7712_v25  ;;  %v1112_v14 = vsub.s32 4294967266, %v8015_v43 }
 0x151   :  { %12308 = vst [vmem:[#allocation50_spill] sm:$0xff] %v8031_v63  ;;  %v8037_v47 = vand.u32 3, %v7909_v24  ;;  %v8041_v27 = vmul.f32 %v7789_v54, %v12310_v35  ;;  %6837 = vcosq.f32 %v1020_v55  ;;  %v1129_v59 = vadd.s32 3, %v1125_v9 }
 0x152   :  { %v2238_v8 = vadd.s32 1, %v8018_v30  ;;  %v2294_v1 = vadd.s32 1, %v6552_v41  ;;  %6839 = vsinq.f32 %v1020_v55  ;;  %v8045_v23 = vsel %vm6511_vm6, 0, %v6510_v37 }
 0x153   :  { %12309 = vst [vmem:[#allocation51_spill] sm:$0xff] %v8037_v47  ;;  %12311 = vst [vmem:[#allocation13_spill] sm:$0xff] %v8041_v27  ;;  %v2235_v33 = vmul.u32 %v2228_v50, %v2219_v52  ;;  %vm2237_vm7 = vc.u32 %v8027_v17, %v8017_v44  ;;  %v1108_v25 = vsub.s32 32, %v8015_v43  ;;  %v2139_v40 = vshll.u32 %v8029_v20, 30 }
 0x154   :  { %v2239_v54 = vsel %vm2237_vm7, %v2238_v8, %v8018_v30  ;;  %vm2295_vm10 = vcmp.gt.s32.totalorder %v2294_v1, 0  ;;  %v1113_v24 = vadd.s32 127, %v1112_v14  ;;  %v2391_v12 = vand.u32 2139095040, %v8041_v27 }
 0x155   :  { %v2240_v31 = vadd.s32 %v2239_v54, %v2235_v33  ;;  %v2296_v16 = vsel %vm2295_vm10, %v2294_v1, 0  ;;  %v8053_v21 = vand.u32 3, %v1129_v59  ;;  %v1216_v37 = vsub.s32 4294967266, %v8045_v23 }
 0x156   :  { %6841 = vrcp.f32 %v7813_v28  ;;  %v2298_v50 = vand.u32 31, %v2296_v16  ;;  %v8057_v19 = vand.u32 3, %v1125_v9  ;;  %v11946_v26 = vand.u32 2147483647, %v7968_v46 }
 0x157   :  { %12312 = vst [vmem:[#allocation52_spill] sm:$0xff] %v8053_v21  ;;  %6843 = vrcp.f32 %v7868_v18  ;;  %v2241_v6 = vadd.s32 536870912, %v2240_v31  ;;  %v8063_v30 = vadd.s32 %v7822_v57, %v7809_v60  ;;  %v8067_v55 = vsub.s32 %v8003_v0, %v2139_v40 }
 0x158   :  { %12313 = vst [vmem:[#allocation53_spill] sm:$0xff] %v8057_v19  ;;  %6845 = vrcp.f32 %v7968_v46  ;;  %v2299_v13 = vsub.s32 32, %v2298_v50  ;;  %v1109_v52 = vshll.u32 %v7890_v7, %v8015_v43  ;;  %v1110_v9 = vshrl.u32 %v1092_v48, %v1108_v25 }
 0x159   :  { %v1114_v41 = vshll.u32 %v1113_v24, 23  ;;  %v2392_v14 = vshrl.u32 %v2391_v12, 23  ;;  %v8071_v59 = vadd.s32 127, %v1216_v37  ;;  %v8076_v57 = vshrl.u32 %v2241_v6, 30 }
 0x15a   :  { %v2302_v8 = vshrl.u32 %v12269_v36, %v2299_v13  ;;  %v2305_v1 = vshrl.u32 %v12254_v11, %v2299_v13  ;;  %v2308_v60 = vshrl.u32 %v12255_v3, %v2299_v13  ;;  %v2291_v0 = vand.u32 8388607, %v11946_v26 }
 0x15b   :  { %v2301_v33 = vshll.u32 %v12259_v39, %v2298_v50  ;;  %v2304_v7 = vshll.u32 %v12269_v36, %v2298_v50  ;;  %v8082_v43 = vpop.eup %6837  ;;  %v2142_v48 = vsub.s32 0, %v8067_v55  ;;  %v2307_v25 = vshll.u32 %v12254_v11, %v2298_v50 }
 0x15c   :  { %12314 = vst [vmem:[#allocation54_spill] sm:$0xff] %v8082_v43  ;;  %v2310_v40 = vshll.u32 %v12255_v3, %v2298_v50  ;;  %v2311_v54 = vshrl.u32 %v12256_v56, %v2299_v13  ;;  %v8088_v24 = vpop.eup %6839  ;;  %v2297_v12 = vshrl.u32 %v2296_v16, 5  ;;  %v6556_v26 = vadd.s32 4294967169, %v2392_v14 }
 0x15d   :  { %12315 = vst [vmem:[#allocation55_spill] sm:$0xff] %v8088_v24  ;;  %v2303_v37 = vor.u32 %v2302_v8, %v2301_v33  ;;  %v2306_v6 = vor.u32 %v2305_v1, %v2304_v7  ;;  %v2309_v5 = vor.u32 %v2308_v60, %v2307_v25  ;;  %v2313_v47 = vshll.u32 %v12256_v56, %v2298_v50 }
 0x15e   :  { %v2312_v19 = vor.u32 %v2311_v54, %v2310_v40  ;;  %v2314_v2 = vshrl.u32 %v12257_v4, %v2299_v13  ;;  %v1115_v45 = vor.u32 4788187, %v1114_v41  ;;  %vm1142_vm1 = vcmp.lt.s32.totalorder %v7534_v34, 0 }
 0x15f   :  { %v1212_v22 = vsub.s32 32, %v8045_v23  ;;  %v1226_v21 = vsub.s32 4, %v7897_v51  ;;  %v2243_v29 = vshll.u32 %v8076_v57, 30  ;;  %v1218_v16 = vshll.u32 %v8071_v59, 23 }
 0x160   :  { %v8096_v49 = vpop.eup %6841  ;;  %v6545_v14 = vmin.u32 %v2142_v48, %v8067_v55  ;;  %v2292_v8 = vor.u32 8388608, %v2291_v0  ;;  %v2315_v1 = vor.u32 %v2314_v2, %v2313_v47  ;;  %v2300_v41 = vshrl.u32 %v12259_v39, %v2299_v13 }
 0x161   :  { %12316 = vst [vmem:[#allocation56_spill] sm:$0xff] %v8096_v49  ;;  %v8100_v50 = vpop.eup %6843  ;;  %vm2316_vm8 = vcmp.lt.s32.totalorder %v2297_v12, 1  ;;  %vm2319_vm9 = vcmp.lt.s32.totalorder %v2297_v12, 4  ;;  %v2398_v60 = vadd.s32 1, %v6556_v26  ;;  %v12319_v7 = vand.u32 2147483647, %v7534_v34 }
 0x162   :  { %12317 = vst [vmem:[#allocation57_spill] sm:$0xff] %v8100_v50  ;;  %v8103_v33 = vpop.eup %6845  ;;  %vm2318_vm12 = vcmp.lt.s32.totalorder %v2297_v12, 3  ;;  %v2321_v59 = vsel %vm2319_vm9, %v2309_v5, 2102212464  ;;  %v2324_v0 = vsel %vm2316_vm8, %v2303_v37, %v2306_v6  ;;  %v2325_v2 = vsel %vm2319_vm9, %v2312_v19, 920167782 }
 0x163   :  { %12318 = vst [vmem:[#allocation58_spill] sm:$0xff] %v8103_v33  ;;  %vm8107_vm11 = vcmp.le.f32.partialorder %v12319_v7, 0.7853982  ;;  %v8112_v47 = vsub.s32 %v2240_v31, %v2243_v29  ;;  %vm2317_vm14 = vcmp.lt.s32.totalorder %v2297_v12, 2  ;;  %v2326_v13 = vsel %vm2318_vm12, %v2309_v5, %v2325_v2 }
 0x164   :  { %v2328_v48 = vsel %vm2316_vm8, %v2306_v6, %v2309_v5  ;;  %v2144_v26 = vclz %v6545_v14  ;;  %v2327_v40 = vsel %vm2317_vm14, %v2324_v0, %v2326_v13  ;;  %v2329_v54 = vsel %vm2319_vm9, %v2315_v1, 1326507024 }
 0x165   :  { %v2332_v33 = vshll.u32 %v2292_v8, 8  ;;  %v2320_v7 = vsel %vm2316_vm8, %v2300_v41, %v2303_v37  ;;  %v2322_v50 = vsel %vm2318_vm12, %v2306_v6, %v2321_v59  ;;  %v2330_v49 = vsel %vm2318_vm12, %v2312_v19, %v2329_v54 }
 0x166   :  { %vm2399_vm4 = vcmp.gt.s32.totalorder %v2398_v60, 0  ;;  %v1111_v43 = vor.u32 %v1110_v9, %v1109_v52  ;;  %v2331_v24 = vsel %vm2317_vm14, %v2328_v48, %v2330_v49  ;;  %v1116_v31 = vand.u32 2147483647, %v1115_v45 }
 0x167   :  { %v8118_v10 = vmul.u32.u64.low %v2332_v33, %v2327_v40  ;;  %v8119_v29 = vmul.u32.u64.high %v2332_v33, %v2327_v40, %v8118_v10  ;;  %v2246_v5 = vsub.s32 0, %v8112_v47  ;;  %v1214_v8 = vshrl.u32 %v8063_v30, %v1212_v22 }
 0x168   :  { %v8123_v14 = vmul.u32.u64.low %v2332_v33, %v2331_v24  ;;  %v8124_v2 = vmul.u32.u64.high %v2332_v33, %v2331_v24, %v8123_v14  ;;  %v1227_v19 = vsel %vm1142_vm1, %v1226_v21, %v7897_v51  ;;  %v2323_v52 = vsel %vm2317_vm14, %v2320_v7, %v2322_v50 }
 0x169   :  { %v2400_v9 = vsel %vm2399_vm4, %v2398_v60, 0  ;;  %v1219_v49 = vor.u32 4788187, %v1218_v16  ;;  %6847 = vrcp.f32 %v8041_v27  ;;  %v6546_v37 = vadd.s32 4294967294, %v2144_v26 }
 0x16a   :  { %v11964_v45 = vand.u32 2147483647, %v8041_v27  ;;  %v1118_v6 = vcvt.s32.f32 %v1111_v43  ;;  %v1213_v24 = vshll.u32 %v7932_v42, %v8045_v23  ;;  %v2342_v1 = vadd.s32 1, %v8119_v29 }
 0x16b   :  { %v2402_v22 = vand.u32 31, %v2400_v9  ;;  %v8138_v30 = vsel %vm8107_vm11, 0, %v1227_v19  ;;  %v6549_v51 = vmin.u32 %v2246_v5, %v8112_v47  ;;  %v2339_v21 = vmul.u32 %v2332_v33, %v2323_v52 }
 0x16c   :  { %vm2341_vm0 = vc.u32 %v8124_v2, %v8118_v10  ;;  %v8143_v12 = vmul.f32 %v1118_v6, %v1116_v31  ;;  %v1215_v16 = vor.u32 %v1214_v8, %v1213_v24  ;;  %v1220_v42 = vand.u32 2147483647, %v1219_v49  ;;  %v8163_v24 = vpop.permute.xlu0 %124 }
 0x16d   :  { %v2343_v43 = vsel %vm2341_vm0, %v2342_v1, %v8119_v29  ;;  %v2403_v50 = vsub.s32 32, %v2402_v22  ;;  %vm6547_vm15 = vcmp.lt.s32.totalorder %v6546_v37, 0  ;;  %v2395_v41 = vand.u32 8388607, %v11964_v45 }
 0x16e   :  { %v2344_v23 = vadd.s32 %v2343_v43, %v2339_v21  ;;  %v2405_v60 = vshll.u32 %v12259_v39, %v2402_v22  ;;  %v2248_v13 = vclz %v6549_v51  ;;  %v2401_v26 = vshrl.u32 %v2400_v9, 5 }
 0x16f   :  { %v2406_v59 = vshrl.u32 %v12269_v36, %v2403_v50  ;;  %v2409_v33 = vshrl.u32 %v12254_v11, %v2403_v50  ;;  %v2412_v0 = vshrl.u32 %v12255_v3, %v2403_v50  ;;  %v2408_v40 = vshll.u32 %v12269_v36, %v2402_v22 }
 0x170   :  { %v2345_v48 = vadd.s32 536870912, %v2344_v23  ;;  %v2411_v7 = vshll.u32 %v12254_v11, %v2402_v22  ;;  %v2414_v29 = vshll.u32 %v12255_v3, %v2402_v22  ;;  %v2415_v31 = vshrl.u32 %v12256_v56, %v2403_v50 }
 0x171   :  { %v2407_v54 = vor.u32 %v2406_v59, %v2405_v60  ;;  %v2410_v14 = vor.u32 %v2409_v33, %v2408_v40  ;;  %v2417_v8 = vshll.u32 %v12256_v56, %v2402_v22  ;;  %v2418_v19 = vshrl.u32 %v12257_v4, %v2403_v50 }
 0x172   :  { %v8156_v5 = vshrl.u32 %v2345_v48, 30  ;;  %v1222_v52 = vcvt.s32.f32 %v1215_v16  ;;  %v8161_v49 = vsel %vm6547_vm15, 0, %v6546_v37  ;;  %v2413_v9 = vor.u32 %v2412_v0, %v2411_v7 }
 0x173   :  { %v2416_v6 = vor.u32 %v2415_v31, %v2414_v29  ;;  %v8165_v1 = vpop.eup %6847  ;;  %v1233_v51 = vadd.s32 3, %v8138_v30  ;;  %v2396_v43 = vor.u32 8388608, %v2395_v41  ;;  %v2419_v60 = vor.u32 %v2418_v19, %v2417_v8 }
 0x174   :  { %12322 = vst [vmem:[#allocation59_spill] sm:$0xff] %v8165_v1  ;;  %v2347_v21 = vshll.u32 %v8156_v5, 30  ;;  %v1120_v22 = vxor.u32 2147483648, %v8143_v12  ;;  %v1223_v59 = vmul.f32 %v1222_v52, %v1220_v42  ;;  %v6550_v33 = vadd.s32 4294967294, %v2248_v13 }
 0x175   :  { %vm2420_vm2 = vcmp.lt.s32.totalorder %v2401_v26, 1  ;;  %v2152_v37 = vsub.s32 4294967266, %v8161_v49  ;;  %vm2423_vm5 = vcmp.lt.s32.totalorder %v2401_v26, 4  ;;  %v8174_v0 = vmul.f32 %v8163_v24, %v7170_v61 }
 0x176   :  { %v2428_v16 = vsel %vm2420_vm2, %v2407_v54, %v2410_v14  ;;  %v8176_v48 = vsub.s32 %v2344_v23, %v2347_v21  ;;  %v2425_v40 = vsel %vm2423_vm5, %v2413_v9, 2102212464  ;;  %v2429_v7 = vsel %vm2423_vm5, %v2416_v6, 920167782 }
 0x177   :  { %12323 = vst [vmem:[#allocation60_spill] sm:$0xff] %v8174_v0  ;;  %v2433_v41 = vsel %vm2423_vm5, %v2419_v60, 1326507024  ;;  %vm2078_vm6 = vcmp.lt.s32.totalorder %v7813_v28, 0  ;;  %v2404_v42 = vshrl.u32 %v12259_v39, %v2403_v50  ;;  %vm2422_vm7 = vcmp.lt.s32.totalorder %v2401_v26, 3 }
 0x178   :  { %v2432_v13 = vsel %vm2420_vm2, %v2410_v14, %v2413_v9  ;;  %v2436_v29 = vshll.u32 %v2396_v43, 8  ;;  %vm6551_vm10 = vcmp.lt.s32.totalorder %v6550_v33, 0  ;;  %vm2421_vm8 = vcmp.lt.s32.totalorder %v2401_v26, 2 }
 0x179   :  { %v2430_v31 = vsel %vm2422_vm7, %v2413_v9, %v2429_v7  ;;  %v2434_v8 = vsel %vm2422_vm7, %v2416_v6, %v2433_v41  ;;  %v2153_v19 = vadd.s32 127, %v2152_v37  ;;  %v2424_v52 = vsel %vm2420_vm2, %v2404_v42, %v2407_v54 }
 0x17a   :  { %v2426_v23 = vsel %vm2422_vm7, %v2410_v14, %v2425_v40  ;;  %v2431_v21 = vsel %vm2421_vm8, %v2428_v16, %v2430_v31  ;;  %v2350_v60 = vsub.s32 0, %v8176_v48  ;;  %v2435_v45 = vsel %vm2421_vm8, %v2432_v13, %v2434_v8 }
 0x17b   :  { %v8185_v1 = vmul.u32.u64.low %v2436_v29, %v2431_v21  ;;  %v8186_v50 = vmul.u32.u64.high %v2436_v29, %v2431_v21, %v8185_v1  ;;  %v12324_v43 = vand.u32 2147483647, %v7813_v28  ;;  %v2148_v9 = vsub.s32 32, %v8161_v49 }
 0x17c   :  { %v2251_v54 = vsel %vm6551_vm10, 0, %v6550_v33  ;;  %v8196_v14 = vmul.u32.u64.low %v2436_v29, %v2435_v45  ;;  %v8197_v6 = vmul.u32.u64.high %v2436_v29, %v2435_v45, %v8196_v14  ;;  %v1224_v37 = vxor.u32 2147483648, %v1223_v59 }
 0x17d   :  { %vm8191_vm9 = vcmp.le.f32.partialorder %v12324_v43, 0.7853982  ;;  %v2162_v16 = vsub.s32 4, %v8029_v20  ;;  %v2427_v40 = vsel %vm2421_vm8, %v2424_v52, %v2426_v23  ;;  %v1247_v7 = vand.u32 2139095040, %v8174_v0 }
 0x17e   :  { %v8202_v41 = vand.u32 3, %v1233_v51  ;;  %v8205_v42 = vand.u32 3, %v8138_v30  ;;  %v2132_v13 = vadd.s32 %v7947_v38, %v7945_v58  ;;  %v2154_v31 = vshll.u32 %v2153_v19, 23 }
 0x17f   :  { %v2256_v33 = vsub.s32 4294967266, %v2251_v54  ;;  %v6553_v45 = vmin.u32 %v2350_v60, %v8176_v48  ;;  %v2446_v8 = vadd.s32 1, %v8186_v50  ;;  %v1248_v21 = vshrl.u32 %v1247_v7, 23 }
 0x180   :  { %12327 = vst [vmem:[#allocation61_spill] sm:$0xff] %v8202_v41  ;;  %12328 = vst [vmem:[#allocation62_spill] sm:$0xff] %v8205_v42  ;;  %v1121_v26 = vsel %vm1038_vm13, %v1120_v22, %v8143_v12  ;;  %v2150_v52 = vshrl.u32 %v2132_v13, %v2148_v9  ;;  %vm2182_vm12 = vcmp.lt.s32.totalorder %v7868_v18, 0  ;;  %v2443_v51 = vmul.u32 %v2436_v29, %v2427_v40 }
 0x181   :  { %vm2445_vm14 = vc.u32 %v8197_v6, %v8185_v1  ;;  %v1225_v58 = vsel %vm1142_vm1, %v1224_v37, %v1223_v59  ;;  %v2163_v38 = vsel %vm2078_vm6, %v2162_v16, %v8029_v20  ;;  %v6512_v19 = vadd.s32 4294967169, %v1248_v21 }
 0x182   :  { %v2447_v30 = vsel %vm2445_vm14, %v2446_v8, %v8186_v50  ;;  %v2149_v12 = vshll.u32 %v8067_v55, %v8161_v49  ;;  %v2155_v22 = vor.u32 4788187, %v2154_v31  ;;  %v2252_v23 = vsub.s32 32, %v2251_v54 }
 0x183   :  { %v2448_v60 = vadd.s32 %v2447_v30, %v2443_v51  ;;  %v1124_v29 = vsel %vm7986_vm3, %v7431_v15, %v1121_v26  ;;  %v2257_v43 = vadd.s32 127, %v2256_v33  ;;  %v2352_v9 = vclz %v6553_v45 }
 0x184   :  { %v1254_v59 = vadd.s32 1, %v6512_v19  ;;  %v8231_v20 = vsel %vm8107_vm11, %v7534_v34, %v1225_v58  ;;  %v2151_v50 = vor.u32 %v2150_v52, %v2149_v12  ;;  %v2236_v14 = vadd.s32 %v8017_v44, %v8027_v17 }
 0x185   :  { %v2449_v55 = vadd.s32 536870912, %v2448_v60  ;;  %v8237_v49 = vsel %vm8191_vm9, 0, %v2163_v38  ;;  %v2266_v32 = vsub.s32 4, %v8076_v57  ;;  %v8242_v37 = vmul.f32 %v8163_v24, %v7174_v62 }
 0x186   :  { %vm1255_vm13 = vcmp.gt.s32.totalorder %v1254_v59, 0  ;;  %v2156_v16 = vand.u32 2147483647, %v2155_v22  ;;  %v2254_v25 = vshrl.u32 %v2236_v14, %v2252_v23  ;;  %6849 = vcosq.f32 %v1124_v29 }
 0x187   :  { %12329 = vst [vmem:[#allocation63_spill] sm:$0xff] %v8242_v37  ;;  %v8244_v40 = vshrl.u32 %v2449_v55, 30  ;;  %v1256_v7 = vsel %vm1255_vm13, %v1254_v59, 0  ;;  %v2258_v13 = vshll.u32 %v2257_v43, 23  ;;  %v6554_v44 = vadd.s32 4294967294, %v2352_v9 }
 0x188   :  { %v1258_v17 = vand.u32 31, %v1256_v7  ;;  %6851 = vsinq.f32 %v1124_v29  ;;  %v2158_v31 = vcvt.s32.f32 %v2151_v50  ;;  %v2253_v33 = vshll.u32 %v8112_v47, %v2251_v54 }
 0x189   :  { %v11967_v45 = vand.u32 2147483647, %v8174_v0  ;;  %6853 = vcosq.f32 %v8231_v20  ;;  %v2169_v8 = vadd.s32 3, %v8237_v49  ;;  %v8253_v21 = vsel %vm2182_vm12, %v2266_v32, %v8076_v57 }
 0x18a   :  { %v1259_v26 = vsub.s32 32, %v1258_v17  ;;  %v8255_v52 = vmul.f32 %v2158_v31, %v2156_v16  ;;  %v8257_v51 = vor.u32 %v2254_v25, %v2253_v33  ;;  %v2451_v58 = vshll.u32 %v8244_v40, 30 }
 0x18b   :  { %v1351_v47 = vand.u32 2139095040, %v8242_v37  ;;  %v2259_v54 = vor.u32 4788187, %v2258_v13  ;;  %vm6555_vm3 = vcmp.lt.s32.totalorder %v6554_v44, 0  ;;  %v1251_v19 = vand.u32 8388607, %v11967_v45 }
 0x18c   :  { %v1262_v38 = vshrl.u32 %v12269_v36, %v1259_v26  ;;  %v1265_v30 = vshrl.u32 %v12254_v11, %v1259_v26  ;;  %v1257_v57 = vshrl.u32 %v1256_v7, 5  ;;  %v1261_v12 = vshll.u32 %v12259_v39, %v1258_v17 }
 0x18d   :  { %v1264_v22 = vshll.u32 %v12269_v36, %v1258_v17  ;;  %v1267_v23 = vshll.u32 %v12254_v11, %v1258_v17  ;;  %v1268_v29 = vshrl.u32 %v12255_v3, %v1259_v26  ;;  %v1270_v43 = vshll.u32 %v12255_v3, %v1258_v17 }
 0x18e   :  { %v1271_v9 = vshrl.u32 %v12256_v56, %v1259_v26  ;;  %v8271_v59 = vsub.s32 %v2448_v60, %v2451_v58  ;;  %v1263_v50 = vor.u32 %v1262_v38, %v1261_v12  ;;  %v1352_v55 = vshrl.u32 %v1351_v47, 23 }
 0x18f   :  { %v1266_v14 = vor.u32 %v1265_v30, %v1264_v22  ;;  %v1269_v32 = vor.u32 %v1268_v29, %v1267_v23  ;;  %v1273_v25 = vshll.u32 %v12256_v56, %v1258_v17  ;;  %v1274_v7 = vshrl.u32 %v12257_v4, %v1259_v26 }
 0x190   :  { %v1272_v16 = vor.u32 %v1271_v9, %v1270_v43  ;;  %v2160_v13 = vxor.u32 2147483648, %v8255_v52  ;;  %v12330_v31 = vand.u32 2147483647, %v7868_v18  ;;  %v2260_v45 = vand.u32 2147483647, %v2259_v54  ;;  %v8284_v47 = vpop.eup %6849 }
 0x191   :  { %v2262_v60 = vcvt.s32.f32 %v8257_v51  ;;  %12333 = vst [vmem:[#allocation64_spill] sm:$0xff] %v8284_v47  ;;  %v8287_v38 = vsel %vm6555_vm3, 0, %v6554_v44  ;;  %v1252_v17 = vor.u32 8388608, %v1251_v19  ;;  %v1275_v30 = vor.u32 %v1274_v7, %v1273_v25 }
 0x192   :  { %vm8278_vm1 = vcmp.le.f32.partialorder %v12330_v31, 0.7853982  ;;  %vm1276_vm11 = vcmp.lt.s32.totalorder %v1257_v57, 1  ;;  %v8289_v12 = vpop.eup %6851  ;;  %v2454_v22 = vsub.s32 0, %v8271_v59  ;;  %vm1279_vm4 = vcmp.lt.s32.totalorder %v1257_v57, 4 }
 0x193   :  { %12334 = vst [vmem:[#allocation65_spill] sm:$0xff] %v8289_v12  ;;  %v1284_v23 = vsel %vm1276_vm11, %v1263_v50, %v1266_v14  ;;  %v6516_v54 = vadd.s32 4294967169, %v1352_v55  ;;  %v8293_v29 = vpop.eup %6853  ;;  %vm1278_vm0 = vcmp.lt.s32.totalorder %v1257_v57, 3  ;;  %v1281_v51 = vsel %vm1279_vm4, %v1269_v32, 2102212464 }
 0x194   :  { %12335 = vst [vmem:[#allocation66_spill] sm:$0xff] %v8293_v29  ;;  %v1285_v43 = vsel %vm1279_vm4, %v1272_v16, 920167782  ;;  %v1288_v9 = vsel %vm1276_vm11, %v1266_v14, %v1269_v32  ;;  %v1260_v44 = vshrl.u32 %v12259_v39, %v1259_v26  ;;  %vm1277_vm15 = vcmp.lt.s32.totalorder %v1257_v57, 2 }
 0x195   :  { %v1286_v19 = vsel %vm1278_vm0, %v1269_v32, %v1285_v43  ;;  %v1289_v25 = vsel %vm1279_vm4, %v1275_v30, 1326507024  ;;  %vm2286_vm2 = vcmp.lt.s32.totalorder %v7968_v46, 0  ;;  %v2360_v7 = vsub.s32 4294967266, %v8287_v38 }
 0x196   :  { %v1287_v31 = vsel %vm1277_vm15, %v1284_v23, %v1286_v19  ;;  %v1290_v58 = vsel %vm1278_vm0, %v1272_v16, %v1289_v25  ;;  %v1292_v55 = vshll.u32 %v1252_v17, 8  ;;  %v6557_v42 = vmin.u32 %v2454_v22, %v8271_v59 }
 0x197   :  { %v1280_v34 = vsel %vm1276_vm11, %v1260_v44, %v1263_v50  ;;  %v1282_v15 = vsel %vm1278_vm0, %v1266_v14, %v1281_v51  ;;  %v1291_v41 = vsel %vm1277_vm15, %v1288_v9, %v1290_v58  ;;  %6855 = vsinq.f32 %v8231_v20 }
 0x198   :  { %v8303_v29 = vmul.u32.u64.low %v1292_v55, %v1291_v41  ;;  %v8304_v26 = vmul.u32.u64.high %v1292_v55, %v1291_v41, %v8303_v29  ;;  %v8306_v32 = vmul.u32.u64.low %v1292_v55, %v1287_v31  ;;  %v8307_v30 = vmul.u32.u64.high %v1292_v55, %v1287_v31, %v8306_v32 }
 0x199   :  { %v8311_v43 = vand.u32 3, %v2169_v8  ;;  %v8314_v16 = vand.u32 3, %v8237_v49  ;;  %v1358_v17 = vadd.s32 1, %v6516_v54  ;;  %v2161_v50 = vsel %vm2078_vm6, %v2160_v13, %v8255_v52 }
 0x19a   :  { %v2263_v14 = vmul.f32 %v2262_v60, %v2260_v45  ;;  %v8322_v41 = vsel %vm8278_vm1, 0, %v8253_v21  ;;  %v1283_v58 = vsel %vm1277_vm15, %v1280_v34, %v1282_v15  ;;  %v2361_v22 = vadd.s32 127, %v2360_v7 }
 0x19b   :  { %12336 = vst [vmem:[#allocation67_spill] sm:$0xff] %v8311_v43  ;;  %12337 = vst [vmem:[#allocation68_spill] sm:$0xff] %v8314_v16  ;;  %v2370_v20 = vsub.s32 4, %v8156_v5  ;;  %v12338_v8 = vand.u32 2147483647, %v8242_v37  ;;  %vm1359_vm5 = vcmp.gt.s32.totalorder %v1358_v17, 0  ;;  %v2456_v45 = vclz %v6557_v42 }
 0x19c   :  { %v12339_v23 = vand.u32 2147483647, %v7968_v46  ;;  %vm1301_vm6 = vc.u32 %v8304_v26, %v8306_v32  ;;  %v1302_v21 = vadd.s32 1, %v8307_v30  ;;  %v1360_v15 = vsel %vm1359_vm5, %v1358_v17, 0 }
 0x19d   :  { %v1355_v49 = vand.u32 8388607, %v12338_v8  ;;  %v8340_v34 = vsel %vm8191_vm9, %v7813_v28, %v2161_v50  ;;  %v8343_v52 = vadd.s32 3, %v8322_v41  ;;  %v1299_v57 = vmul.u32 %v1292_v55, %v1283_v58 }
 0x19e   :  { %vm8330_vm7 = vcmp.le.f32.partialorder %v12339_v23, 0.7853982  ;;  %v1362_v13 = vand.u32 31, %v1360_v15  ;;  %v2264_v60 = vxor.u32 2147483648, %v2263_v14  ;;  %v2340_v42 = vadd.s32 %v8118_v10, %v8124_v2 }
 0x19f   :  { %v8349_v29 = vmul.f32 %v8163_v24, %v12298_v53  ;;  %v1303_v51 = vsel %vm1301_vm6, %v1302_v21, %v8307_v30  ;;  %v2356_v9 = vsub.s32 32, %v8287_v38  ;;  %v2371_v63 = vsel %vm2286_vm2, %v2370_v20, %v8156_v5 }
 0x1a0   :  { %v1304_v44 = vadd.s32 %v1303_v51, %v1299_v57  ;;  %v1363_v19 = vsub.s32 32, %v1362_v13  ;;  %v2362_v25 = vshll.u32 %v2361_v22, 23  ;;  %v6558_v7 = vadd.s32 4294967294, %v2456_v45 }
 0x1a1   :  { %12342 = vst [vmem:[#allocation69_spill] sm:$0xff] %v8349_v29  ;;  %v1356_v31 = vor.u32 8388608, %v1355_v49  ;;  %v1365_v55 = vshll.u32 %v12259_v39, %v1362_v13  ;;  %v1368_v17 = vshll.u32 %v12269_v36, %v1362_v13  ;;  %v1371_v30 = vshll.u32 %v12254_v11, %v1362_v13  ;;  %v8364_v22 = vpop.eup %6855 }
 0x1a2   :  { %v1305_v10 = vadd.s32 536870912, %v1304_v44  ;;  %v1366_v2 = vshrl.u32 %v12269_v36, %v1363_v19  ;;  %v1369_v50 = vshrl.u32 %v12254_v11, %v1363_v19  ;;  %v1372_v58 = vshrl.u32 %v12255_v3, %v1363_v19  ;;  %12343 = vst [vmem:[#allocation70_spill] sm:$0xff] %v8364_v22 }
 0x1a3   :  { %v1375_v5 = vshrl.u32 %v12256_v56, %v1363_v19  ;;  %v1378_v20 = vshrl.u32 %v12257_v4, %v1363_v19  ;;  %v1361_v49 = vshrl.u32 %v1360_v15, 5  ;;  %v1374_v23 = vshll.u32 %v12255_v3, %v1362_v13 }
 0x1a4   :  { %v8366_v8 = vshrl.u32 %v1305_v10, 30  ;;  %v1455_v45 = vand.u32 2139095040, %v8349_v29  ;;  %v1367_v21 = vor.u32 %v1366_v2, %v1365_v55  ;;  %v1370_v57 = vor.u32 %v1369_v50, %v1368_v17 }
 0x1a5   :  { %v1373_v51 = vor.u32 %v1372_v58, %v1371_v30  ;;  %v1377_v16 = vshll.u32 %v12256_v56, %v1362_v13  ;;  %v2265_v28 = vsel %vm2182_vm12, %v2264_v60, %v2263_v14  ;;  %v8375_v43 = vsel %vm8330_vm7, 0, %v2371_v63 }
 0x1a6   :  { %v1307_v10 = vshll.u32 %v8366_v8, 30  ;;  %v1376_v22 = vor.u32 %v1375_v5, %v1374_v23  ;;  %v2358_v15 = vshrl.u32 %v2340_v42, %v2356_v9  ;;  %v2363_v47 = vor.u32 4788187, %v2362_v25 }
 0x1a7   :  { %vm6559_vm10 = vcmp.lt.s32.totalorder %v6558_v7, 0  ;;  %v1379_v12 = vor.u32 %v1378_v20, %v1377_v16  ;;  %vm1380_vm8 = vcmp.lt.s32.totalorder %v1361_v49, 1  ;;  %vm1383_vm9 = vcmp.lt.s32.totalorder %v1361_v49, 4 }
 0x1a8   :  { %v8378_v53 = vsub.s32 %v1304_v44, %v1307_v10  ;;  %v1396_v55 = vshll.u32 %v1356_v31, 8  ;;  %v1364_v13 = vshrl.u32 %v12259_v39, %v1363_v19  ;;  %v1385_v2 = vsel %vm1383_vm9, %v1373_v51, 2102212464 }
 0x1a9   :  { %v1388_v14 = vsel %vm1380_vm8, %v1367_v21, %v1370_v57  ;;  %v1456_v60 = vshrl.u32 %v1455_v45, 23  ;;  %vm1381_vm12 = vcmp.lt.s32.totalorder %v1361_v49, 2  ;;  %vm1382_vm14 = vcmp.lt.s32.totalorder %v1361_v49, 3 }
 0x1aa   :  { %v1310_v63 = vsub.s32 0, %v8378_v53  ;;  %v1389_v17 = vsel %vm1383_vm9, %v1376_v22, 920167782  ;;  %v1384_v30 = vsel %vm1380_vm8, %v1364_v13, %v1367_v21  ;;  %v1392_v9 = vsel %vm1380_vm8, %v1370_v57, %v1373_v51 }
 0x1ab   :  { %v1390_v42 = vsel %vm1382_vm14, %v1373_v51, %v1389_v17  ;;  %v1393_v25 = vsel %vm1383_vm9, %v1379_v12, 1326507024  ;;  %v1386_v44 = vsel %vm1382_vm14, %v1370_v57, %v1385_v2  ;;  %v6520_v20 = vadd.s32 4294967169, %v1456_v60 }
 0x1ac   :  { %v6513_v16 = vmin.u32 %v1310_v63, %v8378_v53  ;;  %v1391_v50 = vsel %vm1381_vm12, %v1388_v14, %v1390_v42  ;;  %v1394_v31 = vsel %vm1382_vm14, %v1376_v22, %v1393_v25  ;;  %v2357_v23 = vshll.u32 %v8176_v48, %v8287_v38 }
 0x1ad   :  { %v1395_v19 = vsel %vm1381_vm12, %v1392_v9, %v1394_v31  ;;  %v8385_v58 = vmul.u32.u64.low %v1396_v55, %v1391_v50  ;;  %v8386_v5 = vmul.u32.u64.high %v1396_v55, %v1391_v50, %v8385_v58  ;;  %6857 = vcosq.f32 %v8340_v34 }
 0x1ae   :  { %v1312_v45 = vclz %v6513_v16  ;;  %v8391_v21 = vmul.u32.u64.low %v1396_v55, %v1395_v19  ;;  %v8392_v51 = vmul.u32.u64.high %v1396_v55, %v1395_v19, %v8391_v21  ;;  %v8396_v12 = vand.u32 3, %v8343_v52 }
 0x1af   :  { %v1387_v22 = vsel %vm1381_vm12, %v1384_v30, %v1386_v44  ;;  %v1462_v57 = vadd.s32 1, %v6520_v20  ;;  %6859 = vsinq.f32 %v8340_v34  ;;  %v2359_v10 = vor.u32 %v2358_v15, %v2357_v23 }
 0x1b0   :  { %12344 = vst [vmem:[#allocation71_spill] sm:$0xff] %v8396_v12  ;;  %v2377_v13 = vadd.s32 3, %v8375_v43  ;;  %v8402_v2 = vsel %vm6559_vm10, 0, %v6558_v7  ;;  %v2268_v48 = vsel %vm8278_vm1, %v7868_v18, %v2265_v28  ;;  %v2364_v38 = vand.u32 2147483647, %v2363_v47 }
 0x1b1   :  { %v1406_v14 = vadd.s32 1, %v8386_v5  ;;  %vm1463_vm13 = vcmp.gt.s32.totalorder %v1462_v57, 0  ;;  %v6514_v52 = vadd.s32 4294967294, %v1312_v45  ;;  %v1403_v49 = vmul.u32 %v1396_v55, %v1387_v22 }
 0x1b2   :  { %vm1405_vm3 = vc.u32 %v8392_v51, %v8385_v58  ;;  %v1464_v34 = vsel %vm1463_vm13, %v1462_v57, 0  ;;  %v2464_v15 = vsub.s32 4294967266, %v8402_v2  ;;  %v11983_v7 = vand.u32 2147483647, %v8349_v29 }
 0x1b3   :  { %v1407_v60 = vsel %vm1405_vm3, %v1406_v14, %v8386_v5  ;;  %v1466_v63 = vand.u32 31, %v1464_v34  ;;  %6861 = vcosq.f32 %v2268_v48  ;;  %v2366_v33 = vcvt.s32.f32 %v2359_v10 }
 0x1b4   :  { %v8414_v28 = vand.u32 3, %v8322_v41  ;;  %v1408_v47 = vadd.s32 %v1407_v60, %v1403_v49  ;;  %6863 = vsinq.f32 %v2268_v48  ;;  %v8416_v17 = vand.u32 3, %v2377_v13 }
 0x1b5   :  { %v8420_v55 = vmul.f32 %v8163_v24, %v12310_v35  ;;  %v1467_v30 = vsub.s32 32, %v1466_v63  ;;  %v8422_v42 = vmul.f32 %v2366_v33, %v2364_v38  ;;  %6865 = vrcp.f32 %v8174_v0 }
 0x1b6   :  { %12345 = vst [vmem:[#allocation72_spill] sm:$0xff] %v8414_v28  ;;  %12346 = vst [vmem:[#allocation73_spill] sm:$0xff] %v8416_v17  ;;  %vm6515_vm1 = vcmp.lt.s32.totalorder %v6514_v52, 0  ;;  %v1409_v9 = vadd.s32 536870912, %v1408_v47  ;;  %v2465_v25 = vadd.s32 127, %v2464_v15  ;;  %v1469_v24 = vshll.u32 %v12259_v39, %v1466_v63 }
 0x1b7   :  { %12347 = vst [vmem:[#allocation74_spill] sm:$0xff] %v8420_v55  ;;  %v1459_v41 = vand.u32 8388607, %v11983_v7  ;;  %v1470_v16 = vshrl.u32 %v12269_v36, %v1467_v30  ;;  %v1473_v44 = vshrl.u32 %v12254_v11, %v1467_v30  ;;  %v1476_v31 = vshrl.u32 %v12255_v3, %v1467_v30  ;;  %v8434_v5 = vpop.eup %6857 }
 0x1b8   :  { %v8429_v50 = vshrl.u32 %v1409_v9, 30  ;;  %v1479_v19 = vshrl.u32 %v12256_v56, %v1467_v30  ;;  %12348 = vst [vmem:[#allocation75_spill] sm:$0xff] %v8434_v5  ;;  %v8436_v20 = vsel %vm6515_vm1, 0, %v6514_v52  ;;  %v1472_v23 = vshll.u32 %v12269_v36, %v1466_v63 }
 0x1b9   :  { %v1478_v45 = vshll.u32 %v12255_v3, %v1466_v63  ;;  %v1559_v21 = vand.u32 2139095040, %v8420_v55  ;;  %v8441_v22 = vpop.eup %6859  ;;  %v8444_v10 = vshrl.u32 %v1464_v34, 5  ;;  %v1471_v13 = vor.u32 %v1470_v16, %v1469_v24 }
 0x1ba   :  { %12349 = vst [vmem:[#allocation76_spill] sm:$0xff] %v8441_v22  ;;  %v1411_v57 = vshll.u32 %v8429_v50, 30  ;;  %v1475_v48 = vshll.u32 %v12254_v11, %v1466_v63  ;;  %v1474_v38 = vor.u32 %v1473_v44, %v1472_v23  ;;  %v1481_v52 = vshll.u32 %v12256_v56, %v1466_v63 }
 0x1bb   :  { %v1480_v14 = vor.u32 %v1479_v19, %v1478_v45  ;;  %v1482_v49 = vshrl.u32 %v12257_v4, %v1467_v30  ;;  %v2444_v15 = vadd.s32 %v8185_v1, %v8197_v6  ;;  %v1460_v33 = vor.u32 8388608, %v1459_v41 }
 0x1bc   :  { %v8451_v60 = vsub.s32 %v1408_v47, %v1411_v57  ;;  %v1477_v9 = vor.u32 %v1476_v31, %v1475_v48  ;;  %v2368_v7 = vxor.u32 2147483648, %v8422_v42  ;;  %v2474_v34 = vsub.s32 4, %v8244_v40 }
 0x1bd   :  { %v1483_v16 = vor.u32 %v1482_v49, %v1481_v52  ;;  %v1560_v24 = vshrl.u32 %v1559_v21, 23  ;;  %v8455_v28 = vpop.eup %6861  ;;  %vm2390_vm11 = vcmp.lt.s32.totalorder %v8041_v27, 0  ;;  %v1320_v63 = vsub.s32 4294967266, %v8436_v20 }
 0x1be   :  { %12350 = vst [vmem:[#allocation77_spill] sm:$0xff] %v8455_v28  ;;  %v1414_v44 = vsub.s32 0, %v8451_v60  ;;  %vm1484_vm4 = vcmp.lt.s32.totalorder %v8444_v10, 1  ;;  %vm1487_vm0 = vcmp.lt.s32.totalorder %v8444_v10, 4  ;;  %v8462_v1 = vpop.eup %6863  ;;  %v2460_v6 = vsub.s32 32, %v8402_v2 }
 0x1bf   :  { %12351 = vst [vmem:[#allocation78_spill] sm:$0xff] %v8462_v1  ;;  %v2466_v47 = vshll.u32 %v2465_v25, 23  ;;  %v1492_v41 = vsel %vm1484_vm4, %v1471_v13, %v1474_v38  ;;  %v1493_v31 = vsel %vm1487_vm0, %v1480_v14, 920167782  ;;  %v8469_v19 = vpop.eup %6865  ;;  %vm1486_vm15 = vcmp.lt.s32.totalorder %v8444_v10, 3 }
 0x1c0   :  { %12352 = vst [vmem:[#allocation79_spill] sm:$0xff] %v8469_v19  ;;  %v6517_v23 = vmin.u32 %v1414_v44, %v8451_v60  ;;  %v1496_v45 = vsel %vm1484_vm4, %v1474_v38, %v1477_v9  ;;  %v1500_v21 = vshll.u32 %v1460_v33, 8  ;;  %vm1485_vm5 = vcmp.lt.s32.totalorder %v8444_v10, 2 }
 0x1c1   :  { %v1494_v25 = vsel %vm1486_vm15, %v1477_v9, %v1493_v31  ;;  %v1497_v57 = vsel %vm1487_vm0, %v1483_v16, 1326507024  ;;  %v6524_v48 = vadd.s32 4294967169, %v1560_v24  ;;  %v1321_v52 = vadd.s32 127, %v1320_v63 }
 0x1c2   :  { %v1489_v49 = vsel %vm1487_vm0, %v1477_v9, 2102212464  ;;  %v1495_v44 = vsel %vm1485_vm5, %v1492_v41, %v1494_v25  ;;  %v1498_v17 = vsel %vm1486_vm15, %v1480_v14, %v1497_v57  ;;  %v1468_v33 = vshrl.u32 %v12259_v39, %v1467_v30 }
 0x1c3   :  { %v1499_v18 = vsel %vm1485_vm5, %v1496_v45, %v1498_v17  ;;  %v8489_v31 = vmul.u32.u64.low %v1500_v21, %v1495_v44  ;;  %v8490_v28 = vmul.u32.u64.high %v1500_v21, %v1495_v44, %v8489_v31  ;;  %v12353_v16 = vand.u32 2147483647, %v8041_v27 }
 0x1c4   :  { %v2462_v9 = vshrl.u32 %v2444_v15, %v2460_v6  ;;  %v1416_v63 = vclz %v6517_v23  ;;  %v8499_v41 = vmul.u32.u64.low %v1500_v21, %v1499_v18  ;;  %v8500_v25 = vmul.u32.u64.high %v1500_v21, %v1499_v18, %v8499_v41 }
 0x1c5   :  { %vm8495_vm6 = vcmp.le.f32.partialorder %v12353_v16, 0.7853982  ;;  %v2467_v14 = vor.u32 4788187, %v2466_v47  ;;  %v1488_v30 = vsel %vm1484_vm4, %v1468_v33, %v1471_v13  ;;  %v1490_v17 = vsel %vm1486_vm15, %v1474_v38, %v1489_v49 }
 0x1c6   :  { %v1566_v45 = vadd.s32 1, %v6524_v48  ;;  %v2461_v57 = vshll.u32 %v8271_v59, %v8402_v2  ;;  %v1316_v44 = vsub.s32 32, %v8436_v20  ;;  %v1322_v16 = vshll.u32 %v1321_v52, 23 }
 0x1c7   :  { %v11989_v15 = vand.u32 2147483647, %v8420_v55  ;;  %v2475_v18 = vsel %vm2390_vm11, %v2474_v34, %v8244_v40  ;;  %6867 = vrcp.f32 %v8242_v37  ;;  %v1510_v13 = vadd.s32 1, %v8490_v28 }
 0x1c8   :  { %vm1567_vm10 = vcmp.gt.s32.totalorder %v1566_v45, 0  ;;  %v2463_v6 = vor.u32 %v2462_v9, %v2461_v57  ;;  %v1300_v38 = vadd.s32 %v8306_v32, %v8304_v26  ;;  %v6518_v47 = vadd.s32 4294967294, %v1416_v63 }
 0x1c9   :  { %v1491_v59 = vsel %vm1485_vm5, %v1488_v30, %v1490_v17  ;;  %v2369_v2 = vsel %vm2286_vm2, %v2368_v7, %v8422_v42  ;;  %v2468_v23 = vand.u32 2147483647, %v2467_v14  ;;  %vm1509_vm8 = vc.u32 %v8500_v25, %v8489_v31 }
 0x1ca   :  { %v1568_v40 = vsel %vm1567_vm10, %v1566_v45, 0  ;;  %v1318_v34 = vshrl.u32 %v1300_v38, %v1316_v44  ;;  %v1323_v48 = vor.u32 4788187, %v1322_v16  ;;  %v1511_v52 = vsel %vm1509_vm8, %v1510_v13, %v8490_v28 }
 0x1cb   :  { %v1563_v26 = vand.u32 8388607, %v11989_v15  ;;  %v8528_v32 = vand.u32 3, %v8375_v43  ;;  %6869 = vrcp.f32 %v8349_v29  ;;  %v1507_v10 = vmul.u32 %v1500_v21, %v1491_v59 }
 0x1cc   :  { %v1570_v49 = vand.u32 31, %v1568_v40  ;;  %v2470_v7 = vcvt.s32.f32 %v2463_v6  ;;  %6871 = vrcp.f32 %v8420_v55  ;;  %v1317_v42 = vshll.u32 %v8378_v53, %v8436_v20 }
 0x1cd   :  { %12356 = vst [vmem:[#allocation80_spill] sm:$0xff] %v8528_v32  ;;  %vm6519_vm2 = vcmp.lt.s32.totalorder %v6518_v47, 0  ;;  %v8537_v28 = vsel %vm8330_vm7, %v7968_v46, %v2369_v2  ;;  %v8541_v43 = vsel %vm8495_vm6, 0, %v2475_v18  ;;  %v8543_v33 = vadd.s32 %v1511_v52, %v1507_v10 }
 0x1ce   :  { %v1571_v21 = vsub.s32 32, %v1570_v49  ;;  %v8545_v9 = vmul.f32 %v2470_v7, %v2468_v23  ;;  %v1319_v63 = vor.u32 %v1318_v34, %v1317_v42  ;;  %v1324_v41 = vand.u32 2147483647, %v1323_v48 }
 0x1cf   :  { %v1564_v14 = vor.u32 8388608, %v1563_v26  ;;  %v8547_v30 = vsel %vm6519_vm2, 0, %v6518_v47  ;;  %v1573_v53 = vshll.u32 %v12259_v39, %v1570_v49  ;;  %v1576_v17 = vshll.u32 %v12269_v36, %v1570_v49  ;;  %v8561_v47 = vpop.permute.xlu1 %144 }
 0x1d0   :  { %v1574_v54 = vshrl.u32 %v12269_v36, %v1571_v21  ;;  %v1577_v20 = vshrl.u32 %v12254_v11, %v1571_v21  ;;  %v1580_v45 = vshrl.u32 %v12255_v3, %v1571_v21  ;;  %v1582_v57 = vshll.u32 %v12255_v3, %v1570_v49 }
 0x1d1   :  { %v1583_v44 = vshrl.u32 %v12256_v56, %v1571_v21  ;;  %v8556_v16 = vpop.eup %6867  ;;  %v1513_v18 = vadd.s32 536870912, %v8543_v33  ;;  %v1569_v13 = vshrl.u32 %v1568_v40, 5  ;;  %v1579_v6 = vshll.u32 %v12254_v11, %v1570_v49 }
 0x1d2   :  { %12357 = vst [vmem:[#allocation81_spill] sm:$0xff] %v8556_v16  ;;  %v1585_v38 = vshll.u32 %v12256_v56, %v1570_v49  ;;  %v1575_v59 = vor.u32 %v1574_v54, %v1573_v53  ;;  %v1578_v2 = vor.u32 %v1577_v20, %v1576_v17  ;;  %v1586_v34 = vshrl.u32 %v12257_v4, %v1571_v21 }
 0x1d3   :  { %v1584_v23 = vor.u32 %v1583_v44, %v1582_v57  ;;  %6873 = vcosq.f32 %v8537_v28  ;;  %v2472_v48 = vxor.u32 2147483648, %v8545_v9  ;;  %vm1246_vm7 = vcmp.lt.s32.totalorder %v8174_v0, 0 }
 0x1d4   :  { %v1330_v52 = vsub.s32 4, %v8366_v8  ;;  %v1581_v40 = vor.u32 %v1580_v45, %v1579_v6  ;;  %v1326_v26 = vcvt.s32.f32 %v1319_v63  ;;  %vm1350_vm9 = vcmp.lt.s32.totalorder %v8242_v37, 0 }
 0x1d5   :  { %v1424_v10 = vsub.s32 4294967266, %v8547_v30  ;;  %v1587_v49 = vor.u32 %v1586_v34, %v1585_v38  ;;  %v8572_v7 = vmul.f32 %v8561_v47, %v7170_v61  ;;  %v8574_v42 = vpop.eup %6869  ;;  %v1434_v53 = vsub.s32 4, %v8429_v50 }
 0x1d6   :  { %12359 = vst [vmem:[#allocation83_spill] sm:$0xff] %v8574_v42  ;;  %v8577_v54 = vshrl.u32 %v1513_v18, 30  ;;  %vm1588_vm12 = vcmp.lt.s32.totalorder %v1569_v13, 1  ;;  %vm1591_vm14 = vcmp.lt.s32.totalorder %v1569_v13, 4  ;;  %v8579_v20 = vpop.eup %6871  ;;  %v12361_v63 = vand.u32 2147483647, %v8174_v0 }
 0x1d7   :  { %12358 = vst [vmem:[#allocation82_spill] sm:$0xff] %v8572_v7  ;;  %12360 = vst [vmem:[#allocation84_spill] sm:$0xff] %v8579_v20  ;;  %v1327_v45 = vmul.f32 %v1326_v26, %v1324_v41  ;;  %v1596_v57 = vsel %vm1588_vm12, %v1575_v59, %v1578_v2  ;;  %v1597_v44 = vsel %vm1591_vm14, %v1584_v23, 920167782  ;;  %v1604_v6 = vshll.u32 %v1564_v14, 8 }
 0x1d8   :  { %vm8583_vm13 = vcmp.le.f32.partialorder %v12361_v63, 0.7853982  ;;  %v1572_v38 = vshrl.u32 %v12259_v39, %v1571_v21  ;;  %vm1590_vm3 = vcmp.lt.s32.totalorder %v1569_v13, 3  ;;  %v1593_v18 = vsel %vm1591_vm14, %v1581_v40, 2102212464 }
 0x1d9   :  { %v1600_v34 = vsel %vm1588_vm12, %v1578_v2, %v1581_v40  ;;  %v12364_v15 = vand.u32 2147483647, %v8242_v37  ;;  %v1425_v63 = vadd.s32 127, %v1424_v10  ;;  %vm1589_vm4 = vcmp.lt.s32.totalorder %v1569_v13, 2 }
 0x1da   :  { %v1598_v46 = vsel %vm1590_vm3, %v1581_v40, %v1597_v44  ;;  %v1601_v41 = vsel %vm1591_vm14, %v1587_v49, 1326507024  ;;  %v1515_v26 = vshll.u32 %v8577_v54, 30  ;;  %v1592_v14 = vsel %vm1588_vm12, %v1572_v38, %v1575_v59 }
 0x1db   :  { %vm8592_vm1 = vcmp.le.f32.partialorder %v12364_v15, 0.7853982  ;;  %v1599_v21 = vsel %vm1589_vm4, %v1596_v57, %v1598_v46  ;;  %v1602_v12 = vsel %vm1590_vm3, %v1584_v23, %v1601_v41  ;;  %v1594_v1 = vsel %vm1590_vm3, %v1578_v2, %v1593_v18 }
 0x1dc   :  { %v1603_v5 = vsel %vm1589_vm4, %v1600_v34, %v1602_v12  ;;  %v8600_v22 = vmul.u32.u64.low %v1604_v6, %v1599_v21  ;;  %v8601_v20 = vmul.u32.u64.high %v1604_v6, %v1599_v21, %v8600_v22  ;;  %v1328_v15 = vxor.u32 2147483648, %v1327_v45 }
 0x1dd   :  { %v1420_v10 = vsub.s32 32, %v8547_v30  ;;  %v8605_v42 = vmul.u32.u64.low %v1604_v6, %v1603_v5  ;;  %v8606_v40 = vmul.u32.u64.high %v1604_v6, %v1603_v5, %v8605_v42  ;;  %v2473_v59 = vsel %vm2390_vm11, %v2472_v48, %v8545_v9  ;;  %v8619_v23 = vpop.eup %6873 }
 0x1de   :  { %v1331_v46 = vsel %vm1246_vm7, %v1330_v52, %v8366_v8  ;;  %v8616_v12 = vmul.f32 %v8561_v47, %v7174_v62  ;;  %v2911_v2 = vand.u32 2139095040, %v8572_v7  ;;  %12368 = vst [vmem:[#allocation86_spill] sm:$0xff] %v8619_v23  ;;  %6875 = vsinq.f32 %v8537_v28 }
 0x1df   :  { %v1404_v5 = vadd.s32 %v8385_v58, %v8392_v51  ;;  %v1435_v9 = vsel %vm1350_vm9, %v1434_v53, %v8429_v50  ;;  %v1595_v48 = vsel %vm1589_vm4, %v1592_v14, %v1594_v1  ;;  %v1426_v8 = vshll.u32 %v1425_v63, 23 }
 0x1e0   :  { %12367 = vst [vmem:[#allocation85_spill] sm:$0xff] %v8616_v12  ;;  %v8629_v52 = vsub.s32 %v8543_v33, %v1515_v26  ;;  %v1614_v49 = vadd.s32 1, %v8601_v20  ;;  %v2912_v42 = vshrl.u32 %v2911_v2, 23  ;;  %v2476_v28 = vsel %vm8495_vm6, %v8041_v27, %v2473_v59 }
 0x1e1   :  { %v1329_v58 = vsel %vm1246_vm7, %v1328_v15, %v1327_v45  ;;  %v1333_v51 = vsel %vm8583_vm13, 0, %v1331_v46  ;;  %v1422_v50 = vshrl.u32 %v1404_v5, %v1420_v10  ;;  %v1611_v13 = vmul.u32 %v1604_v6, %v1595_v48 }
 0x1e2   :  { %vm1613_vm11 = vc.u32 %v8606_v40, %v8600_v22  ;;  %v6576_v1 = vadd.s32 4294967169, %v2912_v42  ;;  %v3015_v33 = vand.u32 2139095040, %v8616_v12  ;;  %v1421_v53 = vshll.u32 %v8451_v60, %v8547_v30 }
 0x1e3   :  { %v1437_v24 = vsel %vm8592_vm1, 0, %v1435_v9  ;;  %v1615_v57 = vsel %vm1613_vm11, %v1614_v49, %v8601_v20  ;;  %v11999_v45 = vand.u32 2147483647, %v8572_v7  ;;  %v1427_v44 = vor.u32 4788187, %v1426_v8 }
 0x1e4   :  { %v1518_v38 = vsub.s32 0, %v8629_v52  ;;  %v1616_v6 = vadd.s32 %v1615_v57, %v1611_v13  ;;  %v2918_v18 = vadd.s32 1, %v6576_v1  ;;  %6877 = vcosq.f32 %v2476_v28 }
 0x1e5   :  { %v2481_v34 = vadd.s32 3, %v8541_v43  ;;  %v1332_v63 = vsel %vm8583_vm13, %v8174_v0, %v1329_v58  ;;  %v1337_v60 = vadd.s32 3, %v1333_v51  ;;  %v1423_v30 = vor.u32 %v1422_v50, %v1421_v53  ;;  %v12375_v58 = vld [vmem:[#allocation8_spill] sm:$0xff] }
 0x1e6   :  { %v1617_v41 = vadd.s32 536870912, %v1616_v6  ;;  %vm2919_vm0 = vcmp.gt.s32.totalorder %v2918_v18, 0  ;;  %v3016_v26 = vshrl.u32 %v3015_v33, 23  ;;  %6879 = vsinq.f32 %v2476_v28 }
 0x1e7   :  { %v8654_v20 = vand.u32 3, %v8541_v43  ;;  %v1441_v14 = vadd.s32 3, %v1437_v24  ;;  %v2920_v21 = vsel %vm2919_vm0, %v2918_v18, 0  ;;  %v1428_v15 = vand.u32 2147483647, %v1427_v44 }
 0x1e8   :  { %v6521_v10 = vmin.u32 %v1518_v38, %v8629_v52  ;;  %v2915_v59 = vand.u32 8388607, %v11999_v45  ;;  %v2922_v46 = vand.u32 31, %v2920_v21  ;;  %v8659_v17 = vpop.eup %6875  ;;  %v8661_v2 = vand.u32 3, %v2481_v34 }
 0x1e9   :  { %12369 = vst [vmem:[#allocation87_spill] sm:$0xff] %v8654_v20  ;;  %12370 = vst [vmem:[#allocation88_spill] sm:$0xff] %v8659_v17  ;;  %6881 = vcosq.f32 %v1332_v63  ;;  %v8663_v5 = vand.u32 3, %v1337_v60  ;;  %v8665_v9 = vand.u32 3, %v1333_v51  ;;  %v1430_v43 = vcvt.s32.f32 %v1423_v30 }
 0x1ea   :  { %12371 = vst [vmem:[#allocation89_spill] sm:$0xff] %v8661_v2  ;;  %v8667_v48 = vshrl.u32 %v1617_v41, 30  ;;  %v2923_v8 = vsub.s32 32, %v2922_v46  ;;  %v6580_v49 = vadd.s32 4294967169, %v3016_v26  ;;  %6883 = vsinq.f32 %v1332_v63 }
 0x1eb   :  { %12372 = vst [vmem:[#allocation90_spill] sm:$0xff] %v8665_v9  ;;  %v8669_v42 = vand.u32 3, %v1441_v14  ;;  %v8671_v28 = vand.u32 3, %v1437_v24  ;;  %v8675_v50 = vmul.f32 %v8561_v47, %v12375_v58  ;;  %v1431_v13 = vmul.f32 %v1430_v43, %v1428_v15 }
 0x1ec   :  { %v1520_v1 = vclz %v6521_v10  ;;  %v2916_v33 = vor.u32 8388608, %v2915_v59  ;;  %v2926_v51 = vshrl.u32 %v12269_v36, %v2923_v8  ;;  %v2925_v53 = vshll.u32 %v12259_v39, %v2922_v46 }
 0x1ed   :  { %12373 = vst [vmem:[#allocation91_spill] sm:$0xff] %v8669_v42  ;;  %12374 = vst [vmem:[#allocation92_spill] sm:$0xff] %v8671_v28  ;;  %v2928_v57 = vshll.u32 %v12269_v36, %v2922_v46  ;;  %v2929_v44 = vshrl.u32 %v12254_v11, %v2923_v8  ;;  %v2932_v38 = vshrl.u32 %v12255_v3, %v2923_v8  ;;  %vm1454_vm15 = vcmp.lt.s32.totalorder %v8349_v29, 0 }
 0x1ee   :  { %12376 = vst [vmem:[#allocation8_spill] sm:$0xff] %v8675_v50  ;;  %v1619_v24 = vshll.u32 %v8667_v48, 30  ;;  %v2921_v18 = vshrl.u32 %v2920_v21, 5  ;;  %v2931_v34 = vshll.u32 %v12254_v11, %v2922_v46  ;;  %v3022_v63 = vadd.s32 1, %v6580_v49  ;;  %v8685_v60 = vpop.eup %6877 }
 0x1ef   :  { %12377 = vst [vmem:[#allocation93_spill] sm:$0xff] %v8685_v60  ;;  %v2927_v30 = vor.u32 %v2926_v51, %v2925_v53  ;;  %v2930_v41 = vor.u32 %v2929_v44, %v2928_v57  ;;  %v2934_v26 = vshll.u32 %v12255_v3, %v2922_v46  ;;  %v2935_v14 = vshrl.u32 %v12256_v56, %v2923_v8 }
 0x1f0   :  { %v1432_v15 = vxor.u32 2147483648, %v1431_v13  ;;  %v1538_v10 = vsub.s32 4, %v8577_v54  ;;  %v8692_v59 = vmul.f32 %v8561_v47, %v12310_v35  ;;  %v2933_v43 = vor.u32 %v2932_v38, %v2931_v34  ;;  %v8694_v21 = vpop.eup %6879 }
 0x1f1   :  { %12379 = vst [vmem:[#allocation95_spill] sm:$0xff] %v8694_v21  ;;  %v12380_v49 = vand.u32 2147483647, %v8349_v29  ;;  %v6522_v51 = vadd.s32 4294967294, %v1520_v1  ;;  %v2936_v53 = vor.u32 %v2935_v14, %v2934_v26  ;;  %v2937_v57 = vshll.u32 %v12256_v56, %v2922_v46 }
 0x1f2   :  { %12378 = vst [vmem:[#allocation94_spill] sm:$0xff] %v8692_v59  ;;  %v2938_v44 = vshrl.u32 %v12257_v4, %v2923_v8  ;;  %v8704_v20 = vsub.s32 %v1616_v6, %v1619_v24  ;;  %vm2940_vm6 = vcmp.lt.s32.totalorder %v2921_v18, 1  ;;  %v2956_v47 = vshll.u32 %v2916_v33, 8 }
 0x1f3   :  { %vm8698_vm5 = vcmp.le.f32.partialorder %v12380_v49, 0.7853982  ;;  %vm3023_vm10 = vcmp.gt.s32.totalorder %v3022_v63, 0  ;;  %v8706_v38 = vpop.eup %6881  ;;  %v2924_v34 = vshrl.u32 %v12259_v39, %v2923_v8  ;;  %vm2943_vm8 = vcmp.lt.s32.totalorder %v2921_v18, 4 }
 0x1f4   :  { %12383 = vst [vmem:[#allocation96_spill] sm:$0xff] %v8706_v38  ;;  %v2939_v27 = vor.u32 %v2938_v44, %v2937_v57  ;;  %v2948_v49 = vsel %vm2940_vm6, %v2927_v30, %v2930_v41  ;;  %vm2942_vm2 = vcmp.lt.s32.totalorder %v2921_v18, 3  ;;  %v2945_v2 = vsel %vm2943_vm8, %v2933_v43, 2102212464  ;;  %v8709_v14 = vpop.eup %6883 }
 0x1f5   :  { %v2949_v1 = vsel %vm2943_vm8, %v2936_v53, 920167782  ;;  %v2952_v26 = vsel %vm2940_vm6, %v2930_v41, %v2933_v43  ;;  %vm2941_vm7 = vcmp.lt.s32.totalorder %v2921_v18, 2  ;;  %v2944_v46 = vsel %vm2940_vm6, %v2924_v34, %v2927_v30 }
 0x1f6   :  { %v2950_v6 = vsel %vm2942_vm2, %v2933_v43, %v2949_v1  ;;  %v2953_v24 = vsel %vm2943_vm8, %v2939_v27, 1326507024  ;;  %v2946_v60 = vsel %vm2942_vm2, %v2930_v41, %v2945_v2  ;;  %v3024_v23 = vsel %vm3023_vm10, %v3022_v63, 0 }
 0x1f7   :  { %v2951_v33 = vsel %vm2941_vm7, %v2948_v49, %v2950_v6  ;;  %v2954_v21 = vsel %vm2942_vm2, %v2936_v53, %v2953_v24  ;;  %v1539_v8 = vsel %vm1454_vm15, %v1538_v10, %v8577_v54  ;;  %vm6523_vm12 = vcmp.lt.s32.totalorder %v6522_v51, 0 }
 0x1f8   :  { %v2955_v57 = vsel %vm2941_vm7, %v2952_v26, %v2954_v21  ;;  %v8715_v44 = vmul.u32.u64.low %v2956_v47, %v2951_v33  ;;  %v8716_v17 = vmul.u32.u64.high %v2956_v47, %v2951_v33, %v8715_v44  ;;  %v1622_v18 = vsub.s32 0, %v8704_v20 }
 0x1f9   :  { %6885 = vrcp.f32 %v8572_v7  ;;  %v12008_v27 = vand.u32 2147483647, %v8616_v12  ;;  %v2947_v2 = vsel %vm2941_vm7, %v2944_v46, %v2946_v60  ;;  %v3026_v63 = vand.u32 31, %v3024_v23 }
 0x1fa   :  { %v8722_v30 = vmul.u32.u64.low %v2956_v47, %v2955_v57  ;;  %v8723_v41 = vmul.u32.u64.high %v2956_v47, %v2955_v57, %v8722_v30  ;;  %v8727_v54 = vsel %vm1350_vm9, %v1432_v15, %v1431_v13  ;;  %v1508_v10 = vadd.s32 %v8489_v31, %v8500_v25 }
 0x1fb   :  { %v8733_v43 = vsel %vm8698_vm5, 0, %v1539_v8  ;;  %6887 = vrcp.f32 %v8616_v12  ;;  %v8736_v21 = vsel %vm6523_vm12, 0, %v6522_v51  ;;  %v2966_v60 = vadd.s32 1, %v8716_v17 }
 0x1fc   :  { %v3027_v53 = vsub.s32 32, %v3026_v63  ;;  %v6525_v49 = vmin.u32 %v1622_v18, %v8704_v20  ;;  %v2963_v13 = vmul.u32 %v2956_v47, %v2947_v2  ;;  %v3019_v15 = vand.u32 8388607, %v12008_v27 }
 0x1fd   :  { %v3119_v31 = vand.u32 2139095040, %v8675_v50  ;;  %vm2965_vm9 = vc.u32 %v8723_v41, %v8715_v44  ;;  %v8746_v25 = vshrl.u32 %v3024_v23, 5  ;;  %v3029_v51 = vshll.u32 %v12259_v39, %v3026_v63 }
 0x1fe   :  { %v3030_v1 = vshrl.u32 %v12269_v36, %v3027_v53  ;;  %v2967_v26 = vsel %vm2965_vm9, %v2966_v60, %v8716_v17  ;;  %v3032_v46 = vshll.u32 %v12269_v36, %v3026_v63  ;;  %v3033_v47 = vshrl.u32 %v12254_v11, %v3027_v53 }
 0x1ff   :  { %v3035_v6 = vshll.u32 %v12254_v11, %v3026_v63  ;;  %v2968_v24 = vadd.s32 %v2967_v26, %v2963_v13  ;;  %v3036_v33 = vshrl.u32 %v12255_v3, %v3027_v53  ;;  %v3038_v8 = vshll.u32 %v12255_v3, %v3026_v63 }
 0x200   :  { %v3039_v23 = vshrl.u32 %v12256_v56, %v3027_v53  ;;  %v3031_v57 = vor.u32 %v3030_v1, %v3029_v51  ;;  %v3034_v18 = vor.u32 %v3033_v47, %v3032_v46  ;;  %v3041_v2 = vshll.u32 %v12256_v56, %v3026_v63 }
 0x201   :  { %v3042_v30 = vshrl.u32 %v12257_v4, %v3027_v53  ;;  %v2969_v17 = vadd.s32 536870912, %v2968_v24  ;;  %v3037_v60 = vor.u32 %v3036_v33, %v3035_v6  ;;  %v3120_v34 = vshrl.u32 %v3119_v31, 23 }
 0x202   :  { %v3040_v27 = vor.u32 %v3039_v23, %v3038_v8  ;;  %v1524_v13 = vsub.s32 32, %v8736_v21  ;;  %v1525_v26 = vshll.u32 %v8629_v52, %v8736_v21  ;;  %v1528_v16 = vsub.s32 4294967266, %v8736_v21 }
 0x203   :  { %v8759_v28 = vpop.eup %6885  ;;  %v3043_v19 = vor.u32 %v3042_v30, %v3041_v2  ;;  %v8765_v51 = vshrl.u32 %v2969_v17, 30  ;;  %v3020_v1 = vor.u32 8388608, %v3019_v15  ;;  %vm3044_vm14 = vcmp.lt.s32.totalorder %v8746_v25, 1 }
 0x204   :  { %12384 = vst [vmem:[#allocation97_spill] sm:$0xff] %v8759_v28  ;;  %vm3047_vm13 = vcmp.lt.s32.totalorder %v8746_v25, 4  ;;  %v1624_v31 = vclz %v6525_v49  ;;  %vm3046_vm3 = vcmp.lt.s32.totalorder %v8746_v25, 3  ;;  %v3052_v46 = vsel %vm3044_vm14, %v3031_v57, %v3034_v18 }
 0x205   :  { %v8769_v63 = vpop.eup %6887  ;;  %v3053_v47 = vsel %vm3047_vm13, %v3040_v27, 920167782  ;;  %v2971_v52 = vshll.u32 %v8765_v51, 30  ;;  %v3056_v15 = vsel %vm3044_vm14, %v3034_v18, %v3037_v60  ;;  %v6584_v6 = vadd.s32 4294967169, %v3120_v34 }
 0x206   :  { %12385 = vst [vmem:[#allocation98_spill] sm:$0xff] %v8769_v63  ;;  %v3054_v21 = vsel %vm3046_vm3, %v3037_v60, %v3053_v47  ;;  %v1526_v33 = vshrl.u32 %v1508_v10, %v1524_v13  ;;  %vm3045_vm4 = vcmp.lt.s32.totalorder %v8746_v25, 2  ;;  %v3049_v8 = vsel %vm3047_vm13, %v3037_v60, 2102212464 }
 0x207   :  { %v3057_v49 = vsel %vm3047_vm13, %v3043_v19, 1326507024  ;;  %v8780_v23 = vsub.s32 %v2968_v24, %v2971_v52  ;;  %v3028_v2 = vshrl.u32 %v12259_v39, %v3027_v53  ;;  %v3055_v30 = vsel %vm3045_vm4, %v3052_v46, %v3054_v21 }
 0x208   :  { %v3058_v17 = vsel %vm3046_vm3, %v3040_v27, %v3057_v49  ;;  %v1529_v47 = vadd.s32 127, %v1528_v16  ;;  %v6526_v63 = vadd.s32 4294967294, %v1624_v31  ;;  %v3060_v10 = vshll.u32 %v3020_v1, 8 }
 0x209   :  { %v3059_v34 = vsel %vm3045_vm4, %v3056_v15, %v3058_v17  ;;  %v2974_v13 = vsub.s32 0, %v8780_v23  ;;  %v3048_v19 = vsel %vm3044_vm14, %v3028_v2, %v3031_v57  ;;  %v3050_v53 = vsel %vm3046_vm3, %v3034_v18, %v3049_v8 }
 0x20a   :  { %v3126_v24 = vadd.s32 1, %v6584_v6  ;;  %v8794_v60 = vmul.u32.u64.low %v3060_v10, %v3059_v34  ;;  %v8795_v46 = vmul.u32.u64.high %v3060_v10, %v3059_v34, %v8794_v60  ;;  %v1545_v16 = vadd.s32 3, %v8733_v43 }
 0x20b   :  { %v8797_v52 = vmul.u32.u64.low %v3060_v10, %v3055_v30  ;;  %v8798_v27 = vmul.u32.u64.high %v3060_v10, %v3055_v30, %v8797_v52  ;;  %6889 = vrcp.f32 %v8675_v50  ;;  %v6577_v1 = vmin.u32 %v2974_v13, %v8780_v23 }
 0x20c   :  { %vm3127_vm11 = vcmp.gt.s32.totalorder %v3126_v24, 0  ;;  %v1436_v57 = vsel %vm8592_vm1, %v8242_v37, %v8727_v54  ;;  %v8808_v18 = vor.u32 %v1526_v33, %v1525_v26  ;;  %v3051_v31 = vsel %vm3045_vm4, %v3048_v19, %v3050_v53 }
 0x20d   :  { %v3128_v21 = vsel %vm3127_vm11, %v3126_v24, 0  ;;  %v1530_v15 = vshll.u32 %v1529_v47, 23  ;;  %vm6527_vm0 = vcmp.lt.s32.totalorder %v6526_v63, 0  ;;  %v2976_v6 = vclz %v6577_v1 }
 0x20e   :  { %v3130_v8 = vand.u32 31, %v3128_v21  ;;  %6891 = vrcp.f32 %v8692_v59  ;;  %vm3069_vm6 = vc.u32 %v8795_v46, %v8797_v52  ;;  %v3070_v49 = vadd.s32 1, %v8798_v27 }
 0x20f   :  { %v12386_v32 = vand.u32 2147483647, %v8675_v50  ;;  %6893 = vcosq.f32 %v1436_v57  ;;  %v8818_v26 = vand.u32 3, %v1545_v16  ;;  %v3067_v25 = vmul.u32 %v3060_v10, %v3051_v31 }
 0x210   :  { %v3131_v33 = vsub.s32 32, %v3130_v8  ;;  %6895 = vsinq.f32 %v1436_v57  ;;  %v8820_v2 = vsel %vm6527_vm0, 0, %v6526_v63  ;;  %v6578_v30 = vadd.s32 4294967294, %v2976_v6 }
 0x211   :  { %v3123_v54 = vand.u32 8388607, %v12386_v32  ;;  %12387 = vst [vmem:[#allocation99_spill] sm:$0xff] %v8818_v26  ;;  %v3071_v17 = vsel %vm3069_vm6, %v3070_v49, %v8798_v27  ;;  %v8823_v47 = vor.u32 4788187, %v1530_v15  ;;  %v1612_v13 = vadd.s32 %v8600_v22, %v8606_v40 }
 0x212   :  { %v3072_v19 = vadd.s32 %v3071_v17, %v3067_v25  ;;  %v3134_v24 = vshrl.u32 %v12269_v36, %v3131_v33  ;;  %v3137_v10 = vshrl.u32 %v12254_v11, %v3131_v33  ;;  %v3143_v60 = vshrl.u32 %v12256_v56, %v3131_v33 }
 0x213   :  { %v3124_v53 = vor.u32 8388608, %v3123_v54  ;;  %v1628_v63 = vsub.s32 32, %v8820_v2  ;;  %v3140_v27 = vshrl.u32 %v12255_v3, %v3131_v33  ;;  %v3223_v1 = vand.u32 2139095040, %v8692_v59 }
 0x214   :  { %v3073_v16 = vadd.s32 536870912, %v3072_v19  ;;  %vm6579_vm1 = vcmp.lt.s32.totalorder %v6578_v30, 0  ;;  %v3133_v57 = vshll.u32 %v12259_v39, %v3130_v8  ;;  %v3136_v22 = vshll.u32 %v12269_v36, %v3130_v8 }
 0x215   :  { %v3142_v40 = vshll.u32 %v12255_v3, %v3130_v8  ;;  %v8837_v31 = vpop.eup %6889  ;;  %v3129_v6 = vshrl.u32 %v3128_v21, 5  ;;  %v3139_v49 = vshll.u32 %v12254_v11, %v3130_v8  ;;  %v3146_v32 = vshrl.u32 %v12257_v4, %v3131_v33 }
 0x216   :  { %12388 = vst [vmem:[#allocation100_spill] sm:$0xff] %v8837_v31  ;;  %v8839_v15 = vshrl.u32 %v3073_v16, 30  ;;  %v3135_v54 = vor.u32 %v3134_v24, %v3133_v57  ;;  %v3138_v25 = vor.u32 %v3137_v10, %v3136_v22  ;;  %v3145_v34 = vshll.u32 %v12256_v56, %v3130_v8 }
 0x217   :  { %v3144_v17 = vor.u32 %v3143_v60, %v3142_v40  ;;  %v1532_v28 = vand.u32 2147483647, %v8823_v47  ;;  %v8845_v9 = vsel %vm6579_vm1, 0, %v6578_v30  ;;  %v3141_v26 = vor.u32 %v3140_v27, %v3139_v49 }
 0x218   :  { %v3075_v37 = vshll.u32 %v8839_v15, 30  ;;  %v8848_v31 = vpop.eup %6891  ;;  %v1630_v16 = vshrl.u32 %v1612_v13, %v1628_v63  ;;  %v1632_v21 = vsub.s32 4294967266, %v8820_v2  ;;  %v3147_v42 = vor.u32 %v3146_v32, %v3145_v34 }
 0x219   :  { %12389 = vst [vmem:[#allocation101_spill] sm:$0xff] %v8848_v31  ;;  %v3224_v0 = vshrl.u32 %v3223_v1, 23  ;;  %v8851_v38 = vpop.eup %6893  ;;  %vm3148_vm10 = vcmp.lt.s32.totalorder %v3129_v6, 1  ;;  %vm3151_vm8 = vcmp.lt.s32.totalorder %v3129_v6, 4  ;;  %v3164_v8 = vshll.u32 %v3124_v53, 8 }
 0x21a   :  { %12390 = vst [vmem:[#allocation102_spill] sm:$0xff] %v8851_v38  ;;  %v8853_v24 = vsub.s32 %v3072_v19, %v3075_v37  ;;  %v8855_v47 = vpop.eup %6895  ;;  %v2984_v30 = vsub.s32 4294967266, %v8845_v9  ;;  %v3132_v10 = vshrl.u32 %v12259_v39, %v3131_v33  ;;  %v3156_v60 = vsel %vm3148_vm10, %v3135_v54, %v3138_v25 }
 0x21b   :  { %12391 = vst [vmem:[#allocation103_spill] sm:$0xff] %v8855_v47  ;;  %v3157_v13 = vsel %vm3151_vm8, %v3144_v17, 920167782  ;;  %vm3149_vm2 = vcmp.lt.s32.totalorder %v3129_v6, 2  ;;  %vm3150_vm7 = vcmp.lt.s32.totalorder %v3129_v6, 3  ;;  %vm1558_vm12 = vcmp.lt.s32.totalorder %v8420_v55, 0 }
 0x21c   :  { %v3078_v63 = vsub.s32 0, %v8853_v24  ;;  %v3153_v34 = vsel %vm3151_vm8, %v3141_v26, 2102212464  ;;  %v3158_v37 = vsel %vm3150_vm7, %v3141_v26, %v3157_v13  ;;  %v3160_v19 = vsel %vm3148_vm10, %v3138_v25, %v3141_v26 }
 0x21d   :  { %v3161_v53 = vsel %vm3151_vm8, %v3147_v42, 1326507024  ;;  %v6588_v27 = vadd.s32 4294967169, %v3224_v0  ;;  %v1633_v1 = vadd.s32 127, %v1632_v21  ;;  %v3152_v33 = vsel %vm3148_vm10, %v3132_v10, %v3135_v54 }
 0x21e   :  { %v6581_v57 = vmin.u32 %v3078_v63, %v8853_v24  ;;  %v3159_v22 = vsel %vm3149_vm2, %v3156_v60, %v3158_v37  ;;  %v3154_v40 = vsel %vm3150_vm7, %v3138_v25, %v3153_v34  ;;  %v3162_v49 = vsel %vm3150_vm7, %v3144_v17, %v3161_v53 }
 0x21f   :  { %v8866_v32 = vmul.u32.u64.low %v3164_v8, %v3159_v22  ;;  %v8867_v31 = vmul.u32.u64.high %v3164_v8, %v3159_v22, %v8866_v32  ;;  %v2985_v38 = vadd.s32 127, %v2984_v30  ;;  %v3163_v13 = vsel %vm3149_vm2, %v3160_v19, %v3162_v49 }
 0x220   :  { %v3080_v47 = vclz %v6581_v57  ;;  %v3230_v26 = vadd.s32 1, %v6588_v27  ;;  %v1629_v0 = vshll.u32 %v8704_v20, %v8820_v2  ;;  %v1642_v42 = vsub.s32 4, %v8667_v48 }
 0x221   :  { %v8874_v21 = vmul.u32.u64.low %v3164_v8, %v3163_v13  ;;  %v8875_v54 = vmul.u32.u64.high %v3164_v8, %v3163_v13, %v8874_v21  ;;  %v12392_v25 = vcvt.s32.f32 %v8808_v18  ;;  %v3155_v60 = vsel %vm3149_vm2, %v3152_v33, %v3154_v40 }
 0x222   :  { %v6582_v10 = vadd.s32 4294967294, %v3080_v47  ;;  %vm3231_vm9 = vcmp.gt.s32.totalorder %v3230_v26, 0  ;;  %v8882_v30 = vor.u32 %v1630_v16, %v1629_v0  ;;  %v1634_v63 = vshll.u32 %v1633_v1, 23 }
 0x223   :  { %v8879_v17 = vmul.f32 %v12392_v25, %v1532_v28  ;;  %v3174_v34 = vadd.s32 1, %v8867_v31  ;;  %v3232_v37 = vsel %vm3231_vm9, %v3230_v26, 0  ;;  %v2980_v20 = vsub.s32 32, %v8845_v9 }
 0x224   :  { %v2986_v2 = vshll.u32 %v2985_v38, 23  ;;  %v12026_v19 = vand.u32 2147483647, %v8692_v59  ;;  %v3234_v53 = vand.u32 31, %v3232_v37  ;;  %v8888_v18 = vand.u32 3, %v8733_v43 }
 0x225   :  { %vm6583_vm14 = vcmp.lt.s32.totalorder %v6582_v10, 0  ;;  %v3171_v28 = vmul.u32 %v3164_v8, %v3155_v60  ;;  %vm3173_vm13 = vc.u32 %v8875_v54, %v8866_v32  ;;  %v8896_v16 = vsel %vm1558_vm12, %v1642_v42, %v8667_v48 }
 0x226   :  { %12393 = vst [vmem:[#allocation104_spill] sm:$0xff] %v8888_v18  ;;  %v2964_v38 = vadd.s32 %v8715_v44, %v8723_v41  ;;  %v3175_v47 = vsel %vm3173_vm13, %v3174_v34, %v8867_v31  ;;  %v8901_v27 = vor.u32 4788187, %v1634_v63  ;;  %v1638_v43 = vcvt.s32.f32 %v8882_v30 }
 0x227   :  { %v3176_v8 = vadd.s32 %v3175_v47, %v3171_v28  ;;  %v3235_v1 = vsub.s32 32, %v3234_v53  ;;  %v8904_v33 = vor.u32 4788187, %v2986_v2  ;;  %v8906_v22 = vsel %vm6583_vm14, 0, %v6582_v10 }
 0x228   :  { %v2982_v57 = vshrl.u32 %v2964_v38, %v2980_v20  ;;  %v3227_v48 = vand.u32 8388607, %v12026_v19  ;;  %v3233_v49 = vshrl.u32 %v3232_v37, 5  ;;  %v3237_v31 = vshll.u32 %v12259_v39, %v3234_v53 }
 0x229   :  { %v3177_v40 = vadd.s32 536870912, %v3176_v8  ;;  %v3238_v44 = vshrl.u32 %v12269_v36, %v3235_v1  ;;  %v3241_v41 = vshrl.u32 %v12254_v11, %v3235_v1  ;;  %v3240_v13 = vshll.u32 %v12269_v36, %v3234_v53 }
 0x22a   :  { %v3244_v26 = vshrl.u32 %v12255_v3, %v3235_v1  ;;  %v3247_v0 = vshrl.u32 %v12256_v56, %v3235_v1  ;;  %v3088_v42 = vsub.s32 4294967266, %v8906_v22  ;;  %v3243_v25 = vshll.u32 %v12254_v11, %v3234_v53 }
 0x22b   :  { %v8917_v21 = vshrl.u32 %v3177_v40, 30  ;;  %v3246_v10 = vshll.u32 %v12255_v3, %v3234_v53  ;;  %v2981_v60 = vshll.u32 %v8780_v23, %v8845_v9  ;;  %v3239_v30 = vor.u32 %v3238_v44, %v3237_v31 }
 0x22c   :  { %v3242_v63 = vor.u32 %v3241_v41, %v3240_v13  ;;  %v3249_v34 = vshll.u32 %v12256_v56, %v3234_v53  ;;  %v3245_v20 = vor.u32 %v3244_v26, %v3243_v25  ;;  %v3250_v28 = vshrl.u32 %v12257_v4, %v3235_v1 }
 0x22d   :  { %v3179_v37 = vshll.u32 %v8917_v21, 30  ;;  %v3248_v2 = vor.u32 %v3247_v0, %v3246_v10  ;;  %v1636_v38 = vand.u32 2147483647, %v8901_v27  ;;  %v2983_v47 = vor.u32 %v2982_v57, %v2981_v60 }
 0x22e   :  { %v3068_v40 = vadd.s32 %v8797_v52, %v8795_v46  ;;  %v3228_v19 = vor.u32 8388608, %v3227_v48  ;;  %v2988_v6 = vand.u32 2147483647, %v8904_v33  ;;  %v3089_v9 = vadd.s32 127, %v3088_v42 }
 0x22f   :  { %v3251_v23 = vor.u32 %v3250_v28, %v3249_v34  ;;  %vm3252_vm3 = vcmp.lt.s32.totalorder %v3233_v49, 1  ;;  %v3084_v53 = vsub.s32 32, %v8906_v22  ;;  %v3236_v44 = vshrl.u32 %v12259_v39, %v3235_v1  ;;  %v8942_v1 = vpop.permute.xlu0 %139 }
 0x230   :  { %vm3255_vm4 = vcmp.lt.s32.totalorder %v3233_v49, 4  ;;  %v3260_v41 = vsel %vm3252_vm3, %v3239_v30, %v3242_v63  ;;  %v12394_v31 = vand.u32 2147483647, %v8420_v55  ;;  %v8939_v46 = vsub.s32 %v3176_v8, %v3179_v37 }
 0x231   :  { %vm3254_vm0 = vcmp.lt.s32.totalorder %v3233_v49, 3  ;;  %v3257_v52 = vsel %vm3255_vm4, %v3245_v20, 2102212464  ;;  %v3261_v57 = vsel %vm3255_vm4, %v3248_v2, 920167782  ;;  %vm3253_vm6 = vcmp.lt.s32.totalorder %v3233_v49, 2 }
 0x232   :  { %vm8935_vm11 = vcmp.le.f32.partialorder %v12394_v31, 0.7853982  ;;  %v3262_v33 = vsel %vm3254_vm0, %v3245_v20, %v3261_v57  ;;  %v3264_v48 = vsel %vm3252_vm3, %v3242_v63, %v3245_v20  ;;  %v3268_v13 = vshll.u32 %v3228_v19, 8 }
 0x233   :  { %v3090_v26 = vshll.u32 %v3089_v9, 23  ;;  %v3256_v0 = vsel %vm3252_vm3, %v3236_v44, %v3239_v30  ;;  %v3263_v42 = vsel %vm3253_vm6, %v3260_v41, %v3262_v33  ;;  %v3265_v25 = vsel %vm3255_vm4, %v3251_v23, 1326507024 }
 0x234   :  { %v3258_v10 = vsel %vm3254_vm0, %v3242_v63, %v3257_v52  ;;  %v3266_v60 = vsel %vm3254_vm0, %v3248_v2, %v3265_v25  ;;  %v8946_v8 = vmul.u32.u64.low %v3268_v13, %v3263_v42  ;;  %v8947_v34 = vmul.u32.u64.high %v3268_v13, %v3263_v42, %v8946_v8 }
 0x235   :  { %v12397_v37 = vand.u32 2147483647, %v8572_v7  ;;  %v3086_v19 = vshrl.u32 %v3068_v40, %v3084_v53  ;;  %v3182_v20 = vsub.s32 0, %v8939_v46  ;;  %v3267_v30 = vsel %vm3253_vm6, %v3264_v48, %v3266_v60 }
 0x236   :  { %v8960_v9 = vmul.f32 %v8942_v1, %v7170_v61  ;;  %v1639_v63 = vmul.f32 %v1638_v43, %v1636_v38  ;;  %v2994_v2 = vsub.s32 4, %v8765_v51  ;;  %v2990_v41 = vcvt.s32.f32 %v2983_v47 }
 0x237   :  { %vm8952_vm1 = vcmp.le.f32.partialorder %v12397_v37, 0.7853982  ;;  %v8963_v23 = vmul.u32.u64.low %v3268_v13, %v3267_v30  ;;  %v8964_v44 = vmul.u32.u64.high %v3268_v13, %v3267_v30, %v8963_v23  ;;  %v3085_v31 = vshll.u32 %v8853_v24, %v8906_v22 }
 0x238   :  { %12400 = vst [vmem:[#allocation105_spill] sm:$0xff] %v8960_v9  ;;  %v3091_v52 = vor.u32 4788187, %v3090_v26  ;;  %v3259_v40 = vsel %vm3253_vm6, %v3256_v0, %v3258_v10  ;;  %v12401_v53 = vxor.u32 2147483648, %v8879_v17  ;;  %vm2910_vm10 = vcmp.lt.s32.totalorder %v8572_v7, 0 }
 0x239   :  { %vm3014_vm8 = vcmp.lt.s32.totalorder %v8616_v12, 0  ;;  %v3278_v43 = vadd.s32 1, %v8947_v34  ;;  %v2991_v38 = vmul.f32 %v2990_v41, %v2988_v6  ;;  %v3087_v47 = vor.u32 %v3086_v19, %v3085_v31 }
 0x23a   :  { %v1537_v61 = vsel %vm1454_vm15, %v12401_v53, %v8879_v17  ;;  %v6585_v57 = vmin.u32 %v3182_v20, %v8939_v46  ;;  %v2495_v24 = vand.u32 2139095040, %v8960_v9  ;;  %v1640_v22 = vxor.u32 2147483648, %v1639_v63 }
 0x23b   :  { %v1645_v49 = vsel %vm8935_vm11, 0, %v8896_v16  ;;  %v3275_v33 = vmul.u32 %v3268_v13, %v3259_v40  ;;  %vm3277_vm15 = vc.u32 %v8964_v44, %v8946_v8  ;;  %v2995_v17 = vsel %vm2910_vm10, %v2994_v2, %v8765_v51 }
 0x23c   :  { %v3092_v48 = vand.u32 2147483647, %v3091_v52  ;;  %v3098_v6 = vsub.s32 4, %v8839_v15  ;;  %v3279_v26 = vsel %vm3277_vm15, %v3278_v43, %v8947_v34  ;;  %v1540_v0 = vsel %vm8698_vm5, %v8349_v29, %v1537_v61 }
 0x23d   :  { %v12402_v42 = vand.u32 2147483647, %v8616_v12  ;;  %v3280_v13 = vadd.s32 %v3279_v26, %v3275_v33  ;;  %v2496_v25 = vshrl.u32 %v2495_v24, 23  ;;  %v1649_v10 = vadd.s32 3, %v1645_v49 }
 0x23e   :  { %v2992_v60 = vxor.u32 2147483648, %v2991_v38  ;;  %v3094_v51 = vcvt.s32.f32 %v3087_v47  ;;  %v3184_v37 = vclz %v6585_v57  ;;  %v1641_v19 = vsel %vm1558_vm12, %v1640_v22, %v1639_v63 }
 0x23f   :  { %vm8994_vm2 = vcmp.le.f32.partialorder %v12402_v42, 0.7853982  ;;  %v2997_v34 = vsel %vm8952_vm1, 0, %v2995_v17  ;;  %vm3118_vm5 = vcmp.lt.s32.totalorder %v8675_v50, 0  ;;  %v3281_v45 = vadd.s32 536870912, %v3280_v13 }
 0x240   :  { %v6560_v20 = vadd.s32 4294967169, %v2496_v25  ;;  %6897 = vcosq.f32 %v1540_v0  ;;  %v3095_v30 = vmul.f32 %v3094_v51, %v3092_v48  ;;  %v3099_v2 = vsel %vm3014_vm8, %v3098_v6, %v8839_v15 }
 0x241   :  { %v9008_v23 = vmul.f32 %v8942_v1, %v7174_v62  ;;  %6899 = vsinq.f32 %v1540_v0  ;;  %v9010_v41 = vand.u32 3, %v1645_v49  ;;  %v9012_v63 = vshrl.u32 %v3281_v45, 30 }
 0x242   :  { %v2502_v31 = vadd.s32 1, %v6560_v20  ;;  %v1644_v52 = vsel %vm8935_vm11, %v8420_v55, %v1641_v19  ;;  %v2993_v40 = vsel %vm2910_vm10, %v2992_v60, %v2991_v38  ;;  %v3001_v53 = vadd.s32 3, %v2997_v34 }
 0x243   :  { %12405 = vst [vmem:[#allocation106_spill] sm:$0xff] %v9008_v23  ;;  %12406 = vst [vmem:[#allocation107_spill] sm:$0xff] %v9010_v41  ;;  %v6586_v61 = vadd.s32 4294967294, %v3184_v37  ;;  %v9021_v15 = vsel %vm8994_vm2, 0, %v3099_v2  ;;  %v3283_v62 = vshll.u32 %v9012_v63, 30  ;;  %v3096_v47 = vxor.u32 2147483648, %v3095_v30 }
 0x244   :  { %v12027_v43 = vand.u32 2147483647, %v8960_v9  ;;  %vm2503_vm7 = vcmp.gt.s32.totalorder %v2502_v31, 0  ;;  %v3202_v57 = vsub.s32 4, %v8917_v21  ;;  %v2599_v27 = vand.u32 2139095040, %v9008_v23 }
 0x245   :  { %v2504_v24 = vsel %vm2503_vm7, %v2502_v31, 0  ;;  %6901 = vcosq.f32 %v1644_v52  ;;  %v2996_v38 = vsel %vm8952_vm1, %v8572_v7, %v2993_v40  ;;  %v12407_v22 = vand.u32 2147483647, %v8675_v50 }
 0x246   :  { %v9036_v33 = vsub.s32 %v3280_v13, %v3283_v62  ;;  %v2506_v17 = vand.u32 31, %v2504_v24  ;;  %6903 = vsinq.f32 %v1644_v52  ;;  %v9038_v48 = vand.u32 3, %v1649_v10 }
 0x247   :  { %vm9032_vm12 = vcmp.le.f32.partialorder %v12407_v22, 0.7853982  ;;  %v9040_v6 = vand.u32 3, %v3001_v53  ;;  %vm6587_vm9 = vcmp.lt.s32.totalorder %v6586_v61, 0  ;;  %v9043_v26 = vadd.s32 3, %v9021_v15 }
 0x248   :  { %v9045_v28 = vand.u32 3, %v2997_v34  ;;  %v2499_v0 = vand.u32 8388607, %v12027_v43  ;;  %v2507_v42 = vsub.s32 32, %v2506_v17  ;;  %6905 = vcosq.f32 %v2996_v38 }
 0x249   :  { %12410 = vst [vmem:[#allocation108_spill] sm:$0xff] %v9040_v6  ;;  %v3097_v13 = vsel %vm3014_vm8, %v3096_v47, %v3095_v30  ;;  %v3203_v25 = vsel %vm3118_vm5, %v3202_v57, %v8917_v21  ;;  %v2600_v10 = vshrl.u32 %v2599_v27, 23  ;;  %v9054_v60 = vsel %vm6587_vm9, 0, %v6586_v61 }
 0x24a   :  { %12411 = vst [vmem:[#allocation109_spill] sm:$0xff] %v9045_v28  ;;  %v3286_v51 = vsub.s32 0, %v9036_v33  ;;  %v2509_v37 = vshll.u32 %v12259_v39, %v2506_v17  ;;  %v2510_v19 = vshrl.u32 %v12269_v36, %v2507_v42  ;;  %v9059_v34 = vpop.eup %6897  ;;  %v2512_v45 = vshll.u32 %v12269_v36, %v2506_v17 }
 0x24b   :  { %v2513_v20 = vshrl.u32 %v12254_v11, %v2507_v42  ;;  %v2515_v30 = vshll.u32 %v12254_v11, %v2506_v17  ;;  %v2516_v2 = vshrl.u32 %v12255_v3, %v2507_v42  ;;  %v9065_v21 = vpop.eup %6899  ;;  %v2500_v31 = vor.u32 8388608, %v2499_v0 }
 0x24c   :  { %v2505_v52 = vshrl.u32 %v2504_v24, 5  ;;  %v2518_v40 = vshll.u32 %v12255_v3, %v2506_v17  ;;  %v2519_v53 = vshrl.u32 %v12256_v56, %v2507_v42  ;;  %v2511_v61 = vor.u32 %v2510_v19, %v2509_v37 }
 0x24d   :  { %v2514_v62 = vor.u32 %v2513_v20, %v2512_v45  ;;  %v2517_v47 = vor.u32 %v2516_v2, %v2515_v30  ;;  %v6564_v57 = vadd.s32 4294967169, %v2600_v10  ;;  %v6589_v27 = vmin.u32 %v3286_v51, %v9036_v33 }
 0x24e   :  { %v2520_v22 = vor.u32 %v2519_v53, %v2518_v40  ;;  %v2521_v43 = vshll.u32 %v12256_v56, %v2506_v17  ;;  %v2522_v28 = vshrl.u32 %v12257_v4, %v2507_v42  ;;  %6907 = vsinq.f32 %v2996_v38 }
 0x24f   :  { %v3100_v24 = vsel %vm8994_vm2, %v8616_v12, %v3097_v13  ;;  %v3192_v0 = vsub.s32 4294967266, %v9054_v60  ;;  %v9078_v37 = vsel %vm9032_vm12, 0, %v3203_v25  ;;  %v9080_v19 = vpop.eup %6901  ;;  %vm2524_vm14 = vcmp.lt.s32.totalorder %v2505_v52, 1 }
 0x250   :  { %v2523_v10 = vor.u32 %v2522_v28, %v2521_v43  ;;  %vm2527_vm13 = vcmp.lt.s32.totalorder %v2505_v52, 4  ;;  %v9083_v51 = vpop.eup %6903  ;;  %v2532_v45 = vsel %vm2524_vm14, %v2511_v61, %v2514_v62  ;;  %v2606_v13 = vadd.s32 1, %v6564_v57 }
 0x251   :  { %v2529_v38 = vsel %vm2527_vm13, %v2517_v47, 2102212464  ;;  %v2533_v16 = vsel %vm2527_vm13, %v2520_v22, 920167782  ;;  %v3288_v20 = vclz %v6589_v27  ;;  %v2508_v30 = vshrl.u32 %v12259_v39, %v2507_v42 }
 0x252   :  { %vm2526_vm3 = vcmp.lt.s32.totalorder %v2505_v52, 3  ;;  %v2540_v25 = vshll.u32 %v2500_v31, 8  ;;  %v9087_v2 = vpop.eup %6905  ;;  %vm2525_vm4 = vcmp.lt.s32.totalorder %v2505_v52, 2  ;;  %v2536_v28 = vsel %vm2524_vm14, %v2514_v62, %v2517_v47 }
 0x253   :  { %12412 = vst [vmem:[#allocation110_spill] sm:$0xff] %v9087_v2  ;;  %v2534_v43 = vsel %vm2526_vm3, %v2517_v47, %v2533_v16  ;;  %v2537_v40 = vsel %vm2527_vm13, %v2523_v10, 1326507024  ;;  %v2528_v53 = vsel %vm2524_vm14, %v2508_v30, %v2511_v61  ;;  %v2530_v17 = vsel %vm2526_vm3, %v2514_v62, %v2529_v38 }
 0x254   :  { %v2535_v12 = vsel %vm2525_vm4, %v2532_v45, %v2534_v43  ;;  %v2538_v7 = vsel %vm2526_vm3, %v2520_v22, %v2537_v40  ;;  %vm2607_vm11 = vcmp.gt.s32.totalorder %v2606_v13, 0  ;;  %6909 = vcosq.f32 %v3100_v24 }
 0x255   :  { %v2539_v57 = vsel %vm2525_vm4, %v2536_v28, %v2538_v7  ;;  %v9093_v27 = vmul.u32.u64.low %v2540_v25, %v2535_v12  ;;  %v9094_v6 = vmul.u32.u64.high %v2540_v25, %v2535_v12, %v9093_v27  ;;  %v12413_v47 = vand.u32 2147483647, %v9008_v23 }
 0x256   :  { %v9097_v42 = vmul.u32.u64.low %v2540_v25, %v2539_v57  ;;  %v9098_v31 = vmul.u32.u64.high %v2540_v25, %v2539_v57, %v9097_v42  ;;  %v6590_v16 = vadd.s32 4294967294, %v3288_v20  ;;  %v9104_v61 = vmul.f32 %v8942_v1, %v12375_v58 }
 0x257   :  { %v2603_v10 = vand.u32 8388607, %v12413_v47  ;;  %v2531_v62 = vsel %vm2525_vm4, %v2528_v53, %v2530_v17  ;;  %v2608_v7 = vsel %vm2607_vm11, %v2606_v13, 0  ;;  %6911 = vsinq.f32 %v3100_v24 }
 0x258   :  { %12414 = vst [vmem:[#allocation111_spill] sm:$0xff] %v9104_v61  ;;  %v3172_v12 = vadd.s32 %v8866_v32, %v8875_v54  ;;  %v9110_v22 = vadd.s32 3, %v9078_v37  ;;  %v2610_v38 = vand.u32 31, %v2608_v7  ;;  %v9112_v45 = vpop.eup %6907  ;;  %v3188_v30 = vsub.s32 32, %v9054_v60 }
 0x259   :  { %12415 = vst [vmem:[#allocation112_spill] sm:$0xff] %v9112_v45  ;;  %v3193_v20 = vadd.s32 127, %v3192_v0  ;;  %v9117_v58 = vadd.s32 %v8946_v8, %v8964_v44  ;;  %v2550_v52 = vadd.s32 1, %v9094_v6  ;;  %v2547_v17 = vmul.u32 %v2540_v25, %v2531_v62 }
 0x25a   :  { %vm2549_vm0 = vc.u32 %v9098_v31, %v9093_v27  ;;  %v2604_v32 = vor.u32 8388608, %v2603_v10  ;;  %v2611_v54 = vsub.s32 32, %v2610_v38  ;;  %vm6591_vm6 = vcmp.lt.s32.totalorder %v6590_v16, 0 }
 0x25b   :  { %v2551_v24 = vsel %vm2549_vm0, %v2550_v52, %v9094_v6  ;;  %v2613_v13 = vshll.u32 %v12259_v39, %v2610_v38  ;;  %v2703_v43 = vand.u32 2139095040, %v9104_v61  ;;  %v2616_v8 = vshll.u32 %v12269_v36, %v2610_v38 }
 0x25c   :  { %v2552_v0 = vadd.s32 %v2551_v24, %v2547_v17  ;;  %v2614_v28 = vshrl.u32 %v12269_v36, %v2611_v54  ;;  %v2619_v44 = vshll.u32 %v12254_v11, %v2610_v38  ;;  %v2617_v25 = vshrl.u32 %v12254_v11, %v2611_v54 }
 0x25d   :  { %v2620_v40 = vshrl.u32 %v12255_v3, %v2611_v54  ;;  %v2622_v53 = vshll.u32 %v12255_v3, %v2610_v38  ;;  %v2623_v57 = vshrl.u32 %v12256_v56, %v2611_v54  ;;  %v9132_v6 = vsel %vm6591_vm6, 0, %v6590_v16 }
 0x25e   :  { %v2553_v42 = vadd.s32 536870912, %v2552_v0  ;;  %v2609_v47 = vshrl.u32 %v2608_v7, 5  ;;  %v2615_v10 = vor.u32 %v2614_v28, %v2613_v13  ;;  %v2618_v62 = vor.u32 %v2617_v25, %v2616_v8  ;;  %v9135_v2 = vpop.eup %6909 }
 0x25f   :  { %v2621_v52 = vor.u32 %v2620_v40, %v2619_v44  ;;  %v2624_v17 = vor.u32 %v2623_v57, %v2622_v53  ;;  %v2626_v24 = vshrl.u32 %v12257_v4, %v2611_v54  ;;  %12416 = vst [vmem:[#allocation113_spill] sm:$0xff] %v9135_v2  ;;  %v3189_v45 = vshll.u32 %v8939_v46, %v9054_v60 }
 0x260   :  { %v3190_v41 = vshrl.u32 %v3172_v12, %v3188_v30  ;;  %v9139_v18 = vshrl.u32 %v2553_v42, 30  ;;  %v2625_v55 = vshll.u32 %v12256_v56, %v2610_v38  ;;  %v3194_v16 = vshll.u32 %v3193_v20, 23 }
 0x261   :  { %v3296_v29 = vsub.s32 4294967266, %v9132_v6  ;;  %v2644_v7 = vshll.u32 %v2604_v32, 8  ;;  %v2704_v13 = vshrl.u32 %v2703_v43, 23  ;;  %v9143_v28 = vpop.eup %6911  ;;  %vm2628_vm1 = vcmp.lt.s32.totalorder %v2609_v47, 1 }
 0x262   :  { %v2555_v8 = vshll.u32 %v9139_v18, 30  ;;  %v2627_v44 = vor.u32 %v2626_v24, %v2625_v55  ;;  %vm2631_vm10 = vcmp.lt.s32.totalorder %v2609_v47, 4  ;;  %vm2630_vm8 = vcmp.lt.s32.totalorder %v2609_v47, 3 }
 0x263   :  { %v2633_v46 = vsel %vm2631_vm10, %v2621_v52, 2102212464  ;;  %v2636_v60 = vsel %vm2628_vm1, %v2615_v10, %v2618_v62  ;;  %v2637_v12 = vsel %vm2631_vm10, %v2624_v17, 920167782  ;;  %v2612_v30 = vshrl.u32 %v12259_v39, %v2611_v54 }
 0x264   :  { %v9149_v38 = vsub.s32 %v2552_v0, %v2555_v8  ;;  %vm2629_vm15 = vcmp.lt.s32.totalorder %v2609_v47, 2  ;;  %v2638_v20 = vsel %vm2630_vm8, %v2621_v52, %v2637_v12  ;;  %vm3222_vm2 = vcmp.lt.s32.totalorder %v8692_v59, 0 }
 0x265   :  { %v3292_v55 = vsub.s32 32, %v9132_v6  ;;  %v3297_v32 = vadd.s32 127, %v3296_v29  ;;  %v2639_v43 = vsel %vm2629_vm15, %v2636_v60, %v2638_v20  ;;  %v2640_v25 = vsel %vm2628_vm1, %v2618_v62, %v2621_v52 }
 0x266   :  { %v2558_v40 = vsub.s32 0, %v9149_v38  ;;  %v2632_v53 = vsel %vm2628_vm1, %v2612_v30, %v2615_v10  ;;  %v2634_v0 = vsel %vm2630_vm8, %v2618_v62, %v2633_v46  ;;  %v2641_v54 = vsel %vm2631_vm10, %v2627_v44, 1326507024 }
 0x267   :  { %v2642_v57 = vsel %vm2630_vm8, %v2624_v17, %v2641_v54  ;;  %v9162_v42 = vmul.u32.u64.low %v2644_v7, %v2639_v43  ;;  %v9163_v24 = vmul.u32.u64.high %v2644_v7, %v2639_v43, %v9162_v42  ;;  %v6568_v8 = vadd.s32 4294967169, %v2704_v13 }
 0x268   :  { %v3191_v29 = vor.u32 %v3190_v41, %v3189_v45  ;;  %v3195_v12 = vor.u32 4788187, %v3194_v16  ;;  %v12417_v60 = vand.u32 2147483647, %v8692_v59  ;;  %v9174_v10 = vmul.f32 %v8942_v1, %v12310_v35 }
 0x269   :  { %v2643_v62 = vsel %vm2629_vm15, %v2640_v25, %v2642_v57  ;;  %v3294_v17 = vshrl.u32 %v9117_v58, %v3292_v55  ;;  %v2710_v13 = vadd.s32 1, %v6568_v8  ;;  %v3298_v41 = vshll.u32 %v3297_v32, 23 }
 0x26a   :  { %vm9168_vm7 = vcmp.le.f32.partialorder %v12417_v60, 0.7853982  ;;  %12420 = vst [vmem:[#allocation114_spill] sm:$0xff] %v9174_v10  ;;  %v9178_v44 = vmul.u32.u64.low %v2644_v7, %v2643_v62  ;;  %v9179_v46 = vmul.u32.u64.high %v2644_v7, %v2643_v62, %v9178_v44  ;;  %v3306_v45 = vsub.s32 4, %v9012_v63 }
 0x26b   :  { %v2635_v16 = vsel %vm2629_vm15, %v2632_v53, %v2634_v0  ;;  %v12042_v30 = vand.u32 2147483647, %v9104_v61  ;;  %v3293_v20 = vshll.u32 %v9036_v33, %v9132_v6  ;;  %v6561_v35 = vmin.u32 %v2558_v40, %v9149_v38 }
 0x26c   :  { %v2654_v1 = vadd.s32 1, %v9163_v24  ;;  %vm2711_vm9 = vcmp.gt.s32.totalorder %v2710_v13, 0  ;;  %v3196_v58 = vand.u32 2147483647, %v3195_v12  ;;  %v3198_v55 = vcvt.s32.f32 %v3191_v29 }
 0x26d   :  { %6913 = vrcp.f32 %v8960_v9  ;;  %v2712_v43 = vsel %vm2711_vm9, %v2710_v13, 0  ;;  %v3295_v32 = vor.u32 %v3294_v17, %v3293_v20  ;;  %v2651_v25 = vmul.u32 %v2644_v7, %v2635_v16 }
 0x26e   :  { %vm2653_vm14 = vc.u32 %v9179_v46, %v9162_v42  ;;  %v2714_v47 = vand.u32 31, %v2712_v43  ;;  %v3299_v53 = vor.u32 4788187, %v3298_v41  ;;  %v3307_v33 = vsel %vm3222_vm2, %v3306_v45, %v9012_v63 }
 0x26f   :  { %v2655_v6 = vsel %vm2653_vm14, %v2654_v1, %v9163_v24  ;;  %v2707_v40 = vand.u32 8388607, %v12042_v30  ;;  %v2560_v0 = vclz %v6561_v35  ;;  %v2807_v8 = vand.u32 2139095040, %v9174_v10 }
 0x270   :  { %v2656_v54 = vadd.s32 %v2655_v6, %v2651_v25  ;;  %v2715_v57 = vsub.s32 32, %v2714_v47  ;;  %v9199_v7 = vand.u32 3, %v9043_v26  ;;  %v9202_v29 = vand.u32 3, %v9110_v22 }
 0x271   :  { %v9205_v12 = vand.u32 3, %v9021_v15  ;;  %6915 = vrcp.f32 %v9008_v23  ;;  %v3199_v63 = vmul.f32 %v3198_v55, %v3196_v58  ;;  %v3302_v24 = vcvt.s32.f32 %v3295_v32 }
 0x272   :  { %12421 = vst [vmem:[#allocation115_spill] sm:$0xff] %v9199_v7  ;;  %12422 = vst [vmem:[#allocation116_spill] sm:$0xff] %v9202_v29  ;;  %v9210_v60 = vsel %vm9168_vm7, 0, %v3307_v33  ;;  %v2657_v62 = vadd.s32 536870912, %v2656_v54  ;;  %v3300_v17 = vand.u32 2147483647, %v3299_v53  ;;  %v2718_v26 = vshrl.u32 %v12269_v36, %v2715_v57 }
 0x273   :  { %12423 = vst [vmem:[#allocation117_spill] sm:$0xff] %v9205_v12  ;;  %v2708_v44 = vor.u32 8388608, %v2707_v40  ;;  %v2721_v13 = vshrl.u32 %v12254_v11, %v2715_v57  ;;  %v6562_v22 = vadd.s32 4294967294, %v2560_v0  ;;  %v2724_v15 = vshrl.u32 %v12255_v3, %v2715_v57 }
 0x274   :  { %v9214_v41 = vshrl.u32 %v2657_v62, 30  ;;  %v2808_v45 = vshrl.u32 %v2807_v8, 23  ;;  %v2717_v16 = vshll.u32 %v12259_v39, %v2714_v47  ;;  %v2720_v20 = vshll.u32 %v12269_v36, %v2714_v47 }
 0x275   :  { %v2726_v35 = vshll.u32 %v12255_v3, %v2714_v47  ;;  %v2727_v1 = vshrl.u32 %v12256_v56, %v2715_v57  ;;  %v2713_v55 = vshrl.u32 %v2712_v43, 5  ;;  %v2723_v32 = vshll.u32 %v12254_v11, %v2714_v47 }
 0x276   :  { %v2659_v58 = vshll.u32 %v9214_v41, 30  ;;  %v2730_v25 = vshrl.u32 %v12257_v4, %v2715_v57  ;;  %v2719_v33 = vor.u32 %v2718_v26, %v2717_v16  ;;  %v2722_v6 = vor.u32 %v2721_v13, %v2720_v20 }
 0x277   :  { %v9224_v53 = vpop.eup %6913  ;;  %v2728_v40 = vor.u32 %v2727_v1, %v2726_v35  ;;  %v2729_v0 = vshll.u32 %v12256_v56, %v2714_v47  ;;  %v3200_v8 = vxor.u32 2147483648, %v3199_v63  ;;  %vm6563_vm13 = vcmp.lt.s32.totalorder %v6562_v22, 0 }
 0x278   :  { %12424 = vst [vmem:[#allocation118_spill] sm:$0xff] %v9224_v53  ;;  %v9227_v62 = vsub.s32 %v2656_v54, %v2659_v58  ;;  %v2725_v30 = vor.u32 %v2724_v15, %v2723_v32  ;;  %v3303_v12 = vmul.f32 %v3302_v24, %v3300_v17  ;;  %v2748_v7 = vshll.u32 %v2708_v44, 8 }
 0x279   :  { %v2731_v29 = vor.u32 %v2730_v25, %v2729_v0  ;;  %vm2732_vm3 = vcmp.lt.s32.totalorder %v2713_v55, 1  ;;  %vm2735_vm4 = vcmp.lt.s32.totalorder %v2713_v55, 4  ;;  %v6572_v53 = vadd.s32 4294967169, %v2808_v45 }
 0x27a   :  { %v2662_v2 = vsub.s32 0, %v9227_v62  ;;  %v9233_v13 = vsel %vm6563_vm13, 0, %v6562_v22  ;;  %vm2734_vm11 = vcmp.lt.s32.totalorder %v2713_v55, 3  ;;  %v2740_v47 = vsel %vm2732_vm3, %v2719_v33, %v2722_v6 }
 0x27b   :  { %v9231_v26 = vpop.eup %6915  ;;  %v2741_v54 = vsel %vm2735_vm4, %v2728_v40, 920167782  ;;  %vm2733_vm0 = vcmp.lt.s32.totalorder %v2713_v55, 2  ;;  %v2737_v24 = vsel %vm2735_vm4, %v2725_v30, 2102212464  ;;  %v2716_v44 = vshrl.u32 %v12259_v39, %v2715_v57 }
 0x27c   :  { %12425 = vst [vmem:[#allocation119_spill] sm:$0xff] %v9231_v26  ;;  %v6565_v15 = vmin.u32 %v2662_v2, %v9227_v62  ;;  %v2742_v17 = vsel %vm2734_vm11, %v2725_v30, %v2741_v54  ;;  %v2744_v20 = vsel %vm2732_vm3, %v2722_v6, %v2725_v30  ;;  %v2745_v45 = vsel %vm2735_vm4, %v2731_v29, 1326507024 }
 0x27d   :  { %v2743_v16 = vsel %vm2733_vm0, %v2740_v47, %v2742_v17  ;;  %v2746_v1 = vsel %vm2734_vm11, %v2728_v40, %v2745_v45  ;;  %v2736_v32 = vsel %vm2732_vm3, %v2716_v44, %v2719_v33  ;;  %v2738_v25 = vsel %vm2734_vm11, %v2722_v6, %v2737_v24 }
 0x27e   :  { %v2664_v35 = vclz %v6565_v15  ;;  %v9240_v22 = vmul.u32.u64.low %v2748_v7, %v2743_v16  ;;  %v9241_v58 = vmul.u32.u64.high %v2748_v7, %v2743_v16, %v9240_v22  ;;  %v2747_v2 = vsel %vm2733_vm0, %v2744_v20, %v2746_v1 }
 0x27f   :  { %v2814_v0 = vadd.s32 1, %v6572_v53  ;;  %v3304_v54 = vxor.u32 2147483648, %v3303_v12  ;;  %v9246_v57 = vmul.u32.u64.low %v2748_v7, %v2747_v2  ;;  %v9247_v26 = vmul.u32.u64.high %v2748_v7, %v2747_v2, %v9246_v57 }
 0x280   :  { %v6566_v43 = vadd.s32 4294967294, %v2664_v35  ;;  %v3201_v30 = vsel %vm3118_vm5, %v3200_v8, %v3199_v63  ;;  %6917 = vrcp.f32 %v9104_v61  ;;  %v12426_v29 = vand.u32 2147483647, %v9174_v10 }
 0x281   :  { %vm2815_vm6 = vcmp.gt.s32.totalorder %v2814_v0, 0  ;;  %v2568_v33 = vsub.s32 4294967266, %v9233_v13  ;;  %v2739_v6 = vsel %vm2733_vm0, %v2736_v32, %v2738_v25  ;;  %v2758_v53 = vadd.s32 1, %v9241_v58 }
 0x282   :  { %v2811_v40 = vand.u32 8388607, %v12426_v29  ;;  %v2816_v47 = vsel %vm2815_vm6, %v2814_v0, 0  ;;  %v9258_v15 = vadd.s32 3, %v9210_v60  ;;  %v9261_v24 = vand.u32 3, %v9078_v37 }
 0x283   :  { %6919 = vrcp.f32 %v9174_v10  ;;  %v2818_v63 = vand.u32 31, %v2816_v47  ;;  %v9267_v8 = vsel %vm9032_vm12, %v8675_v50, %v3201_v30  ;;  %v9271_v55 = vsel %vm3222_vm2, %v3304_v54, %v3303_v12 }
 0x284   :  { %12427 = vst [vmem:[#allocation120_spill] sm:$0xff] %v9261_v24  ;;  %v2548_v17 = vadd.s32 %v9093_v27, %v9098_v31  ;;  %vm6567_vm5 = vcmp.lt.s32.totalorder %v6566_v43, 0  ;;  %v2578_v44 = vsub.s32 4, %v9139_v18  ;;  %v2755_v37 = vmul.u32 %v2748_v7, %v2739_v6 }
 0x285   :  { %vm2757_vm1 = vc.u32 %v9247_v26, %v9240_v22  ;;  %v2819_v16 = vsub.s32 32, %v2818_v63  ;;  %v2564_v20 = vsub.s32 32, %v9233_v13  ;;  %v2569_v49 = vadd.s32 127, %v2568_v33 }
 0x286   :  { %v2759_v45 = vsel %vm2757_vm1, %v2758_v53, %v9241_v58  ;;  %v2812_v35 = vor.u32 8388608, %v2811_v40  ;;  %v9280_v1 = vsel %vm6567_vm5, 0, %v6566_v43  ;;  %v2821_v31 = vshll.u32 %v12259_v39, %v2818_v63 }
 0x287   :  { %v2760_v12 = vadd.s32 %v2759_v45, %v2755_v37  ;;  %v2822_v32 = vshrl.u32 %v12269_v36, %v2819_v16  ;;  %v2825_v27 = vshrl.u32 %v12254_v11, %v2819_v16  ;;  %v2824_v7 = vshll.u32 %v12269_v36, %v2818_v63 }
 0x288   :  { %v2827_v25 = vshll.u32 %v12254_v11, %v2818_v63  ;;  %v2828_v2 = vshrl.u32 %v12255_v3, %v2819_v16  ;;  %v2817_v54 = vshrl.u32 %v2816_v47, 5  ;;  %v2830_v58 = vshll.u32 %v12255_v3, %v2818_v63 }
 0x289   :  { %v2761_v0 = vadd.s32 536870912, %v2760_v12  ;;  %v2831_v43 = vshrl.u32 %v12256_v56, %v2819_v16  ;;  %vm2494_vm12 = vcmp.lt.s32.totalorder %v8960_v9, 0  ;;  %v2823_v57 = vor.u32 %v2822_v32, %v2821_v31 }
 0x28a   :  { %v2826_v30 = vor.u32 %v2825_v27, %v2824_v7  ;;  %v2829_v29 = vor.u32 %v2828_v2, %v2827_v25  ;;  %v9291_v40 = vshll.u32 %v2812_v35, 8  ;;  %v9293_v33 = vpop.eup %6917  ;;  %v2833_v37 = vshll.u32 %v12256_v56, %v2818_v63 }
 0x28b   :  { %12428 = vst [vmem:[#allocation121_spill] sm:$0xff] %v9293_v33  ;;  %v9295_v6 = vshrl.u32 %v2761_v0, 30  ;;  %v2832_v53 = vor.u32 %v2831_v43, %v2830_v58  ;;  %v2834_v47 = vshrl.u32 %v12257_v4, %v2819_v16  ;;  %v2565_v45 = vshll.u32 %v9149_v38, %v9233_v13 }
 0x28c   :  { %v2566_v24 = vshrl.u32 %v2548_v17, %v2564_v20  ;;  %v2570_v50 = vshll.u32 %v2569_v49, 23  ;;  %v2672_v32 = vsub.s32 4294967266, %v9280_v1  ;;  %vm2836_vm10 = vcmp.lt.s32.totalorder %v2817_v54, 1 }
 0x28d   :  { %v9302_v27 = vpop.eup %6919  ;;  %v2763_v35 = vshll.u32 %v9295_v6, 30  ;;  %v2835_v31 = vor.u32 %v2834_v47, %v2833_v37  ;;  %vm2839_vm8 = vcmp.lt.s32.totalorder %v2817_v54, 4  ;;  %v12430_v7 = vand.u32 2147483647, %v8960_v9 }
 0x28e   :  { %12429 = vst [vmem:[#allocation122_spill] sm:$0xff] %v9302_v27  ;;  %v2820_v25 = vshrl.u32 %v12259_v39, %v2819_v16  ;;  %vm2838_vm2 = vcmp.lt.s32.totalorder %v2817_v54, 3  ;;  %v2844_v38 = vsel %vm2836_vm10, %v2823_v57, %v2826_v30  ;;  %v2845_v13 = vsel %vm2839_vm8, %v2832_v53, 920167782 }
 0x28f   :  { %vm9307_vm15 = vcmp.le.f32.partialorder %v12430_v7, 0.7853982  ;;  %v9314_v17 = vsub.s32 %v2760_v12, %v2763_v35  ;;  %vm2837_vm9 = vcmp.lt.s32.totalorder %v2817_v54, 2  ;;  %v2841_v20 = vsel %vm2839_vm8, %v2829_v29, 2102212464 }
 0x290   :  { %v2846_v49 = vsel %vm2838_vm2, %v2829_v29, %v2845_v13  ;;  %v2571_v2 = vor.u32 4788187, %v2570_v50  ;;  %v2668_v0 = vsub.s32 32, %v9280_v1  ;;  %v2673_v58 = vadd.s32 127, %v2672_v32 }
 0x291   :  { %v2847_v43 = vsel %vm2837_vm9, %v2844_v38, %v2846_v49  ;;  %v2766_v16 = vsub.s32 0, %v9314_v17  ;;  %v2840_v37 = vsel %vm2836_vm10, %v2820_v25, %v2823_v57  ;;  %v2848_v47 = vsel %vm2836_vm10, %v2826_v30, %v2829_v29 }
 0x292   :  { %v2849_v12 = vsel %vm2839_vm8, %v2835_v31, 1326507024  ;;  %v2842_v35 = vsel %vm2838_vm2, %v2826_v30, %v2841_v20  ;;  %v9327_v13 = vmul.u32.u64.low %v9291_v40, %v2847_v43  ;;  %v9328_v50 = vmul.u32.u64.high %v9291_v40, %v2847_v43, %v9327_v13 }
 0x293   :  { %v2850_v7 = vsel %vm2838_vm2, %v2832_v53, %v2849_v12  ;;  %v2567_v32 = vor.u32 %v2566_v24, %v2565_v45  ;;  %v2579_v38 = vsel %vm2494_vm12, %v2578_v44, %v9139_v18  ;;  %v6569_v57 = vmin.u32 %v2766_v16, %v9314_v17  ;;  %v9345_v24 = vld [vmem:[%s11876_s1] sm:$0xf] }
 0x294   :  { %v2851_v29 = vsel %vm2837_vm9, %v2848_v47, %v2850_v7  ;;  %v2652_v31 = vadd.s32 %v9162_v42, %v9179_v46  ;;  %v2674_v30 = vshll.u32 %v2673_v58, 23  ;;  %6921 = vcosq.f32 %v9267_v8  ;;  %v9352_v45 = vld [vmem:[%s11875_s0] sm:$0xf]  ;;  %s6984_s0 = smov [#allocation2]  }
 0x295   :  { %v9339_v53 = vmul.u32.u64.low %v9291_v40, %v2851_v29  ;;  %v9340_v25 = vmul.u32.u64.high %v9291_v40, %v2851_v29, %v9339_v53  ;;  %v2768_v18 = vclz %v6569_v57  ;;  %v2843_v44 = vsel %vm2837_vm9, %v2840_v37, %v2842_v35  ;;  %s6479_s1 = sshll.u32 %s6984_s0, 4  ;;  %s6480_s1 = int_to_ptr.vmem [resolvable:$true] %s6479_s1 }
 0x296   :  { %v43_v42 = vmul.f32 %v9352_v45, %v9352_v45  ;;  %v3308_v46 = vsel %vm9168_vm7, %v8692_v59, %v9271_v55  ;;  %v2572_v20 = vand.u32 2147483647, %v2571_v2  ;;  %vm2598_vm14 = vcmp.lt.s32.totalorder %v9008_v23, 0  ;;  %s6952_s7 = scalar_lea.vmem %s6480_s1, 3072  ;;  %p6957_p1 = scmp.lt.s32.totalorder %s6480_s1, %s6480_s1 }
 0x297   :  { %v2670_v49 = vshrl.u32 %v2652_v31, %v2668_v0  ;;  %v2862_v54 = vadd.s32 1, %v9328_v50  ;;  %v2574_v58 = vcvt.s32.f32 %v2567_v32  ;;  %v9364_v43 = vsel %vm9307_vm15, 0, %v2579_v38  ;;  %p6953_p0 = scmp.ne.s32.totalorder %s6480_s1, %s6952_s7  ;;  %p6958_p2 = scmp.lt.s32.totalorder %s6952_s7, %s6952_s7 }
 0x298   :  { %v6570_v16 = vadd.s32 4294967294, %v2768_v18  ;;  %v174_v37 = vand.u32 2139095040, %v9345_v24  ;;  %v2669_v47 = vshll.u32 %v9227_v62, %v9280_v1  ;;  %v2675_v12 = vor.u32 4788187, %v2674_v30 }
 0x299   :  { %v2859_v52 = vmul.u32 %v9291_v40, %v2843_v44  ;;  %vm2861_vm7 = vc.u32 %v9340_v25, %v9327_v13  ;;  %v12433_v55 = vand.u32 2147483647, %v9008_v23  ;;  %v44_v35 = vmul.f32 %v9352_v45, %v43_v42  ;;  %p6959_p3 = por %p6958_p2, %p6957_p1 }
 0x29a   :  { %vm6571_vm3 = vcmp.lt.s32.totalorder %v6570_v16, 0  ;;  %v2863_v0 = vsel %vm2861_vm7, %v2862_v54, %v9328_v50  ;;  %v175_v7 = vshrl.u32 %v174_v37, 23  ;;  %v2575_v32 = vmul.f32 %v2574_v58, %v2572_v20 }
 0x29b   :  { %vm9374_vm13 = vcmp.le.f32.partialorder %v12433_v55, 0.7853982  ;;  %v2671_v62 = vor.u32 %v2670_v49, %v2669_v47  ;;  %v9380_v1 = vsel %vm6571_vm3, 0, %v6570_v16  ;;  %v2864_v40 = vadd.s32 %v2863_v0, %v2859_v52  ;;  %p6960_p4 = pnand %p6959_p3, %p6953_p0 }
 0x29c   :  { %6923 = vsinq.f32 %v9267_v8  ;;  %v9384_v38 = vand.u32 3, %v9210_v60  ;;  %v2585_v57 = vadd.s32 3, %v9364_v43  ;;  %v2682_v29 = vsub.s32 4, %v9214_v41 }
 0x29d   :  { %v2676_v31 = vand.u32 2147483647, %v2675_v12  ;;  %v2865_v30 = vadd.s32 536870912, %v2864_v40  ;;  %v12052_v50 = vand.u32 2147483647, %v9345_v24  ;;  %v6491_v53 = vadd.s32 4294967169, %v175_v7 }
 0x29e   :  { %12436 = vst [vmem:[#allocation123_spill] sm:$0xff] %v9384_v38  ;;  %6925 = vcosq.f32 %v3308_v46  ;;  %v9390_v18 = vand.u32 3, %v9258_v15  ;;  %v2776_v44 = vsub.s32 4294967266, %v9380_v1  ;;  %v45_v8 = vmul.f32 %v9352_v45, %v44_v35  ;;  %v9396_v54 = vpop.eup %6921 }
 0x29f   :  { %v2576_v42 = vxor.u32 2147483648, %v2575_v32  ;;  %v2678_v60 = vcvt.s32.f32 %v2671_v62  ;;  %v9394_v20 = vshrl.u32 %v2865_v30, 30  ;;  %v181_v49 = vadd.s32 1, %v6491_v53 }
 0x2a0   :  { %12437 = vst [vmem:[#allocation124_spill] sm:$0xff] %v9390_v18  ;;  %6927 = vsinq.f32 %v3308_v46  ;;  %v2683_v58 = vsel %vm2598_vm14, %v2682_v29, %v9214_v41  ;;  %vm2702_vm4 = vcmp.lt.s32.totalorder %v9104_v61, 0  ;;  %v2786_v15 = vsub.s32 4, %v9295_v6 }
 0x2a1   :  { %v9403_v16 = vand.u32 3, %v2585_v57  ;;  %v9405_v37 = vmul.f32 %v2678_v60, %v2676_v31  ;;  %v2867_v47 = vshll.u32 %v9394_v20, 30  ;;  %v178_v12 = vand.u32 8388607, %v12052_v50 }
 0x2a2   :  { %v2772_v52 = vsub.s32 32, %v9380_v1  ;;  %v2777_v46 = vadd.s32 127, %v2776_v44  ;;  %v46_v55 = vmul.f32 %v9352_v45, %v45_v8  ;;  %vm182_vm11 = vcmp.gt.s32.totalorder %v181_v49, 0 }
 0x2a3   :  { %12438 = vst [vmem:[#allocation125_spill] sm:$0xff] %v9403_v16  ;;  %v9414_v41 = vsel %vm2494_vm12, %v2576_v42, %v2575_v32  ;;  %v9418_v0 = vsel %vm9374_vm13, 0, %v2683_v58  ;;  %v9420_v35 = vsub.s32 %v2864_v40, %v2867_v47  ;;  %v183_v7 = vsel %vm182_vm11, %v181_v49, 0 }
 0x2a4   :  { %v2756_v62 = vadd.s32 %v9240_v22, %v9247_v26  ;;  %v9427_v57 = vsel %vm2702_vm4, %v2786_v15, %v9295_v6  ;;  %6929 = vrcp.f32 %v9352_v45  ;;  %v185_v29 = vand.u32 31, %v183_v7 }
 0x2a5   :  { %v2773_v31 = vshll.u32 %v9314_v17, %v9380_v1  ;;  %v2870_v40 = vsub.s32 0, %v9420_v35  ;;  %v179_v30 = vor.u32 8388608, %v178_v12  ;;  %v2778_v26 = vshll.u32 %v2777_v46, 23 }
 0x2a6   :  { %v9434_v53 = vpop.eup %6923  ;;  %v2774_v44 = vshrl.u32 %v2756_v62, %v2772_v52  ;;  %v47_v22 = vmul.f32 -28.0, %v46_v55  ;;  %v186_v8 = vsub.s32 32, %v185_v29  ;;  %v184_v42 = vshrl.u32 %v183_v7, 5 }
 0x2a7   :  { %v6573_v6 = vmin.u32 %v2870_v40, %v9420_v35  ;;  %v188_v60 = vshll.u32 %v12259_v39, %v185_v29  ;;  %v191_v49 = vshll.u32 %v12269_v36, %v185_v29  ;;  %v194_v15 = vshll.u32 %v12254_v11, %v185_v29 }
 0x2a8   :  { %v9439_v58 = vpop.eup %6925  ;;  %v189_v17 = vshrl.u32 %v12269_v36, %v186_v8  ;;  %v192_v1 = vshrl.u32 %v12254_v11, %v186_v8  ;;  %v197_v47 = vshll.u32 %v12255_v3, %v185_v29  ;;  %v195_v52 = vshrl.u32 %v12255_v3, %v186_v8 }
 0x2a9   :  { %12439 = vst [vmem:[#allocation126_spill] sm:$0xff] %v9439_v58  ;;  %v2872_v12 = vclz %v6573_v6  ;;  %v198_v46 = vshrl.u32 %v12256_v56, %v186_v8  ;;  %v200_v7 = vshll.u32 %v12256_v56, %v185_v29  ;;  %v2779_v40 = vor.u32 4788187, %v2778_v26 }
 0x2aa   :  { %v9448_v62 = vpop.eup %6927  ;;  %v49_v50 = vmul.f32 48.0, %v46_v55  ;;  %v52_v32 = vmul.f32 -21.0, %v46_v55  ;;  %v201_v36 = vshrl.u32 %v12257_v4, %v186_v8  ;;  %v2775_v27 = vor.u32 %v2774_v44, %v2773_v31 }
 0x2ab   :  { %12440 = vst [vmem:[#allocation127_spill] sm:$0xff] %v9448_v62  ;;  %v6574_v33 = vadd.s32 4294967294, %v2872_v12  ;;  %v190_v16 = vor.u32 %v189_v17, %v188_v60  ;;  %v193_v11 = vor.u32 %v192_v1, %v191_v49  ;;  %vm2806_vm0 = vcmp.lt.s32.totalorder %v9174_v10, 0 }
 0x2ac   :  { %v196_v6 = vor.u32 %v195_v52, %v194_v15  ;;  %v199_v38 = vor.u32 %v198_v46, %v197_v47  ;;  %v202_v3 = vor.u32 %v201_v36, %v200_v7  ;;  %vm203_vm6 = vcmp.lt.s32.totalorder %v184_v42, 1 }
 0x2ad   :  { %v12441_v18 = vand.u32 2147483647, %v9104_v61  ;;  %vm6575_vm1 = vcmp.lt.s32.totalorder %v6574_v33, 0  ;;  %v187_v55 = vshrl.u32 %v12259_v39, %v186_v8  ;;  %vm206_vm12 = vcmp.lt.s32.totalorder %v184_v42, 4 }
 0x2ae   :  { %v219_v4 = vshll.u32 %v179_v30, 8  ;;  %v6930_v29 = vpop.eup %6929  ;;  %v2780_v31 = vand.u32 2147483647, %v2779_v40  ;;  %v9459_v44 = vsel %vm6575_vm1, 0, %v6574_v33  ;;  %vm205_vm10 = vcmp.lt.s32.totalorder %v184_v42, 3 }
 0x2af   :  { %vm9454_vm5 = vcmp.le.f32.partialorder %v12441_v18, 0.7853982  ;;  %v208_v26 = vsel %vm206_vm12, %v196_v6, 2102212464  ;;  %v2782_v60 = vcvt.s32.f32 %v2775_v27  ;;  %v12444_v49 = vand.u32 2147483647, %v9174_v10 }
 0x2b0   :  { %v2890_v18 = vsub.s32 4, %v9394_v20  ;;  %vm204_vm2 = vcmp.lt.s32.totalorder %v184_v42, 2  ;;  %v211_v39 = vsel %vm203_vm6, %v190_v16, %v193_v11  ;;  %v2880_v30 = vsub.s32 4294967266, %v9459_v44 }
 0x2b1   :  { %vm9463_vm8 = vcmp.le.f32.partialorder %v12444_v49, 0.7853982  ;;  %v212_v8 = vsel %vm206_vm12, %v199_v38, 920167782  ;;  %v215_v33 = vsel %vm203_vm6, %v193_v11, %v196_v6  ;;  %v216_v1 = vsel %vm206_vm12, %v202_v3, 1326507024 }
 0x2b2   :  { %v207_v15 = vsel %vm203_vm6, %v187_v55, %v190_v16  ;;  %v209_v27 = vsel %vm205_vm10, %v193_v11, %v208_v26  ;;  %v213_v47 = vsel %vm205_vm10, %v196_v6, %v212_v8  ;;  %v217_v12 = vsel %vm205_vm10, %v199_v38, %v216_v1 }
 0x2b3   :  { %v2783_v52 = vmul.f32 %v2782_v60, %v2780_v31  ;;  %v48_v46 = vadd.f32 %v6930_v29, %v47_v22  ;;  %v214_v7 = vsel %vm204_vm2, %v211_v39, %v213_v47  ;;  %v218_v40 = vsel %vm204_vm2, %v215_v33, %v217_v12 }
 0x2b4   :  { %v50_v36 = vmul.f32 %v9352_v45, %v49_v50  ;;  %v53_v49 = vmul.f32 %v9352_v45, %v52_v32  ;;  %v9476_v59 = vmul.u32.u64.low %v219_v4, %v218_v40  ;;  %v9477_v58 = vmul.u32.u64.high %v219_v4, %v218_v40, %v9476_v59  ;;  %v12456_v40 = vld [vmem:[#allocation96_spill] sm:$0xff] }
 0x2b5   :  { %v2881_v62 = vadd.s32 127, %v2880_v30  ;;  %v210_v3 = vsel %vm204_vm2, %v207_v15, %v209_v27  ;;  %v9480_v16 = vmul.u32.u64.low %v219_v4, %v214_v7  ;;  %v9481_v11 = vmul.u32.u64.high %v219_v4, %v214_v7, %v9480_v16 }
 0x2b6   :  { %v2580_v38 = vsel %vm9307_vm15, %v8960_v9, %v9414_v41  ;;  %v2689_v22 = vadd.s32 3, %v9418_v0  ;;  %v2891_v50 = vsel %vm2806_vm0, %v2890_v18, %v9394_v20  ;;  %v9493_v59 = vand.u32 3, %v9364_v43 }
 0x2b7   :  { %v12448_v32 = vxor.u32 2147483648, %v9405_v37  ;;  %v2784_v6 = vxor.u32 2147483648, %v2783_v52  ;;  %v2789_v63 = vsel %vm9454_vm5, 0, %v9427_v57  ;;  %v2876_v41 = vsub.s32 32, %v9459_v44 }
 0x2b8   :  { %12447 = vst [vmem:[#allocation128_spill] sm:$0xff] %v9493_v59  ;;  %v51_v55 = vadd.f32 %v50_v36, %v48_v46  ;;  %v54_v29 = vmul.f32 %v9352_v45, %v53_v49  ;;  %v226_v20 = vmul.u32 %v219_v4, %v210_v3  ;;  %vm228_vm15 = vc.u32 %v9477_v58, %v9480_v16  ;;  %v12457_v3 = vld [vmem:[#allocation5_spill] sm:$0xff]  ;;  %v12502_v59 = vld [vmem:[#allocation52_spill] sm:$0xff] }
 0x2b9   :  { %v2681_v42 = vsel %vm2598_vm14, %v12448_v32, %v9405_v37  ;;  %v2860_v43 = vadd.s32 %v9327_v13, %v9340_v25  ;;  %v2882_v31 = vshll.u32 %v2881_v62, 23  ;;  %v2893_v37 = vsel %vm9463_vm8, 0, %v2891_v50  ;;  %v12459_v32 = vld [vmem:[#allocation60_spill] sm:$0xff] }
 0x2ba   :  { %v229_v26 = vadd.s32 1, %v9481_v11  ;;  %v9512_v60 = vand.u32 3, %v2689_v22  ;;  %v2793_v57 = vadd.s32 3, %v2789_v63  ;;  %vm56_vm9 = vcmp.lt.f32.partialorder %v9352_v45, 1.0 }
 0x2bb   :  { %v2684_v4 = vsel %vm9374_vm13, %v9008_v23, %v2681_v42  ;;  %v2785_v18 = vsel %vm2702_vm4, %v2784_v6, %v2783_v52  ;;  %v2878_v39 = vshrl.u32 %v2860_v43, %v2876_v41  ;;  %6931 = vcosq.f32 %v2580_v38  ;;  %v12460_v42 = vld [vmem:[#allocation103_spill] sm:$0xff] }
 0x2bc   :  { %12449 = vst [vmem:[#allocation129_spill] sm:$0xff] %v9512_v60  ;;  %v230_v13 = vsel %vm228_vm15, %v229_v26, %v9481_v11  ;;  %v2897_v25 = vadd.s32 3, %v2893_v37  ;;  %v55_v62 = vadd.f32 %v54_v29, %v51_v55  ;;  %6933 = vsinq.f32 %v2580_v38  ;;  %v12458_v38 = vld [vmem:[#allocation6_spill] sm:$0xff] }
 0x2bd   :  { %v231_v30 = vadd.s32 %v230_v13, %v226_v20  ;;  %v2877_v8 = vshll.u32 %v9420_v35, %v9459_v44  ;;  %v2883_v33 = vor.u32 4788187, %v2882_v31  ;;  %v6983_v45 = vmov 0.0   ;;  %v12462_v31 = vld [vmem:[#allocation7_spill] sm:$0xff] }
 0x2be   :  { %v6490_v1 = vsel %vm56_vm9, 1.0, %v6983_v45  ;;  %6935 = vcosq.f32 %v2684_v4  ;;  %v2788_v2 = vsel %vm9454_vm5, %v9104_v61, %v2785_v18  ;;  %v9527_v15 = vand.u32 3, %v9418_v0  ;;  %v12464_v13 = vld [vmem:[#allocation99_spill] sm:$0xff] }
 0x2bf   :  { %v232_v27 = vadd.s32 536870912, %v231_v30  ;;  %6937 = vsinq.f32 %v2684_v4  ;;  %v9529_v47 = vand.u32 3, %v2793_v57  ;;  %v2879_v12 = vor.u32 %v2878_v39, %v2877_v8  ;;  %v12463_v39 = vld [vmem:[#allocation91_spill] sm:$0xff] }
 0x2c0   :  { %12450 = vst [vmem:[#allocation130_spill] sm:$0xff] %v9527_v15  ;;  %v9531_v52 = vand.u32 3, %v2789_v63  ;;  %v9533_v46 = vand.u32 3, %v2897_v25  ;;  %v9535_v35 = vand.u32 3, %v2893_v37  ;;  %v9537_v44 = vmul.f32 %v6490_v1, %v55_v62  ;;  %v12461_v63 = vld [vmem:[#allocation102_spill] sm:$0xff] }
 0x2c1   :  { %12451 = vst [vmem:[#allocation131_spill] sm:$0xff] %v9529_v47  ;;  %v9539_v7 = vshrl.u32 %v232_v27, 30  ;;  %vm1339_vm14 = vcmp.lt.s32.totalorder %v8663_v5, 2  ;;  %6939 = vcosq.f32 %v2788_v2  ;;  %v2884_v0 = vand.u32 2147483647, %v2883_v33 }
 0x2c2   :  { %12452 = vst [vmem:[#allocation132_spill] sm:$0xff] %v9531_v52  ;;  %12453 = vst [vmem:[#allocation133_spill] sm:$0xff] %v9533_v46  ;;  %v1341_v56 = vxor.u32 2147483648, %v8709_v14  ;;  %v12066_v36 = vxor.u32 2147483648, %v12456_v40  ;;  %6941 = vsinq.f32 %v2788_v2  ;;  %v9547_v11 = vrot.slane %v9537_v44, %v12457_v3 }
 0x2c3   :  { %12454 = vst [vmem:[#allocation134_spill] sm:$0xff] %v9535_v35  ;;  %12455 = vst [vmem:[#allocation135_spill] sm:$0xff] %v9537_v44  ;;  %v234_v49 = vshll.u32 %v9539_v7, 30  ;;  %v9551_v22 = vrot.slane %v9537_v44, %v12458_v38  ;;  %v2886_v50 = vcvt.s32.f32 %v2879_v12  ;;  %vm1336_vm7 = vweird.f32 %v12459_v32  ;;  %v12498_v32 = vld [vmem:[#allocation45_spill] sm:$0xff] }
 0x2c4   :  { %v12065_v6 = vxor.u32 2147483648, %v12460_v42  ;;  %v12064_v41 = vxor.u32 2147483648, %v12461_v63  ;;  %v12062_v55 = vxor.u32 2147483648, %v9065_v21  ;;  %vm1340_vm13 = vcmp.eq.s32.totalorder %v8663_v5, 0 }
 0x2c5   :  { %v9557_v29 = vsub.s32 %v231_v30, %v234_v49  ;;  %vm1343_vm3 = vcmp.eq.s32.totalorder %v8663_v5, 2  ;;  %v12063_v20 = vxor.u32 2147483648, %v9059_v34  ;;  %v2887_v43 = vmul.f32 %v2886_v50, %v2884_v0  ;;  %v9573_v4 = vpop.eup %6931  ;;  %v12467_v50 = vld [vmem:[#allocation63_spill] sm:$0xff] }
 0x2c6   :  { %vm173_vm4 = vcmp.lt.s32.totalorder %v9345_v24, 0  ;;  %v9565_v37 = vrot.slane %v9537_v44, %v12462_v31  ;;  %v1342_v26 = vsel %vm1340_vm13, %v12456_v40, %v1341_v56  ;;  %v1345_v57 = vsel %vm1343_vm3, %v12066_v36, %v8709_v14  ;;  %v9579_v25 = vpop.eup %6933 }
 0x2c7   :  { %v237_v18 = vsub.s32 0, %v9557_v29  ;;  %vm1444_vm11 = vcmp.eq.s32.totalorder %v12463_v39, 0  ;;  %vm1447_vm6 = vcmp.eq.s32.totalorder %v12463_v39, 2  ;;  %vm1548_vm5 = vcmp.eq.s32.totalorder %v12464_v13, 0 }
 0x2c8   :  { %v1446_v62 = vsel %vm1444_vm11, %v12461_v63, %v12065_v6  ;;  %v1449_v30 = vsel %vm1447_vm6, %v12064_v41, %v12460_v42  ;;  %v1550_v8 = vsel %vm1548_vm5, %v9059_v34, %v12062_v55  ;;  %vm1551_vm1 = vcmp.eq.s32.totalorder %v12464_v13, 2  ;;  %v9591_v33 = vpop.eup %6935 }
 0x2c9   :  { %12465 = vst [vmem:[#allocation96_spill] sm:$0xff] %v9591_v33  ;;  %v6492_v45 = vmin.u32 %v237_v18, %v9557_v29  ;;  %v1553_v1 = vsel %vm1551_vm1, %v12063_v20, %v9065_v21  ;;  %v12068_v2 = vxor.u32 2147483648, %v9083_v51  ;;  %v12067_v27 = vxor.u32 2147483648, %v9080_v19  ;;  %v9599_v12 = vpop.eup %6937 }
 0x2ca   :  { %12466 = vst [vmem:[#allocation60_spill] sm:$0xff] %v9599_v12  ;;  %v2888_v0 = vxor.u32 2147483648, %v2887_v43  ;;  %v1346_v49 = vsel %vm1339_vm14, %v1342_v26, %v1345_v57  ;;  %vm1440_vm12 = vweird.f32 %v12467_v50  ;;  %vm1443_vm10 = vcmp.lt.s32.totalorder %v12463_v39, 2  ;;  %v12510_v50 = vld [vmem:[#allocation17_spill] sm:$0xff] }
 0x2cb   :  { %v12468_v18 = vand.u32 2147483647, %v9345_v24  ;;  %v239_v20 = vclz %v6492_v45  ;;  %v257_v41 = vsub.s32 4, %v9539_v7  ;;  %v1450_v6 = vsel %vm1443_vm10, %v1446_v62, %v1449_v30  ;;  %v9613_v36 = vpop.eup %6939  ;;  %v12473_v30 = vld [vmem:[#allocation69_spill] sm:$0xff] }
 0x2cc   :  { %vm1547_vm15 = vcmp.lt.s32.totalorder %v12464_v13, 2  ;;  %12471 = vst [vmem:[#allocation103_spill] sm:$0xff] %v9613_v36  ;;  %v227_v5 = vadd.s32 %v9480_v16, %v9477_v58  ;;  %vm1652_vm9 = vcmp.eq.s32.totalorder %v9038_v48, 0  ;;  %vm1655_vm14 = vcmp.eq.s32.totalorder %v9038_v48, 2  ;;  %v9619_v57 = vpop.eup %6941  ;;  %v12522_v36 = vld [vmem:[#allocation53_spill] sm:$0xff] }
 0x2cd   :  { %vm9607_vm2 = vcmp.le.f32.partialorder %v12468_v18, 0.7853982  ;;  %v1554_v26 = vsel %vm1547_vm15, %v1550_v8, %v1553_v1  ;;  %12472 = vst [vmem:[#allocation102_spill] sm:$0xff] %v9619_v57  ;;  %v6493_v39 = vadd.s32 4294967294, %v239_v20  ;;  %v1347_v45 = vsel %vm1336_vm7, nan, %v1346_v49  ;;  %v12474_v1 = vld [vmem:[#allocation90_spill] sm:$0xff] }
 0x2ce   :  { %v1654_v13 = vsel %vm1652_vm9, %v9080_v19, %v12068_v2  ;;  %v1657_v62 = vsel %vm1655_vm14, %v12067_v27, %v9083_v51  ;;  %v2889_v58 = vsel %vm2806_vm0, %v2888_v0, %v2887_v43  ;;  %v1451_v16 = vsel %vm1440_vm12, nan, %v1450_v6  ;;  %v12524_v57 = vld [vmem:[#allocation62_spill] sm:$0xff] }
 0x2cf   :  { %vm1544_vm13 = vweird.f32 %v12473_v30  ;;  %vm1651_vm3 = vcmp.lt.s32.totalorder %v9038_v48, 2  ;;  %vm6494_vm11 = vcmp.lt.s32.totalorder %v6493_v39, 0  ;;  %v258_v20 = vsel %vm173_vm4, %v257_v41, %v9539_v7 }
 0x2d0   :  { %v1555_v8 = vsel %vm1544_vm13, nan, %v1554_v26  ;;  %vm3855_vm6 = vcmp.eq.s32.totalorder %v12474_v1, 0  ;;  %v242_v49 = vsel %vm6494_vm11, 0, %v6493_v39  ;;  %v1658_v18 = vsel %vm1651_vm3, %v1654_v13, %v1657_v62  ;;  %v12476_v39 = vld [vmem:[#allocation74_spill] sm:$0xff]  ;;  %v12477_v13 = vld [vmem:[#allocation79_spill] sm:$0xff] }
 0x2d1   :  { %v3857_v6 = vsel %vm3855_vm6, %v12456_v40, %v1341_v56  ;;  %vm3858_vm0 = vcmp.eq.s32.totalorder %v12474_v1, 2  ;;  %v243_v43 = vsub.s32 32, %v242_v49  ;;  %v244_v48 = vshll.u32 %v9557_v29, %v242_v49  ;;  %v12479_v56 = vld [vmem:[#allocation81_spill] sm:$0xff] }
 0x2d2   :  { %v247_v0 = vsub.s32 4294967266, %v242_v49  ;;  %v12475_v7 = vxor.u32 2147483648, %v12456_v40  ;;  %v9652_v26 = vsel %vm9463_vm8, %v9174_v10, %v2889_v58  ;;  %vm1648_vm5 = vweird.f32 %v12476_v39  ;;  %v12481_v49 = vld [vmem:[#allocation83_spill] sm:$0xff]  ;;  %v12483_v58 = vld [vmem:[#allocation92_spill] sm:$0xff] }
 0x2d3   :  { %v9656_v62 = vmul.f32 %v12477_v13, %v1347_v45  ;;  %v9659_v27 = vmul.f32 %v12479_v56, %v1451_v16  ;;  %v245_v2 = vshrl.u32 %v227_v5, %v243_v43  ;;  %v9662_v35 = vmul.f32 %v12481_v49, %v1555_v8  ;;  %v12484_v5 = vld [vmem:[#allocation104_spill] sm:$0xff] }
 0x2d4   :  { %v3860_v41 = vsel %vm3858_vm0, %v12475_v7, %v8709_v14  ;;  %v248_v29 = vadd.s32 127, %v247_v0  ;;  %vm3854_vm1 = vcmp.lt.s32.totalorder %v12474_v1, 2  ;;  %v260_v14 = vsel %vm9607_vm2, 0, %v258_v20 }
 0x2d5   :  { %12478 = vst [vmem:[#allocation91_spill] sm:$0xff] %v9656_v62  ;;  %12480 = vst [vmem:[#allocation99_spill] sm:$0xff] %v9659_v27  ;;  %v1659_v17 = vsel %vm1648_vm5, nan, %v1658_v18  ;;  %v3861_v40 = vsel %vm3854_vm1, %v3857_v6, %v3860_v41  ;;  %vm3958_vm8 = vcmp.eq.s32.totalorder %v12483_v58, 0  ;;  %v246_v45 = vor.u32 %v245_v2, %v244_v48  ;;  %v12489_v41 = vld [vmem:[#allocation50_spill] sm:$0xff] }
 0x2d6   :  { %12482 = vst [vmem:[#allocation63_spill] sm:$0xff] %v9662_v35  ;;  %v249_v7 = vshll.u32 %v248_v29, 23  ;;  %vm3961_vm10 = vcmp.eq.s32.totalorder %v12483_v58, 2  ;;  %vm4061_vm15 = vcmp.eq.s32.totalorder %v12484_v5, 0  ;;  %v12485_v16 = vxor.u32 2147483648, %v12460_v42  ;;  %v12496_v29 = vld [vmem:[#allocation107_spill] sm:$0xff] }
 0x2d7   :  { %v12486_v1 = vxor.u32 2147483648, %v12461_v63  ;;  %v12487_v43 = vxor.u32 2147483648, %v9065_v21  ;;  %vm4064_vm9 = vcmp.eq.s32.totalorder %v12484_v5, 2  ;;  %v253_v6 = vcvt.s32.f32 %v246_v45 }
 0x2d8   :  { %v3960_v8 = vsel %vm3958_vm8, %v12461_v63, %v12485_v16  ;;  %v250_v2 = vor.u32 4788187, %v249_v7  ;;  %v12488_v48 = vxor.u32 2147483648, %v9059_v34  ;;  %v9686_v52 = vand.u32 3, %v260_v14  ;;  %v12490_v16 = vld [vmem:[#allocation84_spill] sm:$0xff]  ;;  %v12493_v7 = vld [vmem:[#allocation55_spill] sm:$0xff] }
 0x2d9   :  { %v3963_v20 = vsel %vm3961_vm10, %v12486_v1, %v12460_v42  ;;  %v4063_v18 = vsel %vm4061_vm15, %v9059_v34, %v12487_v43  ;;  %v9689_v15 = vmul.f32 %v12490_v16, %v1659_v17  ;;  %vm3957_vm14 = vcmp.lt.s32.totalorder %v12483_v58, 2  ;;  %v12492_v42 = vld [vmem:[#allocation49_spill] sm:$0xff]  ;;  %v12494_v43 = vld [vmem:[#allocation54_spill] sm:$0xff] }
 0x2da   :  { %v4066_v0 = vsel %vm4064_vm9, %v12488_v48, %v9065_v21  ;;  %v12074_v63 = vxor.u32 2147483648, %v12492_v42  ;;  %v251_v1 = vand.u32 2147483647, %v250_v2  ;;  %vm4060_vm3 = vcmp.lt.s32.totalorder %v12484_v5, 2  ;;  %v12495_v48 = vld [vmem:[#allocation43_spill] sm:$0xff] }
 0x2db   :  { %12491 = vst [vmem:[#allocation69_spill] sm:$0xff] %v9689_v15  ;;  %v12078_v45 = vxor.u32 2147483648, %v12493_v7  ;;  %v12080_v10 = vxor.u32 2147483648, %v12494_v43  ;;  %v9698_v34 = vsel %vm1336_vm7, nan, %v3861_v40  ;;  %v3964_v21 = vsel %vm3957_vm14, %v3960_v8, %v3963_v20  ;;  %v12499_v40 = vld [vmem:[#allocation65_spill] sm:$0xff] }
 0x2dc   :  { %v4067_v14 = vsel %vm4060_vm3, %v4063_v18, %v4066_v0  ;;  %vm924_vm11 = vcmp.eq.s32.totalorder %v12495_v48, 0  ;;  %v254_v17 = vmul.f32 %v253_v6, %v251_v1  ;;  %vm4164_vm6 = vcmp.eq.s32.totalorder %v12496_v29, 0  ;;  %v12500_v0 = vld [vmem:[#allocation64_spill] sm:$0xff] }
 0x2dd   :  { %v12497_v58 = vxor.u32 2147483648, %v12489_v41  ;;  %vm927_vm0 = vcmp.eq.s32.totalorder %v12495_v48, 2  ;;  %vm1028_vm7 = vcmp.eq.s32.totalorder %v12498_v32, 0  ;;  %vm1031_vm1 = vcmp.eq.s32.totalorder %v12498_v32, 2 }
 0x2de   :  { %v929_v5 = vsel %vm927_vm0, %v12074_v63, %v12489_v41  ;;  %v255_v20 = vxor.u32 2147483648, %v254_v17  ;;  %vm4163_vm8 = vcmp.lt.s32.totalorder %v12496_v29, 2  ;;  %v1030_v18 = vsel %vm1028_vm7, %v12494_v43, %v12078_v45  ;;  %v12503_v45 = vld [vmem:[#allocation66_spill] sm:$0xff] }
 0x2df   :  { %v926_v2 = vsel %vm924_vm11, %v12492_v42, %v12497_v58  ;;  %v1033_v6 = vsel %vm1031_vm1, %v12080_v10, %v12493_v7  ;;  %v1136_v1 = vxor.u32 2147483648, %v12500_v0  ;;  %vm4167_vm10 = vcmp.eq.s32.totalorder %v12496_v29, 2  ;;  %v12501_v58 = vld [vmem:[#allocation70_spill] sm:$0xff] }
 0x2e0   :  { %vm923_vm15 = vcmp.lt.s32.totalorder %v12495_v48, 2  ;;  %vm1027_vm9 = vcmp.lt.s32.totalorder %v12498_v32, 2  ;;  %v12084_v63 = vxor.u32 2147483648, %v12501_v58  ;;  %v256_v8 = vsel %vm173_vm4, %v255_v20, %v254_v17  ;;  %v12505_v17 = vld [vmem:[#allocation61_spill] sm:$0xff]  ;;  %v12508_v20 = vld [vmem:[#allocation15_spill] sm:$0xff] }
 0x2e1   :  { %v930_v61 = vsel %vm923_vm15, %v926_v2, %v929_v5  ;;  %vm1132_vm14 = vcmp.eq.s32.totalorder %v12502_v59, 0  ;;  %v1240_v46 = vxor.u32 2147483648, %v12503_v45  ;;  %v259_v10 = vsel %vm9607_vm2, %v9345_v24, %v256_v8 }
 0x2e2   :  { %v1034_v47 = vsel %vm1027_vm9, %v1030_v18, %v1033_v6  ;;  %v12504_v23 = vxor.u32 2147483648, %v12499_v40  ;;  %vm1135_vm3 = vcmp.eq.s32.totalorder %v12502_v59, 2  ;;  %6943 = vcosq.f32 %v259_v10  ;;  %v12509_v18 = vld [vmem:[#allocation16_spill] sm:$0xff] }
 0x2e3   :  { %v1137_v32 = vsel %vm1135_vm3, %v1136_v1, %v12499_v40  ;;  %vm1236_vm4 = vcmp.eq.s32.totalorder %v12505_v17, 0  ;;  %vm1239_vm11 = vcmp.eq.s32.totalorder %v12505_v17, 2  ;;  %6945 = vsinq.f32 %v259_v10 }
 0x2e4   :  { %v1134_v48 = vsel %vm1132_vm14, %v12500_v0, %v12504_v23  ;;  %v12506_v2 = vxor.u32 2147483648, %v9083_v51  ;;  %v1238_v23 = vsel %vm1236_vm4, %v12503_v45, %v12084_v63  ;;  %v1241_v5 = vsel %vm1239_vm11, %v1240_v46, %v12501_v58 }
 0x2e5   :  { %vm269_vm2 = vcmp.eq.s32.totalorder %v9686_v52, 2  ;;  %v12507_v8 = vxor.u32 2147483648, %v9080_v19  ;;  %vm920_vm0 = vweird.f32 %v12508_v20  ;;  %vm1024_vm7 = vweird.f32 %v12509_v18 }
 0x2e6   :  { %v4166_v55 = vsel %vm4164_vm6, %v9080_v19, %v12506_v2  ;;  %vm1131_vm6 = vcmp.lt.s32.totalorder %v12502_v59, 2  ;;  %vm266_vm1 = vcmp.eq.s32.totalorder %v9686_v52, 0  ;;  %v931_v6 = vsel %vm920_vm0, nan, %v930_v61 }
 0x2e7   :  { %v4169_v10 = vsel %vm4167_vm10, %v12507_v8, %v9083_v51  ;;  %v1035_v2 = vsel %vm1024_vm7, nan, %v1034_v47  ;;  %v1138_v63 = vsel %vm1131_vm6, %v1134_v48, %v1137_v32  ;;  %vm1235_vm15 = vcmp.lt.s32.totalorder %v12505_v17, 2  ;;  %v12514_v32 = vld [vmem:[#allocation36_spill] sm:$0xff] }
 0x2e8   :  { %v3965_v19 = vsel %vm1440_vm12, nan, %v3964_v21  ;;  %v9766_v51 = vsel %vm1544_vm13, nan, %v4067_v14  ;;  %v5824_v59 = vsub.f32 %v9656_v62, %v9698_v34  ;;  %v1242_v8 = vsel %vm1235_vm15, %v1238_v23, %v1241_v5  ;;  %v12511_v21 = vld [vmem:[#allocation21_spill] sm:$0xff]  ;;  %v9791_v23 = vpop.permute.xlu1 %306 }
 0x2e9   :  { %vm265_vm10 = vcmp.lt.s32.totalorder %v9686_v52, 2  ;;  %v4170_v61 = vsel %vm4163_vm8, %v4166_v55, %v4169_v10  ;;  %v5825_v47 = vsub.f32 %v9659_v27, %v3965_v19  ;;  %v5826_v48 = vsub.f32 %v9662_v35, %v9766_v51  ;;  %v12512_v14 = vld [vmem:[#allocation29_spill] sm:$0xff]  ;;  %v12516_v55 = vld [vmem:[#allocation46_spill] sm:$0xff] }
 0x2ea   :  { %vm1128_vm12 = vweird.f32 %v12510_v50  ;;  %vm1232_vm13 = vweird.f32 %v12511_v21  ;;  %v9781_v34 = vmul.f32 %v12512_v14, %v931_v6  ;;  %v9784_v17 = vmul.f32 %v12514_v32, %v1035_v2  ;;  %v12519_v2 = vld [vmem:[#allocation51_spill] sm:$0xff] }
 0x2eb   :  { %v1139_v30 = vsel %vm1128_vm12, nan, %v1138_v63  ;;  %v1243_v29 = vsel %vm1232_vm13, nan, %v1242_v8  ;;  %vm3442_vm8 = vcmp.lt.s32.totalorder %v12516_v55, 2  ;;  %vm3443_vm9 = vcmp.eq.s32.totalorder %v12516_v55, 0 }
 0x2ec   :  { %12513 = vst [vmem:[#allocation90_spill] sm:$0xff] %v9781_v34  ;;  %12515 = vst [vmem:[#allocation74_spill] sm:$0xff] %v9784_v17  ;;  %vm3446_vm14 = vcmp.eq.s32.totalorder %v12516_v55, 2  ;;  %vm263_vm3 = vweird.f32 %v9345_v24  ;;  %v12517_v63 = vxor.u32 2147483648, %v12489_v41  ;;  %v12518_v10 = vxor.u32 2147483648, %v12492_v42 }
 0x2ed   :  { %vm3546_vm4 = vcmp.eq.s32.totalorder %v12519_v2, 0  ;;  %vm3549_vm11 = vcmp.eq.s32.totalorder %v12519_v2, 2  ;;  %v12520_v19 = vxor.u32 2147483648, %v12493_v7  ;;  %v12521_v8 = vxor.u32 2147483648, %v12494_v43 }
 0x2ee   :  { %v3445_v5 = vsel %vm3443_vm9, %v12492_v42, %v12517_v63  ;;  %v3448_v6 = vsel %vm3446_vm14, %v12518_v10, %v12489_v41  ;;  %vm3649_vm6 = vcmp.eq.s32.totalorder %v12522_v36, 0  ;;  %vm3652_vm15 = vcmp.eq.s32.totalorder %v12522_v36, 2  ;;  %v6944_v63 = vpop.eup %6943 }
 0x2ef   :  { %v3548_v51 = vsel %vm3546_vm4, %v12494_v43, %v12520_v19  ;;  %v3551_v9 = vsel %vm3549_vm11, %v12521_v8, %v12493_v7  ;;  %v12523_v42 = vxor.u32 2147483648, %v12499_v40  ;;  %v3654_v10 = vsel %vm3652_vm15, %v1136_v1, %v12499_v40  ;;  %v6946_v19 = vpop.eup %6945 }
 0x2f0   :  { %vm3752_vm9 = vcmp.eq.s32.totalorder %v12524_v57, 0  ;;  %vm3755_vm14 = vcmp.eq.s32.totalorder %v12524_v57, 2  ;;  %v270_v60 = vxor.u32 2147483648, %v6944_v63  ;;  %vm321_vm4 = vcmp.eq.s32.totalorder %v9791_v23, 1 }
 0x2f1   :  { %v3651_v41 = vsel %vm3649_vm6, %v12500_v0, %v12523_v42  ;;  %vm3545_vm11 = vcmp.lt.s32.totalorder %v12519_v2, 2  ;;  %v12525_v7 = vxor.u32 2147483648, %v12501_v58  ;;  %v3757_v8 = vsel %vm3755_vm14, %v1240_v46, %v12501_v58  ;;  %v12526_v42 = vld [vmem:[#allocation37_spill] sm:$0xff] }
 0x2f2   :  { %v267_v33 = vxor.u32 2147483648, %v6946_v19  ;;  %v3449_v40 = vsel %vm3442_vm8, %v3445_v5, %v3448_v6  ;;  %v3552_v0 = vsel %vm3545_vm11, %v3548_v51, %v3551_v9  ;;  %vm3648_vm6 = vcmp.lt.s32.totalorder %v12522_v36, 2  ;;  %v12528_v58 = vld [vmem:[#allocation41_spill] sm:$0xff]  ;;  %v12530_v5 = vld [vmem:[#allocation12_spill] sm:$0xff]  ;;  %v9859_v6 = vpop.permute.xlu0 %303 }
 0x2f3   :  { %v3754_v43 = vsel %vm3752_vm9, %v12503_v45, %v12525_v7  ;;  %v271_v1 = vsel %vm269_vm2, %v270_v60, %v6946_v19  ;;  %v9828_v12 = vmul.f32 %v12526_v42, %v1139_v30  ;;  %v3655_v2 = vsel %vm3648_vm6, %v3651_v41, %v3654_v10  ;;  %v12532_v51 = vld [vmem:[#allocation76_spill] sm:$0xff]  ;;  %v12533_v41 = vld [vmem:[#allocation75_spill] sm:$0xff] }
 0x2f4   :  { %vm3751_vm15 = vcmp.lt.s32.totalorder %v12524_v57, 2  ;;  %v268_v45 = vsel %vm266_vm1, %v6944_v63, %v267_v33  ;;  %v4171_v46 = vsel %vm1648_vm5, nan, %v4170_v61  ;;  %v9836_v55 = vmul.f32 %v12528_v58, %v1243_v29 }
 0x2f5   :  { %12527 = vst [vmem:[#allocation79_spill] sm:$0xff] %v9828_v12  ;;  %v3758_v9 = vsel %vm3751_vm15, %v3754_v43, %v3757_v8  ;;  %v5827_v36 = vsub.f32 %v9689_v15, %v4171_v46  ;;  %v9840_v60 = vmul.f32 %v12477_v13, %v5824_v59  ;;  %v3450_v30 = vsel %vm920_vm0, nan, %v3449_v40  ;;  %v9892_v43 = vpop.permute.xlu1 %312  ;;  %v12541_v40 = vld [vmem:[#allocation67_spill] sm:$0xff] }
 0x2f6   :  { %12529 = vst [vmem:[#allocation81_spill] sm:$0xff] %v9836_v55  ;;  %v3553_v57 = vsel %vm1024_vm7, nan, %v3552_v0  ;;  %v272_v33 = vsel %vm265_vm10, %v268_v45, %v271_v1  ;;  %v3656_v39 = vsel %vm1128_vm12, nan, %v3655_v2  ;;  %v5820_v61 = vsub.f32 %v9781_v34, %v3450_v30 }
 0x2f7   :  { %v5821_v29 = vsub.f32 %v9784_v17, %v3553_v57  ;;  %v9854_v59 = vrot.slane %v9537_v44, %v12530_v5  ;;  %v9857_v20 = vmul.f32 %v12479_v56, %v5825_v47  ;;  %v3759_v52 = vsel %vm1232_vm13, nan, %v3758_v9 }
 0x2f8   :  { %v5822_v18 = vsub.f32 %v9828_v12, %v3656_v39  ;;  %6947 = vcosq.f32 %v9652_v26  ;;  %v5823_v50 = vsub.f32 %v9836_v55, %v3759_v52  ;;  %v12093_v63 = vxor.u32 2147483648, %v12532_v51  ;;  %v12550_v52 = vld [vmem:[#allocation71_spill] sm:$0xff]  ;;  %v12553_v39 = vld [vmem:[#allocation88_spill] sm:$0xff] }
 0x2f9   :  { %12531 = vst [vmem:[#allocation83_spill] sm:$0xff] %v9857_v20  ;;  %v12092_v10 = vxor.u32 2147483648, %v12533_v41  ;;  %6949 = vsinq.f32 %v9652_v26  ;;  %v9871_v47 = vsel %vm263_vm3, nan, %v272_v33  ;;  %v9874_v19 = vmul.f32 %v12481_v49, %v5826_v48  ;;  %v12548_v33 = vld [vmem:[#allocation78_spill] sm:$0xff] }
 0x2fa   :  { %v9877_v21 = vmul.f32 %v12490_v16, %v5827_v36  ;;  %v9883_v7 = vsel %vm321_vm4, %v9840_v60, %v9656_v62  ;;  %vm320_vm5 = vcmp.eq.s32.totalorder %v9859_v6, 1  ;;  %v9887_v26 = vmul.f32 %v12512_v14, %v5820_v61  ;;  %v12545_v36 = vld [vmem:[#allocation38_spill] sm:$0xff]  ;;  %v12613_v62 = vld [vmem:[#allocation9_spill] sm:$0xff] }
 0x2fb   :  { %12534 = vst [vmem:[#allocation92_spill] sm:$0xff] %v9874_v19  ;;  %12536 = vst [vmem:[#allocation50_spill] sm:$0xff] %v9883_v7  ;;  %v9890_v24 = vmul.f32 %v12514_v32, %v5821_v29  ;;  %v9898_v48 = vsel %vm321_vm4, %v9857_v20, %v9659_v27  ;;  %v9901_v8 = vmul.f32 %v12526_v42, %v5822_v18  ;;  %vm2172_vm2 = vcmp.eq.s32.totalorder %v12541_v40, 0  ;;  %v12551_v18 = vld [vmem:[#allocation77_spill] sm:$0xff] }
 0x2fc   :  { %12535 = vst [vmem:[#allocation104_spill] sm:$0xff] %v9877_v21  ;;  %12537 = vst [vmem:[#allocation84_spill] sm:$0xff] %v9887_v26  ;;  %vm2175_vm0 = vcmp.eq.s32.totalorder %v12541_v40, 2  ;;  %v295_v0 = vmul.f32 %v9871_v47, %v9537_v44  ;;  %v9908_v1 = vmul.f32 %v12528_v58, %v5823_v50  ;;  %v2174_v2 = vsel %vm2172_vm2, %v12533_v41, %v12093_v63  ;;  %v12561_v58 = vld [vmem:[#allocation93_spill] sm:$0xff] }
 0x2fd   :  { %12538 = vst [vmem:[#allocation49_spill] sm:$0xff] %v9890_v24  ;;  %12539 = vst [vmem:[#allocation55_spill] sm:$0xff] %v9898_v48  ;;  %v2177_v45 = vsel %vm2175_vm0, %v12092_v10, %v12532_v51  ;;  %v9920_v46 = vsel %vm321_vm4, %v9874_v19, %v9662_v35  ;;  %v9926_v9 = vsel %vm321_vm4, %v9877_v21, %v9689_v15  ;;  %vm323_vm7 = vcmp.eq.s32.totalorder %v9892_v43, 1  ;;  %v12599_v15 = vld [vmem:[#allocation87_spill] sm:$0xff] }
 0x2fe   :  { %12540 = vst [vmem:[#allocation54_spill] sm:$0xff] %v9901_v8  ;;  %12542 = vst [vmem:[#allocation43_spill] sm:$0xff] %v9908_v1  ;;  %vm2168_vm1 = vweird.f32 %v12545_v36  ;;  %v9934_v30 = vsel %vm320_vm5, %v9887_v26, %v9781_v34  ;;  %v9940_v57 = vsel %vm320_vm5, %v9890_v24, %v9784_v17  ;;  %vm2171_vm10 = vcmp.lt.s32.totalorder %v12541_v40, 2  ;;  %v10041_v24 = vpop.permute.xlu0 %309  ;;  %v12601_v36 = vld [vmem:[#allocation25_spill] sm:$0xff]  ;;  %v12650_v43 = vld [vmem:[#allocation127_spill] sm:$0xff] }
 0x2ff   :  { %12543 = vst [vmem:[#allocation107_spill] sm:$0xff] %v9920_v46  ;;  %12544 = vst [vmem:[#allocation45_spill] sm:$0xff] %v9926_v9  ;;  %v9948_v61 = vsel %vm320_vm5, %v9901_v8, %v9828_v12  ;;  %v2178_v29 = vsel %vm2171_vm10, %v2174_v2, %v2177_v45  ;;  %vm2275_vm12 = vcmp.lt.s32.totalorder %v12550_v52, 2  ;;  %v9953_v10 = vrot.slane %v295_v0, %v12457_v3  ;;  %v12557_v12 = vld [vmem:[#allocation86_spill] sm:$0xff]  ;;  %v12559_v9 = vld [vmem:[#allocation44_spill] sm:$0xff] }
 0x300   :  { %12546 = vst [vmem:[#allocation65_spill] sm:$0xff] %v9934_v30  ;;  %12547 = vst [vmem:[#allocation64_spill] sm:$0xff] %v9940_v57  ;;  %v9956_v63 = vrot.slane %v295_v0, %v12458_v38  ;;  %v9962_v40 = vsel %vm320_vm5, %v9908_v1, %v9836_v55  ;;  %v9966_v2 = vrot.slane %v295_v0, %v12462_v31  ;;  %vm2276_vm13 = vcmp.eq.s32.totalorder %v12550_v52, 0  ;;  %v12554_v30 = vld [vmem:[#allocation39_spill] sm:$0xff]  ;;  %v12556_v55 = vld [vmem:[#allocation73_spill] sm:$0xff] }
 0x301   :  { %12549 = vst [vmem:[#allocation70_spill] sm:$0xff] %v9948_v61  ;;  %12552 = vst [vmem:[#allocation52_spill] sm:$0xff] %v9962_v40  ;;  %v9969_v45 = vrot.slane %v295_v0, %v12530_v5  ;;  %vm2279_vm8 = vcmp.eq.s32.totalorder %v12550_v52, 2  ;;  %v2179_v61 = vsel %vm2168_vm1, nan, %v2178_v29  ;;  %vm2272_vm3 = vweird.f32 %v12554_v30  ;;  %v12560_v29 = vld [vmem:[#allocation95_spill] sm:$0xff]  ;;  %v12607_v30 = vld [vmem:[#allocation26_spill] sm:$0xff] }
 0x302   :  { %v9973_v50 = vpop.eup %6947  ;;  %v12555_v40 = vxor.u32 2147483648, %v12548_v33  ;;  %vm2379_vm9 = vcmp.lt.s32.totalorder %v12556_v55, 2  ;;  %v2384_v0 = vxor.u32 2147483648, %v12557_v12  ;;  %v12558_v34 = vxor.u32 2147483648, %v12551_v18  ;;  %v12595_v38 = vld [vmem:[#allocation59_spill] sm:$0xff] }
 0x303   :  { %v9983_v17 = vpop.eup %6949  ;;  %vm2376_vm14 = vweird.f32 %v12559_v9  ;;  %vm2380_vm11 = vcmp.eq.s32.totalorder %v12556_v55, 0  ;;  %v2485_v46 = vxor.u32 2147483648, %v12560_v29  ;;  %v10002_v7 = vsel %vm321_vm4, %v9956_v63, %v9551_v22 }
 0x304   :  { %v2278_v57 = vsel %vm2276_vm13, %v12551_v18, %v12555_v40  ;;  %v2281_v1 = vsel %vm2279_vm8, %v12558_v34, %v12548_v33  ;;  %v9996_v40 = vsel %vm321_vm4, %v9953_v10, %v9547_v11  ;;  %12563 = vst [vmem:[#allocation61_spill] sm:$0xff] %v10002_v7  ;;  %v12564_v34 = vxor.u32 2147483648, %v12553_v39 }
 0x305   :  { %12562 = vst [vmem:[#allocation66_spill] sm:$0xff] %v9996_v40  ;;  %vm2383_vm6 = vcmp.eq.s32.totalorder %v12556_v55, 2  ;;  %v10012_v48 = vsel %vm321_vm4, %v9966_v2, %v9565_v37  ;;  %v10018_v40 = vsel %vm321_vm4, %v9969_v45, %v9854_v59  ;;  %v10024_v7 = vsel %vm320_vm5, %v9953_v10, %v9547_v11 }
 0x306   :  { %v2382_v8 = vsel %vm2380_vm11, %v12557_v12, %v12564_v34  ;;  %12565 = vst [vmem:[#allocation15_spill] sm:$0xff] %v10012_v48  ;;  %12566 = vst [vmem:[#allocation16_spill] sm:$0xff] %v10018_v40  ;;  %v10030_v34 = vsel %vm320_vm5, %v9956_v63, %v9551_v22  ;;  %v10036_v48 = vsel %vm320_vm5, %v9966_v2, %v9565_v37  ;;  %v12570_v40 = vld [vmem:[#allocation89_spill] sm:$0xff]  ;;  %v12573_v26 = vxor.u32 2147483648, %v12561_v58 }
 0x307   :  { %12567 = vst [vmem:[#allocation17_spill] sm:$0xff] %v10024_v7  ;;  %12568 = vst [vmem:[#allocation21_spill] sm:$0xff] %v10030_v34  ;;  %v2385_v23 = vsel %vm2383_vm6, %v2384_v0, %v12553_v39  ;;  %vm2484_vm4 = vcmp.eq.s32.totalorder %v12570_v40, 0  ;;  %vm2487_vm15 = vcmp.eq.s32.totalorder %v12570_v40, 2  ;;  %v10047_v7 = vsel %vm320_vm5, %v9969_v45, %v9854_v59 }
 0x308   :  { %12569 = vst [vmem:[#allocation46_spill] sm:$0xff] %v10036_v48  ;;  %12571 = vst [vmem:[#allocation51_spill] sm:$0xff] %v10047_v7  ;;  %v10053_v34 = vsel %vm323_vm7, %v9953_v10, %v9547_v11  ;;  %v2486_v48 = vsel %vm2484_vm4, %v12561_v58, %v2485_v46  ;;  %v2489_v5 = vsel %vm2487_vm15, %v12573_v26, %v12560_v29  ;;  %vm2483_vm5 = vcmp.lt.s32.totalorder %v12570_v40, 2  ;;  %v12576_v7 = vld [vmem:[#allocation68_spill] sm:$0xff] }
 0x309   :  { %12572 = vst [vmem:[#allocation53_spill] sm:$0xff] %v10053_v34  ;;  %v10063_v31 = vsel %vm323_vm7, %v9956_v63, %v9551_v22  ;;  %v10069_v6 = vsel %vm323_vm7, %v9966_v2, %v9565_v37  ;;  %v2282_v34 = vsel %vm2275_vm12, %v2278_v57, %v2281_v1  ;;  %v2386_v26 = vsel %vm2379_vm9, %v2382_v8, %v2385_v23  ;;  %v12580_v57 = vld [vmem:[#allocation13_spill] sm:$0xff] }
 0x30a   :  { %12574 = vst [vmem:[#allocation62_spill] sm:$0xff] %v10063_v31  ;;  %12575 = vst [vmem:[#allocation76_spill] sm:$0xff] %v10069_v6  ;;  %vm4679_vm2 = vcmp.eq.s32.totalorder %v12576_v7, 0  ;;  %vm4682_vm0 = vcmp.eq.s32.totalorder %v12576_v7, 2  ;;  %vm322_vm10 = vcmp.eq.s32.totalorder %v10041_v24, 1  ;;  %v2490_v31 = vsel %vm2483_vm5, %v2486_v48, %v2489_v5 }
 0x30b   :  { %v12577_v42 = vxor.u32 2147483648, %v12532_v51  ;;  %v12578_v52 = vxor.u32 2147483648, %v12533_v41  ;;  %v10089_v55 = vsel %vm322_vm10, %v9953_v10, %v9547_v11  ;;  %v2283_v8 = vsel %vm2272_vm3, nan, %v2282_v34 }
 0x30c   :  { %12579 = vst [vmem:[#allocation75_spill] sm:$0xff] %v10089_v55  ;;  %vm2480_vm12 = vweird.f32 %v12580_v57  ;;  %v10104_v5 = vsel %vm322_vm10, %v9966_v2, %v9565_v37  ;;  %vm4678_vm13 = vcmp.lt.s32.totalorder %v12576_v7, 2  ;;  %v10116_v40 = vsel %vm322_vm10, %v9969_v45, %v9854_v59 }
 0x30d   :  { %v4681_v32 = vsel %vm4679_vm2, %v12533_v41, %v12577_v42  ;;  %v4684_v1 = vsel %vm4682_vm0, %v12578_v52, %v12532_v51  ;;  %v10098_v42 = vsel %vm322_vm10, %v9956_v63, %v9551_v22  ;;  %12582 = vst [vmem:[#allocation38_spill] sm:$0xff] %v10104_v5  ;;  %v2387_v51 = vsel %vm2376_vm14, nan, %v2386_v26  ;;  %v12583_v41 = vld [vmem:[#allocation56_spill] sm:$0xff]  ;;  %12585 = vst [vmem:[#allocation71_spill] sm:$0xff] %v10116_v40  ;;  %v12590_v40 = vld [vmem:[#allocation57_spill] sm:$0xff] }
 0x30e   :  { %12581 = vst [vmem:[#allocation67_spill] sm:$0xff] %v10098_v42  ;;  %v10109_v48 = vmul.f32 %v12583_v41, %v2179_v61  ;;  %v2491_v34 = vsel %vm2480_vm12, nan, %v2490_v31  ;;  %v4685_v23 = vsel %vm4678_vm13, %v4681_v32, %v4684_v1  ;;  %v12586_v52 = vld [vmem:[#allocation72_spill] sm:$0xff]  ;;  %v12587_v26 = vxor.u32 2147483648, %v12548_v33  ;;  %v12592_v31 = vld [vmem:[#allocation58_spill] sm:$0xff] }
 0x30f   :  { %vm4782_vm8 = vcmp.eq.s32.totalorder %v12586_v52, 0  ;;  %vm4785_vm9 = vcmp.eq.s32.totalorder %v12586_v52, 2  ;;  %v12588_v7 = vxor.u32 2147483648, %v12551_v18  ;;  %v12589_v42 = vld [vmem:[#allocation80_spill] sm:$0xff]  ;;  %v10131_v55 = vmul.f32 %v12590_v40, %v2283_v8 }
 0x310   :  { %12584 = vst [vmem:[#allocation78_spill] sm:$0xff] %v10109_v48  ;;  %v4784_v61 = vsel %vm4782_vm8, %v12551_v18, %v12587_v26  ;;  %vm4885_vm11 = vcmp.eq.s32.totalorder %v12589_v42, 0  ;;  %vm4888_vm6 = vcmp.eq.s32.totalorder %v12589_v42, 2  ;;  %v10134_v32 = vmul.f32 %v12592_v31, %v2387_v51 }
 0x311   :  { %v4787_v5 = vsel %vm4785_vm9, %v12588_v7, %v12548_v33  ;;  %12591 = vst [vmem:[#allocation77_spill] sm:$0xff] %v10131_v55  ;;  %v12594_v1 = vxor.u32 2147483648, %v12553_v39  ;;  %v4890_v26 = vsel %vm4888_vm6, %v2384_v0, %v12553_v39  ;;  %v10141_v3 = vmul.f32 %v12595_v38, %v2491_v34  ;;  %v12597_v33 = vld [vmem:[#allocation32_spill] sm:$0xff]  ;;  %v12598_v7 = vld [vmem:[#allocation31_spill] sm:$0xff] }
 0x312   :  { %12593 = vst [vmem:[#allocation88_spill] sm:$0xff] %v10134_v32  ;;  %vm4781_vm4 = vcmp.lt.s32.totalorder %v12586_v52, 2  ;;  %v12115_v18 = vxor.u32 2147483648, %v12597_v33  ;;  %v12117_v14 = vxor.u32 2147483648, %v12598_v7  ;;  %v4686_v8 = vsel %vm2168_vm1, nan, %v4685_v23 }
 0x313   :  { %v4887_v6 = vsel %vm4885_vm11, %v12557_v12, %v12594_v1  ;;  %12596 = vst [vmem:[#allocation39_spill] sm:$0xff] %v10141_v3  ;;  %v4788_v51 = vsel %vm4781_vm4, %v4784_v61, %v4787_v5  ;;  %vm4884_vm15 = vcmp.lt.s32.totalorder %v12589_v42, 2  ;;  %vm4988_vm5 = vcmp.eq.s32.totalorder %v12599_v15, 0  ;;  %v12602_v42 = vld [vmem:[#allocation35_spill] sm:$0xff]  ;;  %v12603_v5 = vld [vmem:[#allocation33_spill] sm:$0xff] }
 0x314   :  { %v4891_v12 = vsel %vm4884_vm15, %v4887_v6, %v4890_v26  ;;  %vm4987_vm2 = vcmp.lt.s32.totalorder %v12599_v15, 2  ;;  %v4990_v39 = vsel %vm4988_vm5, %v12561_v58, %v2485_v46  ;;  %vm4991_vm0 = vcmp.eq.s32.totalorder %v12599_v15, 2  ;;  %v12604_v61 = vld [vmem:[#allocation23_spill] sm:$0xff]  ;;  %v12605_v26 = vld [vmem:[#allocation24_spill] sm:$0xff] }
 0x315   :  { %v12600_v0 = vxor.u32 2147483648, %v12561_v58  ;;  %v5832_v52 = vsub.f32 %v10109_v48, %v4686_v8  ;;  %vm1756_vm1 = vcmp.eq.s32.totalorder %v12601_v36, 0  ;;  %vm1759_vm13 = vcmp.eq.s32.totalorder %v12601_v36, 2 }
 0x316   :  { %v1758_v6 = vsel %vm1756_vm1, %v12598_v7, %v12115_v18  ;;  %v1761_v46 = vsel %vm1759_vm13, %v12117_v14, %v12597_v33  ;;  %v1861_v15 = vxor.u32 2147483648, %v12602_v42  ;;  %v1864_v23 = vxor.u32 2147483648, %v12603_v5 }
 0x317   :  { %v4993_v34 = vsel %vm4991_vm0, %v12600_v0, %v12560_v29  ;;  %v4789_v58 = vsel %vm2272_vm3, nan, %v4788_v51  ;;  %v4892_v29 = vsel %vm2376_vm14, nan, %v4891_v12  ;;  %v1965_v1 = vxor.u32 2147483648, %v12604_v61  ;;  %v12608_v12 = vld [vmem:[#allocation30_spill] sm:$0xff] }
 0x318   :  { %v1968_v8 = vxor.u32 2147483648, %v12605_v26  ;;  %v4994_v0 = vsel %vm4987_vm2, %v4990_v39, %v4993_v34  ;;  %v5833_v18 = vsub.f32 %v10131_v55, %v4789_v58  ;;  %v5834_v35 = vsub.f32 %v10134_v32, %v4892_v29  ;;  %v12610_v58 = vld [vmem:[#allocation47_spill] sm:$0xff] }
 0x319   :  { %vm1755_vm8 = vcmp.lt.s32.totalorder %v12601_v36, 2  ;;  %v10177_v14 = vmul.f32 %v12583_v41, %v5832_v52  ;;  %vm1860_vm3 = vcmp.eq.s32.totalorder %v12607_v30, 0  ;;  %vm1863_vm9 = vcmp.eq.s32.totalorder %v12607_v30, 2  ;;  %v12609_v36 = vld [vmem:[#allocation48_spill] sm:$0xff] }
 0x31a   :  { %v1762_v27 = vsel %vm1755_vm8, %v1758_v6, %v1761_v46  ;;  %v1862_v9 = vsel %vm1860_vm3, %v12603_v5, %v1861_v15  ;;  %v1865_v51 = vsel %vm1863_vm9, %v1864_v23, %v12602_v42  ;;  %vm1964_vm14 = vcmp.eq.s32.totalorder %v12608_v12, 0 }
 0x31b   :  { %12606 = vst [vmem:[#allocation73_spill] sm:$0xff] %v10177_v14  ;;  %vm1967_vm11 = vcmp.eq.s32.totalorder %v12608_v12, 2  ;;  %v1966_v39 = vsel %vm1964_vm14, %v12605_v26, %v1965_v1  ;;  %v2069_v52 = vxor.u32 2147483648, %v12609_v36  ;;  %v2072_v6 = vxor.u32 2147483648, %v12610_v58 }
 0x31c   :  { %v1969_v34 = vsel %vm1967_vm11, %v1968_v8, %v12604_v61  ;;  %v10193_v46 = vsel %vm323_vm7, %v9969_v45, %v9854_v59  ;;  %v4995_v29 = vsel %vm2480_vm12, nan, %v4994_v0  ;;  %v10198_v41 = vmul.f32 %v12590_v40, %v5833_v18 }
 0x31d   :  { %12611 = vst [vmem:[#allocation86_spill] sm:$0xff] %v10193_v46  ;;  %vm1752_vm6 = vweird.f32 %v12613_v62  ;;  %v5835_v44 = vsub.f32 %v10141_v3, %v4995_v29  ;;  %vm1859_vm4 = vcmp.lt.s32.totalorder %v12607_v30, 2  ;;  %vm1963_vm15 = vcmp.lt.s32.totalorder %v12608_v12, 2  ;;  %v12614_v46 = vld [vmem:[#allocation42_spill] sm:$0xff]  ;;  %v10219_v30 = vpop.permute.xlu1 %318 }
 0x31e   :  { %12612 = vst [vmem:[#allocation44_spill] sm:$0xff] %v10198_v41  ;;  %v1763_v21 = vsel %vm1752_vm6, nan, %v1762_v27  ;;  %v1866_v19 = vsel %vm1859_vm4, %v1862_v9, %v1865_v51  ;;  %v1970_v20 = vsel %vm1963_vm15, %v1966_v39, %v1969_v34  ;;  %vm2068_vm5 = vcmp.eq.s32.totalorder %v12614_v46, 0  ;;  %v12619_v51 = vld [vmem:[#allocation11_spill] sm:$0xff]  ;;  %v12620_v12 = vld [vmem:[#allocation14_spill] sm:$0xff] }
 0x31f   :  { %vm2071_vm12 = vcmp.eq.s32.totalorder %v12614_v46, 2  ;;  %v10209_v57 = vmul.f32 %v12592_v31, %v5834_v35  ;;  %v10215_v18 = vsel %vm323_vm7, %v10177_v14, %v10109_v48  ;;  %v2070_v27 = vsel %vm2068_vm5, %v12610_v58, %v2069_v52  ;;  %v12618_v35 = vld [vmem:[#allocation10_spill] sm:$0xff] }
 0x320   :  { %12616 = vst [vmem:[#allocation93_spill] sm:$0xff] %v10215_v18  ;;  %v2073_v0 = vsel %vm2071_vm12, %v2072_v6, %v12609_v36  ;;  %v10225_v9 = vsel %vm323_vm7, %v10198_v41, %v10131_v55  ;;  %vm1856_vm2 = vweird.f32 %v12618_v35  ;;  %vm1960_vm0 = vweird.f32 %v12619_v51  ;;  %v12621_v29 = vld [vmem:[#allocation18_spill] sm:$0xff]  ;;  %v12623_v55 = vld [vmem:[#allocation27_spill] sm:$0xff] }
 0x321   :  { %12615 = vst [vmem:[#allocation95_spill] sm:$0xff] %v10209_v57  ;;  %12617 = vst [vmem:[#allocation89_spill] sm:$0xff] %v10225_v9  ;;  %vm2064_vm1 = vweird.f32 %v12620_v12  ;;  %v1867_v39 = vsel %vm1856_vm2, nan, %v1866_v19  ;;  %v1971_v34 = vsel %vm1960_vm0, nan, %v1970_v20  ;;  %vm2067_vm13 = vcmp.lt.s32.totalorder %v12614_v46, 2  ;;  %v12625_v19 = vld [vmem:[#allocation28_spill] sm:$0xff] }
 0x322   :  { %v10236_v18 = vmul.f32 %v12621_v29, %v1763_v21  ;;  %v2074_v48 = vsel %vm2067_vm13, %v2070_v27, %v2073_v0  ;;  %vm4267_vm8 = vcmp.eq.s32.totalorder %v12623_v55, 0  ;;  %vm4270_vm3 = vcmp.eq.s32.totalorder %v12623_v55, 2  ;;  %v12630_v14 = vld [vmem:[#allocation34_spill] sm:$0xff] }
 0x323   :  { %vm325_vm9 = vcmp.eq.s32.totalorder %v10219_v30, 1  ;;  %v12624_v9 = vxor.u32 2147483648, %v12597_v33  ;;  %vm4370_vm14 = vcmp.eq.s32.totalorder %v12625_v19, 0  ;;  %v12628_v46 = vxor.u32 2147483648, %v12598_v7 }
 0x324   :  { %12622 = vst [vmem:[#allocation68_spill] sm:$0xff] %v10236_v18  ;;  %v10249_v20 = vsel %vm325_vm9, %v9953_v10, %v9547_v11  ;;  %v10255_v21 = vsel %vm325_vm9, %v9956_v63, %v9551_v22  ;;  %v4372_v0 = vsel %vm4370_vm14, %v12603_v5, %v1861_v15  ;;  %vm4373_vm11 = vcmp.eq.s32.totalorder %v12625_v19, 2  ;;  %v12632_v5 = vld [vmem:[#allocation40_spill] sm:$0xff] }
 0x325   :  { %v4269_v41 = vsel %vm4267_vm8, %v12598_v7, %v12624_v9  ;;  %12626 = vst [vmem:[#allocation13_spill] sm:$0xff] %v10249_v20  ;;  %12627 = vst [vmem:[#allocation72_spill] sm:$0xff] %v10255_v21  ;;  %v4272_v27 = vsel %vm4270_vm3, %v12628_v46, %v12597_v33  ;;  %v10266_v9 = vsel %vm325_vm9, %v9966_v2, %v9565_v37  ;;  %vm4473_vm4 = vcmp.eq.s32.totalorder %v12630_v14, 0  ;;  %v12633_v46 = vld [vmem:[#allocation19_spill] sm:$0xff] }
 0x326   :  { %12629 = vst [vmem:[#allocation80_spill] sm:$0xff] %v10266_v9  ;;  %v4375_v20 = vsel %vm4373_vm11, %v1864_v23, %v12602_v42  ;;  %vm4476_vm15 = vcmp.eq.s32.totalorder %v12630_v14, 2  ;;  %v10275_v33 = vsel %vm325_vm9, %v9969_v45, %v9854_v59  ;;  %v4475_v7 = vsel %vm4473_vm4, %v12605_v26, %v1965_v1  ;;  %v12635_v1 = vld [vmem:[#allocation20_spill] sm:$0xff] }
 0x327   :  { %12631 = vst [vmem:[#allocation32_spill] sm:$0xff] %v10275_v33  ;;  %v4478_v15 = vsel %vm4476_vm15, %v1968_v8, %v12604_v61  ;;  %vm4576_vm5 = vcmp.eq.s32.totalorder %v12632_v5, 0  ;;  %vm4579_vm12 = vcmp.eq.s32.totalorder %v12632_v5, 2  ;;  %vm4266_vm13 = vcmp.lt.s32.totalorder %v12623_v55, 2 }
 0x328   :  { %vm4369_vm8 = vcmp.lt.s32.totalorder %v12625_v19, 2  ;;  %v4578_v42 = vsel %vm4576_vm5, %v12610_v58, %v2069_v52  ;;  %v4581_v23 = vsel %vm4579_vm12, %v2072_v6, %v12609_v36  ;;  %v10286_v9 = vmul.f32 %v12633_v46, %v1867_v39  ;;  %v12638_v52 = vld [vmem:[#allocation112_spill] sm:$0xff]  ;;  %v12639_v6 = vld [vmem:[#allocation110_spill] sm:$0xff] }
 0x329   :  { %v4273_v33 = vsel %vm4266_vm13, %v4269_v41, %v4272_v27  ;;  %v4376_v21 = vsel %vm4369_vm8, %v4372_v0, %v4375_v20  ;;  %vm4472_vm3 = vcmp.lt.s32.totalorder %v12630_v14, 2  ;;  %v2075_v61 = vsel %vm2064_vm1, nan, %v2074_v48  ;;  %v12641_v20 = vld [vmem:[#allocation22_spill] sm:$0xff] }
 0x32a   :  { %12634 = vst [vmem:[#allocation31_spill] sm:$0xff] %v10286_v9  ;;  %v10292_v26 = vmul.f32 %v12635_v1, %v1971_v34  ;;  %v4479_v55 = vsel %vm4472_vm3, %v4475_v7, %v4478_v15  ;;  %vm4575_vm14 = vcmp.lt.s32.totalorder %v12632_v5, 2  ;;  %v10296_v8 = vmul.f32 %v12595_v38, %v5835_v44  ;;  %v12640_v34 = vld [vmem:[#allocation113_spill] sm:$0xff]  ;;  %v12643_v5 = vld [vmem:[#allocation115_spill] sm:$0xff] }
 0x32b   :  { %v4582_v36 = vsel %vm4575_vm14, %v4578_v42, %v4581_v23  ;;  %v3005_v58 = vxor.u32 2147483648, %v12638_v52  ;;  %v3008_v41 = vxor.u32 2147483648, %v12639_v6  ;;  %v4274_v14 = vsel %vm1752_vm6, nan, %v4273_v33 }
 0x32c   :  { %12636 = vst [vmem:[#allocation87_spill] sm:$0xff] %v10292_v26  ;;  %12637 = vst [vmem:[#allocation25_spill] sm:$0xff] %v10296_v8  ;;  %v4377_v48 = vsel %vm1856_vm2, nan, %v4376_v21  ;;  %v12136_v39 = vxor.u32 2147483648, %v9143_v28  ;;  %v12135_v19 = vxor.u32 2147483648, %v12640_v34  ;;  %v10307_v27 = vmul.f32 %v12641_v20, %v2075_v61  ;;  %v12642_v21 = vld [vmem:[#allocation108_spill] sm:$0xff] }
 0x32d   :  { %v4480_v44 = vsel %vm1960_vm0, nan, %v4479_v55  ;;  %v5828_v0 = vsub.f32 %v10236_v18, %v4274_v14  ;;  %v5829_v7 = vsub.f32 %v10286_v9, %v4377_v48  ;;  %v4583_v62 = vsel %vm2064_vm1, nan, %v4582_v36 }
 0x32e   :  { %v5830_v35 = vsub.f32 %v10292_v26, %v4480_v44  ;;  %vm3004_vm6 = vcmp.eq.s32.totalorder %v12642_v21, 0  ;;  %vm3007_vm2 = vcmp.eq.s32.totalorder %v12642_v21, 2  ;;  %vm3108_vm11 = vcmp.eq.s32.totalorder %v12643_v5, 0 }
 0x32f   :  { %v3006_v33 = vsel %vm3004_vm6, %v12639_v6, %v3005_v58  ;;  %v3009_v15 = vsel %vm3007_vm2, %v3008_v41, %v12638_v52  ;;  %vm3111_vm0 = vcmp.eq.s32.totalorder %v12643_v5, 2  ;;  %v3110_v51 = vsel %vm3108_vm11, %v12640_v34, %v12136_v39 }
 0x330   :  { %v3113_v12 = vsel %vm3111_vm0, %v12135_v19, %v9143_v28  ;;  %v3213_v42 = vxor.u32 2147483648, %v9434_v53  ;;  %v3216_v23 = vxor.u32 2147483648, %v9396_v54  ;;  %v10334_v61 = vsel %vm323_vm7, %v10209_v57, %v10134_v32 }
 0x331   :  { %12644 = vst [vmem:[#allocation35_spill] sm:$0xff] %v10334_v61  ;;  %v5831_v55 = vsub.f32 %v10307_v27, %v4583_v62  ;;  %v10338_v36 = vmul.f32 %v12621_v29, %v5828_v0  ;;  %v10341_v14 = vmul.f32 %v12633_v46, %v5829_v7  ;;  %v10347_v48 = vsel %vm323_vm7, %v10296_v8, %v10141_v3  ;;  %v12649_v0 = vld [vmem:[#allocation116_spill] sm:$0xff] }
 0x332   :  { %12647 = vst [vmem:[#allocation24_spill] sm:$0xff] %v10347_v48  ;;  %v10350_v44 = vmul.f32 %v12635_v1, %v5830_v35  ;;  %vm3003_vm1 = vcmp.lt.s32.totalorder %v12642_v21, 2  ;;  %vm3107_vm4 = vcmp.lt.s32.totalorder %v12643_v5, 2  ;;  %vm3212_vm15 = vcmp.eq.s32.totalorder %v12649_v0, 0  ;;  %v12651_v48 = vld [vmem:[#allocation126_spill] sm:$0xff] }
 0x333   :  { %12645 = vst [vmem:[#allocation33_spill] sm:$0xff] %v10338_v36  ;;  %12646 = vst [vmem:[#allocation23_spill] sm:$0xff] %v10341_v14  ;;  %v3010_v62 = vsel %vm3003_vm1, %v3006_v33, %v3009_v15  ;;  %v3114_v19 = vsel %vm3107_vm4, %v3110_v51, %v3113_v12  ;;  %vm3215_vm5 = vcmp.eq.s32.totalorder %v12649_v0, 2  ;;  %v3214_v7 = vsel %vm3212_vm15, %v9396_v54, %v3213_v42  ;;  %v12655_v15 = vld [vmem:[#allocation82_spill] sm:$0xff]  ;;  %v12656_v51 = vld [vmem:[#allocation85_spill] sm:$0xff] }
 0x334   :  { %12648 = vst [vmem:[#allocation26_spill] sm:$0xff] %v10350_v44  ;;  %v3217_v39 = vsel %vm3215_vm5, %v3216_v23, %v9434_v53  ;;  %v3317_v61 = vxor.u32 2147483648, %v12650_v43  ;;  %v3320_v3 = vxor.u32 2147483648, %v12651_v48  ;;  %v10361_v35 = vmul.f32 %v12641_v20, %v5831_v55  ;;  %v12657_v12 = vld [vmem:[#allocation8_spill] sm:$0xff]  ;;  %v10381_v55 = vpop.permute.xlu0 %315  ;;  %v12659_v20 = vld [vmem:[#allocation94_spill] sm:$0xff] }
 0x335   :  { %v10367_v21 = vsel %vm322_vm10, %v10338_v36, %v10236_v18  ;;  %v10373_v33 = vsel %vm322_vm10, %v10341_v14, %v10286_v9  ;;  %vm3000_vm7 = vweird.f32 %v12655_v15  ;;  %vm3104_vm12 = vweird.f32 %v12656_v51  ;;  %12658 = vst [vmem:[#allocation9_spill] sm:$0xff] %v10381_v55  ;;  %v12661_v14 = vld [vmem:[#allocation109_spill] sm:$0xff]  ;;  %v12664_v36 = vld [vmem:[#allocation98_spill] sm:$0xff] }
 0x336   :  { %12652 = vst [vmem:[#allocation30_spill] sm:$0xff] %v10361_v35  ;;  %12653 = vst [vmem:[#allocation48_spill] sm:$0xff] %v10367_v21  ;;  %v3011_v5 = vsel %vm3000_vm7, nan, %v3010_v62  ;;  %vm3208_vm13 = vweird.f32 %v12657_v12  ;;  %vm3211_vm8 = vcmp.lt.s32.totalorder %v12649_v0, 2  ;;  %v3115_v21 = vsel %vm3104_vm12, nan, %v3114_v19  ;;  %v10396_v19 = vpop.permute.xlu1 %387  ;;  %v12684_v51 = vld [vmem:[#allocation129_spill] sm:$0xff] }
 0x337   :  { %12654 = vst [vmem:[#allocation47_spill] sm:$0xff] %v10373_v33  ;;  %v3218_v18 = vsel %vm3211_vm8, %v3214_v7, %v3217_v39  ;;  %vm3312_vm3 = vweird.f32 %v12659_v20  ;;  %v12660_v33 = vld [vmem:[#allocation124_spill] sm:$0xff]  ;;  %vm5503_vm2 = vcmp.eq.s32.totalorder %v12661_v14, 0  ;;  %vm5506_vm11 = vcmp.eq.s32.totalorder %v12661_v14, 2  ;;  %v12662_v7 = vld [vmem:[#allocation97_spill] sm:$0xff]  ;;  %v12685_v12 = vld [vmem:[#allocation102_spill] sm:$0xff] }
 0x338   :  { %vm3316_vm14 = vcmp.eq.s32.totalorder %v12660_v33, 0  ;;  %vm3319_vm6 = vcmp.eq.s32.totalorder %v12660_v33, 2  ;;  %vm3315_vm0 = vcmp.lt.s32.totalorder %v12660_v33, 2  ;;  %v5505_v0 = vsel %vm5503_vm2, %v12639_v6, %v3005_v58  ;;  %v12674_v33 = vld [vmem:[#allocation123_spill] sm:$0xff] }
 0x339   :  { %v3318_v62 = vsel %vm3316_vm14, %v12651_v48, %v3317_v61  ;;  %v3321_v9 = vsel %vm3319_vm6, %v3320_v3, %v12650_v43  ;;  %v5508_v39 = vsel %vm5506_vm11, %v3008_v41, %v12638_v52  ;;  %vm324_vm1 = vcmp.eq.s32.totalorder %v10381_v55, 1 }
 0x33a   :  { %v10399_v32 = vmul.f32 %v12662_v7, %v3011_v5  ;;  %v10402_v1 = vmul.f32 %v12664_v36, %v3115_v21  ;;  %v10408_v46 = vsel %vm324_vm1, %v9953_v10, %v9547_v11  ;;  %v10414_v52 = vsel %vm324_vm1, %v9956_v63, %v9551_v22  ;;  %v12669_v10 = vld [vmem:[#allocation117_spill] sm:$0xff] }
 0x33b   :  { %12666 = vst [vmem:[#allocation11_spill] sm:$0xff] %v10408_v46  ;;  %12667 = vst [vmem:[#allocation14_spill] sm:$0xff] %v10414_v52  ;;  %v3219_v58 = vsel %vm3208_vm13, nan, %v3218_v18  ;;  %v3322_v6 = vsel %vm3315_vm0, %v3318_v62, %v3321_v9  ;;  %vm5502_vm4 = vcmp.lt.s32.totalorder %v12661_v14, 2  ;;  %v10423_v41 = vsel %vm324_vm1, %v9966_v2, %v9565_v37  ;;  %v12673_v2 = vld [vmem:[#allocation120_spill] sm:$0xff]  ;;  %v12692_v46 = vld [vmem:[#allocation133_spill] sm:$0xff] }
 0x33c   :  { %12663 = vst [vmem:[#allocation42_spill] sm:$0xff] %v10399_v32  ;;  %12665 = vst [vmem:[#allocation10_spill] sm:$0xff] %v10402_v1  ;;  %v5509_v11 = vsel %vm5502_vm4, %v5505_v0, %v5508_v39  ;;  %vm5606_vm15 = vcmp.eq.s32.totalorder %v12669_v10, 0  ;;  %vm5609_vm5 = vcmp.eq.s32.totalorder %v12669_v10, 2  ;;  %v10431_v22 = vsel %vm324_vm1, %v9969_v45, %v9854_v59 }
 0x33d   :  { %12668 = vst [vmem:[#allocation27_spill] sm:$0xff] %v10423_v41  ;;  %12670 = vst [vmem:[#allocation28_spill] sm:$0xff] %v10431_v22  ;;  %v12671_v63 = vxor.u32 2147483648, %v9143_v28  ;;  %v12672_v9 = vxor.u32 2147483648, %v12640_v34  ;;  %vm5709_vm8 = vcmp.eq.s32.totalorder %v12673_v2, 0  ;;  %vm5712_vm14 = vcmp.eq.s32.totalorder %v12673_v2, 2 }
 0x33e   :  { %v5711_v14 = vsel %vm5709_vm8, %v9396_v54, %v3213_v42  ;;  %v5714_v21 = vsel %vm5712_vm14, %v3216_v23, %v9434_v53  ;;  %vm5812_vm6 = vcmp.eq.s32.totalorder %v12674_v33, 0  ;;  %vm5815_vm2 = vcmp.eq.s32.totalorder %v12674_v33, 2  ;;  %v12675_v54 = vld [vmem:[#allocation100_spill] sm:$0xff]  ;;  %v12690_v22 = vld [vmem:[#allocation131_spill] sm:$0xff] }
 0x33f   :  { %v5608_v18 = vsel %vm5606_vm15, %v12640_v34, %v12671_v63  ;;  %v5611_v37 = vsel %vm5609_vm5, %v12672_v9, %v9143_v28  ;;  %v5814_v59 = vsel %vm5812_vm6, %v12651_v48, %v3317_v61  ;;  %v5817_v45 = vsel %vm5815_vm2, %v3320_v3, %v12650_v43  ;;  %v10449_v34 = vpop.permute.xlu1 %393  ;;  %v12677_v43 = vld [vmem:[#allocation125_spill] sm:$0xff] }
 0x340   :  { %v2589_v5 = vxor.u32 2147483648, %v9579_v25  ;;  %v2592_v28 = vxor.u32 2147483648, %v9573_v4  ;;  %v3323_v62 = vsel %vm3312_vm3, nan, %v3322_v6  ;;  %v10454_v42 = vmul.f32 %v12675_v54, %v3219_v58  ;;  %v12678_v58 = vld [vmem:[#allocation60_spill] sm:$0xff] }
 0x341   :  { %vm5605_vm11 = vcmp.lt.s32.totalorder %v12669_v10, 2  ;;  %vm5708_vm0 = vcmp.lt.s32.totalorder %v12673_v2, 2  ;;  %v5510_v53 = vsel %vm3000_vm7, nan, %v5509_v11  ;;  %vm5811_vm4 = vcmp.lt.s32.totalorder %v12674_v33, 2  ;;  %v12679_v10 = vld [vmem:[#allocation96_spill] sm:$0xff]  ;;  %v10468_v11 = vpop.permute.xlu0 %384 }
 0x342   :  { %12676 = vst [vmem:[#allocation34_spill] sm:$0xff] %v10454_v42  ;;  %v5612_v3 = vsel %vm5605_vm11, %v5608_v18, %v5611_v37  ;;  %v5715_v23 = vsel %vm5708_vm0, %v5711_v14, %v5714_v21  ;;  %v5818_v61 = vsel %vm5811_vm4, %v5814_v59, %v5817_v45  ;;  %v5840_v48 = vsub.f32 %v10399_v32, %v5510_v53  ;;  %v12681_v18 = vld [vmem:[#allocation101_spill] sm:$0xff] }
 0x343   :  { %vm2588_vm15 = vcmp.eq.s32.totalorder %v12677_v43, 0  ;;  %vm2591_vm5 = vcmp.eq.s32.totalorder %v12677_v43, 2  ;;  %v2693_v6 = vxor.u32 2147483648, %v12678_v58  ;;  %v2696_v15 = vxor.u32 2147483648, %v12679_v10  ;;  %v10493_v59 = vpop.permute.xlu1 %399 }
 0x344   :  { %v2590_v0 = vsel %vm2588_vm15, %v9573_v4, %v2589_v5  ;;  %v2593_v39 = vsel %vm2591_vm5, %v2592_v28, %v9579_v25  ;;  %v10474_v63 = vsel %vm322_vm10, %v10350_v44, %v10292_v26  ;;  %v10477_v9 = vmul.f32 %v12681_v18, %v3323_v62  ;;  %12683 = vst [vmem:[#allocation110_spill] sm:$0xff] %v10493_v59  ;;  %v12695_v44 = vld [vmem:[#allocation111_spill] sm:$0xff] }
 0x345   :  { %12680 = vst [vmem:[#allocation40_spill] sm:$0xff] %v10474_v63  ;;  %v5613_v37 = vsel %vm3104_vm12, nan, %v5612_v3  ;;  %v10483_v2 = vsel %vm3208_vm13, nan, %v5715_v23  ;;  %v10487_v14 = vsel %vm3312_vm3, nan, %v5818_v61  ;;  %vm2587_vm7 = vcmp.lt.s32.totalorder %v12677_v43, 2  ;;  %v12687_v23 = vld [vmem:[#allocation103_spill] sm:$0xff]  ;;  %v10514_v41 = vpop.permute.xlu0 %390 }
 0x346   :  { %12682 = vst [vmem:[#allocation112_spill] sm:$0xff] %v10477_v9  ;;  %v5841_v21 = vsub.f32 %v10402_v1, %v5613_v37  ;;  %v2594_v45 = vsel %vm2587_vm7, %v2590_v0, %v2593_v39  ;;  %vm2692_vm12 = vcmp.eq.s32.totalorder %v12684_v51, 0  ;;  %vm2695_vm8 = vcmp.eq.s32.totalorder %v12684_v51, 2  ;;  %v12688_v37 = vld [vmem:[#allocation105_spill] sm:$0xff]  ;;  %12691 = vst [vmem:[#allocation108_spill] sm:$0xff] %v10514_v41  ;;  %v12696_v41 = vld [vmem:[#allocation114_spill] sm:$0xff] }
 0x347   :  { %v2797_v62 = vxor.u32 2147483648, %v12685_v12  ;;  %v10499_v20 = vmul.f32 %v12662_v7, %v5840_v48  ;;  %v2694_v53 = vsel %vm2692_vm12, %v12679_v10, %v2693_v6  ;;  %v2697_v3 = vsel %vm2695_vm8, %v2696_v15, %v12678_v58  ;;  %v12689_v48 = vld [vmem:[#allocation106_spill] sm:$0xff] }
 0x348   :  { %v2800_v61 = vxor.u32 2147483648, %v12687_v23  ;;  %v5843_v43 = vsub.f32 %v10477_v9, %v10487_v14  ;;  %vm2584_vm13 = vweird.f32 %v12688_v37  ;;  %v2901_v0 = vxor.u32 2147483648, %v9983_v17 }
 0x349   :  { %12686 = vst [vmem:[#allocation113_spill] sm:$0xff] %v10499_v20  ;;  %v2904_v39 = vxor.u32 2147483648, %v9973_v50  ;;  %v2595_v33 = vsel %vm2584_vm13, nan, %v2594_v45  ;;  %vm2688_vm3 = vweird.f32 %v12689_v48  ;;  %vm2691_vm14 = vcmp.lt.s32.totalorder %v12684_v51, 2  ;;  %v12693_v45 = vld [vmem:[#allocation128_spill] sm:$0xff]  ;;  %v10523_v51 = vpop.permute.xlu1 %469 }
 0x34a   :  { %vm2796_vm6 = vcmp.eq.s32.totalorder %v12690_v22, 0  ;;  %v2698_v52 = vsel %vm2691_vm14, %v2694_v53, %v2697_v3  ;;  %vm2799_vm2 = vcmp.eq.s32.totalorder %v12690_v22, 2  ;;  %vm2900_vm11 = vcmp.eq.s32.totalorder %v12692_v46, 0  ;;  %12694 = vst [vmem:[#allocation115_spill] sm:$0xff] %v10523_v51  ;;  %v12697_v51 = vld [vmem:[#allocation118_spill] sm:$0xff] }
 0x34b   :  { %v2798_v14 = vsel %vm2796_vm6, %v12687_v23, %v2797_v62  ;;  %v2801_v7 = vsel %vm2799_vm2, %v2800_v61, %v12685_v12  ;;  %vm2903_vm0 = vcmp.eq.s32.totalorder %v12692_v46, 2  ;;  %vm5091_vm4 = vcmp.eq.s32.totalorder %v12693_v45, 0 }
 0x34c   :  { %vm5094_vm15 = vcmp.eq.s32.totalorder %v12693_v45, 2  ;;  %v2902_v59 = vsel %vm2900_vm11, %v9973_v50, %v2901_v0  ;;  %v2905_v53 = vsel %vm2903_vm0, %v2904_v39, %v9983_v17  ;;  %v5093_v3 = vsel %vm5091_vm4, %v9573_v4, %v2589_v5 }
 0x34d   :  { %v5096_v63 = vsel %vm5094_vm15, %v2592_v28, %v9579_v25  ;;  %v2699_v26 = vsel %vm2688_vm3, nan, %v2698_v52  ;;  %vm2792_vm5 = vweird.f32 %v12695_v44  ;;  %vm2795_vm7 = vcmp.lt.s32.totalorder %v12690_v22, 2  ;;  %v12699_v25 = vld [vmem:[#allocation130_spill] sm:$0xff]  ;;  %v10541_v28 = vpop.permute.xlu0 %396 }
 0x34e   :  { %vm2896_vm12 = vweird.f32 %v12696_v41  ;;  %v2802_v29 = vsel %vm2795_vm7, %v2798_v14, %v2801_v7  ;;  %vm2899_vm8 = vcmp.lt.s32.totalorder %v12692_v46, 2  ;;  %v10536_v8 = vmul.f32 %v12697_v51, %v2595_v33  ;;  %12700 = vst [vmem:[#allocation127_spill] sm:$0xff] %v10541_v28  ;;  %v12701_v7 = vld [vmem:[#allocation132_spill] sm:$0xff]  ;;  %v10551_v14 = vpop.permute.xlu1 %475 }
 0x34f   :  { %vm5090_vm14 = vcmp.lt.s32.totalorder %v12693_v45, 2  ;;  %v2906_v4 = vsel %vm2899_vm8, %v2902_v59, %v2905_v53  ;;  %vm5194_vm6 = vcmp.eq.s32.totalorder %v12699_v25, 0  ;;  %v371_v52 = vmul.f32 3.0, %v9871_v47  ;;  %12702 = vst [vmem:[#allocation126_spill] sm:$0xff] %v10551_v14  ;;  %v12704_v53 = vld [vmem:[#allocation119_spill] sm:$0xff]  ;;  %v12777_v14 = vld [vmem:[#allocation25_spill] sm:$0xff] }
 0x350   :  { %12698 = vst [vmem:[#allocation116_spill] sm:$0xff] %v10536_v8  ;;  %v5097_v5 = vsel %vm5090_vm14, %v5093_v3, %v5096_v63  ;;  %v5196_v22 = vsel %vm5194_vm6, %v12679_v10, %v2693_v6  ;;  %vm5197_vm2 = vcmp.eq.s32.totalorder %v12699_v25, 2  ;;  %vm5297_vm11 = vcmp.eq.s32.totalorder %v12701_v7, 0 }
 0x351   :  { %vm5300_vm0 = vcmp.eq.s32.totalorder %v12701_v7, 2  ;;  %v5199_v46 = vsel %vm5197_vm2, %v2696_v15, %v12678_v58  ;;  %v5299_v33 = vsel %vm5297_vm11, %v12687_v23, %v2797_v62  ;;  %v372_v59 = vmul.f32 %v371_v52, %v9871_v47  ;;  %v12706_v62 = vld [vmem:[#allocation134_spill] sm:$0xff] }
 0x352   :  { %v5302_v63 = vsel %vm5300_vm0, %v2800_v61, %v12685_v12  ;;  %v10554_v45 = vmul.f32 %v12664_v36, %v5841_v21  ;;  %v2803_v6 = vsel %vm2792_vm5, nan, %v2802_v29  ;;  %v2907_v10 = vsel %vm2896_vm12, nan, %v2906_v4  ;;  %v12707_v29 = vld [vmem:[#allocation121_spill] sm:$0xff]  ;;  %v10575_v4 = vpop.permute.xlu0 %466  ;;  %v12761_v36 = vld [vmem:[#allocation90_spill] sm:$0xff] }
 0x353   :  { %v10561_v3 = vmul.f32 %v12704_v53, %v2699_v26  ;;  %v5098_v58 = vsel %vm2584_vm13, nan, %v5097_v5  ;;  %vm5193_vm4 = vcmp.lt.s32.totalorder %v12699_v25, 2  ;;  %vm5296_vm15 = vcmp.lt.s32.totalorder %v12701_v7, 2 }
 0x354   :  { %12703 = vst [vmem:[#allocation82_spill] sm:$0xff] %v10554_v45  ;;  %v6495_v15 = vadd.f32 -1.0, %v372_v59  ;;  %v5200_v12 = vsel %vm5193_vm4, %v5196_v22, %v5199_v46  ;;  %v5303_v21 = vsel %vm5296_vm15, %v5299_v33, %v5302_v63  ;;  %vm5400_vm7 = vcmp.eq.s32.totalorder %v12706_v62, 0  ;;  %v12712_v22 = vld [vmem:[#allocation122_spill] sm:$0xff] }
 0x355   :  { %12705 = vst [vmem:[#allocation85_spill] sm:$0xff] %v10561_v3  ;;  %vm5403_vm8 = vcmp.eq.s32.totalorder %v12706_v62, 2  ;;  %v10570_v23 = vmul.f32 %v12707_v29, %v2803_v6  ;;  %v5402_v26 = vsel %vm5400_vm7, %v9973_v50, %v2901_v0  ;;  %v5836_v37 = vsub.f32 %v10536_v8, %v5098_v58  ;;  %v12716_v58 = vld [vmem:[#allocation83_spill] sm:$0xff] }
 0x356   :  { %v5405_v61 = vsel %vm5403_vm8, %v2904_v39, %v9983_v17  ;;  %v12709_v5 = vsub.f32 %v10454_v42, %v10483_v2  ;;  %v10584_v52 = vmul.f32 %v12681_v18, %v5843_v43  ;;  %v10587_v7 = vmul.f32 %v12712_v22, %v2907_v10  ;;  %v10597_v39 = vpop.permute.xlu1 %481  ;;  %v12760_v18 = vld [vmem:[#allocation43_spill] sm:$0xff] }
 0x357   :  { %12708 = vst [vmem:[#allocation8_spill] sm:$0xff] %v10570_v23  ;;  %vm5399_vm13 = vcmp.lt.s32.totalorder %v12706_v62, 2  ;;  %v5201_v17 = vsel %vm2688_vm3, nan, %v5200_v12  ;;  %v5304_v50 = vsel %vm2792_vm5, nan, %v5303_v21  ;;  %v10594_v0 = vmul.f32 0.5, %v6495_v15  ;;  %12714 = vst [vmem:[#allocation117_spill] sm:$0xff] %v10597_v39 }
 0x358   :  { %v10581_v25 = vmul.f32 %v12675_v54, %v12709_v5  ;;  %12711 = vst [vmem:[#allocation124_spill] sm:$0xff] %v10584_v52  ;;  %12713 = vst [vmem:[#allocation109_spill] sm:$0xff] %v10587_v7  ;;  %v5896_v2 = vmul.f32 3.0, %v12477_v13  ;;  %v5406_v46 = vsel %vm5399_vm13, %v5402_v26, %v5405_v61  ;;  %v5897_v43 = vmul.f32 3.0, %v12479_v56  ;;  %v12717_v12 = vld [vmem:[#allocation92_spill] sm:$0xff]  ;;  %v12721_v5 = vld [vmem:[#allocation135_spill] sm:$0xff] }
 0x359   :  { %v5898_v33 = vmul.f32 3.0, %v12481_v49  ;;  %v5899_v63 = vmul.f32 3.0, %v12490_v16  ;;  %v5837_v59 = vsub.f32 %v10561_v3, %v5201_v17  ;;  %v5838_v48 = vsub.f32 %v10570_v23, %v5304_v50  ;;  %v12718_v62 = vld [vmem:[#allocation104_spill] sm:$0xff]  ;;  %v10633_v50 = vpop.permute.xlu0 %472 }
 0x35a   :  { %12710 = vst [vmem:[#allocation94_spill] sm:$0xff] %v10581_v25  ;;  %v10605_v44 = vmul.f32 %v12697_v51, %v5836_v37  ;;  %v5920_v6 = vmul.f32 %v5896_v2, %v9840_v60  ;;  %v10612_v10 = vsel %vm322_vm10, %v10361_v35, %v10307_v27  ;;  %v5921_v15 = vmul.f32 %v5897_v43, %v12716_v58  ;;  %v12728_v51 = vld [vmem:[#allocation91_spill] sm:$0xff]  ;;  %v10664_v28 = vpop.permute.xlu1 %551 }
 0x35b   :  { %v5922_v21 = vmul.f32 %v5898_v33, %v12717_v12  ;;  %v5923_v26 = vmul.f32 %v5899_v63, %v12718_v62  ;;  %v10621_v61 = vsel %vm325_vm9, %v10499_v20, %v10399_v32  ;;  %v10627_v37 = vsel %vm325_vm9, %v10554_v45, %v10402_v1  ;;  %12722 = vst [vmem:[#allocation60_spill] sm:$0xff] %v10633_v50  ;;  %v12748_v32 = vld [vmem:[#allocation54_spill] sm:$0xff]  ;;  %v12758_v45 = vld [vmem:[#allocation15_spill] sm:$0xff]  ;;  %v12759_v20 = vld [vmem:[#allocation16_spill] sm:$0xff] }
 0x35c   :  { %12715 = vst [vmem:[#allocation120_spill] sm:$0xff] %v10605_v44  ;;  %12719 = vst [vmem:[#allocation123_spill] sm:$0xff] %v10621_v61  ;;  %v5407_v24 = vsel %vm2896_vm12, nan, %v5406_v46  ;;  %v376_v17 = vmul.f32 %v10594_v0, %v12721_v5  ;;  %v10639_v2 = vsel %vm325_vm9, %v10581_v25, %v10454_v42  ;;  %v10645_v43 = vsel %vm325_vm9, %v10584_v52, %v10477_v9  ;;  %v12750_v25 = vld [vmem:[#allocation50_spill] sm:$0xff] }
 0x35d   :  { %12720 = vst [vmem:[#allocation125_spill] sm:$0xff] %v10627_v37  ;;  %12723 = vst [vmem:[#allocation96_spill] sm:$0xff] %v10639_v2  ;;  %v5839_v41 = vsub.f32 %v10587_v7, %v5407_v24  ;;  %vm402_vm10 = vcmp.eq.s32.totalorder %v10396_v19, 1  ;;  %v10650_v46 = vmul.f32 %v12704_v53, %v5837_v59  ;;  %v10653_v33 = vmul.f32 %v12707_v29, %v5838_v48  ;;  %v12729_v24 = vld [vmem:[#allocation99_spill] sm:$0xff]  ;;  %v12731_v53 = vld [vmem:[#allocation69_spill] sm:$0xff] }
 0x35e   :  { %12724 = vst [vmem:[#allocation129_spill] sm:$0xff] %v10645_v43  ;;  %v10659_v63 = vsel %vm324_vm1, %v10605_v44, %v10536_v8  ;;  %v10662_v30 = vsub.f32 %v5920_v6, %v12728_v51  ;;  %v10667_v7 = vsub.f32 %v5921_v15, %v12729_v24  ;;  %v12730_v43 = vld [vmem:[#allocation63_spill] sm:$0xff]  ;;  %v10673_v48 = vsub.f32 %v5923_v26, %v12731_v53  ;;  %v12732_v29 = vld [vmem:[#allocation29_spill] sm:$0xff]  ;;  %v12737_v51 = vld [vmem:[#allocation36_spill] sm:$0xff] }
 0x35f   :  { %12725 = vst [vmem:[#allocation102_spill] sm:$0xff] %v10650_v46  ;;  %12726 = vst [vmem:[#allocation103_spill] sm:$0xff] %v10653_v33  ;;  %v10670_v59 = vsub.f32 %v5922_v21, %v12730_v43  ;;  %v5892_v2 = vmul.f32 3.0, %v12732_v29  ;;  %v12733_v37 = vld [vmem:[#allocation5_spill] sm:$0xff]  ;;  %v5893_v6 = vmul.f32 3.0, %v12737_v51  ;;  %v10685_v15 = vmul.f32 %v12712_v22, %v5839_v41  ;;  %v12740_v21 = vld [vmem:[#allocation7_spill] sm:$0xff] }
 0x360   :  { %12727 = vst [vmem:[#allocation105_spill] sm:$0xff] %v10659_v63  ;;  %v10677_v61 = vrot.slane %v376_v17, %v12733_v37  ;;  %v12735_v63 = vld [vmem:[#allocation6_spill] sm:$0xff]  ;;  %v12738_v44 = vld [vmem:[#allocation37_spill] sm:$0xff]  ;;  %v10688_v43 = vrot.slane %v376_v17, %v12740_v21  ;;  %v12742_v53 = vld [vmem:[#allocation12_spill] sm:$0xff]  ;;  %v10698_v1 = vsel %vm324_vm1, %v10650_v46, %v10561_v3  ;;  %v10704_v41 = vsel %vm324_vm1, %v10653_v33, %v10570_v23 }
 0x361   :  { %v10680_v8 = vrot.slane %v376_v17, %v12735_v63  ;;  %v5894_v9 = vmul.f32 3.0, %v12738_v44  ;;  %12739 = vst [vmem:[#allocation133_spill] sm:$0xff] %v10685_v15  ;;  %v10691_v26 = vrot.slane %v376_v17, %v12742_v53  ;;  %v12744_v24 = vld [vmem:[#allocation84_spill] sm:$0xff]  ;;  %12745 = vst [vmem:[#allocation114_spill] sm:$0xff] %v10698_v1  ;;  %v12747_v22 = vld [vmem:[#allocation49_spill] sm:$0xff]  ;;  %v10708_v17 = vpop.permute.xlu0 %478  ;;  %vm401_vm9 = vcmp.eq.s32.totalorder %v10468_v11, 1 }
 0x362   :  { %12734 = vst [vmem:[#allocation106_spill] sm:$0xff] %v10677_v61  ;;  %12741 = vst [vmem:[#allocation128_spill] sm:$0xff] %v10688_v43  ;;  %v5916_v42 = vmul.f32 %v5892_v2, %v12744_v24  ;;  %v5917_v15 = vmul.f32 %v5893_v6, %v12747_v22  ;;  %v10714_v2 = vsel %vm402_vm10, %v10662_v30, %v12750_v25  ;;  %v12751_v3 = vld [vmem:[#allocation55_spill] sm:$0xff]  ;;  %v12753_v23 = vld [vmem:[#allocation66_spill] sm:$0xff]  ;;  %v5905_v24 = vmul.f32 3.0, %v12590_v40 }
 0x363   :  { %12736 = vst [vmem:[#allocation131_spill] sm:$0xff] %v10680_v8  ;;  %12743 = vst [vmem:[#allocation111_spill] sm:$0xff] %v10691_v26  ;;  %v5918_v52 = vmul.f32 %v5894_v9, %v12748_v32  ;;  %v10720_v1 = vsel %vm402_vm10, %v10667_v7, %v12751_v3  ;;  %v10728_v9 = vsel %vm402_vm10, %v10677_v61, %v12753_v23  ;;  %v12754_v33 = vld [vmem:[#allocation61_spill] sm:$0xff]  ;;  %v12755_v46 = vld [vmem:[#allocation107_spill] sm:$0xff]  ;;  %v10748_v23 = vpop.permute.xlu1 %557  ;;  %vm404_vm3 = vcmp.eq.s32.totalorder %v10449_v34, 1 }
 0x364   :  { %12746 = vst [vmem:[#allocation130_spill] sm:$0xff] %v10704_v41  ;;  %12749 = vst [vmem:[#allocation132_spill] sm:$0xff] %v10708_v17  ;;  %v12752_v41 = vld [vmem:[#allocation41_spill] sm:$0xff]  ;;  %v10734_v25 = vsel %vm402_vm10, %v10680_v8, %v12754_v33  ;;  %v10740_v3 = vsel %vm402_vm10, %v10670_v59, %v12755_v46  ;;  %v10754_v33 = vsel %vm402_vm10, %v10688_v43, %v12758_v45  ;;  %v12767_v22 = vld [vmem:[#allocation56_spill] sm:$0xff]  ;;  %v5993_v34 = vmul.f32 5.0, %v12479_v56 }
 0x365   :  { %v5895_v6 = vmul.f32 3.0, %v12752_v41  ;;  %v12756_v17 = vld [vmem:[#allocation45_spill] sm:$0xff]  ;;  %12757 = vst [vmem:[#allocation134_spill] sm:$0xff] %v10748_v23  ;;  %v10760_v46 = vsel %vm402_vm10, %v10691_v26, %v12759_v20  ;;  %v10764_v39 = vsub.f32 %v5916_v42, %v12761_v36  ;;  %v12765_v23 = vld [vmem:[#allocation79_spill] sm:$0xff]  ;;  %v5904_v45 = vmul.f32 3.0, %v12767_v22  ;;  %v10797_v22 = vpop.permute.xlu0 %548  ;;  %v12812_v11 = vld [vmem:[#allocation38_spill] sm:$0xff] }
 0x366   :  { %v10746_v55 = vsel %vm402_vm10, %v10673_v48, %v12756_v17  ;;  %v12763_v17 = vld [vmem:[#allocation74_spill] sm:$0xff]  ;;  %v10770_v32 = vsub.f32 %v5918_v52, %v12765_v23  ;;  %v12768_v41 = vld [vmem:[#allocation17_spill] sm:$0xff]  ;;  %v5906_v42 = vmul.f32 3.0, %v12592_v31  ;;  %v5907_v52 = vmul.f32 3.0, %v12595_v38 }
 0x367   :  { %v5919_v54 = vmul.f32 %v5895_v6, %v12760_v18  ;;  %12762 = vst [vmem:[#allocation83_spill] sm:$0xff] %v10764_v39  ;;  %v10767_v50 = vsub.f32 %v5917_v15, %v12763_v17  ;;  %v10778_v19 = vsel %vm401_vm9, %v10677_v61, %v12768_v41  ;;  %v12769_v20 = vld [vmem:[#allocation21_spill] sm:$0xff]  ;;  %v12770_v15 = vld [vmem:[#allocation46_spill] sm:$0xff]  ;;  %v12773_v17 = vld [vmem:[#allocation44_spill] sm:$0xff]  ;;  %vm566_vm14 = vcmp.eq.s32.totalorder %v10664_v28, 1 }
 0x368   :  { %12766 = vst [vmem:[#allocation104_spill] sm:$0xff] %v10770_v32  ;;  %v10784_v36 = vsel %vm401_vm9, %v10680_v8, %v12769_v20  ;;  %v10792_v6 = vsel %vm401_vm9, %v10688_v43, %v12770_v15  ;;  %v12772_v41 = vld [vmem:[#allocation73_spill] sm:$0xff]  ;;  %v5929_v40 = vmul.f32 %v5905_v24, %v12773_v17  ;;  %v12774_v20 = vld [vmem:[#allocation51_spill] sm:$0xff]  ;;  %v5930_v15 = vmul.f32 %v5906_v42, %v10209_v57  ;;  %v12788_v57 = vld [vmem:[#allocation62_spill] sm:$0xff] }
 0x369   :  { %12764 = vst [vmem:[#allocation92_spill] sm:$0xff] %v10767_v50  ;;  %12771 = vst [vmem:[#allocation135_spill] sm:$0xff] %v10792_v6  ;;  %v5928_v23 = vmul.f32 %v5904_v45, %v12772_v41  ;;  %v10803_v31 = vsel %vm401_vm9, %v10691_v26, %v12774_v20  ;;  %v12776_v38 = vld [vmem:[#allocation81_spill] sm:$0xff]  ;;  %v5931_v44 = vmul.f32 %v5907_v52, %v12777_v14  ;;  %v12780_v45 = vld [vmem:[#allocation64_spill] sm:$0xff]  ;;  %v10829_v52 = vpop.permute.xlu1 %563  ;;  %vm483_vm6 = vcmp.eq.s32.totalorder %v10575_v4, 1 }
 0x36a   :  { %12775 = vst [vmem:[#allocation91_spill] sm:$0xff] %v10803_v31  ;;  %v10806_v18 = vsub.f32 %v5919_v54, %v12776_v38  ;;  %v12778_v51 = vld [vmem:[#allocation65_spill] sm:$0xff]  ;;  %v10820_v17 = vsel %vm401_vm9, %v10767_v50, %v12780_v45  ;;  %v12782_v20 = vld [vmem:[#allocation70_spill] sm:$0xff]  ;;  %12785 = vst [vmem:[#allocation5_spill] sm:$0xff] %v10829_v52  ;;  %v10841_v45 = vsel %vm404_vm3, %v10680_v8, %v12788_v57  ;;  %vm565_vm11 = vcmp.eq.s32.totalorder %v10797_v22, 1 }
 0x36b   :  { %v10814_v24 = vsel %vm401_vm9, %v10764_v39, %v12778_v51  ;;  %12781 = vst [vmem:[#allocation63_spill] sm:$0xff] %v10820_v17  ;;  %v10826_v38 = vsel %vm401_vm9, %v10770_v32, %v12782_v20  ;;  %v12784_v54 = vld [vmem:[#allocation18_spill] sm:$0xff]  ;;  %v12786_v14 = vld [vmem:[#allocation53_spill] sm:$0xff]  ;;  %12789 = vst [vmem:[#allocation7_spill] sm:$0xff] %v10841_v45 }
 0x36c   :  { %12779 = vst [vmem:[#allocation99_spill] sm:$0xff] %v10814_v24  ;;  %12783 = vst [vmem:[#allocation69_spill] sm:$0xff] %v10826_v38  ;;  %v5900_v42 = vmul.f32 3.0, %v12784_v54  ;;  %v10835_v51 = vsel %vm404_vm3, %v10677_v61, %v12786_v14  ;;  %v12790_v41 = vld [vmem:[#allocation108_spill] sm:$0xff]  ;;  %v12791_v20 = vld [vmem:[#allocation19_spill] sm:$0xff] }
 0x36d   :  { %12787 = vst [vmem:[#allocation6_spill] sm:$0xff] %v10835_v51  ;;  %vm403_vm5 = vcmp.eq.s32.totalorder %v12790_v41, 1  ;;  %v5901_v38 = vmul.f32 3.0, %v12791_v20  ;;  %v12792_v17 = vld [vmem:[#allocation78_spill] sm:$0xff]  ;;  %v12793_v52 = vld [vmem:[#allocation77_spill] sm:$0xff]  ;;  %v12794_v32 = vld [vmem:[#allocation20_spill] sm:$0xff] }
 0x36e   :  { %v10846_v54 = vsub.f32 %v5928_v23, %v12792_v17  ;;  %v10849_v24 = vsub.f32 %v5929_v40, %v12793_v52  ;;  %v5902_v50 = vmul.f32 3.0, %v12794_v32  ;;  %v12795_v14 = vld [vmem:[#allocation33_spill] sm:$0xff]  ;;  %v12796_v39 = vld [vmem:[#allocation76_spill] sm:$0xff]  ;;  %v12798_v45 = vld [vmem:[#allocation86_spill] sm:$0xff]  ;;  %v6184_v41 = vmul.f32 9.0, %v12477_v13 }
 0x36f   :  { %v5924_v51 = vmul.f32 %v5900_v42, %v12795_v14  ;;  %v10857_v57 = vsel %vm404_vm3, %v10688_v43, %v12796_v39  ;;  %v10863_v20 = vsel %vm404_vm3, %v10691_v26, %v12798_v45  ;;  %v12800_v23 = vld [vmem:[#allocation88_spill] sm:$0xff]  ;;  %v12801_v40 = vld [vmem:[#allocation39_spill] sm:$0xff]  ;;  %v12804_v39 = vld [vmem:[#allocation22_spill] sm:$0xff]  ;;  %v10880_v45 = vpop.permute.xlu0 %554 }
 0x370   :  { %12797 = vst [vmem:[#allocation12_spill] sm:$0xff] %v10857_v57  ;;  %12799 = vst [vmem:[#allocation50_spill] sm:$0xff] %v10863_v20  ;;  %v10866_v17 = vsub.f32 %v5930_v15, %v12800_v23  ;;  %v10869_v52 = vsub.f32 %v5931_v44, %v12801_v40  ;;  %v12803_v32 = vld [vmem:[#allocation52_spill] sm:$0xff]  ;;  %v5903_v14 = vmul.f32 3.0, %v12804_v39  ;;  %v12805_v57 = vld [vmem:[#allocation23_spill] sm:$0xff] }
 0x371   :  { %v10875_v42 = vsel %vm401_vm9, %v10806_v18, %v12803_v32  ;;  %v5925_v29 = vmul.f32 %v5901_v38, %v12805_v57  ;;  %v12806_v31 = vld [vmem:[#allocation26_spill] sm:$0xff]  ;;  %12807 = vst [vmem:[#allocation66_spill] sm:$0xff] %v10880_v45  ;;  %v12808_v20 = vld [vmem:[#allocation75_spill] sm:$0xff]  ;;  %v10898_v38 = vsel %vm403_vm5, %v10688_v43, %v12812_v11  ;;  %v12820_v43 = vld [vmem:[#allocation68_spill] sm:$0xff] }
 0x372   :  { %12802 = vst [vmem:[#allocation55_spill] sm:$0xff] %v10869_v52  ;;  %v5926_v6 = vmul.f32 %v5902_v50, %v12806_v31  ;;  %v10886_v44 = vsel %vm403_vm5, %v10677_v61, %v12808_v20  ;;  %v12810_v15 = vld [vmem:[#allocation67_spill] sm:$0xff]  ;;  %12813 = vst [vmem:[#allocation45_spill] sm:$0xff] %v10898_v38  ;;  %v12816_v20 = vld [vmem:[#allocation93_spill] sm:$0xff]  ;;  %v5927_v11 = vmul.f32 %v5903_v14, %v10361_v35  ;;  %v10922_v31 = vpop.permute.xlu1 %633  ;;  %v454_v14 = vmul.f32 2.0, %v9871_v47 }
 0x373   :  { %12809 = vst [vmem:[#allocation61_spill] sm:$0xff] %v10886_v44  ;;  %v10892_v32 = vsel %vm403_vm5, %v10680_v8, %v12810_v15  ;;  %v12814_v50 = vld [vmem:[#allocation71_spill] sm:$0xff]  ;;  %v10910_v40 = vsel %vm404_vm3, %v10846_v54, %v12816_v20  ;;  %v12818_v15 = vld [vmem:[#allocation89_spill] sm:$0xff]  ;;  %v10920_v61 = vsub.f32 %v5924_v51, %v12820_v43  ;;  %v12824_v20 = vld [vmem:[#allocation24_spill] sm:$0xff]  ;;  %vm648_vm2 = vcmp.eq.s32.totalorder %v10922_v31, 1 }
 0x374   :  { %12811 = vst [vmem:[#allocation107_spill] sm:$0xff] %v10892_v32  ;;  %v10904_v23 = vsel %vm403_vm5, %v10691_v26, %v12814_v50  ;;  %12817 = vst [vmem:[#allocation16_spill] sm:$0xff] %v10910_v40  ;;  %v10916_v8 = vsel %vm404_vm3, %v10849_v24, %v12818_v15  ;;  %v12822_v50 = vld [vmem:[#allocation35_spill] sm:$0xff]  ;;  %v10934_v57 = vsel %vm404_vm3, %v10869_v52, %v12824_v20  ;;  %v452_v15 = vmul.f32 5.0, %v9871_v47 }
 0x375   :  { %12815 = vst [vmem:[#allocation15_spill] sm:$0xff] %v10904_v23  ;;  %12819 = vst [vmem:[#allocation90_spill] sm:$0xff] %v10916_v8  ;;  %v10928_v26 = vsel %vm404_vm3, %v10866_v17, %v12822_v50  ;;  %v12826_v43 = vld [vmem:[#allocation31_spill] sm:$0xff]  ;;  %v5992_v50 = vmul.f32 5.0, %v12477_v13  ;;  %v5994_v20 = vmul.f32 5.0, %v12481_v49  ;;  %v5995_v32 = vmul.f32 5.0, %v12490_v16 }
 0x376   :  { %12821 = vst [vmem:[#allocation74_spill] sm:$0xff] %v10920_v61  ;;  %12823 = vst [vmem:[#allocation79_spill] sm:$0xff] %v10928_v26  ;;  %v10939_v51 = vsub.f32 %v5925_v29, %v12826_v43  ;;  %v12828_v35 = vld [vmem:[#allocation87_spill] sm:$0xff]  ;;  %v453_v38 = vmul.f32 %v452_v15, %v10594_v0  ;;  %v10951_v44 = vsub.f32 %v5927_v11, %v10307_v27  ;;  %v12832_v29 = vld [vmem:[#allocation48_spill] sm:$0xff]  ;;  %v534_v43 = vmul.f32 7.0, %v9871_v47 }
 0x377   :  { %12825 = vst [vmem:[#allocation17_spill] sm:$0xff] %v10934_v57  ;;  %v10942_v39 = vsub.f32 %v5926_v6, %v12828_v35  ;;  %v12830_v23 = vld [vmem:[#allocation115_spill] sm:$0xff]  ;;  %v10957_v35 = vsel %vm403_vm5, %v10920_v61, %v12832_v29  ;;  %v10959_v6 = vpop.permute.xlu0 %560  ;;  %v6016_v15 = vmul.f32 %v5992_v50, %v10662_v30  ;;  %v6017_v57 = vmul.f32 %v5993_v34, %v10667_v7  ;;  %v12837_v29 = vld [vmem:[#allocation40_spill] sm:$0xff]  ;;  %v10978_v50 = vpop.permute.xlu1 %639 }
 0x378   :  { %12827 = vst [vmem:[#allocation21_spill] sm:$0xff] %v10939_v51  ;;  %vm484_vm12 = vcmp.eq.s32.totalorder %v12830_v23, 1  ;;  %12831 = vst [vmem:[#allocation51_spill] sm:$0xff] %v10951_v44  ;;  %v455_v45 = vsub.f32 %v453_v38, %v454_v14  ;;  %v6018_v26 = vmul.f32 %v5994_v20, %v10670_v59  ;;  %v6019_v27 = vmul.f32 %v5995_v32, %v10673_v48  ;;  %v12835_v11 = vld [vmem:[#allocation47_spill] sm:$0xff] }
 0x379   :  { %12829 = vst [vmem:[#allocation46_spill] sm:$0xff] %v10942_v39  ;;  %12833 = vst [vmem:[#allocation81_spill] sm:$0xff] %v10957_v35  ;;  %v10970_v8 = vsel %vm403_vm5, %v10939_v51, %v12835_v11  ;;  %v6040_v38 = vsub.f32 %v6016_v15, %v9840_v60  ;;  %v6088_v14 = vmul.f32 7.0, %v12477_v13  ;;  %v536_v32 = vmul.f32 3.0, %v10594_v0 }
 0x37a   :  { %12834 = vst [vmem:[#allocation65_spill] sm:$0xff] %v10959_v6  ;;  %12836 = vst [vmem:[#allocation64_spill] sm:$0xff] %v10970_v8  ;;  %v10976_v6 = vsel %vm403_vm5, %v10942_v39, %v12837_v29  ;;  %v457_v34 = vmul.f32 0.33333334, %v455_v45  ;;  %v6041_v20 = vsub.f32 %v6017_v57, %v12716_v58  ;;  %v6042_v11 = vsub.f32 %v6018_v26, %v12717_v12 }
 0x37b   :  { %12838 = vst [vmem:[#allocation70_spill] sm:$0xff] %v10976_v6  ;;  %v6043_v8 = vsub.f32 %v6019_v27, %v12718_v62  ;;  %v6089_v35 = vmul.f32 7.0, %v12479_v56  ;;  %v6090_v29 = vmul.f32 7.0, %v12481_v49  ;;  %v6112_v6 = vmul.f32 %v6088_v14, %v6040_v38  ;;  %v10997_v26 = vpop.permute.xlu0 %630  ;;  %v11007_v14 = vpop.permute.xlu1 %645 }
 0x37c   :  { %v10992_v60 = vsel %vm403_vm5, %v10951_v44, %v10612_v10  ;;  %v458_v0 = vmul.f32 %v457_v34, %v12721_v5  ;;  %v535_v58 = vmul.f32 %v534_v43, %v457_v34  ;;  %v616_v12 = vmul.f32 9.0, %v9871_v47  ;;  %12840 = vst [vmem:[#allocation62_spill] sm:$0xff] %v11007_v14 }
 0x37d   :  { %12839 = vst [vmem:[#allocation53_spill] sm:$0xff] %v10992_v60  ;;  %v698_v62 = vmul.f32 11.0, %v9871_v47  ;;  %v6091_v57 = vmul.f32 7.0, %v12490_v16  ;;  %v6113_v45 = vmul.f32 %v6089_v35, %v6041_v20  ;;  %v6114_v15 = vmul.f32 %v6090_v29, %v6042_v11 }
 0x37e   :  { %v6064_v10 = vsel %vm484_vm12, %v6040_v38, %v10714_v2  ;;  %v6185_v27 = vmul.f32 9.0, %v12479_v56  ;;  %v6186_v43 = vmul.f32 9.0, %v12481_v49  ;;  %v537_v60 = vsub.f32 %v535_v58, %v536_v32 }
 0x37f   :  { %v6115_v44 = vmul.f32 %v6091_v57, %v6043_v8  ;;  %v11010_v47 = vsub.f32 %v6112_v6, %v10662_v30  ;;  %v11013_v35 = vsub.f32 %v6113_v45, %v10667_v7  ;;  %v11016_v29 = vrot.slane %v458_v0, %v12733_v37 }
 0x380   :  { %v11019_v2 = vrot.slane %v458_v0, %v12735_v63  ;;  %v11022_v39 = vrot.slane %v458_v0, %v12740_v21  ;;  %v6187_v51 = vmul.f32 9.0, %v12490_v16  ;;  %v11026_v32 = vrot.slane %v458_v0, %v12742_v53  ;;  %v11041_v0 = vpop.permute.xlu0 %636 }
 0x381   :  { %v539_v58 = vmul.f32 0.25, %v537_v60  ;;  %v11029_v30 = vsub.f32 %v6114_v15, %v10670_v59  ;;  %v11032_v7 = vsub.f32 %v6115_v44, %v10673_v48  ;;  %v618_v6 = vmul.f32 4.0, %v457_v34  ;;  %12841 = vst [vmem:[#allocation108_spill] sm:$0xff] %v11041_v0 }
 0x382   :  { %v6065_v57 = vsel %vm484_vm12, %v6041_v20, %v10720_v1  ;;  %v6066_v45 = vsel %vm484_vm12, %v6042_v11, %v10740_v3  ;;  %v6208_v14 = vmul.f32 %v6184_v41, %v11010_v47  ;;  %v6067_v48 = vsel %vm484_vm12, %v6043_v8, %v10746_v55  ;;  %v11060_v55 = vpop.permute.xlu1 %715 }
 0x383   :  { %v540_v60 = vmul.f32 %v539_v58, %v12721_v5  ;;  %v617_v59 = vmul.f32 %v616_v12, %v539_v58  ;;  %v6209_v44 = vmul.f32 %v6185_v27, %v11013_v35  ;;  %v514_v1 = vsel %vm484_vm12, %v11016_v29, %v10728_v9 }
 0x384   :  { %v515_v3 = vsel %vm484_vm12, %v11019_v2, %v10734_v25  ;;  %v6210_v34 = vmul.f32 %v6186_v43, %v11029_v30  ;;  %v6211_v12 = vmul.f32 %v6187_v51, %v11032_v7  ;;  %v516_v9 = vsel %vm484_vm12, %v11022_v39, %v10754_v33 }
 0x385   :  { %v517_v25 = vsel %vm484_vm12, %v11026_v32, %v10760_v46  ;;  %v6160_v51 = vsel %vm566_vm14, %v11010_v47, %v6064_v10  ;;  %v6161_v15 = vsel %vm566_vm14, %v11013_v35, %v6065_v57  ;;  %v619_v41 = vsub.f32 %v617_v59, %v618_v6 }
 0x386   :  { %v700_v27 = vmul.f32 5.0, %v539_v58  ;;  %v6232_v43 = vsub.f32 %v6208_v14, %v6040_v38  ;;  %v6280_v61 = vmul.f32 11.0, %v12477_v13  ;;  %v11078_v33 = vrot.slane %v540_v60, %v12733_v37  ;;  %v11090_v38 = vpop.permute.xlu0 %642  ;;  %v11103_v59 = vpop.permute.xlu1 %721 }
 0x387   :  { %v6233_v0 = vsub.f32 %v6209_v44, %v6041_v20  ;;  %v6234_v40 = vsub.f32 %v6210_v34, %v6042_v11  ;;  %v6235_v23 = vsub.f32 %v6211_v12, %v6043_v8  ;;  %v11081_v46 = vrot.slane %v540_v60, %v12735_v63  ;;  %12842 = vst [vmem:[#allocation78_spill] sm:$0xff] %v11090_v38 }
 0x388   :  { %v11084_v10 = vrot.slane %v540_v60, %v12740_v21  ;;  %v11087_v52 = vrot.slane %v540_v60, %v12742_v53  ;;  %v621_v6 = vmul.f32 0.2, %v619_v41  ;;  %vm730_vm0 = vcmp.eq.s32.totalorder %v11060_v55, 1 }
 0x389   :  { %v6162_v13 = vsel %vm566_vm14, %v11029_v30, %v6066_v45  ;;  %v6281_v8 = vmul.f32 11.0, %v12479_v56  ;;  %v6282_v20 = vmul.f32 11.0, %v12481_v49  ;;  %v6283_v11 = vmul.f32 11.0, %v12490_v16 }
 0x38a   :  { %v622_v14 = vmul.f32 %v621_v6, %v12721_v5  ;;  %v699_v58 = vmul.f32 %v698_v62, %v621_v6  ;;  %v6163_v57 = vsel %vm566_vm14, %v11032_v7, %v6067_v48  ;;  %v6304_v60 = vmul.f32 %v6280_v61, %v6232_v43  ;;  %v11135_v6 = vpop.permute.xlu0 %712 }
 0x38b   :  { %v596_v45 = vsel %vm566_vm14, %v11078_v33, %v514_v1  ;;  %v6305_v44 = vmul.f32 %v6281_v8, %v6233_v0  ;;  %v6306_v56 = vmul.f32 %v6282_v20, %v6234_v40  ;;  %v6307_v34 = vmul.f32 %v6283_v11, %v6235_v23 }
 0x38c   :  { %v597_v49 = vsel %vm566_vm14, %v11081_v46, %v515_v3  ;;  %v598_v16 = vsel %vm566_vm14, %v11084_v10, %v516_v9  ;;  %v599_v61 = vsel %vm566_vm14, %v11087_v52, %v517_v25  ;;  %v11118_v62 = vrot.slane %v622_v14, %v12733_v37 }
 0x38d   :  { %v11121_v48 = vrot.slane %v622_v14, %v12735_v63  ;;  %v11124_v1 = vrot.slane %v622_v14, %v12740_v21  ;;  %v11127_v12 = vrot.slane %v622_v14, %v12742_v53  ;;  %v701_v3 = vsub.f32 %v699_v58, %v700_v27 }
 0x38e   :  { %v6256_v9 = vsel %vm648_vm2, %v6232_v43, %v6160_v51  ;;  %v6328_v41 = vsub.f32 %v6304_v60, %v11010_v47  ;;  %v6329_v28 = vsub.f32 %v6305_v44, %v11013_v35  ;;  %v6330_v25 = vsub.f32 %v6306_v56, %v11029_v30 }
 0x38f   :  { %vm647_vm4 = vcmp.eq.s32.totalorder %v10997_v26, 1  ;;  %v703_v8 = vmul.f32 0.16666667, %v701_v3  ;;  %v6257_v20 = vsel %vm648_vm2, %v6233_v0, %v6161_v15  ;;  %v6258_v27 = vsel %vm648_vm2, %v6234_v40, %v6162_v13  ;;  %v11155_v40 = vpop.permute.xlu1 %727 }
 0x390   :  { %v6331_v11 = vsub.f32 %v6307_v34, %v11032_v7  ;;  %v678_v47 = vsel %vm648_vm2, %v11118_v62, %v596_v45  ;;  %v6259_v35 = vsel %vm648_vm2, %v6235_v23, %v6163_v57  ;;  %v510_v30 = vsel %vm483_vm6, %v11016_v29, %v10778_v19  ;;  %12843 = vst [vmem:[#allocation77_spill] sm:$0xff] %v11155_v40  ;;  %v12844_v57 = vld [vmem:[#allocation135_spill] sm:$0xff]  ;;  %v12863_v40 = vld [vmem:[#allocation6_spill] sm:$0xff] }
 0x391   :  { %v511_v0 = vsel %vm483_vm6, %v11019_v2, %v10784_v36  ;;  %v679_v7 = vsel %vm648_vm2, %v11121_v48, %v597_v49  ;;  %v680_v51 = vsel %vm648_vm2, %v11124_v1, %v598_v16  ;;  %v681_v15 = vsel %vm648_vm2, %v11127_v12, %v599_v61  ;;  %v12845_v45 = vld [vmem:[#allocation91_spill] sm:$0xff] }
 0x392   :  { %v704_v19 = vmul.f32 %v703_v8, %v12721_v5  ;;  %vm729_vm15 = vcmp.eq.s32.totalorder %v11135_v6, 1  ;;  %v6352_v36 = vsel %vm730_vm0, %v6328_v41, %v6256_v9  ;;  %v6353_v43 = vsel %vm730_vm0, %v6329_v28, %v6257_v20  ;;  %v12846_v28 = vld [vmem:[#allocation29_spill] sm:$0xff]  ;;  %v12847_v8 = vld [vmem:[#allocation36_spill] sm:$0xff] }
 0x393   :  { %v6354_v23 = vsel %vm730_vm0, %v6330_v25, %v6258_v27  ;;  %v6355_v13 = vsel %vm730_vm0, %v6331_v11, %v6259_v35  ;;  %v512_v60 = vsel %vm483_vm6, %v11022_v39, %v12844_v57  ;;  %v6404_v9 = vpop.permute.xlu1 %6403  ;;  %v5988_v25 = vmul.f32 5.0, %v12846_v28  ;;  %v12848_v27 = vld [vmem:[#allocation37_spill] sm:$0xff] }
 0x394   :  { %v11177_v14 = vrot.slane %v704_v19, %v12733_v37  ;;  %v11180_v31 = vrot.slane %v704_v19, %v12735_v63  ;;  %v11183_v5 = vrot.slane %v704_v19, %v12740_v21  ;;  %v11186_v58 = vrot.slane %v704_v19, %v12742_v53 }
 0x395   :  { %v513_v37 = vsel %vm483_vm6, %v11026_v32, %v12845_v45  ;;  %v592_v63 = vsel %vm565_vm11, %v11078_v33, %v510_v30  ;;  %v593_v21 = vsel %vm565_vm11, %v11081_v46, %v511_v0  ;;  %v594_v41 = vsel %vm565_vm11, %v11084_v10, %v512_v60  ;;  %v12849_v0 = vld [vmem:[#allocation126_spill] sm:$0xff] }
 0x396   :  { %v760_v53 = vsel %vm730_vm0, %v11177_v14, %v678_v47  ;;  %v761_v44 = vsel %vm730_vm0, %v11180_v31, %v679_v7  ;;  %v762_v56 = vsel %vm730_vm0, %v11183_v5, %v680_v51  ;;  %v763_v34 = vsel %vm730_vm0, %v11186_v58, %v681_v15  ;;  %v12850_v7 = vld [vmem:[#allocation41_spill] sm:$0xff]  ;;  %v12851_v15 = vld [vmem:[#allocation83_spill] sm:$0xff] }
 0x397   :  { %v6376_v49 = vmul.f32 %v6352_v36, %v760_v53  ;;  %v6377_v16 = vmul.f32 %v6353_v43, %v761_v44  ;;  %v6378_v61 = vmul.f32 %v6354_v23, %v762_v56  ;;  %v6379_v3 = vmul.f32 %v6355_v13, %v763_v34  ;;  %v12852_v36 = vld [vmem:[#allocation92_spill] sm:$0xff] }
 0x398   :  { %v5989_v20 = vmul.f32 5.0, %v12847_v8  ;;  %v5990_v11 = vmul.f32 5.0, %v12848_v27  ;;  %vm486_vm7 = vcmp.eq.s32.totalorder %v12849_v0, 1  ;;  %v5991_v51 = vmul.f32 5.0, %v12850_v7  ;;  %v12853_v23 = vld [vmem:[#allocation104_spill] sm:$0xff] }
 0x399   :  { %v6430_v47 = vmul.f32 %v6404_v9, %v6376_v49  ;;  %v6431_v35 = vmul.f32 %v6404_v9, %v6377_v16  ;;  %v6432_v30 = vmul.f32 %v6404_v9, %v6378_v61  ;;  %v6433_v55 = vmul.f32 %v6404_v9, %v6379_v3  ;;  %v12854_v56 = vld [vmem:[#allocation84_spill] sm:$0xff]  ;;  %v12855_v49 = vld [vmem:[#allocation49_spill] sm:$0xff]  ;;  %v12856_v61 = vld [vmem:[#allocation54_spill] sm:$0xff] }
 0x39a   :  { %v6012_v19 = vmul.f32 %v5988_v25, %v12851_v15  ;;  %v6013_v43 = vmul.f32 %v5989_v20, %v12852_v36  ;;  %v6014_v13 = vmul.f32 %v5990_v11, %v12853_v23  ;;  %v595_v57 = vsel %vm565_vm11, %v11087_v52, %v513_v37  ;;  %v12857_v25 = vld [vmem:[#allocation134_spill] sm:$0xff]  ;;  %v12858_v11 = vld [vmem:[#allocation43_spill] sm:$0xff] }
 0x39b   :  { %6454 = vst [vmem:[#allocation2 + $0x20] sm:$0xff] %v6430_v47  ;;  %6455 = vst [vmem:[#allocation2 + $0x28] sm:$0xff] %v6431_v35  ;;  %v674_v60 = vsel %vm647_vm4, %v11118_v62, %v592_v63  ;;  %v675_v45 = vsel %vm647_vm4, %v11121_v48, %v593_v21  ;;  %v676_v53 = vsel %vm647_vm4, %v11124_v1, %v594_v41  ;;  %v6084_v3 = vmul.f32 7.0, %v12846_v28 }
 0x39c   :  { %6456 = vst [vmem:[#allocation2 + $0x30] sm:$0xff] %v6432_v30  ;;  %6457 = vst [vmem:[#allocation2 + $0x38] sm:$0xff] %v6433_v55  ;;  %v6015_v44 = vmul.f32 %v5991_v51, %v10806_v18  ;;  %v6036_v34 = vsub.f32 %v6012_v19, %v12854_v56  ;;  %v6037_v16 = vsub.f32 %v6013_v43, %v12855_v49  ;;  %v6085_v21 = vmul.f32 7.0, %v12847_v8 }
 0x39d   :  { %v6038_v37 = vsub.f32 %v6014_v13, %v12856_v61  ;;  %v677_v63 = vsel %vm647_vm4, %v11127_v12, %v595_v57  ;;  %v6086_v9 = vmul.f32 7.0, %v12848_v27  ;;  %vm568_vm8 = vcmp.eq.s32.totalorder %v12857_v25, 1  ;;  %v12860_v61 = vld [vmem:[#allocation99_spill] sm:$0xff] }
 0x39e   :  { %v11251_v41 = vsel %vm729_vm15, %v11177_v14, %v674_v60  ;;  %v11256_v20 = vsel %vm729_vm15, %v11180_v31, %v675_v45  ;;  %v6039_v47 = vsub.f32 %v6015_v44, %v12858_v11  ;;  %v6087_v35 = vmul.f32 7.0, %v12850_v7  ;;  %v11270_v45 = vpop.permute.xlu0 %718 }
 0x39f   :  { %v11263_v30 = vsel %vm729_vm15, %v11183_v5, %v676_v53  ;;  %v6108_v55 = vmul.f32 %v6084_v3, %v6036_v34  ;;  %v6109_v51 = vmul.f32 %v6085_v21, %v6037_v16  ;;  %v6110_v19 = vmul.f32 %v6086_v9, %v6038_v37  ;;  %12859 = vst [vmem:[#allocation76_spill] sm:$0xff] %v11270_v45  ;;  %v12864_v45 = vld [vmem:[#allocation7_spill] sm:$0xff] }
 0x3a0   :  { %v759_v43 = vsel %vm729_vm15, %v11186_v58, %v677_v63  ;;  %v6111_v13 = vmul.f32 %v6087_v35, %v6039_v47  ;;  %v6180_v57 = vmul.f32 9.0, %v12846_v28  ;;  %v6181_v60 = vmul.f32 9.0, %v12847_v8  ;;  %v12861_v63 = vld [vmem:[#allocation63_spill] sm:$0xff]  ;;  %v12862_v35 = vld [vmem:[#allocation69_spill] sm:$0xff] }
 0x3a1   :  { %v6132_v44 = vsub.f32 %v6108_v55, %v12851_v15  ;;  %v6133_v56 = vsub.f32 %v6109_v51, %v12852_v36  ;;  %v6134_v53 = vsub.f32 %v6110_v19, %v12853_v23  ;;  %v6182_v49 = vmul.f32 9.0, %v12848_v27 }
 0x3a2   :  { %v6060_v3 = vsel %vm483_vm6, %v6036_v34, %v12860_v61  ;;  %v6061_v21 = vsel %vm483_vm6, %v6037_v16, %v12861_v63  ;;  %v6135_v9 = vsub.f32 %v6111_v13, %v10806_v18  ;;  %v6183_v11 = vmul.f32 9.0, %v12850_v7 }
 0x3a3   :  { %v6062_v15 = vsel %vm483_vm6, %v6038_v37, %v12862_v35  ;;  %v6063_v36 = vsel %vm483_vm6, %v6039_v47, %v10875_v42  ;;  %v6204_v23 = vmul.f32 %v6180_v57, %v6132_v44  ;;  %v6276_v55 = vmul.f32 11.0, %v12846_v28 }
 0x3a4   :  { %v6205_v51 = vmul.f32 %v6181_v60, %v6133_v56  ;;  %v6206_v19 = vmul.f32 %v6182_v49, %v6134_v53  ;;  %v6207_v61 = vmul.f32 %v6183_v11, %v6135_v9  ;;  %v6277_v63 = vmul.f32 11.0, %v12847_v8  ;;  %v11303_v8 = vpop.permute.xlu0 %724 }
 0x3a5   :  { %v6228_v38 = vsub.f32 %v6204_v23, %v6036_v34  ;;  %v6278_v18 = vmul.f32 11.0, %v12848_v27  ;;  %v6279_v13 = vmul.f32 11.0, %v12850_v7  ;;  %v522_v35 = vsel %vm486_vm7, %v11016_v29, %v12863_v40  ;;  %v12865_v40 = vld [vmem:[#allocation12_spill] sm:$0xff] }
 0x3a6   :  { %v6229_v4 = vsub.f32 %v6205_v51, %v6037_v16  ;;  %v6230_v42 = vsub.f32 %v6206_v19, %v6038_v37  ;;  %v6231_v57 = vsub.f32 %v6207_v61, %v6039_v47  ;;  %v523_v28 = vsel %vm486_vm7, %v11019_v2, %v12864_v45  ;;  %v12866_v45 = vld [vmem:[#allocation50_spill] sm:$0xff] }
 0x3a7   :  { %vm650_vm13 = vcmp.eq.s32.totalorder %v10978_v50, 1  ;;  %v6156_v27 = vsel %vm565_vm11, %v6132_v44, %v6060_v3  ;;  %v6157_v7 = vsel %vm565_vm11, %v6133_v56, %v6061_v21  ;;  %v6300_v34 = vmul.f32 %v6276_v55, %v6228_v38  ;;  %v6414_v50 = vpop.permute.xlu1 %6413 }
 0x3a8   :  { %v524_v16 = vsel %vm486_vm7, %v11022_v39, %v12865_v40  ;;  %v6158_v37 = vsel %vm565_vm11, %v6134_v53, %v6062_v15  ;;  %v6159_v47 = vsel %vm565_vm11, %v6135_v9, %v6063_v36  ;;  %v6301_v60 = vmul.f32 %v6277_v63, %v6229_v4  ;;  %v12869_v40 = vld [vmem:[#allocation58_spill] sm:$0xff] }
 0x3a9   :  { %v525_v49 = vsel %vm486_vm7, %v11026_v32, %v12866_v45  ;;  %v6302_v3 = vmul.f32 %v6278_v18, %v6230_v42  ;;  %v6303_v21 = vmul.f32 %v6279_v13, %v6231_v57  ;;  %v6324_v11 = vsub.f32 %v6300_v34, %v6132_v44  ;;  %v6399_v13 = vpop.permute.xlu0 %6398  ;;  %v12871_v45 = vld [vmem:[#allocation55_spill] sm:$0xff] }
 0x3aa   :  { %v604_v23 = vsel %vm568_vm8, %v11078_v33, %v522_v35  ;;  %vm732_vm10 = vcmp.eq.s32.totalorder %v11103_v59, 1  ;;  %v6252_v15 = vsel %vm647_vm4, %v6228_v38, %v6156_v27  ;;  %v6325_v22 = vsub.f32 %v6301_v60, %v6133_v56  ;;  %v12868_v27 = vld [vmem:[#allocation57_spill] sm:$0xff] }
 0x3ab   :  { %v605_v36 = vsel %vm568_vm8, %v11081_v46, %v523_v28  ;;  %v606_v55 = vsel %vm568_vm8, %v11084_v10, %v524_v16  ;;  %v6253_v44 = vsel %vm647_vm4, %v6229_v4, %v6157_v7  ;;  %v6326_v51 = vsub.f32 %v6302_v3, %v6134_v53  ;;  %v12867_v4 = vld [vmem:[#allocation56_spill] sm:$0xff]  ;;  %v12870_v16 = vld [vmem:[#allocation59_spill] sm:$0xff] }
 0x3ac   :  { %v6327_v19 = vsub.f32 %v6303_v21, %v6135_v9  ;;  %v6348_v61 = vsel %vm729_vm15, %v6324_v11, %v6252_v15  ;;  %v6254_v38 = vsel %vm647_vm4, %v6230_v42, %v6158_v37  ;;  %v6255_v56 = vsel %vm647_vm4, %v6231_v57, %v6159_v47  ;;  %v12872_v21 = vld [vmem:[#allocation73_spill] sm:$0xff] }
 0x3ad   :  { %v6349_v63 = vsel %vm729_vm15, %v6325_v22, %v6253_v44  ;;  %v6372_v18 = vmul.f32 %v6348_v61, %v11251_v41  ;;  %v6350_v35 = vsel %vm729_vm15, %v6326_v51, %v6254_v38  ;;  %v6000_v28 = vmul.f32 5.0, %v12867_v4  ;;  %v12873_v44 = vld [vmem:[#allocation44_spill] sm:$0xff]  ;;  %v12874_v61 = vld [vmem:[#allocation95_spill] sm:$0xff] }
 0x3ae   :  { %v6351_v53 = vsel %vm729_vm15, %v6327_v19, %v6255_v56  ;;  %v6373_v9 = vmul.f32 %v6349_v63, %v11256_v20  ;;  %v6374_v42 = vmul.f32 %v6350_v35, %v11263_v30  ;;  %v6001_v7 = vmul.f32 5.0, %v12868_v27  ;;  %v12875_v56 = vld [vmem:[#allocation25_spill] sm:$0xff] }
 0x3af   :  { %v6375_v26 = vmul.f32 %v6351_v53, %v759_v43  ;;  %v6426_v57 = vmul.f32 %v6399_v13, %v6372_v18  ;;  %v6002_v41 = vmul.f32 5.0, %v12869_v40  ;;  %v6003_v37 = vmul.f32 5.0, %v12870_v16 }
 0x3b0   :  { %v6427_v34 = vmul.f32 %v6399_v13, %v6373_v9  ;;  %v6024_v47 = vmul.f32 %v6000_v28, %v10846_v54  ;;  %v6428_v60 = vmul.f32 %v6399_v13, %v6374_v42  ;;  %v607_v20 = vsel %vm568_vm8, %v11087_v52, %v525_v49 }
 0x3b1   :  { %v6429_v6 = vmul.f32 %v6399_v13, %v6375_v26  ;;  %6450 = vst [vmem:[#allocation2] sm:$0xff] %v6426_v57  ;;  %v6025_v30 = vmul.f32 %v6001_v7, %v10849_v24  ;;  %v6026_v43 = vmul.f32 %v6002_v41, %v10866_v17  ;;  %v6027_v3 = vmul.f32 %v6003_v37, %v12871_v45 }
 0x3b2   :  { %6451 = vst [vmem:[#allocation2 + $0x8] sm:$0xff] %v6427_v34  ;;  %v6048_v11 = vsub.f32 %v6024_v47, %v12872_v21  ;;  %v6096_v15 = vmul.f32 7.0, %v12867_v4  ;;  %6452 = vst [vmem:[#allocation2 + $0x10] sm:$0xff] %v6428_v60  ;;  %v686_v22 = vsel %vm650_vm13, %v11118_v62, %v604_v23  ;;  %v6097_v49 = vmul.f32 7.0, %v12868_v27 }
 0x3b3   :  { %6453 = vst [vmem:[#allocation2 + $0x18] sm:$0xff] %v6429_v6  ;;  %v6049_v51 = vsub.f32 %v6025_v30, %v12873_v44  ;;  %v6098_v19 = vmul.f32 7.0, %v12869_v40  ;;  %v6050_v38 = vsub.f32 %v6026_v43, %v12874_v61  ;;  %v6051_v63 = vsub.f32 %v6027_v3, %v12875_v56  ;;  %v12876_v6 = vld [vmem:[#allocation60_spill] sm:$0xff] }
 0x3b4   :  { %v6099_v18 = vmul.f32 7.0, %v12870_v16  ;;  %v6120_v13 = vmul.f32 %v6096_v15, %v6048_v11  ;;  %v687_v35 = vsel %vm650_vm13, %v11121_v48, %v605_v36  ;;  %v688_v23 = vsel %vm650_vm13, %v11124_v1, %v606_v55  ;;  %v12877_v43 = vld [vmem:[#allocation16_spill] sm:$0xff] }
 0x3b5   :  { %v689_v53 = vsel %vm650_vm13, %v11127_v12, %v607_v20  ;;  %v6121_v9 = vmul.f32 %v6097_v49, %v6049_v51  ;;  %v768_v28 = vsel %vm732_vm10, %v11177_v14, %v686_v22  ;;  %v769_v42 = vsel %vm732_vm10, %v11180_v31, %v687_v35  ;;  %v12879_v35 = vld [vmem:[#allocation79_spill] sm:$0xff] }
 0x3b6   :  { %v6122_v26 = vmul.f32 %v6098_v19, %v6050_v38  ;;  %v6123_v57 = vmul.f32 %v6099_v18, %v6051_v63  ;;  %v6144_v36 = vsub.f32 %v6120_v13, %v10846_v54  ;;  %v6192_v55 = vmul.f32 9.0, %v12867_v4 }
 0x3b7   :  { %v6145_v7 = vsub.f32 %v6121_v9, %v10849_v24  ;;  %v6193_v34 = vmul.f32 9.0, %v12868_v27  ;;  %v6194_v47 = vmul.f32 9.0, %v12869_v40  ;;  %v6195_v60 = vmul.f32 9.0, %v12870_v16 }
 0x3b8   :  { %v6146_v41 = vsub.f32 %v6122_v26, %v10866_v17  ;;  %v6147_v37 = vsub.f32 %v6123_v57, %v12871_v45  ;;  %vm485_vm9 = vcmp.eq.s32.totalorder %v12876_v6, 1  ;;  %v770_v54 = vsel %vm732_vm10, %v11183_v5, %v688_v23  ;;  %v12878_v45 = vld [vmem:[#allocation90_spill] sm:$0xff] }
 0x3b9   :  { %v771_v24 = vsel %vm732_vm10, %v11186_v58, %v689_v53  ;;  %v6216_v20 = vmul.f32 %v6192_v55, %v6144_v36  ;;  %v6217_v30 = vmul.f32 %v6193_v34, %v6145_v7  ;;  %v6072_v17 = vsel %vm486_vm7, %v6048_v11, %v12877_v43  ;;  %v12880_v53 = vld [vmem:[#allocation17_spill] sm:$0xff]  ;;  %v12881_v43 = vld [vmem:[#allocation66_spill] sm:$0xff] }
 0x3ba   :  { %v6073_v3 = vsel %vm486_vm7, %v6049_v51, %v12878_v45  ;;  %v6218_v21 = vmul.f32 %v6194_v47, %v6146_v41  ;;  %v6219_v15 = vmul.f32 %v6195_v60, %v6147_v37  ;;  %v6288_v49 = vmul.f32 11.0, %v12867_v4 }
 0x3bb   :  { %v6240_v22 = vsub.f32 %v6216_v20, %v6048_v11  ;;  %v6241_v44 = vsub.f32 %v6217_v30, %v6049_v51  ;;  %v6289_v19 = vmul.f32 11.0, %v12868_v27  ;;  %v6290_v18 = vmul.f32 11.0, %v12869_v40 }
 0x3bc   :  { %v6242_v61 = vsub.f32 %v6218_v21, %v6050_v38  ;;  %v6243_v56 = vsub.f32 %v6219_v15, %v6051_v63  ;;  %v6291_v13 = vmul.f32 11.0, %v12870_v16  ;;  %v6074_v23 = vsel %vm486_vm7, %v6050_v38, %v12879_v35  ;;  %v12883_v21 = vld [vmem:[#allocation76_spill] sm:$0xff]  ;;  %v12889_v35 = vld [vmem:[#allocation19_spill] sm:$0xff] }
 0x3bd   :  { %v6075_v9 = vsel %vm486_vm7, %v6051_v63, %v12880_v53  ;;  %v6312_v11 = vmul.f32 %v6288_v49, %v6240_v22  ;;  %v6313_v51 = vmul.f32 %v6289_v19, %v6241_v44  ;;  %v6168_v4 = vsel %vm568_vm8, %v6144_v36, %v6072_v17  ;;  %v12882_v17 = vld [vmem:[#allocation108_spill] sm:$0xff] }
 0x3be   :  { %v6169_v27 = vsel %vm568_vm8, %v6145_v7, %v6073_v3  ;;  %v6314_v26 = vmul.f32 %v6290_v18, %v6242_v61  ;;  %v6315_v40 = vmul.f32 %v6291_v13, %v6243_v56  ;;  %v6170_v16 = vsel %vm568_vm8, %v6146_v41, %v6074_v23  ;;  %v12888_v18 = vld [vmem:[#allocation18_spill] sm:$0xff]  ;;  %v12890_v53 = vld [vmem:[#allocation20_spill] sm:$0xff] }
 0x3bf   :  { %v6171_v38 = vsel %vm568_vm8, %v6147_v37, %v6075_v9  ;;  %v6336_v57 = vsub.f32 %v6312_v11, %v6144_v36  ;;  %v6337_v55 = vsub.f32 %v6313_v51, %v6145_v7  ;;  %v6264_v0 = vsel %vm650_vm13, %v6240_v22, %v6168_v4 }
 0x3c0   :  { %v6265_v63 = vsel %vm650_vm13, %v6241_v44, %v6169_v27  ;;  %v6338_v34 = vsub.f32 %v6314_v26, %v6146_v41  ;;  %v6339_v47 = vsub.f32 %v6315_v40, %v6147_v37  ;;  %v6266_v60 = vsel %vm650_vm13, %v6242_v61, %v6170_v16  ;;  %v12884_v44 = vld [vmem:[#allocation61_spill] sm:$0xff]  ;;  %v12891_v27 = vld [vmem:[#allocation22_spill] sm:$0xff] }
 0x3c1   :  { %v6267_v20 = vsel %vm650_vm13, %v6243_v56, %v6171_v38  ;;  %v6360_v25 = vsel %vm732_vm10, %v6336_v57, %v6264_v0  ;;  %v6361_v36 = vsel %vm732_vm10, %v6337_v55, %v6265_v63  ;;  %vm567_vm3 = vcmp.eq.s32.totalorder %v12881_v43, 1  ;;  %v12886_v61 = vld [vmem:[#allocation45_spill] sm:$0xff]  ;;  %v12892_v40 = vld [vmem:[#allocation110_spill] sm:$0xff] }
 0x3c2   :  { %v6362_v7 = vsel %vm732_vm10, %v6338_v34, %v6266_v60  ;;  %v6363_v30 = vsel %vm732_vm10, %v6339_v47, %v6267_v20  ;;  %v6384_v41 = vmul.f32 %v6360_v25, %v768_v28  ;;  %v6385_v37 = vmul.f32 %v6361_v36, %v769_v42  ;;  %v12885_v28 = vld [vmem:[#allocation107_spill] sm:$0xff]  ;;  %v12893_v38 = vld [vmem:[#allocation74_spill] sm:$0xff]  ;;  %v12894_v55 = vld [vmem:[#allocation21_spill] sm:$0xff] }
 0x3c3   :  { %vm649_vm5 = vcmp.eq.s32.totalorder %v12882_v17, 1  ;;  %v6386_v45 = vmul.f32 %v6362_v7, %v770_v54  ;;  %v6387_v3 = vmul.f32 %v6363_v30, %v771_v24  ;;  %vm731_vm12 = vcmp.eq.s32.totalorder %v12883_v21, 1  ;;  %v12887_v24 = vld [vmem:[#allocation15_spill] sm:$0xff]  ;;  %v12895_v63 = vld [vmem:[#allocation46_spill] sm:$0xff]  ;;  %v12897_v7 = vld [vmem:[#allocation33_spill] sm:$0xff] }
 0x3c4   :  { %v6438_v15 = vmul.f32 %v6414_v50, %v6384_v41  ;;  %v6439_v22 = vmul.f32 %v6414_v50, %v6385_v37  ;;  %v518_v49 = vsel %vm485_vm9, %v11016_v29, %v12884_v44  ;;  %v519_v42 = vsel %vm485_vm9, %v11019_v2, %v12885_v28  ;;  %v12896_v25 = vld [vmem:[#allocation51_spill] sm:$0xff] }
 0x3c5   :  { %v6440_v59 = vmul.f32 %v6414_v50, %v6386_v45  ;;  %v6441_v19 = vmul.f32 %v6414_v50, %v6387_v3  ;;  %v520_v54 = vsel %vm485_vm9, %v11022_v39, %v12886_v61  ;;  %v521_v56 = vsel %vm485_vm9, %v11026_v32, %v12887_v24  ;;  %v12898_v41 = vld [vmem:[#allocation23_spill] sm:$0xff]  ;;  %v12899_v50 = vld [vmem:[#allocation26_spill] sm:$0xff] }
 0x3c6   :  { %6462 = vst [vmem:[#allocation2 + $0x60] sm:$0xff] %v6438_v15  ;;  %6463 = vst [vmem:[#allocation2 + $0x68] sm:$0xff] %v6439_v22  ;;  %v5996_v13 = vmul.f32 5.0, %v12888_v18  ;;  %v5997_v23 = vmul.f32 5.0, %v12889_v35  ;;  %v5998_v9 = vmul.f32 5.0, %v12890_v53  ;;  %v600_v11 = vsel %vm567_vm3, %v11078_v33, %v518_v49  ;;  %v12900_v15 = vld [vmem:[#allocation117_spill] sm:$0xff] }
 0x3c7   :  { %6464 = vst [vmem:[#allocation2 + $0x70] sm:$0xff] %v6440_v59  ;;  %6465 = vst [vmem:[#allocation2 + $0x78] sm:$0xff] %v6441_v19  ;;  %v601_v51 = vsel %vm567_vm3, %v11081_v46, %v519_v42  ;;  %v602_v4 = vsel %vm567_vm3, %v11084_v10, %v520_v54  ;;  %v5999_v26 = vmul.f32 5.0, %v12891_v27  ;;  %vm406_vm14 = vcmp.eq.s32.totalorder %v12892_v40, 1  ;;  %v12901_v22 = vld [vmem:[#allocation30_spill] sm:$0xff] }
 0x3c8   :  { %v603_v16 = vsel %vm567_vm3, %v11087_v52, %v521_v56  ;;  %v6020_v57 = vmul.f32 %v5996_v13, %v12893_v38  ;;  %v6021_v0 = vmul.f32 %v5997_v23, %v12894_v55  ;;  %v6022_v34 = vmul.f32 %v5998_v9, %v12895_v63 }
 0x3c9   :  { %v682_v47 = vsel %vm649_vm5, %v11118_v62, %v600_v11  ;;  %v683_v60 = vsel %vm649_vm5, %v11121_v48, %v601_v51  ;;  %v684_v20 = vsel %vm649_vm5, %v11124_v1, %v602_v4  ;;  %v6023_v36 = vmul.f32 %v5999_v26, %v12896_v25 }
 0x3ca   :  { %v6044_v30 = vsub.f32 %v6020_v57, %v12897_v7  ;;  %v6045_v37 = vsub.f32 %v6021_v0, %v12898_v41  ;;  %v6046_v45 = vsub.f32 %v6022_v34, %v12899_v50  ;;  %v6092_v3 = vmul.f32 7.0, %v12888_v18  ;;  %v12903_v7 = vld [vmem:[#allocation64_spill] sm:$0xff]  ;;  %v12904_v41 = vld [vmem:[#allocation70_spill] sm:$0xff] }
 0x3cb   :  { %vm488_vm6 = vcmp.eq.s32.totalorder %v12900_v15, 1  ;;  %v6047_v44 = vsub.f32 %v6023_v36, %v12901_v22  ;;  %v6093_v49 = vmul.f32 7.0, %v12889_v35  ;;  %v6094_v59 = vmul.f32 7.0, %v12890_v53 }
 0x3cc   :  { %v6095_v19 = vmul.f32 7.0, %v12891_v27  ;;  %v685_v28 = vsel %vm649_vm5, %v11127_v12, %v603_v16  ;;  %v764_v42 = vsel %vm731_vm12, %v11177_v14, %v682_v47  ;;  %v765_v61 = vsel %vm731_vm12, %v11180_v31, %v683_v60 }
 0x3cd   :  { %v6116_v54 = vmul.f32 %v6092_v3, %v6044_v30  ;;  %v766_v24 = vsel %vm731_vm12, %v11183_v5, %v684_v20  ;;  %v6117_v56 = vmul.f32 %v6093_v49, %v6045_v37  ;;  %v6118_v13 = vmul.f32 %v6094_v59, %v6046_v45  ;;  %v12905_v49 = vld [vmem:[#allocation5_spill] sm:$0xff] }
 0x3ce   :  { %v6119_v23 = vmul.f32 %v6095_v19, %v6047_v44  ;;  %v767_v9 = vsel %vm731_vm12, %v11186_v58, %v685_v28  ;;  %v6188_v51 = vmul.f32 9.0, %v12888_v18  ;;  %v6189_v4 = vmul.f32 9.0, %v12889_v35 }
 0x3cf   :  { %v6140_v11 = vsub.f32 %v6116_v54, %v12893_v38  ;;  %v6141_v26 = vsub.f32 %v6117_v56, %v12894_v55  ;;  %v6142_v16 = vsub.f32 %v6118_v13, %v12895_v63  ;;  %v6190_v0 = vmul.f32 9.0, %v12890_v53  ;;  %v12902_v38 = vld [vmem:[#allocation81_spill] sm:$0xff]  ;;  %v12908_v56 = vld [vmem:[#allocation106_spill] sm:$0xff] }
 0x3d0   :  { %v6143_v57 = vsub.f32 %v6119_v23, %v12896_v25  ;;  %v6191_v34 = vmul.f32 9.0, %v12891_v27  ;;  %v6284_v60 = vmul.f32 11.0, %v12888_v18  ;;  %v6285_v20 = vmul.f32 11.0, %v12889_v35  ;;  %v12906_v35 = vld [vmem:[#allocation53_spill] sm:$0xff] }
 0x3d1   :  { %v6212_v47 = vmul.f32 %v6188_v51, %v6140_v11  ;;  %v6068_v36 = vsel %vm485_vm9, %v6044_v30, %v12902_v38  ;;  %v6069_v55 = vsel %vm485_vm9, %v6045_v37, %v12903_v7  ;;  %v6213_v63 = vmul.f32 %v6189_v4, %v6141_v26  ;;  %v12907_v54 = vld [vmem:[#allocation13_spill] sm:$0xff]  ;;  %v12909_v4 = vld [vmem:[#allocation72_spill] sm:$0xff] }
 0x3d2   :  { %v6286_v25 = vmul.f32 11.0, %v12890_v53  ;;  %v6070_v50 = vsel %vm485_vm9, %v6046_v45, %v12904_v41  ;;  %v6214_v3 = vmul.f32 %v6190_v0, %v6142_v16  ;;  %v6215_v22 = vmul.f32 %v6191_v34, %v6143_v57  ;;  %v12910_v0 = vld [vmem:[#allocation131_spill] sm:$0xff]  ;;  %v12911_v34 = vld [vmem:[#allocation62_spill] sm:$0xff]  ;;  %v12914_v7 = vld [vmem:[#allocation32_spill] sm:$0xff] }
 0x3d3   :  { %v6236_v18 = vsub.f32 %v6212_v47, %v6044_v30  ;;  %vm570_vm2 = vcmp.eq.s32.totalorder %v12905_v49, 1  ;;  %v6071_v59 = vsel %vm485_vm9, %v6047_v44, %v12906_v35  ;;  %v6237_v19 = vsub.f32 %v6213_v63, %v6045_v37  ;;  %v12913_v47 = vld [vmem:[#allocation128_spill] sm:$0xff] }
 0x3d4   :  { %v6287_v28 = vmul.f32 11.0, %v12891_v27  ;;  %v448_v53 = vsel %vm406_vm14, %v12908_v56, %v12907_v54  ;;  %v6238_v13 = vsub.f32 %v6214_v3, %v6046_v45  ;;  %v6239_v23 = vsub.f32 %v6215_v22, %v6047_v44  ;;  %v12912_v27 = vld [vmem:[#allocation80_spill] sm:$0xff]  ;;  %v12915_v45 = vld [vmem:[#allocation111_spill] sm:$0xff] }
 0x3d5   :  { %v6308_v51 = vmul.f32 %v6284_v60, %v6236_v18  ;;  %v449_v30 = vsel %vm406_vm14, %v12910_v0, %v12909_v4  ;;  %vm652_vm11 = vcmp.eq.s32.totalorder %v12911_v34, 1  ;;  %v6164_v6 = vsel %vm567_vm3, %v6140_v11, %v6068_v36  ;;  %v12916_v4 = vld [vmem:[#allocation77_spill] sm:$0xff] }
 0x3d6   :  { %v6309_v37 = vmul.f32 %v6285_v20, %v6237_v19  ;;  %v450_v38 = vsel %vm406_vm14, %v12913_v47, %v12912_v27  ;;  %v451_v44 = vsel %vm406_vm14, %v12915_v45, %v12914_v7  ;;  %v6165_v60 = vsel %vm567_vm3, %v6141_v26, %v6069_v55  ;;  %v12919_v7 = vld [vmem:[#allocation100_spill] sm:$0xff] }
 0x3d7   :  { %v6310_v63 = vmul.f32 %v6286_v25, %v6238_v13  ;;  %v6311_v41 = vmul.f32 %v6287_v28, %v6239_v23  ;;  %v530_v36 = vsel %vm488_vm6, %v11016_v29, %v448_v53  ;;  %v6166_v20 = vsel %vm567_vm3, %v6142_v16, %v6070_v50 }
 0x3d8   :  { %v6167_v3 = vsel %vm567_vm3, %v6143_v57, %v6071_v59  ;;  %v6332_v22 = vsub.f32 %v6308_v51, %v6140_v11  ;;  %v6333_v35 = vsub.f32 %v6309_v37, %v6141_v26  ;;  %v6260_v54 = vsel %vm649_vm5, %v6236_v18, %v6164_v6  ;;  %v6409_v59 = vpop.permute.xlu0 %6408  ;;  %v12917_v37 = vld [vmem:[#allocation97_spill] sm:$0xff] }
 0x3d9   :  { %v6261_v55 = vsel %vm649_vm5, %v6237_v19, %v6165_v60  ;;  %v6334_v25 = vsub.f32 %v6310_v63, %v6142_v16  ;;  %v6335_v28 = vsub.f32 %v6311_v41, %v6143_v57  ;;  %vm734_vm0 = vcmp.eq.s32.totalorder %v12916_v4, 1  ;;  %v12920_v63 = vld [vmem:[#allocation101_spill] sm:$0xff] }
 0x3da   :  { %v6262_v53 = vsel %vm649_vm5, %v6238_v13, %v6166_v20  ;;  %v6263_v50 = vsel %vm649_vm5, %v6239_v23, %v6167_v3  ;;  %v6356_v43 = vsel %vm731_vm12, %v6332_v22, %v6260_v54  ;;  %v6357_v11 = vsel %vm731_vm12, %v6333_v35, %v6261_v55  ;;  %v12921_v41 = vld [vmem:[#allocation113_spill] sm:$0xff]  ;;  %v12922_v35 = vld [vmem:[#allocation82_spill] sm:$0xff] }
 0x3db   :  { %v6358_v26 = vsel %vm731_vm12, %v6334_v25, %v6262_v53  ;;  %v6359_v16 = vsel %vm731_vm12, %v6335_v28, %v6263_v50  ;;  %v6380_v57 = vmul.f32 %v6356_v43, %v764_v42  ;;  %v6381_v18 = vmul.f32 %v6357_v11, %v765_v61  ;;  %v12923_v54 = vld [vmem:[#allocation94_spill] sm:$0xff]  ;;  %v12924_v28 = vld [vmem:[#allocation124_spill] sm:$0xff] }
 0x3dc   :  { %v6382_v19 = vmul.f32 %v6358_v26, %v766_v24  ;;  %v6383_v13 = vmul.f32 %v6359_v16, %v767_v9  ;;  %v531_v17 = vsel %vm488_vm6, %v11019_v2, %v449_v30  ;;  %v532_v23 = vsel %vm488_vm6, %v11022_v39, %v450_v38  ;;  %v12918_v24 = vld [vmem:[#allocation98_spill] sm:$0xff] }
 0x3dd   :  { %v6434_v51 = vmul.f32 %v6409_v59, %v6380_v57  ;;  %v6435_v6 = vmul.f32 %v6409_v59, %v6381_v18  ;;  %v533_v21 = vsel %vm488_vm6, %v11026_v32, %v451_v44  ;;  %v5912_v42 = vmul.f32 3.0, %v12917_v37  ;;  %v12925_v50 = vld [vmem:[#allocation42_spill] sm:$0xff] }
 0x3de   :  { %v6436_v61 = vmul.f32 %v6409_v59, %v6382_v19  ;;  %v6437_v27 = vmul.f32 %v6409_v59, %v6383_v13  ;;  %v5913_v9 = vmul.f32 3.0, %v12918_v24  ;;  %v5914_v60 = vmul.f32 3.0, %v12919_v7  ;;  %v12926_v26 = vld [vmem:[#allocation10_spill] sm:$0xff] }
 0x3df   :  { %6458 = vst [vmem:[#allocation2 + $0x40] sm:$0xff] %v6434_v51  ;;  %6459 = vst [vmem:[#allocation2 + $0x48] sm:$0xff] %v6435_v6  ;;  %v612_v30 = vsel %vm570_vm2, %v11078_v33, %v530_v36  ;;  %v613_v38 = vsel %vm570_vm2, %v11081_v46, %v531_v17  ;;  %v5915_v44 = vmul.f32 3.0, %v12920_v63  ;;  %v5936_v20 = vmul.f32 %v5912_v42, %v12921_v41  ;;  %v12927_v57 = vld [vmem:[#allocation34_spill] sm:$0xff]  ;;  %v12928_v17 = vld [vmem:[#allocation112_spill] sm:$0xff] }
 0x3e0   :  { %6460 = vst [vmem:[#allocation2 + $0x50] sm:$0xff] %v6436_v61  ;;  %6461 = vst [vmem:[#allocation2 + $0x58] sm:$0xff] %v6437_v27  ;;  %v614_v3 = vsel %vm570_vm2, %v11084_v10, %v532_v23  ;;  %v615_v22 = vsel %vm570_vm2, %v11087_v52, %v533_v21  ;;  %v5937_v36 = vmul.f32 %v5913_v9, %v12922_v35  ;;  %v6008_v11 = vmul.f32 5.0, %v12917_v37 }
 0x3e1   :  { %v5938_v55 = vmul.f32 %v5914_v60, %v12923_v54  ;;  %v694_v25 = vsel %vm652_vm11, %v11118_v62, %v612_v30  ;;  %v5939_v53 = vmul.f32 %v5915_v44, %v12924_v28  ;;  %v5960_v43 = vsub.f32 %v5936_v20, %v12925_v50 }
 0x3e2   :  { %v5961_v16 = vsub.f32 %v5937_v36, %v12926_v26  ;;  %v6009_v59 = vmul.f32 5.0, %v12918_v24  ;;  %v6010_v19 = vmul.f32 5.0, %v12919_v7  ;;  %v695_v13 = vsel %vm652_vm11, %v11121_v48, %v613_v38  ;;  %v12930_v26 = vld [vmem:[#allocation125_spill] sm:$0xff] }
 0x3e3   :  { %v5962_v18 = vsub.f32 %v5938_v55, %v12927_v57  ;;  %v5963_v23 = vsub.f32 %v5939_v53, %v12928_v17  ;;  %v6011_v51 = vmul.f32 5.0, %v12920_v63  ;;  %v6032_v6 = vmul.f32 %v6008_v11, %v5960_v43 }
 0x3e4   :  { %v696_v21 = vsel %vm652_vm11, %v11124_v1, %v614_v3  ;;  %v11634_v42 = vsel %vm652_vm11, %v11127_v12, %v615_v22  ;;  %v6033_v61 = vmul.f32 %v6009_v59, %v5961_v16  ;;  %v11639_v9 = vsel %vm734_vm0, %v11177_v14, %v694_v25 }
 0x3e5   :  { %v6034_v27 = vmul.f32 %v6010_v19, %v5962_v18  ;;  %v6035_v60 = vmul.f32 %v6011_v51, %v5963_v23  ;;  %v6056_v30 = vsub.f32 %v6032_v6, %v12921_v41  ;;  %v6104_v38 = vmul.f32 7.0, %v12917_v37 }
 0x3e6   :  { %v6057_v44 = vsub.f32 %v6033_v61, %v12922_v35  ;;  %v6105_v3 = vmul.f32 7.0, %v12918_v24  ;;  %v6106_v22 = vmul.f32 7.0, %v12919_v7  ;;  %v777_v36 = vsel %vm734_vm0, %v11180_v31, %v695_v13  ;;  %v12929_v35 = vld [vmem:[#allocation123_spill] sm:$0xff] }
 0x3e7   :  { %v6058_v20 = vsub.f32 %v6034_v27, %v12923_v54  ;;  %v6059_v55 = vsub.f32 %v6035_v60, %v12924_v28  ;;  %v6107_v25 = vmul.f32 7.0, %v12920_v63  ;;  %v6128_v53 = vmul.f32 %v6104_v38, %v6056_v30 }
 0x3e8   :  { %v778_v41 = vsel %vm734_vm0, %v11183_v5, %v696_v21  ;;  %v5984_v54 = vsel %vm406_vm14, %v5960_v43, %v12929_v35  ;;  %v6129_v50 = vmul.f32 %v6105_v3, %v6057_v44  ;;  %v5985_v57 = vsel %vm406_vm14, %v5961_v16, %v12930_v26  ;;  %v12931_v21 = vld [vmem:[#allocation96_spill] sm:$0xff]  ;;  %v12932_v3 = vld [vmem:[#allocation129_spill] sm:$0xff] }
 0x3e9   :  { %v6130_v11 = vmul.f32 %v6106_v22, %v6058_v20  ;;  %v6131_v59 = vmul.f32 %v6107_v25, %v6059_v55  ;;  %v6152_v19 = vsub.f32 %v6128_v53, %v5960_v43  ;;  %v6200_v28 = vmul.f32 9.0, %v12917_v37  ;;  %v12933_v53 = vld [vmem:[#allocation127_spill] sm:$0xff] }
 0x3ea   :  { %v6153_v13 = vsub.f32 %v6129_v50, %v5961_v16  ;;  %v6201_v51 = vmul.f32 9.0, %v12918_v24  ;;  %v6202_v6 = vmul.f32 9.0, %v12919_v7  ;;  %v5986_v61 = vsel %vm406_vm14, %v5962_v18, %v12931_v21 }
 0x3eb   :  { %v6154_v17 = vsub.f32 %v6130_v11, %v5962_v18  ;;  %v6155_v27 = vsub.f32 %v6131_v59, %v5963_v23  ;;  %v6203_v60 = vmul.f32 9.0, %v12920_v63  ;;  %v6224_v38 = vmul.f32 %v6200_v28, %v6152_v19 }
 0x3ec   :  { %v5987_v43 = vsel %vm406_vm14, %v5963_v23, %v12932_v3  ;;  %v6080_v16 = vsel %vm488_vm6, %v6056_v30, %v5984_v54  ;;  %v6225_v22 = vmul.f32 %v6201_v51, %v6153_v13  ;;  %vm405_vm4 = vcmp.eq.s32.totalorder %v12933_v53, 1 }
 0x3ed   :  { %v6226_v25 = vmul.f32 %v6202_v6, %v6154_v17  ;;  %v6081_v35 = vsel %vm488_vm6, %v6057_v44, %v5985_v57  ;;  %v6227_v50 = vmul.f32 %v6203_v60, %v6155_v27  ;;  %v6248_v18 = vsub.f32 %v6224_v38, %v6056_v30 }
 0x3ee   :  { %v6296_v11 = vmul.f32 11.0, %v12917_v37  ;;  %v6249_v26 = vsub.f32 %v6225_v22, %v6057_v44  ;;  %v6297_v28 = vmul.f32 11.0, %v12918_v24  ;;  %v6298_v40 = vmul.f32 11.0, %v12919_v7 }
 0x3ef   :  { %v6250_v59 = vsub.f32 %v6226_v25, %v6058_v20  ;;  %v6082_v23 = vsel %vm488_vm6, %v6058_v20, %v5986_v61  ;;  %v6251_v54 = vsub.f32 %v6227_v50, %v6059_v55  ;;  %v6299_v51 = vmul.f32 11.0, %v12920_v63  ;;  %v12935_v50 = vld [vmem:[#allocation133_spill] sm:$0xff] }
 0x3f0   :  { %v6320_v6 = vmul.f32 %v6296_v11, %v6248_v18  ;;  %v6083_v57 = vsel %vm488_vm6, %v6059_v55, %v5987_v43  ;;  %v6176_v30 = vsel %vm570_vm2, %v6152_v19, %v6080_v16  ;;  %v6321_v37 = vmul.f32 %v6297_v28, %v6249_v26  ;;  %v6424_v16 = vpop.permute.xlu1 %6423  ;;  %v12938_v28 = vld [vmem:[#allocation65_spill] sm:$0xff] }
 0x3f1   :  { %v6322_v44 = vmul.f32 %v6298_v40, %v6250_v59  ;;  %v6177_v24 = vsel %vm570_vm2, %v6153_v13, %v6081_v35  ;;  %v6178_v7 = vsel %vm570_vm2, %v6154_v17, %v6082_v23  ;;  %v6323_v21 = vmul.f32 %v6299_v51, %v6251_v54  ;;  %v12934_v35 = vld [vmem:[#allocation109_spill] sm:$0xff]  ;;  %v12939_v40 = vld [vmem:[#allocation78_spill] sm:$0xff] }
 0x3f2   :  { %v6344_v20 = vsub.f32 %v6320_v6, %v6152_v19  ;;  %v6179_v63 = vsel %vm570_vm2, %v6155_v27, %v6083_v57  ;;  %v6272_v15 = vsel %vm652_vm11, %v6248_v18, %v6176_v30  ;;  %v6345_v55 = vsub.f32 %v6321_v37, %v6153_v13  ;;  %v12942_v6 = vld [vmem:[#allocation27_spill] sm:$0xff]  ;;  %v12943_v30 = vld [vmem:[#allocation118_spill] sm:$0xff] }
 0x3f3   :  { %v6346_v61 = vsub.f32 %v6322_v44, %v6154_v17  ;;  %v6273_v60 = vsel %vm652_vm11, %v6249_v26, %v6177_v24  ;;  %v6274_v38 = vsel %vm652_vm11, %v6250_v59, %v6178_v7  ;;  %v6347_v3 = vsub.f32 %v6323_v21, %v6155_v27  ;;  %v12937_v26 = vld [vmem:[#allocation132_spill] sm:$0xff]  ;;  %v12944_v44 = vld [vmem:[#allocation119_spill] sm:$0xff]  ;;  %v12945_v7 = vld [vmem:[#allocation121_spill] sm:$0xff] }
 0x3f4   :  { %v6368_v43 = vsel %vm734_vm0, %v6344_v20, %v6272_v15  ;;  %v6275_v19 = vsel %vm652_vm11, %v6251_v54, %v6179_v63  ;;  %v6369_v49 = vsel %vm734_vm0, %v6345_v55, %v6273_v60  ;;  %v779_v27 = vsel %vm734_vm0, %v11186_v58, %v11634_v42  ;;  %v12941_v54 = vld [vmem:[#allocation14_spill] sm:$0xff] }
 0x3f5   :  { %v6370_v13 = vsel %vm734_vm0, %v6346_v61, %v6274_v38  ;;  %v6392_v17 = vmul.f32 %v6368_v43, %v11639_v9  ;;  %v6371_v22 = vsel %vm734_vm0, %v6347_v3, %v6275_v19  ;;  %v6393_v25 = vmul.f32 %v6369_v49, %v777_v36  ;;  %v12940_v36 = vld [vmem:[#allocation11_spill] sm:$0xff]  ;;  %v12947_v63 = vld [vmem:[#allocation122_spill] sm:$0xff]  ;;  %v12948_v61 = vld [vmem:[#allocation120_spill] sm:$0xff] }
 0x3f6   :  { %v6394_v34 = vmul.f32 %v6370_v13, %v778_v41  ;;  %v11717_v11 = vsel %vm324_vm1, %v12935_v50, %v12934_v35  ;;  %vm487_vm15 = vcmp.eq.s32.totalorder %v12937_v26, 1  ;;  %v6395_v9 = vmul.f32 %v6371_v22, %v779_v27  ;;  %v12949_v38 = vld [vmem:[#allocation102_spill] sm:$0xff]  ;;  %v12950_v43 = vld [vmem:[#allocation103_spill] sm:$0xff]  ;;  %v12951_v49 = vld [vmem:[#allocation116_spill] sm:$0xff] }
 0x3f7   :  { %v6446_v59 = vmul.f32 %v6424_v16, %v6392_v17  ;;  %vm569_vm7 = vcmp.eq.s32.totalorder %v12938_v28, 1  ;;  %vm651_vm8 = vcmp.eq.s32.totalorder %v12939_v40, 1  ;;  %v6447_v42 = vmul.f32 %v6424_v16, %v6393_v25  ;;  %v12952_v17 = vld [vmem:[#allocation85_spill] sm:$0xff]  ;;  %v12953_v27 = vld [vmem:[#allocation8_spill] sm:$0xff] }
 0x3f8   :  { %v6448_v23 = vmul.f32 %v6424_v16, %v6394_v34  ;;  %vm733_vm13 = vcmp.eq.s32.totalorder %v11303_v8, 1  ;;  %v6449_v4 = vmul.f32 %v6424_v16, %v6395_v9  ;;  %v444_v41 = vsel %vm405_vm4, %v12908_v56, %v12940_v36  ;;  %v12946_v56 = vld [vmem:[#allocation28_spill] sm:$0xff] }
 0x3f9   :  { %6470 = vst [vmem:[#allocation2 + $0xa0] sm:$0xff] %v6446_v59  ;;  %v445_v51 = vsel %vm405_vm4, %v12910_v0, %v12941_v54  ;;  %6471 = vst [vmem:[#allocation2 + $0xa8] sm:$0xff] %v6447_v42  ;;  %v446_v57 = vsel %vm405_vm4, %v12913_v47, %v12942_v6  ;;  %v5908_v37 = vmul.f32 3.0, %v12943_v30  ;;  %v5909_v24 = vmul.f32 3.0, %v12944_v44 }
 0x3fa   :  { %6472 = vst [vmem:[#allocation2 + $0xb0] sm:$0xff] %v6448_v23  ;;  %v5910_v21 = vmul.f32 3.0, %v12945_v7  ;;  %6473 = vst [vmem:[#allocation2 + $0xb8] sm:$0xff] %v6449_v4  ;;  %v447_v20 = vsel %vm405_vm4, %v12915_v45, %v12946_v56  ;;  %v526_v0 = vsel %vm487_vm15, %v11016_v29, %v444_v41  ;;  %v527_v47 = vsel %vm487_vm15, %v11019_v2, %v445_v51 }
 0x3fb   :  { %v5911_v15 = vmul.f32 3.0, %v12947_v63  ;;  %v528_v55 = vsel %vm487_vm15, %v11022_v39, %v446_v57  ;;  %v5932_v60 = vmul.f32 %v5908_v37, %v12948_v61  ;;  %v5933_v3 = vmul.f32 %v5909_v24, %v12949_v38 }
 0x3fc   :  { %v5934_v45 = vmul.f32 %v5910_v21, %v12950_v43  ;;  %v529_v29 = vsel %vm487_vm15, %v11026_v32, %v447_v20  ;;  %v608_v2 = vsel %vm569_vm7, %v11078_v33, %v526_v0  ;;  %v609_v19 = vsel %vm569_vm7, %v11081_v46, %v527_v47 }
 0x3fd   :  { %v5935_v39 = vmul.f32 %v5911_v15, %v12935_v50  ;;  %v5956_v13 = vsub.f32 %v5932_v60, %v12951_v49  ;;  %v5957_v16 = vsub.f32 %v5933_v3, %v12952_v17  ;;  %v6004_v25 = vmul.f32 5.0, %v12943_v30  ;;  %v12954_v15 = vld [vmem:[#allocation105_spill] sm:$0xff] }
 0x3fe   :  { %v5958_v22 = vsub.f32 %v5934_v45, %v12953_v27  ;;  %v6005_v34 = vmul.f32 5.0, %v12944_v44  ;;  %v6006_v33 = vmul.f32 5.0, %v12945_v7  ;;  %v6007_v18 = vmul.f32 5.0, %v12947_v63 }
 0x3ff   :  { %v5959_v32 = vsub.f32 %v5935_v39, %v12934_v35  ;;  %v610_v46 = vsel %vm569_vm7, %v11084_v10, %v528_v55  ;;  %v611_v9 = vsel %vm569_vm7, %v11087_v52, %v529_v29  ;;  %v690_v59 = vsel %vm651_vm8, %v11118_v62, %v608_v2  ;;  %v12956_v29 = vld [vmem:[#allocation130_spill] sm:$0xff] }
 0x400   :  { %v6028_v42 = vmul.f32 %v6004_v25, %v5956_v13  ;;  %v691_v35 = vsel %vm651_vm8, %v11121_v48, %v609_v19  ;;  %v6029_v23 = vmul.f32 %v6005_v34, %v5957_v16  ;;  %v6030_v4 = vmul.f32 %v6006_v33, %v5958_v22 }
 0x401   :  { %v6031_v36 = vmul.f32 %v6007_v18, %v5959_v32  ;;  %v692_v10 = vsel %vm651_vm8, %v11124_v1, %v610_v46  ;;  %v693_v52 = vsel %vm651_vm8, %v11127_v12, %v611_v9  ;;  %v6100_v62 = vmul.f32 7.0, %v12943_v30 }
 0x402   :  { %v6052_v41 = vsub.f32 %v6028_v42, %v12948_v61  ;;  %v6053_v54 = vsub.f32 %v6029_v23, %v12949_v38  ;;  %v6054_v51 = vsub.f32 %v6030_v4, %v12950_v43  ;;  %v6101_v6 = vmul.f32 7.0, %v12944_v44  ;;  %v12955_v43 = vld [vmem:[#allocation114_spill] sm:$0xff] }
 0x403   :  { %v6055_v48 = vsub.f32 %v6031_v36, %v12935_v50  ;;  %v772_v1 = vsel %vm733_vm13, %v11177_v14, %v690_v59  ;;  %v6102_v57 = vmul.f32 7.0, %v12945_v7  ;;  %v6103_v12 = vmul.f32 7.0, %v12947_v63 }
 0x404   :  { %v6124_v37 = vmul.f32 %v6100_v62, %v6052_v41  ;;  %v773_v24 = vsel %vm733_vm13, %v11180_v31, %v691_v35  ;;  %v774_v21 = vsel %vm733_vm13, %v11183_v5, %v692_v10  ;;  %v775_v50 = vsel %vm733_vm13, %v11186_v58, %v693_v52 }
 0x405   :  { %v6125_v56 = vmul.f32 %v6101_v6, %v6053_v54  ;;  %v6126_v20 = vmul.f32 %v6102_v57, %v6054_v51  ;;  %v6127_v14 = vmul.f32 %v6103_v12, %v6055_v48  ;;  %v6196_v47 = vmul.f32 9.0, %v12943_v30  ;;  %v6419_v12 = vpop.permute.xlu0 %6418 }
 0x406   :  { %v6148_v0 = vsub.f32 %v6124_v37, %v5956_v13  ;;  %v5980_v55 = vsel %vm405_vm4, %v5956_v13, %v12954_v15  ;;  %v6197_v31 = vmul.f32 9.0, %v12944_v44  ;;  %v6198_v60 = vmul.f32 9.0, %v12945_v7 }
 0x407   :  { %v6149_v61 = vsub.f32 %v6125_v56, %v5957_v16  ;;  %v6150_v5 = vsub.f32 %v6126_v20, %v5958_v22  ;;  %v6151_v38 = vsub.f32 %v6127_v14, %v5959_v32  ;;  %v6199_v3 = vmul.f32 9.0, %v12947_v63 }
 0x408   :  { %v6220_v58 = vmul.f32 %v6196_v47, %v6148_v0  ;;  %v5981_v45 = vsel %vm405_vm4, %v5957_v16, %v12955_v43  ;;  %v5982_v2 = vsel %vm405_vm4, %v5958_v22, %v12956_v29  ;;  %v5983_v19 = vsel %vm405_vm4, %v5959_v32, %v11717_v11 }
 0x409   :  { %v6221_v39 = vmul.f32 %v6197_v31, %v6149_v61  ;;  %v6222_v49 = vmul.f32 %v6198_v60, %v6150_v5  ;;  %v6223_v13 = vmul.f32 %v6199_v3, %v6151_v38  ;;  %v6292_v17 = vmul.f32 11.0, %v12943_v30 }
 0x40a   :  { %v6293_v27 = vmul.f32 11.0, %v12944_v44  ;;  %v6076_v25 = vsel %vm487_vm15, %v6052_v41, %v5980_v55  ;;  %v6244_v34 = vsub.f32 %v6220_v58, %v6052_v41  ;;  %v6294_v33 = vmul.f32 11.0, %v12945_v7 }
 0x40b   :  { %v6245_v16 = vsub.f32 %v6221_v39, %v6053_v54  ;;  %v6077_v22 = vsel %vm487_vm15, %v6053_v54, %v5981_v45  ;;  %v6246_v18 = vsub.f32 %v6222_v49, %v6054_v51  ;;  %v6247_v53 = vsub.f32 %v6223_v13, %v6055_v48 }
 0x40c   :  { %v6295_v11 = vmul.f32 11.0, %v12947_v63  ;;  %v6078_v32 = vsel %vm487_vm15, %v6054_v51, %v5982_v2  ;;  %v6079_v30 = vsel %vm487_vm15, %v6055_v48, %v5983_v19  ;;  %v6316_v44 = vmul.f32 %v6292_v17, %v6244_v34 }
 0x40d   :  { %v6317_v46 = vmul.f32 %v6293_v27, %v6245_v16  ;;  %v6172_v9 = vsel %vm569_vm7, %v6148_v0, %v6076_v25  ;;  %v6173_v7 = vsel %vm569_vm7, %v6149_v61, %v6077_v22  ;;  %v6318_v59 = vmul.f32 %v6294_v33, %v6246_v18 }
 0x40e   :  { %v6319_v42 = vmul.f32 %v6295_v11, %v6247_v53  ;;  %v6174_v35 = vsel %vm569_vm7, %v6150_v5, %v6078_v32  ;;  %v6175_v63 = vsel %vm569_vm7, %v6151_v38, %v6079_v30  ;;  %v6340_v23 = vsub.f32 %v6316_v44, %v6148_v0 }
 0x40f   :  { %v6341_v4 = vsub.f32 %v6317_v46, %v6149_v61  ;;  %v6268_v26 = vsel %vm651_vm8, %v6244_v34, %v6172_v9  ;;  %v6269_v36 = vsel %vm651_vm8, %v6245_v16, %v6173_v7  ;;  %v6342_v10 = vsub.f32 %v6318_v59, %v6150_v5 }
 0x410   :  { %v6343_v52 = vsub.f32 %v6319_v42, %v6151_v38  ;;  %v6270_v41 = vsel %vm651_vm8, %v6246_v18, %v6174_v35  ;;  %v6271_v62 = vsel %vm651_vm8, %v6247_v53, %v6175_v63  ;;  %v6364_v28 = vsel %vm733_vm13, %v6340_v23, %v6268_v26 }
 0x411   :  { %v6365_v54 = vsel %vm733_vm13, %v6341_v4, %v6269_v36  ;;  %v6366_v51 = vsel %vm733_vm13, %v6342_v10, %v6270_v41  ;;  %v6388_v6 = vmul.f32 %v6364_v28, %v772_v1 }
 0x412   :  { %v6367_v48 = vsel %vm733_vm13, %v6343_v52, %v6271_v62  ;;  %v6389_v57 = vmul.f32 %v6365_v54, %v773_v24  ;;  %v6390_v37 = vmul.f32 %v6366_v51, %v774_v21 }
 0x413   :  { %v6391_v40 = vmul.f32 %v6367_v48, %v775_v50  ;;  %v6442_v56 = vmul.f32 %v6419_v12, %v6388_v6 }
 0x414   :  { %v6443_v20 = vmul.f32 %v6419_v12, %v6389_v57  ;;  %v6444_v14 = vmul.f32 %v6419_v12, %v6390_v37 }
 0x415   :  { %v6445_v0 = vmul.f32 %v6419_v12, %v6391_v40  ;;  %6466 = vst [vmem:[#allocation2 + $0x80] sm:$0xff] %v6442_v56 }
 0x416   :  { %6467 = vst [vmem:[#allocation2 + $0x88] sm:$0xff] %v6443_v20  ;;  %6468 = vst [vmem:[#allocation2 + $0x90] sm:$0xff] %v6444_v14 }
 0x417   :  { %6469 = vst [vmem:[#allocation2 + $0x98] sm:$0xff] %v6445_v0 }
 0x418   :  { %6963 = shalt.err (!%p6960_p4)
}
 0x419   :  { %s6964_s10 = scalar_lea.hbm %s11880_s5, 3072 }
 0x41a   :  { %p6965_p5 = scmp.ne.s32.totalorder %s11880_s5, %s6964_s10  ;;  %p6968_p6 = scmp.lt.u32.totalorder %s6964_s10, %s11880_s5 }
 0x41c   :  { %p6970_p7 = pnand %p6968_p6, %p6965_p5 }
 0x41e   :  { %6973 = shalt.err (!%p6970_p7)
}
 0x41f   :  { %s6985_s14 = smov 512   ;;  %s6986_s15 = smov 32  }
 0x420   :  { %6485 = dma.vmem_to_hbm [thread:$0]  %s6480_s1, 3072, %s11880_s5, [#allocation3], %s6985_s14, %s6985_s14, %s6986_s15  }
 0x421   :  { %6974 = dma.done.wait [#allocation3], 3072  }
 0x422   :  { %6975 = vsyncadd [#allocation3], 4294964224 }
 0x423   :  { %6489 = vsyncpa [#allocation3], 1 }

</bundles_post_ra>
